<compile_context>
chip_gen: v5e
topology: v5e:2x2
jax: 0.10.0
libtpu: 0.0.40
codegen_flags: <defaults>
</compile_context>

<pallas_src>
import numpy as np
import jax
import jax.numpy as jnp
from jax import lax
from jax.experimental import pallas as pl
from jax.experimental.pallas import tpu as pltpu

LANE = 128   # lanes per vreg (fast axis)
SUB = 8      # sublanes per vreg


# ----------------------------------------------------------------------------
# Deterministic parameter construction (mirrors Ricker.__init__)
# ----------------------------------------------------------------------------
def _ricker_np(points: int, a: float) -> np.ndarray:
    """scipy.signal.ricker equivalent."""
    A = 2.0 / (np.sqrt(3.0 * a) * (np.pi ** 0.25))
    wsq = a ** 2
    vec = np.arange(0, points) - (points - 1.0) / 2.0
    xsq = vec ** 2
    mod = 1.0 - xsq / wsq
    gauss = np.exp(-xsq / (2.0 * wsq))
    return A * mod * gauss


def make_ricker_weights(widths=np.arange(1, 51)) -> jnp.ndarray:
    """Returns Conv1d weight of shape (O, 1, K), float32 (O = len(widths))."""
    length = int(10 * widths[-1])
    length = length if length % 2 != 0 else length + 1
    wavelets = np.empty((len(widths), length), dtype=np.float64)
    for ind, width in enumerate(widths):
        cwavelet = np.conj(_ricker_np(length, width)[::-1])
        wavelets[ind] = cwavelet
    return jnp.asarray(wavelets[:, None, :], dtype=jnp.float32)  # (O, 1, K)


def _round_up(v: int, m: int) -> int:
    return (v + m - 1) // m * m


# ----------------------------------------------------------------------------
# Kernel: one (batch, L-tile) step.
#   out[o, 128*c + j] = sum_k W[o, k] * xwin[128*c + k + j],   xwin = padded signal
#                                                              starting at i*TL.
# The distinct Toeplitz "diagonal" blocks
#   diag[s][8*g + r, j] = xwin[128*s + 8*g + (7 - r) + j]          (s = c + q)
# are built on-chip (broadcast row + one strided XLU roll per group + one select
# for the 128-lane wrap), then each output lane block is one MXU matmul against
# the group-reversed weight bank.
# ----------------------------------------------------------------------------
def _ricker_conv_kernel(w_ref, xa_ref, xb_ref, o_ref, diag_ref):
    # w_ref    : (O_PAD, KP)        f32  zero-padded bank, taps reversed within
    #                                     every sublane group of 8.
    # xa_ref   : (1, n_lane, 128)   f32  signal rows of this output tile.
    # xb_ref   : (1, n_lane, 128)   f32  next tile's rows (right halo; first n_k used).
    # o_ref    : (1, O, TL)         f32  output tile, lanes = sequence positions.
    # diag_ref : (n_diag*128, 128)  f32  distinct Toeplitz diagonal blocks.
    o_rows = o_ref.shape[1]
    kp = w_ref.shape[1]
    tl = o_ref.shape[2]
    n_lane = tl // LANE              # output lane blocks per tile
    n_k = kp // LANE                 # 128-tap kernel blocks
    n_src = n_lane + n_k             # window rows touched by this tile
    n_diag = n_src - 1               # distinct diagonal blocks s = c + q
    n_grp = LANE // SUB              # 16 sublane groups per 128-tap block
    assert diag_ref.shape[0] == n_diag * LANE
    assert xa_ref.shape[1] == n_lane and xb_ref.shape[1] == n_lane
    assert n_k <= n_lane             # halo fits in one extra window block

    def window_row(m):
        # Sublane-broadcast (8, 128) copy of window row m (static index).
        if m < n_lane:
            row = xa_ref[0, pl.ds(m, 1), :]
        else:
            row = xb_ref[0, pl.ds(m - n_lane, 1), :]
        return jnp.broadcast_to(row, (SUB, LANE))

    def rolled_groups(row_b):
        # One strided XLU roll per sublane group g:
        #   rolled[g][r, j] = row[(8*g + 7 - r + j) % 128]
        # (taps reversed within the group -> per-sublane shift stride is +1).
        return [
            pltpu.roll(row_b, LANE - SUB * g - (SUB - 1), axis=1,
                       stride=1, stride_axis=0)
            for g in range(n_grp)
        ]

    # j - r iota, used to select row s vs. row s+1 at the 128-lane wrap point.
    dj = (lax.broadcasted_iota(jnp.int32, (SUB, LANE), 1)
          - lax.broadcasted_iota(jnp.int32, (SUB, LANE), 0))

    # Diagonal-major build: block s depends only on window rows s and s+1.  The
    # rolled copies of the upper row are carried to the next iteration so every
    # source row is rolled exactly once per group.
    prev = rolled_groups(window_row(0))
    for s in range(n_diag):
        cur = rolled_groups(window_row(s + 1))
        for g in range(n_grp):
            thresh = LANE - SUB * g - (SUB - 1)
            # diag[s][8g + r, j] = xwin[128*s + 8*g + (7 - r) + j]
            blk = jnp.where(dj < thresh, prev[g], cur[g])
            diag_ref[pl.ds(LANE * s + SUB * g, SUB), :] = blk
        prev = cur

        # Output column c is complete once diagonal blocks c .. c+n_k-1 exist;
        # issue its matmul now so the MXU work overlaps the remaining build.
        c = s - (n_k - 1)
        if 0 <= c < n_lane:
            slab = jnp.dot(w_ref[...], diag_ref[pl.ds(LANE * c, kp), :],
                           preferred_element_type=jnp.float32)
            # 50 of 56 rows -> one masked sublane group per lane block; cheaper
            # than widening the HBM output and re-slicing it in the wrapper.
            o_ref[0, :, pl.ds(LANE * c, LANE)] = slab[:o_rows, :]


# ----------------------------------------------------------------------------
# Wrapper: padding / layout glue + pallas_call
# ----------------------------------------------------------------------------
def ricker_forward(x: jnp.ndarray, weights: jnp.ndarray) -> jnp.ndarray:
    """x: (B, 1, L) float32; weights: (O, 1, K) float32 -> (B, O, L) float32."""
    B, cin, L = x.shape
    assert cin == 1, "Ricker conv expects a single input channel"
    O, _, K = weights.shape
    assert K % 2 == 1, "'same' padding path assumes an odd kernel length"

    KP = _round_up(K, LANE)                    # 501 -> 512 taps
    O_PAD = _round_up(O, SUB)                  # 50  -> 56 filter rows
    # Lane tile: multiple of 1024 so the x windows are clean (8, 128)-row blocks
    # and the K halo / per-step overhead are well amortized; must cover KP.
    TL = _round_up(max(KP, 1024), 1024)
    L_pad = _round_up(L, TL)
    n_lane = TL // LANE
    n_k = KP // LANE
    n_diag = n_lane + n_k - 1

    pad_left = (K - 1) // 2                    # PyTorch 'same' left pad (odd K)
    total = L_pad + TL                         # + one extra window block for the halo
    NR = total // LANE

    # Zero-padded signal reshaped into 128-lane rows (fetched as small windows,
    # never resident whole in VMEM).
    x_sig = x[:, 0, :].astype(jnp.float32)
    x_full = jnp.zeros((B, total), jnp.float32).at[:, pad_left:pad_left + L].set(x_sig)
    x2d = x_full.reshape(B, NR, LANE)

    # Zero-padded wavelet bank; reverse the tap order inside every sublane group
    # of 8 to match the reversed-sublane Toeplitz layout built in the kernel.
    w_pad = jnp.zeros((O_PAD, KP), jnp.float32).at[:O, :K].set(
        weights[:, 0, :].astype(jnp.float32))
    w_perm = w_pad.reshape(O_PAD, KP // SUB, SUB)[:, :, ::-1].reshape(O_PAD, KP)

    out = pl.pallas_call(
        _ricker_conv_kernel,
        out_shape=jax.ShapeDtypeStruct((B, O, L_pad), jnp.float32),
        grid_spec=pltpu.PrefetchScalarGridSpec(
            num_scalar_prefetch=0,
            grid=(B, L_pad // TL),
            in_specs=[
                # Wavelet bank: resident (constant block index).
                pl.BlockSpec((O_PAD, KP), lambda b, i: (0, 0)),
                # Signal window of this tile and its right halo (same x2d array
                # passed twice) -> VMEM use is O(TL), not O(L).
                pl.BlockSpec((1, n_lane, LANE), lambda b, i: (b, i, 0)),
                pl.BlockSpec((1, n_lane, LANE), lambda b, i: (b, i + 1, 0)),
            ],
            out_specs=pl.BlockSpec((1, O, TL), lambda b, i: (b, 0, i)),
            scratch_shapes=[
                pltpu.VMEM((n_diag * LANE, LANE), jnp.float32),  # diagonal blocks
            ],
        ),
        compiler_params=pltpu.CompilerParams(
            dimension_semantics=("parallel", "parallel"),
        ),
    )(w_perm, x2d, x2d)

    return out if L_pad == L else out[:, :, :L]


# ----------------------------------------------------------------------------
# Pure-JAX reference (matches PyTorch Conv1d cross-correlation, 'same' padding)
# ----------------------------------------------------------------------------
def ricker_forward_ref(x: jnp.ndarray, weights: jnp.ndarray) -> jnp.ndarray:
    return lax.conv_general_dilated(
        x.astype(jnp.float32),
        weights.astype(jnp.float32),
        window_strides=(1,),
        padding="SAME",
        dimension_numbers=("NCH", "OIH", "NCH"),
    )


if __name__ == "__main__":
    widths = np.arange(1, 51)               # module default -> O=50, K=501
    weights = make_ricker_weights(widths)   # (50, 1, 501) float32

    B, L = 2, 128
    key = jax.random.PRNGKey(0)
    x = jax.random.normal(key, (B, 1, L), dtype=jnp.float32)   # NCW, like Conv1d input

    fwd = jax.jit(ricker_forward)
    out = jax.block_until_ready(fwd(x, weights))
    assert out.shape == (B, weights.shape[0], L), out.shape
    assert out.dtype == jnp.float32

    ref = jax.block_until_ready(ricker_forward_ref(x, weights))
    np.testing.assert_allclose(np.asarray(out), np.asarray(ref), rtol=2e-4, atol=2e-4)

    print("KERNEL_OK")
</pallas_src>

<mosaic_0001>
module attributes {stable_mosaic.version = 11 : i64} {
  func.func @_ricker_conv_kernel(%arg0: i32, %arg1: i32, %arg2: memref<56x512xf32, #tpu.memory_space<vmem>>, %arg3: memref<1x8x128xf32, #tpu.memory_space<vmem>>, %arg4: memref<1x8x128xf32, #tpu.memory_space<vmem>>, %arg5: memref<1x50x1024xf32, #tpu.memory_space<vmem>>, %arg6: memref<1408x128xf32, #tpu.memory_space<vmem>>) attributes {dimension_semantics = [#tpu.dimension_semantics<parallel>, #tpu.dimension_semantics<parallel>], iteration_bounds = array<i64: 2, 1>, scalar_prefetch = 0 : i64, scratch_operands = 1 : i64, tpu.core_type = #tpu.core_type<tc>, window_params = [{pipeline_mode = #tpu.pipeline_mode<synchronous>, transform_indices = @transform_0, window_bounds = array<i64: 56, 512>}, {transform_indices = @transform_1, window_bounds = array<i64: 1, 8, 128>}, {transform_indices = @transform_2, window_bounds = array<i64: 1, 8, 128>}, {transform_indices = @transform_3, window_bounds = array<i64: 1, 50, 1024>}]} {
    %0 = tpu.iota {dimensions = array<i32: 1>} : vector<8x128xi32>
    %1 = tpu.iota {dimensions = array<i32: 0>} : vector<8x128xi32>
    %2 = arith.subi %0, %1 : vector<8x128xi32>
    %c0 = arith.constant 0 : index
    %c0_0 = arith.constant 0 : index
    %c0_1 = arith.constant 0 : index
    %3 = vector.load %arg3[%c0, %c0_0, %c0_1] : memref<1x8x128xf32, #tpu.memory_space<vmem>>, vector<1x1x128xf32>
    %4 = vector.shape_cast %3 : vector<1x1x128xf32> to vector<1x128xf32>
    %5 = vector.shape_cast %4 : vector<1x128xf32> to vector<1x128xf32>
    %6 = vector.broadcast %5 : vector<1x128xf32> to vector<8x128xf32>
    %c121_i32 = arith.constant 121 : i32
    %7 = tpu.dynamic_rotate %6 by %c121_i32 dim 1 {stride = 1 : si32, stride_dimension = 0 : si32} : vector<8x128xf32>, i32 -> vector<8x128xf32>
    %c113_i32 = arith.constant 113 : i32
    %8 = tpu.dynamic_rotate %6 by %c113_i32 dim 1 {stride = 1 : si32, stride_dimension = 0 : si32} : vector<8x128xf32>, i32 -> vector<8x128xf32>
    %c105_i32 = arith.constant 105 : i32
    %9 = tpu.dynamic_rotate %6 by %c105_i32 dim 1 {stride = 1 : si32, stride_dimension = 0 : si32} : vector<8x128xf32>, i32 -> vector<8x128xf32>
    %c97_i32 = arith.constant 97 : i32
    %10 = tpu.dynamic_rotate %6 by %c97_i32 dim 1 {stride = 1 : si32, stride_dimension = 0 : si32} : vector<8x128xf32>, i32 -> vector<8x128xf32>
    %c89_i32 = arith.constant 89 : i32
    %11 = tpu.dynamic_rotate %6 by %c89_i32 dim 1 {stride = 1 : si32, stride_dimension = 0 : si32} : vector<8x128xf32>, i32 -> vector<8x128xf32>
    %c81_i32 = arith.constant 81 : i32
    %12 = tpu.dynamic_rotate %6 by %c81_i32 dim 1 {stride = 1 : si32, stride_dimension = 0 : si32} : vector<8x128xf32>, i32 -> vector<8x128xf32>
    %c73_i32 = arith.constant 73 : i32
    %13 = tpu.dynamic_rotate %6 by %c73_i32 dim 1 {stride = 1 : si32, stride_dimension = 0 : si32} : vector<8x128xf32>, i32 -> vector<8x128xf32>
    %c65_i32 = arith.constant 65 : i32
    %14 = tpu.dynamic_rotate %6 by %c65_i32 dim 1 {stride = 1 : si32, stride_dimension = 0 : si32} : vector<8x128xf32>, i32 -> vector<8x128xf32>
    %c57_i32 = arith.constant 57 : i32
    %15 = tpu.dynamic_rotate %6 by %c57_i32 dim 1 {stride = 1 : si32, stride_dimension = 0 : si32} : vector<8x128xf32>, i32 -> vector<8x128xf32>
    %c49_i32 = arith.constant 49 : i32
    %16 = tpu.dynamic_rotate %6 by %c49_i32 dim 1 {stride = 1 : si32, stride_dimension = 0 : si32} : vector<8x128xf32>, i32 -> vector<8x128xf32>
    %c41_i32 = arith.constant 41 : i32
    %17 = tpu.dynamic_rotate %6 by %c41_i32 dim 1 {stride = 1 : si32, stride_dimension = 0 : si32} : vector<8x128xf32>, i32 -> vector<8x128xf32>
    %c33_i32 = arith.constant 33 : i32
    %18 = tpu.dynamic_rotate %6 by %c33_i32 dim 1 {stride = 1 : si32, stride_dimension = 0 : si32} : vector<8x128xf32>, i32 -> vector<8x128xf32>
    %c25_i32 = arith.constant 25 : i32
    %19 = tpu.dynamic_rotate %6 by %c25_i32 dim 1 {stride = 1 : si32, stride_dimension = 0 : si32} : vector<8x128xf32>, i32 -> vector<8x128xf32>
    %c17_i32 = arith.constant 17 : i32
    %20 = tpu.dynamic_rotate %6 by %c17_i32 dim 1 {stride = 1 : si32, stride_dimension = 0 : si32} : vector<8x128xf32>, i32 -> vector<8x128xf32>
    %c9_i32 = arith.constant 9 : i32
    %21 = tpu.dynamic_rotate %6 by %c9_i32 dim 1 {stride = 1 : si32, stride_dimension = 0 : si32} : vector<8x128xf32>, i32 -> vector<8x128xf32>
    %c1_i32 = arith.constant 1 : i32
    %22 = tpu.dynamic_rotate %6 by %c1_i32 dim 1 {stride = 1 : si32, stride_dimension = 0 : si32} : vector<8x128xf32>, i32 -> vector<8x128xf32>
    %c0_2 = arith.constant 0 : index
    %c1 = arith.constant 1 : index
    %c0_3 = arith.constant 0 : index
    %23 = vector.load %arg3[%c0_2, %c1, %c0_3] : memref<1x8x128xf32, #tpu.memory_space<vmem>>, vector<1x1x128xf32>
    %24 = vector.shape_cast %23 : vector<1x1x128xf32> to vector<1x128xf32>
    %25 = vector.shape_cast %24 : vector<1x128xf32> to vector<1x128xf32>
    %26 = vector.broadcast %25 : vector<1x128xf32> to vector<8x128xf32>
    %c121_i32_4 = arith.constant 121 : i32
    %27 = tpu.dynamic_rotate %26 by %c121_i32_4 dim 1 {stride = 1 : si32, stride_dimension = 0 : si32} : vector<8x128xf32>, i32 -> vector<8x128xf32>
    %c113_i32_5 = arith.constant 113 : i32
    %28 = tpu.dynamic_rotate %26 by %c113_i32_5 dim 1 {stride = 1 : si32, stride_dimension = 0 : si32} : vector<8x128xf32>, i32 -> vector<8x128xf32>
    %c105_i32_6 = arith.constant 105 : i32
    %29 = tpu.dynamic_rotate %26 by %c105_i32_6 dim 1 {stride = 1 : si32, stride_dimension = 0 : si32} : vector<8x128xf32>, i32 -> vector<8x128xf32>
    %c97_i32_7 = arith.constant 97 : i32
    %30 = tpu.dynamic_rotate %26 by %c97_i32_7 dim 1 {stride = 1 : si32, stride_dimension = 0 : si32} : vector<8x128xf32>, i32 -> vector<8x128xf32>
    %c89_i32_8 = arith.constant 89 : i32
    %31 = tpu.dynamic_rotate %26 by %c89_i32_8 dim 1 {stride = 1 : si32, stride_dimension = 0 : si32} : vector<8x128xf32>, i32 -> vector<8x128xf32>
    %c81_i32_9 = arith.constant 81 : i32
    %32 = tpu.dynamic_rotate %26 by %c81_i32_9 dim 1 {stride = 1 : si32, stride_dimension = 0 : si32} : vector<8x128xf32>, i32 -> vector<8x128xf32>
    %c73_i32_10 = arith.constant 73 : i32
    %33 = tpu.dynamic_rotate %26 by %c73_i32_10 dim 1 {stride = 1 : si32, stride_dimension = 0 : si32} : vector<8x128xf32>, i32 -> vector<8x128xf32>
    %c65_i32_11 = arith.constant 65 : i32
    %34 = tpu.dynamic_rotate %26 by %c65_i32_11 dim 1 {stride = 1 : si32, stride_dimension = 0 : si32} : vector<8x128xf32>, i32 -> vector<8x128xf32>
    %c57_i32_12 = arith.constant 57 : i32
    %35 = tpu.dynamic_rotate %26 by %c57_i32_12 dim 1 {stride = 1 : si32, stride_dimension = 0 : si32} : vector<8x128xf32>, i32 -> vector<8x128xf32>
    %c49_i32_13 = arith.constant 49 : i32
    %36 = tpu.dynamic_rotate %26 by %c49_i32_13 dim 1 {stride = 1 : si32, stride_dimension = 0 : si32} : vector<8x128xf32>, i32 -> vector<8x128xf32>
    %c41_i32_14 = arith.constant 41 : i32
    %37 = tpu.dynamic_rotate %26 by %c41_i32_14 dim 1 {stride = 1 : si32, stride_dimension = 0 : si32} : vector<8x128xf32>, i32 -> vector<8x128xf32>
    %c33_i32_15 = arith.constant 33 : i32
    %38 = tpu.dynamic_rotate %26 by %c33_i32_15 dim 1 {stride = 1 : si32, stride_dimension = 0 : si32} : vector<8x128xf32>, i32 -> vector<8x128xf32>
    %c25_i32_16 = arith.constant 25 : i32
    %39 = tpu.dynamic_rotate %26 by %c25_i32_16 dim 1 {stride = 1 : si32, stride_dimension = 0 : si32} : vector<8x128xf32>, i32 -> vector<8x128xf32>
    %c17_i32_17 = arith.constant 17 : i32
    %40 = tpu.dynamic_rotate %26 by %c17_i32_17 dim 1 {stride = 1 : si32, stride_dimension = 0 : si32} : vector<8x128xf32>, i32 -> vector<8x128xf32>
    %c9_i32_18 = arith.constant 9 : i32
    %41 = tpu.dynamic_rotate %26 by %c9_i32_18 dim 1 {stride = 1 : si32, stride_dimension = 0 : si32} : vector<8x128xf32>, i32 -> vector<8x128xf32>
    %c1_i32_19 = arith.constant 1 : i32
    %42 = tpu.dynamic_rotate %26 by %c1_i32_19 dim 1 {stride = 1 : si32, stride_dimension = 0 : si32} : vector<8x128xf32>, i32 -> vector<8x128xf32>
    %c121_i32_20 = arith.constant 121 : i32
    %43 = vector.broadcast %c121_i32_20 : i32 to vector<8x128xi32>
    %44 = arith.cmpi slt, %2, %43 : vector<8x128xi32>
    %45 = arith.select %44, %7, %27 : vector<8x128xi1>, vector<8x128xf32>
    %c0_21 = arith.constant 0 : index
    %c0_22 = arith.constant 0 : index
    %46 = vector.load %arg6[%c0_21, %c0_22] : memref<1408x128xf32, #tpu.memory_space<vmem>>, vector<8x128xf32>
    tpu.vector_store %arg6[%c0_21, %c0_22], %45 {strides = array<i32>} : memref<1408x128xf32, #tpu.memory_space<vmem>>, vector<8x128xf32>,
    %c113_i32_23 = arith.constant 113 : i32
    %47 = vector.broadcast %c113_i32_23 : i32 to vector<8x128xi32>
    %48 = arith.cmpi slt, %2, %47 : vector<8x128xi32>
    %49 = arith.select %48, %8, %28 : vector<8x128xi1>, vector<8x128xf32>
    %c8 = arith.constant 8 : index
    %c0_24 = arith.constant 0 : index
    %50 = vector.load %arg6[%c8, %c0_24] : memref<1408x128xf32, #tpu.memory_space<vmem>>, vector<8x128xf32>
    tpu.vector_store %arg6[%c8, %c0_24], %49 {strides = array<i32>} : memref<1408x128xf32, #tpu.memory_space<vmem>>, vector<8x128xf32>,
    %c105_i32_25 = arith.constant 105 : i32
    %51 = vector.broadcast %c105_i32_25 : i32 to vector<8x128xi32>
    %52 = arith.cmpi slt, %2, %51 : vector<8x128xi32>
    %53 = arith.select %52, %9, %29 : vector<8x128xi1>, vector<8x128xf32>
    %c16 = arith.constant 16 : index
    %c0_26 = arith.constant 0 : index
    %54 = vector.load %arg6[%c16, %c0_26] : memref<1408x128xf32, #tpu.memory_space<vmem>>, vector<8x128xf32>
    tpu.vector_store %arg6[%c16, %c0_26], %53 {strides = array<i32>} : memref<1408x128xf32, #tpu.memory_space<vmem>>, vector<8x128xf32>,
    %c97_i32_27 = arith.constant 97 : i32
    %55 = vector.broadcast %c97_i32_27 : i32 to vector<8x128xi32>
    %56 = arith.cmpi slt, %2, %55 : vector<8x128xi32>
    %57 = arith.select %56, %10, %30 : vector<8x128xi1>, vector<8x128xf32>
    %c24 = arith.constant 24 : index
    %c0_28 = arith.constant 0 : index
    %58 = vector.load %arg6[%c24, %c0_28] : memref<1408x128xf32, #tpu.memory_space<vmem>>, vector<8x128xf32>
    tpu.vector_store %arg6[%c24, %c0_28], %57 {strides = array<i32>} : memref<1408x128xf32, #tpu.memory_space<vmem>>, vector<8x128xf32>,
    %c89_i32_29 = arith.constant 89 : i32
    %59 = vector.broadcast %c89_i32_29 : i32 to vector<8x128xi32>
    %60 = arith.cmpi slt, %2, %59 : vector<8x128xi32>
    %61 = arith.select %60, %11, %31 : vector<8x128xi1>, vector<8x128xf32>
    %c32 = arith.constant 32 : index
    %c0_30 = arith.constant 0 : index
    %62 = vector.load %arg6[%c32, %c0_30] : memref<1408x128xf32, #tpu.memory_space<vmem>>, vector<8x128xf32>
    tpu.vector_store %arg6[%c32, %c0_30], %61 {strides = array<i32>} : memref<1408x128xf32, #tpu.memory_space<vmem>>, vector<8x128xf32>,
    %c81_i32_31 = arith.constant 81 : i32
    %63 = vector.broadcast %c81_i32_31 : i32 to vector<8x128xi32>
    %64 = arith.cmpi slt, %2, %63 : vector<8x128xi32>
    %65 = arith.select %64, %12, %32 : vector<8x128xi1>, vector<8x128xf32>
    %c40 = arith.constant 40 : index
    %c0_32 = arith.constant 0 : index
    %66 = vector.load %arg6[%c40, %c0_32] : memref<1408x128xf32, #tpu.memory_space<vmem>>, vector<8x128xf32>
    tpu.vector_store %arg6[%c40, %c0_32], %65 {strides = array<i32>} : memref<1408x128xf32, #tpu.memory_space<vmem>>, vector<8x128xf32>,
    %c73_i32_33 = arith.constant 73 : i32
    %67 = vector.broadcast %c73_i32_33 : i32 to vector<8x128xi32>
    %68 = arith.cmpi slt, %2, %67 : vector<8x128xi32>
    %69 = arith.select %68, %13, %33 : vector<8x128xi1>, vector<8x128xf32>
    %c48 = arith.constant 48 : index
    %c0_34 = arith.constant 0 : index
    %70 = vector.load %arg6[%c48, %c0_34] : memref<1408x128xf32, #tpu.memory_space<vmem>>, vector<8x128xf32>
    tpu.vector_store %arg6[%c48, %c0_34], %69 {strides = array<i32>} : memref<1408x128xf32, #tpu.memory_space<vmem>>, vector<8x128xf32>,
    %c65_i32_35 = arith.constant 65 : i32
    %71 = vector.broadcast %c65_i32_35 : i32 to vector<8x128xi32>
    %72 = arith.cmpi slt, %2, %71 : vector<8x128xi32>
    %73 = arith.select %72, %14, %34 : vector<8x128xi1>, vector<8x128xf32>
    %c56 = arith.constant 56 : index
    %c0_36 = arith.constant 0 : index
    %74 = vector.load %arg6[%c56, %c0_36] : memref<1408x128xf32, #tpu.memory_space<vmem>>, vector<8x128xf32>
    tpu.vector_store %arg6[%c56, %c0_36], %73 {strides = array<i32>} : memref<1408x128xf32, #tpu.memory_space<vmem>>, vector<8x128xf32>,
    %c57_i32_37 = arith.constant 57 : i32
    %75 = vector.broadcast %c57_i32_37 : i32 to vector<8x128xi32>
    %76 = arith.cmpi slt, %2, %75 : vector<8x128xi32>
    %77 = arith.select %76, %15, %35 : vector<8x128xi1>, vector<8x128xf32>
    %c64 = arith.constant 64 : index
    %c0_38 = arith.constant 0 : index
    %78 = vector.load %arg6[%c64, %c0_38] : memref<1408x128xf32, #tpu.memory_space<vmem>>, vector<8x128xf32>
    tpu.vector_store %arg6[%c64, %c0_38], %77 {strides = array<i32>} : memref<1408x128xf32, #tpu.memory_space<vmem>>, vector<8x128xf32>,
    %c49_i32_39 = arith.constant 49 : i32
    %79 = vector.broadcast %c49_i32_39 : i32 to vector<8x128xi32>
    %80 = arith.cmpi slt, %2, %79 : vector<8x128xi32>
    %81 = arith.select %80, %16, %36 : vector<8x128xi1>, vector<8x128xf32>
    %c72 = arith.constant 72 : index
    %c0_40 = arith.constant 0 : index
    %82 = vector.load %arg6[%c72, %c0_40] : memref<1408x128xf32, #tpu.memory_space<vmem>>, vector<8x128xf32>
    tpu.vector_store %arg6[%c72, %c0_40], %81 {strides = array<i32>} : memref<1408x128xf32, #tpu.memory_space<vmem>>, vector<8x128xf32>,
    %c41_i32_41 = arith.constant 41 : i32
    %83 = vector.broadcast %c41_i32_41 : i32 to vector<8x128xi32>
    %84 = arith.cmpi slt, %2, %83 : vector<8x128xi32>
    %85 = arith.select %84, %17, %37 : vector<8x128xi1>, vector<8x128xf32>
    %c80 = arith.constant 80 : index
    %c0_42 = arith.constant 0 : index
    %86 = vector.load %arg6[%c80, %c0_42] : memref<1408x128xf32, #tpu.memory_space<vmem>>, vector<8x128xf32>
    tpu.vector_store %arg6[%c80, %c0_42], %85 {strides = array<i32>} : memref<1408x128xf32, #tpu.memory_space<vmem>>, vector<8x128xf32>,
    %c33_i32_43 = arith.constant 33 : i32
    %87 = vector.broadcast %c33_i32_43 : i32 to vector<8x128xi32>
    %88 = arith.cmpi slt, %2, %87 : vector<8x128xi32>
    %89 = arith.select %88, %18, %38 : vector<8x128xi1>, vector<8x128xf32>
    %c88 = arith.constant 88 : index
    %c0_44 = arith.constant 0 : index
    %90 = vector.load %arg6[%c88, %c0_44] : memref<1408x128xf32, #tpu.memory_space<vmem>>, vector<8x128xf32>
    tpu.vector_store %arg6[%c88, %c0_44], %89 {strides = array<i32>} : memref<1408x128xf32, #tpu.memory_space<vmem>>, vector<8x128xf32>,
    %c25_i32_45 = arith.constant 25 : i32
    %91 = vector.broadcast %c25_i32_45 : i32 to vector<8x128xi32>
    %92 = arith.cmpi slt, %2, %91 : vector<8x128xi32>
    %93 = arith.select %92, %19, %39 : vector<8x128xi1>, vector<8x128xf32>
    %c96 = arith.constant 96 : index
    %c0_46 = arith.constant 0 : index
    %94 = vector.load %arg6[%c96, %c0_46] : memref<1408x128xf32, #tpu.memory_space<vmem>>, vector<8x128xf32>
    tpu.vector_store %arg6[%c96, %c0_46], %93 {strides = array<i32>} : memref<1408x128xf32, #tpu.memory_space<vmem>>, vector<8x128xf32>,
    %c17_i32_47 = arith.constant 17 : i32
    %95 = vector.broadcast %c17_i32_47 : i32 to vector<8x128xi32>
    %96 = arith.cmpi slt, %2, %95 : vector<8x128xi32>
    %97 = arith.select %96, %20, %40 : vector<8x128xi1>, vector<8x128xf32>
    %c104 = arith.constant 104 : index
    %c0_48 = arith.constant 0 : index
    %98 = vector.load %arg6[%c104, %c0_48] : memref<1408x128xf32, #tpu.memory_space<vmem>>, vector<8x128xf32>
    tpu.vector_store %arg6[%c104, %c0_48], %97 {strides = array<i32>} : memref<1408x128xf32, #tpu.memory_space<vmem>>, vector<8x128xf32>,
    %c9_i32_49 = arith.constant 9 : i32
    %99 = vector.broadcast %c9_i32_49 : i32 to vector<8x128xi32>
    %100 = arith.cmpi slt, %2, %99 : vector<8x128xi32>
    %101 = arith.select %100, %21, %41 : vector<8x128xi1>, vector<8x128xf32>
    %c112 = arith.constant 112 : index
    %c0_50 = arith.constant 0 : index
    %102 = vector.load %arg6[%c112, %c0_50] : memref<1408x128xf32, #tpu.memory_space<vmem>>, vector<8x128xf32>
    tpu.vector_store %arg6[%c112, %c0_50], %101 {strides = array<i32>} : memref<1408x128xf32, #tpu.memory_space<vmem>>, vector<8x128xf32>,
    %c1_i32_51 = arith.constant 1 : i32
    %103 = vector.broadcast %c1_i32_51 : i32 to vector<8x128xi32>
    %104 = arith.cmpi slt, %2, %103 : vector<8x128xi32>
    %105 = arith.select %104, %22, %42 : vector<8x128xi1>, vector<8x128xf32>
    %c120 = arith.constant 120 : index
    %c0_52 = arith.constant 0 : index
    %106 = vector.load %arg6[%c120, %c0_52] : memref<1408x128xf32, #tpu.memory_space<vmem>>, vector<8x128xf32>
    tpu.vector_store %arg6[%c120, %c0_52], %105 {strides = array<i32>} : memref<1408x128xf32, #tpu.memory_space<vmem>>, vector<8x128xf32>,
    %c0_53 = arith.constant 0 : index
    %c2 = arith.constant 2 : index
    %c0_54 = arith.constant 0 : index
    %107 = vector.load %arg3[%c0_53, %c2, %c0_54] : memref<1x8x128xf32, #tpu.memory_space<vmem>>, vector<1x1x128xf32>
    %108 = vector.shape_cast %107 : vector<1x1x128xf32> to vector<1x128xf32>
    %109 = vector.shape_cast %108 : vector<1x128xf32> to vector<1x128xf32>
    %110 = vector.broadcast %109 : vector<1x128xf32> to vector<8x128xf32>
    %c121_i32_55 = arith.constant 121 : i32
    %111 = tpu.dynamic_rotate %110 by %c121_i32_55 dim 1 {stride = 1 : si32, stride_dimension = 0 : si32} : vector<8x128xf32>, i32 -> vector<8x128xf32>
    %c113_i32_56 = arith.constant 113 : i32
    %112 = tpu.dynamic_rotate %110 by %c113_i32_56 dim 1 {stride = 1 : si32, stride_dimension = 0 : si32} : vector<8x128xf32>, i32 -> vector<8x128xf32>
    %c105_i32_57 = arith.constant 105 : i32
    %113 = tpu.dynamic_rotate %110 by %c105_i32_57 dim 1 {stride = 1 : si32, stride_dimension = 0 : si32} : vector<8x128xf32>, i32 -> vector<8x128xf32>
    %c97_i32_58 = arith.constant 97 : i32
    %114 = tpu.dynamic_rotate %110 by %c97_i32_58 dim 1 {stride = 1 : si32, stride_dimension = 0 : si32} : vector<8x128xf32>, i32 -> vector<8x128xf32>
    %c89_i32_59 = arith.constant 89 : i32
    %115 = tpu.dynamic_rotate %110 by %c89_i32_59 dim 1 {stride = 1 : si32, stride_dimension = 0 : si32} : vector<8x128xf32>, i32 -> vector<8x128xf32>
    %c81_i32_60 = arith.constant 81 : i32
    %116 = tpu.dynamic_rotate %110 by %c81_i32_60 dim 1 {stride = 1 : si32, stride_dimension = 0 : si32} : vector<8x128xf32>, i32 -> vector<8x128xf32>
    %c73_i32_61 = arith.constant 73 : i32
    %117 = tpu.dynamic_rotate %110 by %c73_i32_61 dim 1 {stride = 1 : si32, stride_dimension = 0 : si32} : vector<8x128xf32>, i32 -> vector<8x128xf32>
    %c65_i32_62 = arith.constant 65 : i32
    %118 = tpu.dynamic_rotate %110 by %c65_i32_62 dim 1 {stride = 1 : si32, stride_dimension = 0 : si32} : vector<8x128xf32>, i32 -> vector<8x128xf32>
    %c57_i32_63 = arith.constant 57 : i32
    %119 = tpu.dynamic_rotate %110 by %c57_i32_63 dim 1 {stride = 1 : si32, stride_dimension = 0 : si32} : vector<8x128xf32>, i32 -> vector<8x128xf32>
    %c49_i32_64 = arith.constant 49 : i32
    %120 = tpu.dynamic_rotate %110 by %c49_i32_64 dim 1 {stride = 1 : si32, stride_dimension = 0 : si32} : vector<8x128xf32>, i32 -> vector<8x128xf32>
    %c41_i32_65 = arith.constant 41 : i32
    %121 = tpu.dynamic_rotate %110 by %c41_i32_65 dim 1 {stride = 1 : si32, stride_dimension = 0 : si32} : vector<8x128xf32>, i32 -> vector<8x128xf32>
    %c33_i32_66 = arith.constant 33 : i32
    %122 = tpu.dynamic_rotate %110 by %c33_i32_66 dim 1 {stride = 1 : si32, stride_dimension = 0 : si32} : vector<8x128xf32>, i32 -> vector<8x128xf32>
    %c25_i32_67 = arith.constant 25 : i32
    %123 = tpu.dynamic_rotate %110 by %c25_i32_67 dim 1 {stride = 1 : si32, stride_dimension = 0 : si32} : vector<8x128xf32>, i32 -> vector<8x128xf32>
    %c17_i32_68 = arith.constant 17 : i32
    %124 = tpu.dynamic_rotate %110 by %c17_i32_68 dim 1 {stride = 1 : si32, stride_dimension = 0 : si32} : vector<8x128xf32>, i32 -> vector<8x128xf32>
    %c9_i32_69 = arith.constant 9 : i32
    %125 = tpu.dynamic_rotate %110 by %c9_i32_69 dim 1 {stride = 1 : si32, stride_dimension = 0 : si32} : vector<8x128xf32>, i32 -> vector<8x128xf32>
    %c1_i32_70 = arith.constant 1 : i32
    %126 = tpu.dynamic_rotate %110 by %c1_i32_70 dim 1 {stride = 1 : si32, stride_dimension = 0 : si32} : vector<8x128xf32>, i32 -> vector<8x128xf32>
    %c121_i32_71 = arith.constant 121 : i32
    %127 = vector.broadcast %c121_i32_71 : i32 to vector<8x128xi32>
    %128 = arith.cmpi slt, %2, %127 : vector<8x128xi32>
    %129 = arith.select %128, %27, %111 : vector<8x128xi1>, vector<8x128xf32>
    %c128 = arith.constant 128 : index
    %c0_72 = arith.constant 0 : index
    %130 = vector.load %arg6[%c128, %c0_72] : memref<1408x128xf32, #tpu.memory_space<vmem>>, vector<8x128xf32>
    tpu.vector_store %arg6[%c128, %c0_72], %129 {strides = array<i32>} : memref<1408x128xf32, #tpu.memory_space<vmem>>, vector<8x128xf32>,
    %c113_i32_73 = arith.constant 113 : i32
    %131 = vector.broadcast %c113_i32_73 : i32 to vector<8x128xi32>
    %132 = arith.cmpi slt, %2, %131 : vector<8x128xi32>
    %133 = arith.select %132, %28, %112 : vector<8x128xi1>, vector<8x128xf32>
    %c136 = arith.constant 136 : index
    %c0_74 = arith.constant 0 : index
    %134 = vector.load %arg6[%c136, %c0_74] : memref<1408x128xf32, #tpu.memory_space<vmem>>, vector<8x128xf32>
    tpu.vector_store %arg6[%c136, %c0_74], %133 {strides = array<i32>} : memref<1408x128xf32, #tpu.memory_space<vmem>>, vector<8x128xf32>,
    %c105_i32_75 = arith.constant 105 : i32
    %135 = vector.broadcast %c105_i32_75 : i32 to vector<8x128xi32>
    %136 = arith.cmpi slt, %2, %135 : vector<8x128xi32>
    %137 = arith.select %136, %29, %113 : vector<8x128xi1>, vector<8x128xf32>
    %c144 = arith.constant 144 : index
    %c0_76 = arith.constant 0 : index
    %138 = vector.load %arg6[%c144, %c0_76] : memref<1408x128xf32, #tpu.memory_space<vmem>>, vector<8x128xf32>
    tpu.vector_store %arg6[%c144, %c0_76], %137 {strides = array<i32>} : memref<1408x128xf32, #tpu.memory_space<vmem>>, vector<8x128xf32>,
    %c97_i32_77 = arith.constant 97 : i32
    %139 = vector.broadcast %c97_i32_77 : i32 to vector<8x128xi32>
    %140 = arith.cmpi slt, %2, %139 : vector<8x128xi32>
    %141 = arith.select %140, %30, %114 : vector<8x128xi1>, vector<8x128xf32>
    %c152 = arith.constant 152 : index
    %c0_78 = arith.constant 0 : index
    %142 = vector.load %arg6[%c152, %c0_78] : memref<1408x128xf32, #tpu.memory_space<vmem>>, vector<8x128xf32>
    tpu.vector_store %arg6[%c152, %c0_78], %141 {strides = array<i32>} : memref<1408x128xf32, #tpu.memory_space<vmem>>, vector<8x128xf32>,
    %c89_i32_79 = arith.constant 89 : i32
    %143 = vector.broadcast %c89_i32_79 : i32 to vector<8x128xi32>
    %144 = arith.cmpi slt, %2, %143 : vector<8x128xi32>
    %145 = arith.select %144, %31, %115 : vector<8x128xi1>, vector<8x128xf32>
    %c160 = arith.constant 160 : index
    %c0_80 = arith.constant 0 : index
    %146 = vector.load %arg6[%c160, %c0_80] : memref<1408x128xf32, #tpu.memory_space<vmem>>, vector<8x128xf32>
    tpu.vector_store %arg6[%c160, %c0_80], %145 {strides = array<i32>} : memref<1408x128xf32, #tpu.memory_space<vmem>>, vector<8x128xf32>,
    %c81_i32_81 = arith.constant 81 : i32
    %147 = vector.broadcast %c81_i32_81 : i32 to vector<8x128xi32>
    %148 = arith.cmpi slt, %2, %147 : vector<8x128xi32>
    %149 = arith.select %148, %32, %116 : vector<8x128xi1>, vector<8x128xf32>
    %c168 = arith.constant 168 : index
    %c0_82 = arith.constant 0 : index
    %150 = vector.load %arg6[%c168, %c0_82] : memref<1408x128xf32, #tpu.memory_space<vmem>>, vector<8x128xf32>
    tpu.vector_store %arg6[%c168, %c0_82], %149 {strides = array<i32>} : memref<1408x128xf32, #tpu.memory_space<vmem>>, vector<8x128xf32>,
    %c73_i32_83 = arith.constant 73 : i32
    %151 = vector.broadcast %c73_i32_83 : i32 to vector<8x128xi32>
    %152 = arith.cmpi slt, %2, %151 : vector<8x128xi32>
    %153 = arith.select %152, %33, %117 : vector<8x128xi1>, vector<8x128xf32>
    %c176 = arith.constant 176 : index
    %c0_84 = arith.constant 0 : index
    %154 = vector.load %arg6[%c176, %c0_84] : memref<1408x128xf32, #tpu.memory_space<vmem>>, vector<8x128xf32>
    tpu.vector_store %arg6[%c176, %c0_84], %153 {strides = array<i32>} : memref<1408x128xf32, #tpu.memory_space<vmem>>, vector<8x128xf32>,
    %c65_i32_85 = arith.constant 65 : i32
    %155 = vector.broadcast %c65_i32_85 : i32 to vector<8x128xi32>
    %156 = arith.cmpi slt, %2, %155 : vector<8x128xi32>
    %157 = arith.select %156, %34, %118 : vector<8x128xi1>, vector<8x128xf32>
    %c184 = arith.constant 184 : index
    %c0_86 = arith.constant 0 : index
    %158 = vector.load %arg6[%c184, %c0_86] : memref<1408x128xf32, #tpu.memory_space<vmem>>, vector<8x128xf32>
    tpu.vector_store %arg6[%c184, %c0_86], %157 {strides = array<i32>} : memref<1408x128xf32, #tpu.memory_space<vmem>>, vector<8x128xf32>,
    %c57_i32_87 = arith.constant 57 : i32
    %159 = vector.broadcast %c57_i32_87 : i32 to vector<8x128xi32>
    %160 = arith.cmpi slt, %2, %159 : vector<8x128xi32>
    %161 = arith.select %160, %35, %119 : vector<8x128xi1>, vector<8x128xf32>
    %c192 = arith.constant 192 : index
    %c0_88 = arith.constant 0 : index
    %162 = vector.load %arg6[%c192, %c0_88] : memref<1408x128xf32, #tpu.memory_space<vmem>>, vector<8x128xf32>
    tpu.vector_store %arg6[%c192, %c0_88], %161 {strides = array<i32>} : memref<1408x128xf32, #tpu.memory_space<vmem>>, vector<8x128xf32>,
    %c49_i32_89 = arith.constant 49 : i32
    %163 = vector.broadcast %c49_i32_89 : i32 to vector<8x128xi32>
    %164 = arith.cmpi slt, %2, %163 : vector<8x128xi32>
    %165 = arith.select %164, %36, %120 : vector<8x128xi1>, vector<8x128xf32>
    %c200 = arith.constant 200 : index
    %c0_90 = arith.constant 0 : index
    %166 = vector.load %arg6[%c200, %c0_90] : memref<1408x128xf32, #tpu.memory_space<vmem>>, vector<8x128xf32>
    tpu.vector_store %arg6[%c200, %c0_90], %165 {strides = array<i32>} : memref<1408x128xf32, #tpu.memory_space<vmem>>, vector<8x128xf32>,
    %c41_i32_91 = arith.constant 41 : i32
    %167 = vector.broadcast %c41_i32_91 : i32 to vector<8x128xi32>
    %168 = arith.cmpi slt, %2, %167 : vector<8x128xi32>
    %169 = arith.select %168, %37, %121 : vector<8x128xi1>, vector<8x128xf32>
    %c208 = arith.constant 208 : index
    %c0_92 = arith.constant 0 : index
    %170 = vector.load %arg6[%c208, %c0_92] : memref<1408x128xf32, #tpu.memory_space<vmem>>, vector<8x128xf32>
    tpu.vector_store %arg6[%c208, %c0_92], %169 {strides = array<i32>} : memref<1408x128xf32, #tpu.memory_space<vmem>>, vector<8x128xf32>,
    %c33_i32_93 = arith.constant 33 : i32
    %171 = vector.broadcast %c33_i32_93 : i32 to vector<8x128xi32>
    %172 = arith.cmpi slt, %2, %171 : vector<8x128xi32>
    %173 = arith.select %172, %38, %122 : vector<8x128xi1>, vector<8x128xf32>
    %c216 = arith.constant 216 : index
    %c0_94 = arith.constant 0 : index
    %174 = vector.load %arg6[%c216, %c0_94] : memref<1408x128xf32, #tpu.memory_space<vmem>>, vector<8x128xf32>
    tpu.vector_store %arg6[%c216, %c0_94], %173 {strides = array<i32>} : memref<1408x128xf32, #tpu.memory_space<vmem>>, vector<8x128xf32>,
    %c25_i32_95 = arith.constant 25 : i32
    %175 = vector.broadcast %c25_i32_95 : i32 to vector<8x128xi32>
    %176 = arith.cmpi slt, %2, %175 : vector<8x128xi32>
    %177 = arith.select %176, %39, %123 : vector<8x128xi1>, vector<8x128xf32>
    %c224 = arith.constant 224 : index
    %c0_96 = arith.constant 0 : index
    %178 = vector.load %arg6[%c224, %c0_96] : memref<1408x128xf32, #tpu.memory_space<vmem>>, vector<8x128xf32>
    tpu.vector_store %arg6[%c224, %c0_96], %177 {strides = array<i32>} : memref<1408x128xf32, #tpu.memory_space<vmem>>, vector<8x128xf32>,
    %c17_i32_97 = arith.constant 17 : i32
    %179 = vector.broadcast %c17_i32_97 : i32 to vector<8x128xi32>
    %180 = arith.cmpi slt, %2, %179 : vector<8x128xi32>
    %181 = arith.select %180, %40, %124 : vector<8x128xi1>, vector<8x128xf32>
    %c232 = arith.constant 232 : index
    %c0_98 = arith.constant 0 : index
    %182 = vector.load %arg6[%c232, %c0_98] : memref<1408x128xf32, #tpu.memory_space<vmem>>, vector<8x128xf32>
    tpu.vector_store %arg6[%c232, %c0_98], %181 {strides = array<i32>} : memref<1408x128xf32, #tpu.memory_space<vmem>>, vector<8x128xf32>,
    %c9_i32_99 = arith.constant 9 : i32
    %183 = vector.broadcast %c9_i32_99 : i32 to vector<8x128xi32>
    %184 = arith.cmpi slt, %2, %183 : vector<8x128xi32>
    %185 = arith.select %184, %41, %125 : vector<8x128xi1>, vector<8x128xf32>
    %c240 = arith.constant 240 : index
    %c0_100 = arith.constant 0 : index
    %186 = vector.load %arg6[%c240, %c0_100] : memref<1408x128xf32, #tpu.memory_space<vmem>>, vector<8x128xf32>
    tpu.vector_store %arg6[%c240, %c0_100], %185 {strides = array<i32>} : memref<1408x128xf32, #tpu.memory_space<vmem>>, vector<8x128xf32>,
    %c1_i32_101 = arith.constant 1 : i32
    %187 = vector.broadcast %c1_i32_101 : i32 to vector<8x128xi32>
    %188 = arith.cmpi slt, %2, %187 : vector<8x128xi32>
    %189 = arith.select %188, %42, %126 : vector<8x128xi1>, vector<8x128xf32>
    %c248 = arith.constant 248 : index
    %c0_102 = arith.constant 0 : index
    %190 = vector.load %arg6[%c248, %c0_102] : memref<1408x128xf32, #tpu.memory_space<vmem>>, vector<8x128xf32>
    tpu.vector_store %arg6[%c248, %c0_102], %189 {strides = array<i32>} : memref<1408x128xf32, #tpu.memory_space<vmem>>, vector<8x128xf32>,
    %c0_103 = arith.constant 0 : index
    %c3 = arith.constant 3 : index
    %c0_104 = arith.constant 0 : index
    %191 = vector.load %arg3[%c0_103, %c3, %c0_104] : memref<1x8x128xf32, #tpu.memory_space<vmem>>, vector<1x1x128xf32>
    %192 = vector.shape_cast %191 : vector<1x1x128xf32> to vector<1x128xf32>
    %193 = vector.shape_cast %192 : vector<1x128xf32> to vector<1x128xf32>
    %194 = vector.broadcast %193 : vector<1x128xf32> to vector<8x128xf32>
    %c121_i32_105 = arith.constant 121 : i32
    %195 = tpu.dynamic_rotate %194 by %c121_i32_105 dim 1 {stride = 1 : si32, stride_dimension = 0 : si32} : vector<8x128xf32>, i32 -> vector<8x128xf32>
    %c113_i32_106 = arith.constant 113 : i32
    %196 = tpu.dynamic_rotate %194 by %c113_i32_106 dim 1 {stride = 1 : si32, stride_dimension = 0 : si32} : vector<8x128xf32>, i32 -> vector<8x128xf32>
    %c105_i32_107 = arith.constant 105 : i32
    %197 = tpu.dynamic_rotate %194 by %c105_i32_107 dim 1 {stride = 1 : si32, stride_dimension = 0 : si32} : vector<8x128xf32>, i32 -> vector<8x128xf32>
    %c97_i32_108 = arith.constant 97 : i32
    %198 = tpu.dynamic_rotate %194 by %c97_i32_108 dim 1 {stride = 1 : si32, stride_dimension = 0 : si32} : vector<8x128xf32>, i32 -> vector<8x128xf32>
    %c89_i32_109 = arith.constant 89 : i32
    %199 = tpu.dynamic_rotate %194 by %c89_i32_109 dim 1 {stride = 1 : si32, stride_dimension = 0 : si32} : vector<8x128xf32>, i32 -> vector<8x128xf32>
    %c81_i32_110 = arith.constant 81 : i32
    %200 = tpu.dynamic_rotate %194 by %c81_i32_110 dim 1 {stride = 1 : si32, stride_dimension = 0 : si32} : vector<8x128xf32>, i32 -> vector<8x128xf32>
    %c73_i32_111 = arith.constant 73 : i32
    %201 = tpu.dynamic_rotate %194 by %c73_i32_111 dim 1 {stride = 1 : si32, stride_dimension = 0 : si32} : vector<8x128xf32>, i32 -> vector<8x128xf32>
    %c65_i32_112 = arith.constant 65 : i32
    %202 = tpu.dynamic_rotate %194 by %c65_i32_112 dim 1 {stride = 1 : si32, stride_dimension = 0 : si32} : vector<8x128xf32>, i32 -> vector<8x128xf32>
    %c57_i32_113 = arith.constant 57 : i32
    %203 = tpu.dynamic_rotate %194 by %c57_i32_113 dim 1 {stride = 1 : si32, stride_dimension = 0 : si32} : vector<8x128xf32>, i32 -> vector<8x128xf32>
    %c49_i32_114 = arith.constant 49 : i32
    %204 = tpu.dynamic_rotate %194 by %c49_i32_114 dim 1 {stride = 1 : si32, stride_dimension = 0 : si32} : vector<8x128xf32>, i32 -> vector<8x128xf32>
    %c41_i32_115 = arith.constant 41 : i32
    %205 = tpu.dynamic_rotate %194 by %c41_i32_115 dim 1 {stride = 1 : si32, stride_dimension = 0 : si32} : vector<8x128xf32>, i32 -> vector<8x128xf32>
    %c33_i32_116 = arith.constant 33 : i32
    %206 = tpu.dynamic_rotate %194 by %c33_i32_116 dim 1 {stride = 1 : si32, stride_dimension = 0 : si32} : vector<8x128xf32>, i32 -> vector<8x128xf32>
    %c25_i32_117 = arith.constant 25 : i32
    %207 = tpu.dynamic_rotate %194 by %c25_i32_117 dim 1 {stride = 1 : si32, stride_dimension = 0 : si32} : vector<8x128xf32>, i32 -> vector<8x128xf32>
    %c17_i32_118 = arith.constant 17 : i32
    %208 = tpu.dynamic_rotate %194 by %c17_i32_118 dim 1 {stride = 1 : si32, stride_dimension = 0 : si32} : vector<8x128xf32>, i32 -> vector<8x128xf32>
    %c9_i32_119 = arith.constant 9 : i32
    %209 = tpu.dynamic_rotate %194 by %c9_i32_119 dim 1 {stride = 1 : si32, stride_dimension = 0 : si32} : vector<8x128xf32>, i32 -> vector<8x128xf32>
    %c1_i32_120 = arith.constant 1 : i32
    %210 = tpu.dynamic_rotate %194 by %c1_i32_120 dim 1 {stride = 1 : si32, stride_dimension = 0 : si32} : vector<8x128xf32>, i32 -> vector<8x128xf32>
    %c121_i32_121 = arith.constant 121 : i32
    %211 = vector.broadcast %c121_i32_121 : i32 to vector<8x128xi32>
    %212 = arith.cmpi slt, %2, %211 : vector<8x128xi32>
    %213 = arith.select %212, %111, %195 : vector<8x128xi1>, vector<8x128xf32>
    %c256 = arith.constant 256 : index
    %c0_122 = arith.constant 0 : index
    %214 = vector.load %arg6[%c256, %c0_122] : memref<1408x128xf32, #tpu.memory_space<vmem>>, vector<8x128xf32>
    tpu.vector_store %arg6[%c256, %c0_122], %213 {strides = array<i32>} : memref<1408x128xf32, #tpu.memory_space<vmem>>, vector<8x128xf32>,
    %c113_i32_123 = arith.constant 113 : i32
    %215 = vector.broadcast %c113_i32_123 : i32 to vector<8x128xi32>
    %216 = arith.cmpi slt, %2, %215 : vector<8x128xi32>
    %217 = arith.select %216, %112, %196 : vector<8x128xi1>, vector<8x128xf32>
    %c264 = arith.constant 264 : index
    %c0_124 = arith.constant 0 : index
    %218 = vector.load %arg6[%c264, %c0_124] : memref<1408x128xf32, #tpu.memory_space<vmem>>, vector<8x128xf32>
    tpu.vector_store %arg6[%c264, %c0_124], %217 {strides = array<i32>} : memref<1408x128xf32, #tpu.memory_space<vmem>>, vector<8x128xf32>,
    %c105_i32_125 = arith.constant 105 : i32
    %219 = vector.broadcast %c105_i32_125 : i32 to vector<8x128xi32>
    %220 = arith.cmpi slt, %2, %219 : vector<8x128xi32>
    %221 = arith.select %220, %113, %197 : vector<8x128xi1>, vector<8x128xf32>
    %c272 = arith.constant 272 : index
    %c0_126 = arith.constant 0 : index
    %222 = vector.load %arg6[%c272, %c0_126] : memref<1408x128xf32, #tpu.memory_space<vmem>>, vector<8x128xf32>
    tpu.vector_store %arg6[%c272, %c0_126], %221 {strides = array<i32>} : memref<1408x128xf32, #tpu.memory_space<vmem>>, vector<8x128xf32>,
    %c97_i32_127 = arith.constant 97 : i32
    %223 = vector.broadcast %c97_i32_127 : i32 to vector<8x128xi32>
    %224 = arith.cmpi slt, %2, %223 : vector<8x128xi32>
    %225 = arith.select %224, %114, %198 : vector<8x128xi1>, vector<8x128xf32>
    %c280 = arith.constant 280 : index
    %c0_128 = arith.constant 0 : index
    %226 = vector.load %arg6[%c280, %c0_128] : memref<1408x128xf32, #tpu.memory_space<vmem>>, vector<8x128xf32>
    tpu.vector_store %arg6[%c280, %c0_128], %225 {strides = array<i32>} : memref<1408x128xf32, #tpu.memory_space<vmem>>, vector<8x128xf32>,
    %c89_i32_129 = arith.constant 89 : i32
    %227 = vector.broadcast %c89_i32_129 : i32 to vector<8x128xi32>
    %228 = arith.cmpi slt, %2, %227 : vector<8x128xi32>
    %229 = arith.select %228, %115, %199 : vector<8x128xi1>, vector<8x128xf32>
    %c288 = arith.constant 288 : index
    %c0_130 = arith.constant 0 : index
    %230 = vector.load %arg6[%c288, %c0_130] : memref<1408x128xf32, #tpu.memory_space<vmem>>, vector<8x128xf32>
    tpu.vector_store %arg6[%c288, %c0_130], %229 {strides = array<i32>} : memref<1408x128xf32, #tpu.memory_space<vmem>>, vector<8x128xf32>,
    %c81_i32_131 = arith.constant 81 : i32
    %231 = vector.broadcast %c81_i32_131 : i32 to vector<8x128xi32>
    %232 = arith.cmpi slt, %2, %231 : vector<8x128xi32>
    %233 = arith.select %232, %116, %200 : vector<8x128xi1>, vector<8x128xf32>
    %c296 = arith.constant 296 : index
    %c0_132 = arith.constant 0 : index
    %234 = vector.load %arg6[%c296, %c0_132] : memref<1408x128xf32, #tpu.memory_space<vmem>>, vector<8x128xf32>
    tpu.vector_store %arg6[%c296, %c0_132], %233 {strides = array<i32>} : memref<1408x128xf32, #tpu.memory_space<vmem>>, vector<8x128xf32>,
    %c73_i32_133 = arith.constant 73 : i32
    %235 = vector.broadcast %c73_i32_133 : i32 to vector<8x128xi32>
    %236 = arith.cmpi slt, %2, %235 : vector<8x128xi32>
    %237 = arith.select %236, %117, %201 : vector<8x128xi1>, vector<8x128xf32>
    %c304 = arith.constant 304 : index
    %c0_134 = arith.constant 0 : index
    %238 = vector.load %arg6[%c304, %c0_134] : memref<1408x128xf32, #tpu.memory_space<vmem>>, vector<8x128xf32>
    tpu.vector_store %arg6[%c304, %c0_134], %237 {strides = array<i32>} : memref<1408x128xf32, #tpu.memory_space<vmem>>, vector<8x128xf32>,
    %c65_i32_135 = arith.constant 65 : i32
    %239 = vector.broadcast %c65_i32_135 : i32 to vector<8x128xi32>
    %240 = arith.cmpi slt, %2, %239 : vector<8x128xi32>
    %241 = arith.select %240, %118, %202 : vector<8x128xi1>, vector<8x128xf32>
    %c312 = arith.constant 312 : index
    %c0_136 = arith.constant 0 : index
    %242 = vector.load %arg6[%c312, %c0_136] : memref<1408x128xf32, #tpu.memory_space<vmem>>, vector<8x128xf32>
    tpu.vector_store %arg6[%c312, %c0_136], %241 {strides = array<i32>} : memref<1408x128xf32, #tpu.memory_space<vmem>>, vector<8x128xf32>,
    %c57_i32_137 = arith.constant 57 : i32
    %243 = vector.broadcast %c57_i32_137 : i32 to vector<8x128xi32>
    %244 = arith.cmpi slt, %2, %243 : vector<8x128xi32>
    %245 = arith.select %244, %119, %203 : vector<8x128xi1>, vector<8x128xf32>
    %c320 = arith.constant 320 : index
    %c0_138 = arith.constant 0 : index
    %246 = vector.load %arg6[%c320, %c0_138] : memref<1408x128xf32, #tpu.memory_space<vmem>>, vector<8x128xf32>
    tpu.vector_store %arg6[%c320, %c0_138], %245 {strides = array<i32>} : memref<1408x128xf32, #tpu.memory_space<vmem>>, vector<8x128xf32>,
    %c49_i32_139 = arith.constant 49 : i32
    %247 = vector.broadcast %c49_i32_139 : i32 to vector<8x128xi32>
    %248 = arith.cmpi slt, %2, %247 : vector<8x128xi32>
    %249 = arith.select %248, %120, %204 : vector<8x128xi1>, vector<8x128xf32>
    %c328 = arith.constant 328 : index
    %c0_140 = arith.constant 0 : index
    %250 = vector.load %arg6[%c328, %c0_140] : memref<1408x128xf32, #tpu.memory_space<vmem>>, vector<8x128xf32>
    tpu.vector_store %arg6[%c328, %c0_140], %249 {strides = array<i32>} : memref<1408x128xf32, #tpu.memory_space<vmem>>, vector<8x128xf32>,
    %c41_i32_141 = arith.constant 41 : i32
    %251 = vector.broadcast %c41_i32_141 : i32 to vector<8x128xi32>
    %252 = arith.cmpi slt, %2, %251 : vector<8x128xi32>
    %253 = arith.select %252, %121, %205 : vector<8x128xi1>, vector<8x128xf32>
    %c336 = arith.constant 336 : index
    %c0_142 = arith.constant 0 : index
    %254 = vector.load %arg6[%c336, %c0_142] : memref<1408x128xf32, #tpu.memory_space<vmem>>, vector<8x128xf32>
    tpu.vector_store %arg6[%c336, %c0_142], %253 {strides = array<i32>} : memref<1408x128xf32, #tpu.memory_space<vmem>>, vector<8x128xf32>,
    %c33_i32_143 = arith.constant 33 : i32
    %255 = vector.broadcast %c33_i32_143 : i32 to vector<8x128xi32>
    %256 = arith.cmpi slt, %2, %255 : vector<8x128xi32>
    %257 = arith.select %256, %122, %206 : vector<8x128xi1>, vector<8x128xf32>
    %c344 = arith.constant 344 : index
    %c0_144 = arith.constant 0 : index
    %258 = vector.load %arg6[%c344, %c0_144] : memref<1408x128xf32, #tpu.memory_space<vmem>>, vector<8x128xf32>
    tpu.vector_store %arg6[%c344, %c0_144], %257 {strides = array<i32>} : memref<1408x128xf32, #tpu.memory_space<vmem>>, vector<8x128xf32>,
    %c25_i32_145 = arith.constant 25 : i32
    %259 = vector.broadcast %c25_i32_145 : i32 to vector<8x128xi32>
    %260 = arith.cmpi slt, %2, %259 : vector<8x128xi32>
    %261 = arith.select %260, %123, %207 : vector<8x128xi1>, vector<8x128xf32>
    %c352 = arith.constant 352 : index
    %c0_146 = arith.constant 0 : index
    %262 = vector.load %arg6[%c352, %c0_146] : memref<1408x128xf32, #tpu.memory_space<vmem>>, vector<8x128xf32>
    tpu.vector_store %arg6[%c352, %c0_146], %261 {strides = array<i32>} : memref<1408x128xf32, #tpu.memory_space<vmem>>, vector<8x128xf32>,
    %c17_i32_147 = arith.constant 17 : i32
    %263 = vector.broadcast %c17_i32_147 : i32 to vector<8x128xi32>
    %264 = arith.cmpi slt, %2, %263 : vector<8x128xi32>
    %265 = arith.select %264, %124, %208 : vector<8x128xi1>, vector<8x128xf32>
    %c360 = arith.constant 360 : index
    %c0_148 = arith.constant 0 : index
    %266 = vector.load %arg6[%c360, %c0_148] : memref<1408x128xf32, #tpu.memory_space<vmem>>, vector<8x128xf32>
    tpu.vector_store %arg6[%c360, %c0_148], %265 {strides = array<i32>} : memref<1408x128xf32, #tpu.memory_space<vmem>>, vector<8x128xf32>,
    %c9_i32_149 = arith.constant 9 : i32
    %267 = vector.broadcast %c9_i32_149 : i32 to vector<8x128xi32>
    %268 = arith.cmpi slt, %2, %267 : vector<8x128xi32>
    %269 = arith.select %268, %125, %209 : vector<8x128xi1>, vector<8x128xf32>
    %c368 = arith.constant 368 : index
    %c0_150 = arith.constant 0 : index
    %270 = vector.load %arg6[%c368, %c0_150] : memref<1408x128xf32, #tpu.memory_space<vmem>>, vector<8x128xf32>
    tpu.vector_store %arg6[%c368, %c0_150], %269 {strides = array<i32>} : memref<1408x128xf32, #tpu.memory_space<vmem>>, vector<8x128xf32>,
    %c1_i32_151 = arith.constant 1 : i32
    %271 = vector.broadcast %c1_i32_151 : i32 to vector<8x128xi32>
    %272 = arith.cmpi slt, %2, %271 : vector<8x128xi32>
    %273 = arith.select %272, %126, %210 : vector<8x128xi1>, vector<8x128xf32>
    %c376 = arith.constant 376 : index
    %c0_152 = arith.constant 0 : index
    %274 = vector.load %arg6[%c376, %c0_152] : memref<1408x128xf32, #tpu.memory_space<vmem>>, vector<8x128xf32>
    tpu.vector_store %arg6[%c376, %c0_152], %273 {strides = array<i32>} : memref<1408x128xf32, #tpu.memory_space<vmem>>, vector<8x128xf32>,
    %c0_153 = arith.constant 0 : index
    %c4 = arith.constant 4 : index
    %c0_154 = arith.constant 0 : index
    %275 = vector.load %arg3[%c0_153, %c4, %c0_154] : memref<1x8x128xf32, #tpu.memory_space<vmem>>, vector<1x1x128xf32>
    %276 = vector.shape_cast %275 : vector<1x1x128xf32> to vector<1x128xf32>
    %277 = vector.shape_cast %276 : vector<1x128xf32> to vector<1x128xf32>
    %278 = vector.broadcast %277 : vector<1x128xf32> to vector<8x128xf32>
    %c121_i32_155 = arith.constant 121 : i32
    %279 = tpu.dynamic_rotate %278 by %c121_i32_155 dim 1 {stride = 1 : si32, stride_dimension = 0 : si32} : vector<8x128xf32>, i32 -> vector<8x128xf32>
    %c113_i32_156 = arith.constant 113 : i32
    %280 = tpu.dynamic_rotate %278 by %c113_i32_156 dim 1 {stride = 1 : si32, stride_dimension = 0 : si32} : vector<8x128xf32>, i32 -> vector<8x128xf32>
    %c105_i32_157 = arith.constant 105 : i32
    %281 = tpu.dynamic_rotate %278 by %c105_i32_157 dim 1 {stride = 1 : si32, stride_dimension = 0 : si32} : vector<8x128xf32>, i32 -> vector<8x128xf32>
    %c97_i32_158 = arith.constant 97 : i32
    %282 = tpu.dynamic_rotate %278 by %c97_i32_158 dim 1 {stride = 1 : si32, stride_dimension = 0 : si32} : vector<8x128xf32>, i32 -> vector<8x128xf32>
    %c89_i32_159 = arith.constant 89 : i32
    %283 = tpu.dynamic_rotate %278 by %c89_i32_159 dim 1 {stride = 1 : si32, stride_dimension = 0 : si32} : vector<8x128xf32>, i32 -> vector<8x128xf32>
    %c81_i32_160 = arith.constant 81 : i32
    %284 = tpu.dynamic_rotate %278 by %c81_i32_160 dim 1 {stride = 1 : si32, stride_dimension = 0 : si32} : vector<8x128xf32>, i32 -> vector<8x128xf32>
    %c73_i32_161 = arith.constant 73 : i32
    %285 = tpu.dynamic_rotate %278 by %c73_i32_161 dim 1 {stride = 1 : si32, stride_dimension = 0 : si32} : vector<8x128xf32>, i32 -> vector<8x128xf32>
    %c65_i32_162 = arith.constant 65 : i32
    %286 = tpu.dynamic_rotate %278 by %c65_i32_162 dim 1 {stride = 1 : si32, stride_dimension = 0 : si32} : vector<8x128xf32>, i32 -> vector<8x128xf32>
    %c57_i32_163 = arith.constant 57 : i32
    %287 = tpu.dynamic_rotate %278 by %c57_i32_163 dim 1 {stride = 1 : si32, stride_dimension = 0 : si32} : vector<8x128xf32>, i32 -> vector<8x128xf32>
    %c49_i32_164 = arith.constant 49 : i32
    %288 = tpu.dynamic_rotate %278 by %c49_i32_164 dim 1 {stride = 1 : si32, stride_dimension = 0 : si32} : vector<8x128xf32>, i32 -> vector<8x128xf32>
    %c41_i32_165 = arith.constant 41 : i32
    %289 = tpu.dynamic_rotate %278 by %c41_i32_165 dim 1 {stride = 1 : si32, stride_dimension = 0 : si32} : vector<8x128xf32>, i32 -> vector<8x128xf32>
    %c33_i32_166 = arith.constant 33 : i32
    %290 = tpu.dynamic_rotate %278 by %c33_i32_166 dim 1 {stride = 1 : si32, stride_dimension = 0 : si32} : vector<8x128xf32>, i32 -> vector<8x128xf32>
    %c25_i32_167 = arith.constant 25 : i32
    %291 = tpu.dynamic_rotate %278 by %c25_i32_167 dim 1 {stride = 1 : si32, stride_dimension = 0 : si32} : vector<8x128xf32>, i32 -> vector<8x128xf32>
    %c17_i32_168 = arith.constant 17 : i32
    %292 = tpu.dynamic_rotate %278 by %c17_i32_168 dim 1 {stride = 1 : si32, stride_dimension = 0 : si32} : vector<8x128xf32>, i32 -> vector<8x128xf32>
    %c9_i32_169 = arith.constant 9 : i32
    %293 = tpu.dynamic_rotate %278 by %c9_i32_169 dim 1 {stride = 1 : si32, stride_dimension = 0 : si32} : vector<8x128xf32>, i32 -> vector<8x128xf32>
    %c1_i32_170 = arith.constant 1 : i32
    %294 = tpu.dynamic_rotate %278 by %c1_i32_170 dim 1 {stride = 1 : si32, stride_dimension = 0 : si32} : vector<8x128xf32>, i32 -> vector<8x128xf32>
    %c121_i32_171 = arith.constant 121 : i32
    %295 = vector.broadcast %c121_i32_171 : i32 to vector<8x128xi32>
    %296 = arith.cmpi slt, %2, %295 : vector<8x128xi32>
    %297 = arith.select %296, %195, %279 : vector<8x128xi1>, vector<8x128xf32>
    %c384 = arith.constant 384 : index
    %c0_172 = arith.constant 0 : index
    %298 = vector.load %arg6[%c384, %c0_172] : memref<1408x128xf32, #tpu.memory_space<vmem>>, vector<8x128xf32>
    tpu.vector_store %arg6[%c384, %c0_172], %297 {strides = array<i32>} : memref<1408x128xf32, #tpu.memory_space<vmem>>, vector<8x128xf32>,
    %c113_i32_173 = arith.constant 113 : i32
    %299 = vector.broadcast %c113_i32_173 : i32 to vector<8x128xi32>
    %300 = arith.cmpi slt, %2, %299 : vector<8x128xi32>
    %301 = arith.select %300, %196, %280 : vector<8x128xi1>, vector<8x128xf32>
    %c392 = arith.constant 392 : index
    %c0_174 = arith.constant 0 : index
    %302 = vector.load %arg6[%c392, %c0_174] : memref<1408x128xf32, #tpu.memory_space<vmem>>, vector<8x128xf32>
    tpu.vector_store %arg6[%c392, %c0_174], %301 {strides = array<i32>} : memref<1408x128xf32, #tpu.memory_space<vmem>>, vector<8x128xf32>,
    %c105_i32_175 = arith.constant 105 : i32
    %303 = vector.broadcast %c105_i32_175 : i32 to vector<8x128xi32>
    %304 = arith.cmpi slt, %2, %303 : vector<8x128xi32>
    %305 = arith.select %304, %197, %281 : vector<8x128xi1>, vector<8x128xf32>
    %c400 = arith.constant 400 : index
    %c0_176 = arith.constant 0 : index
    %306 = vector.load %arg6[%c400, %c0_176] : memref<1408x128xf32, #tpu.memory_space<vmem>>, vector<8x128xf32>
    tpu.vector_store %arg6[%c400, %c0_176], %305 {strides = array<i32>} : memref<1408x128xf32, #tpu.memory_space<vmem>>, vector<8x128xf32>,
    %c97_i32_177 = arith.constant 97 : i32
    %307 = vector.broadcast %c97_i32_177 : i32 to vector<8x128xi32>
    %308 = arith.cmpi slt, %2, %307 : vector<8x128xi32>
    %309 = arith.select %308, %198, %282 : vector<8x128xi1>, vector<8x128xf32>
    %c408 = arith.constant 408 : index
    %c0_178 = arith.constant 0 : index
    %310 = vector.load %arg6[%c408, %c0_178] : memref<1408x128xf32, #tpu.memory_space<vmem>>, vector<8x128xf32>
    tpu.vector_store %arg6[%c408, %c0_178], %309 {strides = array<i32>} : memref<1408x128xf32, #tpu.memory_space<vmem>>, vector<8x128xf32>,
    %c89_i32_179 = arith.constant 89 : i32
    %311 = vector.broadcast %c89_i32_179 : i32 to vector<8x128xi32>
    %312 = arith.cmpi slt, %2, %311 : vector<8x128xi32>
    %313 = arith.select %312, %199, %283 : vector<8x128xi1>, vector<8x128xf32>
    %c416 = arith.constant 416 : index
    %c0_180 = arith.constant 0 : index
    %314 = vector.load %arg6[%c416, %c0_180] : memref<1408x128xf32, #tpu.memory_space<vmem>>, vector<8x128xf32>
    tpu.vector_store %arg6[%c416, %c0_180], %313 {strides = array<i32>} : memref<1408x128xf32, #tpu.memory_space<vmem>>, vector<8x128xf32>,
    %c81_i32_181 = arith.constant 81 : i32
    %315 = vector.broadcast %c81_i32_181 : i32 to vector<8x128xi32>
    %316 = arith.cmpi slt, %2, %315 : vector<8x128xi32>
    %317 = arith.select %316, %200, %284 : vector<8x128xi1>, vector<8x128xf32>
    %c424 = arith.constant 424 : index
    %c0_182 = arith.constant 0 : index
    %318 = vector.load %arg6[%c424, %c0_182] : memref<1408x128xf32, #tpu.memory_space<vmem>>, vector<8x128xf32>
    tpu.vector_store %arg6[%c424, %c0_182], %317 {strides = array<i32>} : memref<1408x128xf32, #tpu.memory_space<vmem>>, vector<8x128xf32>,
    %c73_i32_183 = arith.constant 73 : i32
    %319 = vector.broadcast %c73_i32_183 : i32 to vector<8x128xi32>
    %320 = arith.cmpi slt, %2, %319 : vector<8x128xi32>
    %321 = arith.select %320, %201, %285 : vector<8x128xi1>, vector<8x128xf32>
    %c432 = arith.constant 432 : index
    %c0_184 = arith.constant 0 : index
    %322 = vector.load %arg6[%c432, %c0_184] : memref<1408x128xf32, #tpu.memory_space<vmem>>, vector<8x128xf32>
    tpu.vector_store %arg6[%c432, %c0_184], %321 {strides = array<i32>} : memref<1408x128xf32, #tpu.memory_space<vmem>>, vector<8x128xf32>,
    %c65_i32_185 = arith.constant 65 : i32
    %323 = vector.broadcast %c65_i32_185 : i32 to vector<8x128xi32>
    %324 = arith.cmpi slt, %2, %323 : vector<8x128xi32>
    %325 = arith.select %324, %202, %286 : vector<8x128xi1>, vector<8x128xf32>
    %c440 = arith.constant 440 : index
    %c0_186 = arith.constant 0 : index
    %326 = vector.load %arg6[%c440, %c0_186] : memref<1408x128xf32, #tpu.memory_space<vmem>>, vector<8x128xf32>
    tpu.vector_store %arg6[%c440, %c0_186], %325 {strides = array<i32>} : memref<1408x128xf32, #tpu.memory_space<vmem>>, vector<8x128xf32>,
    %c57_i32_187 = arith.constant 57 : i32
    %327 = vector.broadcast %c57_i32_187 : i32 to vector<8x128xi32>
    %328 = arith.cmpi slt, %2, %327 : vector<8x128xi32>
    %329 = arith.select %328, %203, %287 : vector<8x128xi1>, vector<8x128xf32>
    %c448 = arith.constant 448 : index
    %c0_188 = arith.constant 0 : index
    %330 = vector.load %arg6[%c448, %c0_188] : memref<1408x128xf32, #tpu.memory_space<vmem>>, vector<8x128xf32>
    tpu.vector_store %arg6[%c448, %c0_188], %329 {strides = array<i32>} : memref<1408x128xf32, #tpu.memory_space<vmem>>, vector<8x128xf32>,
    %c49_i32_189 = arith.constant 49 : i32
    %331 = vector.broadcast %c49_i32_189 : i32 to vector<8x128xi32>
    %332 = arith.cmpi slt, %2, %331 : vector<8x128xi32>
    %333 = arith.select %332, %204, %288 : vector<8x128xi1>, vector<8x128xf32>
    %c456 = arith.constant 456 : index
    %c0_190 = arith.constant 0 : index
    %334 = vector.load %arg6[%c456, %c0_190] : memref<1408x128xf32, #tpu.memory_space<vmem>>, vector<8x128xf32>
    tpu.vector_store %arg6[%c456, %c0_190], %333 {strides = array<i32>} : memref<1408x128xf32, #tpu.memory_space<vmem>>, vector<8x128xf32>,
    %c41_i32_191 = arith.constant 41 : i32
    %335 = vector.broadcast %c41_i32_191 : i32 to vector<8x128xi32>
    %336 = arith.cmpi slt, %2, %335 : vector<8x128xi32>
    %337 = arith.select %336, %205, %289 : vector<8x128xi1>, vector<8x128xf32>
    %c464 = arith.constant 464 : index
    %c0_192 = arith.constant 0 : index
    %338 = vector.load %arg6[%c464, %c0_192] : memref<1408x128xf32, #tpu.memory_space<vmem>>, vector<8x128xf32>
    tpu.vector_store %arg6[%c464, %c0_192], %337 {strides = array<i32>} : memref<1408x128xf32, #tpu.memory_space<vmem>>, vector<8x128xf32>,
    %c33_i32_193 = arith.constant 33 : i32
    %339 = vector.broadcast %c33_i32_193 : i32 to vector<8x128xi32>
    %340 = arith.cmpi slt, %2, %339 : vector<8x128xi32>
    %341 = arith.select %340, %206, %290 : vector<8x128xi1>, vector<8x128xf32>
    %c472 = arith.constant 472 : index
    %c0_194 = arith.constant 0 : index
    %342 = vector.load %arg6[%c472, %c0_194] : memref<1408x128xf32, #tpu.memory_space<vmem>>, vector<8x128xf32>
    tpu.vector_store %arg6[%c472, %c0_194], %341 {strides = array<i32>} : memref<1408x128xf32, #tpu.memory_space<vmem>>, vector<8x128xf32>,
    %c25_i32_195 = arith.constant 25 : i32
    %343 = vector.broadcast %c25_i32_195 : i32 to vector<8x128xi32>
    %344 = arith.cmpi slt, %2, %343 : vector<8x128xi32>
    %345 = arith.select %344, %207, %291 : vector<8x128xi1>, vector<8x128xf32>
    %c480 = arith.constant 480 : index
    %c0_196 = arith.constant 0 : index
    %346 = vector.load %arg6[%c480, %c0_196] : memref<1408x128xf32, #tpu.memory_space<vmem>>, vector<8x128xf32>
    tpu.vector_store %arg6[%c480, %c0_196], %345 {strides = array<i32>} : memref<1408x128xf32, #tpu.memory_space<vmem>>, vector<8x128xf32>,
    %c17_i32_197 = arith.constant 17 : i32
    %347 = vector.broadcast %c17_i32_197 : i32 to vector<8x128xi32>
    %348 = arith.cmpi slt, %2, %347 : vector<8x128xi32>
    %349 = arith.select %348, %208, %292 : vector<8x128xi1>, vector<8x128xf32>
    %c488 = arith.constant 488 : index
    %c0_198 = arith.constant 0 : index
    %350 = vector.load %arg6[%c488, %c0_198] : memref<1408x128xf32, #tpu.memory_space<vmem>>, vector<8x128xf32>
    tpu.vector_store %arg6[%c488, %c0_198], %349 {strides = array<i32>} : memref<1408x128xf32, #tpu.memory_space<vmem>>, vector<8x128xf32>,
    %c9_i32_199 = arith.constant 9 : i32
    %351 = vector.broadcast %c9_i32_199 : i32 to vector<8x128xi32>
    %352 = arith.cmpi slt, %2, %351 : vector<8x128xi32>
    %353 = arith.select %352, %209, %293 : vector<8x128xi1>, vector<8x128xf32>
    %c496 = arith.constant 496 : index
    %c0_200 = arith.constant 0 : index
    %354 = vector.load %arg6[%c496, %c0_200] : memref<1408x128xf32, #tpu.memory_space<vmem>>, vector<8x128xf32>
    tpu.vector_store %arg6[%c496, %c0_200], %353 {strides = array<i32>} : memref<1408x128xf32, #tpu.memory_space<vmem>>, vector<8x128xf32>,
    %c1_i32_201 = arith.constant 1 : i32
    %355 = vector.broadcast %c1_i32_201 : i32 to vector<8x128xi32>
    %356 = arith.cmpi slt, %2, %355 : vector<8x128xi32>
    %357 = arith.select %356, %210, %294 : vector<8x128xi1>, vector<8x128xf32>
    %c504 = arith.constant 504 : index
    %c0_202 = arith.constant 0 : index
    %358 = vector.load %arg6[%c504, %c0_202] : memref<1408x128xf32, #tpu.memory_space<vmem>>, vector<8x128xf32>
    tpu.vector_store %arg6[%c504, %c0_202], %357 {strides = array<i32>} : memref<1408x128xf32, #tpu.memory_space<vmem>>, vector<8x128xf32>,
    %c0_203 = arith.constant 0 : index
    %c0_204 = arith.constant 0 : index
    %359 = vector.load %arg2[%c0_203, %c0_204] : memref<56x512xf32, #tpu.memory_space<vmem>>, vector<56x512xf32>
    %c0_205 = arith.constant 0 : index
    %c0_206 = arith.constant 0 : index
    %360 = vector.load %arg6[%c0_205, %c0_206] : memref<1408x128xf32, #tpu.memory_space<vmem>>, vector<512x128xf32>
    %cst = arith.constant dense<0.000000e+00> : vector<56x128xf32>
    %361 = tpu.matmul %359, %360, %cst {dimension_numbers = #tpu.dot_dimension_numbers<[1], [0], [0], [1], [0, 0, 1, 1], [], []>} : vector<56x512xf32>, vector<512x128xf32>, vector<56x128xf32> -> vector<56x128xf32>
    %362 = vector.extract_strided_slice %361 {offsets = [0, 0], sizes = [50, 128], strides = [1, 1]} : vector<56x128xf32> to vector<50x128xf32>
    %c0_207 = arith.constant 0 : index
    %c0_208 = arith.constant 0 : index
    %c0_209 = arith.constant 0 : index
    %363 = vector.load %arg5[%c0_207, %c0_208, %c0_209] : memref<1x50x1024xf32, #tpu.memory_space<vmem>>, vector<1x50x128xf32>
    %364 = vector.shape_cast %363 : vector<1x50x128xf32> to vector<50x128xf32>
    %365 = vector.shape_cast %362 : vector<50x128xf32> to vector<1x50x128xf32>
    tpu.vector_store %arg5[%c0_207, %c0_208, %c0_209], %365 {strides = array<i32>} : memref<1x50x1024xf32, #tpu.memory_space<vmem>>, vector<1x50x128xf32>,
    %c0_210 = arith.constant 0 : index
    %c5 = arith.constant 5 : index
    %c0_211 = arith.constant 0 : index
    %366 = vector.load %arg3[%c0_210, %c5, %c0_211] : memref<1x8x128xf32, #tpu.memory_space<vmem>>, vector<1x1x128xf32>
    %367 = vector.shape_cast %366 : vector<1x1x128xf32> to vector<1x128xf32>
    %368 = vector.shape_cast %367 : vector<1x128xf32> to vector<1x128xf32>
    %369 = vector.broadcast %368 : vector<1x128xf32> to vector<8x128xf32>
    %c121_i32_212 = arith.constant 121 : i32
    %370 = tpu.dynamic_rotate %369 by %c121_i32_212 dim 1 {stride = 1 : si32, stride_dimension = 0 : si32} : vector<8x128xf32>, i32 -> vector<8x128xf32>
    %c113_i32_213 = arith.constant 113 : i32
    %371 = tpu.dynamic_rotate %369 by %c113_i32_213 dim 1 {stride = 1 : si32, stride_dimension = 0 : si32} : vector<8x128xf32>, i32 -> vector<8x128xf32>
    %c105_i32_214 = arith.constant 105 : i32
    %372 = tpu.dynamic_rotate %369 by %c105_i32_214 dim 1 {stride = 1 : si32, stride_dimension = 0 : si32} : vector<8x128xf32>, i32 -> vector<8x128xf32>
    %c97_i32_215 = arith.constant 97 : i32
    %373 = tpu.dynamic_rotate %369 by %c97_i32_215 dim 1 {stride = 1 : si32, stride_dimension = 0 : si32} : vector<8x128xf32>, i32 -> vector<8x128xf32>
    %c89_i32_216 = arith.constant 89 : i32
    %374 = tpu.dynamic_rotate %369 by %c89_i32_216 dim 1 {stride = 1 : si32, stride_dimension = 0 : si32} : vector<8x128xf32>, i32 -> vector<8x128xf32>
    %c81_i32_217 = arith.constant 81 : i32
    %375 = tpu.dynamic_rotate %369 by %c81_i32_217 dim 1 {stride = 1 : si32, stride_dimension = 0 : si32} : vector<8x128xf32>, i32 -> vector<8x128xf32>
    %c73_i32_218 = arith.constant 73 : i32
    %376 = tpu.dynamic_rotate %369 by %c73_i32_218 dim 1 {stride = 1 : si32, stride_dimension = 0 : si32} : vector<8x128xf32>, i32 -> vector<8x128xf32>
    %c65_i32_219 = arith.constant 65 : i32
    %377 = tpu.dynamic_rotate %369 by %c65_i32_219 dim 1 {stride = 1 : si32, stride_dimension = 0 : si32} : vector<8x128xf32>, i32 -> vector<8x128xf32>
    %c57_i32_220 = arith.constant 57 : i32
    %378 = tpu.dynamic_rotate %369 by %c57_i32_220 dim 1 {stride = 1 : si32, stride_dimension = 0 : si32} : vector<8x128xf32>, i32 -> vector<8x128xf32>
    %c49_i32_221 = arith.constant 49 : i32
    %379 = tpu.dynamic_rotate %369 by %c49_i32_221 dim 1 {stride = 1 : si32, stride_dimension = 0 : si32} : vector<8x128xf32>, i32 -> vector<8x128xf32>
    %c41_i32_222 = arith.constant 41 : i32
    %380 = tpu.dynamic_rotate %369 by %c41_i32_222 dim 1 {stride = 1 : si32, stride_dimension = 0 : si32} : vector<8x128xf32>, i32 -> vector<8x128xf32>
    %c33_i32_223 = arith.constant 33 : i32
    %381 = tpu.dynamic_rotate %369 by %c33_i32_223 dim 1 {stride = 1 : si32, stride_dimension = 0 : si32} : vector<8x128xf32>, i32 -> vector<8x128xf32>
    %c25_i32_224 = arith.constant 25 : i32
    %382 = tpu.dynamic_rotate %369 by %c25_i32_224 dim 1 {stride = 1 : si32, stride_dimension = 0 : si32} : vector<8x128xf32>, i32 -> vector<8x128xf32>
    %c17_i32_225 = arith.constant 17 : i32
    %383 = tpu.dynamic_rotate %369 by %c17_i32_225 dim 1 {stride = 1 : si32, stride_dimension = 0 : si32} : vector<8x128xf32>, i32 -> vector<8x128xf32>
    %c9_i32_226 = arith.constant 9 : i32
    %384 = tpu.dynamic_rotate %369 by %c9_i32_226 dim 1 {stride = 1 : si32, stride_dimension = 0 : si32} : vector<8x128xf32>, i32 -> vector<8x128xf32>
    %c1_i32_227 = arith.constant 1 : i32
    %385 = tpu.dynamic_rotate %369 by %c1_i32_227 dim 1 {stride = 1 : si32, stride_dimension = 0 : si32} : vector<8x128xf32>, i32 -> vector<8x128xf32>
    %c121_i32_228 = arith.constant 121 : i32
    %386 = vector.broadcast %c121_i32_228 : i32 to vector<8x128xi32>
    %387 = arith.cmpi slt, %2, %386 : vector<8x128xi32>
    %388 = arith.select %387, %279, %370 : vector<8x128xi1>, vector<8x128xf32>
    %c512 = arith.constant 512 : index
    %c0_229 = arith.constant 0 : index
    %389 = vector.load %arg6[%c512, %c0_229] : memref<1408x128xf32, #tpu.memory_space<vmem>>, vector<8x128xf32>
    tpu.vector_store %arg6[%c512, %c0_229], %388 {strides = array<i32>} : memref<1408x128xf32, #tpu.memory_space<vmem>>, vector<8x128xf32>,
    %c113_i32_230 = arith.constant 113 : i32
    %390 = vector.broadcast %c113_i32_230 : i32 to vector<8x128xi32>
    %391 = arith.cmpi slt, %2, %390 : vector<8x128xi32>
    %392 = arith.select %391, %280, %371 : vector<8x128xi1>, vector<8x128xf32>
    %c520 = arith.constant 520 : index
    %c0_231 = arith.constant 0 : index
    %393 = vector.load %arg6[%c520, %c0_231] : memref<1408x128xf32, #tpu.memory_space<vmem>>, vector<8x128xf32>
    tpu.vector_store %arg6[%c520, %c0_231], %392 {strides = array<i32>} : memref<1408x128xf32, #tpu.memory_space<vmem>>, vector<8x128xf32>,
    %c105_i32_232 = arith.constant 105 : i32
    %394 = vector.broadcast %c105_i32_232 : i32 to vector<8x128xi32>
    %395 = arith.cmpi slt, %2, %394 : vector<8x128xi32>
    %396 = arith.select %395, %281, %372 : vector<8x128xi1>, vector<8x128xf32>
    %c528 = arith.constant 528 : index
    %c0_233 = arith.constant 0 : index
    %397 = vector.load %arg6[%c528, %c0_233] : memref<1408x128xf32, #tpu.memory_space<vmem>>, vector<8x128xf32>
    tpu.vector_store %arg6[%c528, %c0_233], %396 {strides = array<i32>} : memref<1408x128xf32, #tpu.memory_space<vmem>>, vector<8x128xf32>,
    %c97_i32_234 = arith.constant 97 : i32
    %398 = vector.broadcast %c97_i32_234 : i32 to vector<8x128xi32>
    %399 = arith.cmpi slt, %2, %398 : vector<8x128xi32>
    %400 = arith.select %399, %282, %373 : vector<8x128xi1>, vector<8x128xf32>
    %c536 = arith.constant 536 : index
    %c0_235 = arith.constant 0 : index
    %401 = vector.load %arg6[%c536, %c0_235] : memref<1408x128xf32, #tpu.memory_space<vmem>>, vector<8x128xf32>
    tpu.vector_store %arg6[%c536, %c0_235], %400 {strides = array<i32>} : memref<1408x128xf32, #tpu.memory_space<vmem>>, vector<8x128xf32>,
    %c89_i32_236 = arith.constant 89 : i32
    %402 = vector.broadcast %c89_i32_236 : i32 to vector<8x128xi32>
    %403 = arith.cmpi slt, %2, %402 : vector<8x128xi32>
    %404 = arith.select %403, %283, %374 : vector<8x128xi1>, vector<8x128xf32>
    %c544 = arith.constant 544 : index
    %c0_237 = arith.constant 0 : index
    %405 = vector.load %arg6[%c544, %c0_237] : memref<1408x128xf32, #tpu.memory_space<vmem>>, vector<8x128xf32>
    tpu.vector_store %arg6[%c544, %c0_237], %404 {strides = array<i32>} : memref<1408x128xf32, #tpu.memory_space<vmem>>, vector<8x128xf32>,
    %c81_i32_238 = arith.constant 81 : i32
    %406 = vector.broadcast %c81_i32_238 : i32 to vector<8x128xi32>
    %407 = arith.cmpi slt, %2, %406 : vector<8x128xi32>
    %408 = arith.select %407, %284, %375 : vector<8x128xi1>, vector<8x128xf32>
    %c552 = arith.constant 552 : index
    %c0_239 = arith.constant 0 : index
    %409 = vector.load %arg6[%c552, %c0_239] : memref<1408x128xf32, #tpu.memory_space<vmem>>, vector<8x128xf32>
    tpu.vector_store %arg6[%c552, %c0_239], %408 {strides = array<i32>} : memref<1408x128xf32, #tpu.memory_space<vmem>>, vector<8x128xf32>,
    %c73_i32_240 = arith.constant 73 : i32
    %410 = vector.broadcast %c73_i32_240 : i32 to vector<8x128xi32>
    %411 = arith.cmpi slt, %2, %410 : vector<8x128xi32>
    %412 = arith.select %411, %285, %376 : vector<8x128xi1>, vector<8x128xf32>
    %c560 = arith.constant 560 : index
    %c0_241 = arith.constant 0 : index
    %413 = vector.load %arg6[%c560, %c0_241] : memref<1408x128xf32, #tpu.memory_space<vmem>>, vector<8x128xf32>
    tpu.vector_store %arg6[%c560, %c0_241], %412 {strides = array<i32>} : memref<1408x128xf32, #tpu.memory_space<vmem>>, vector<8x128xf32>,
    %c65_i32_242 = arith.constant 65 : i32
    %414 = vector.broadcast %c65_i32_242 : i32 to vector<8x128xi32>
    %415 = arith.cmpi slt, %2, %414 : vector<8x128xi32>
    %416 = arith.select %415, %286, %377 : vector<8x128xi1>, vector<8x128xf32>
    %c568 = arith.constant 568 : index
    %c0_243 = arith.constant 0 : index
    %417 = vector.load %arg6[%c568, %c0_243] : memref<1408x128xf32, #tpu.memory_space<vmem>>, vector<8x128xf32>
    tpu.vector_store %arg6[%c568, %c0_243], %416 {strides = array<i32>} : memref<1408x128xf32, #tpu.memory_space<vmem>>, vector<8x128xf32>,
    %c57_i32_244 = arith.constant 57 : i32
    %418 = vector.broadcast %c57_i32_244 : i32 to vector<8x128xi32>
    %419 = arith.cmpi slt, %2, %418 : vector<8x128xi32>
    %420 = arith.select %419, %287, %378 : vector<8x128xi1>, vector<8x128xf32>
    %c576 = arith.constant 576 : index
    %c0_245 = arith.constant 0 : index
    %421 = vector.load %arg6[%c576, %c0_245] : memref<1408x128xf32, #tpu.memory_space<vmem>>, vector<8x128xf32>
    tpu.vector_store %arg6[%c576, %c0_245], %420 {strides = array<i32>} : memref<1408x128xf32, #tpu.memory_space<vmem>>, vector<8x128xf32>,
    %c49_i32_246 = arith.constant 49 : i32
    %422 = vector.broadcast %c49_i32_246 : i32 to vector<8x128xi32>
    %423 = arith.cmpi slt, %2, %422 : vector<8x128xi32>
    %424 = arith.select %423, %288, %379 : vector<8x128xi1>, vector<8x128xf32>
    %c584 = arith.constant 584 : index
    %c0_247 = arith.constant 0 : index
    %425 = vector.load %arg6[%c584, %c0_247] : memref<1408x128xf32, #tpu.memory_space<vmem>>, vector<8x128xf32>
    tpu.vector_store %arg6[%c584, %c0_247], %424 {strides = array<i32>} : memref<1408x128xf32, #tpu.memory_space<vmem>>, vector<8x128xf32>,
    %c41_i32_248 = arith.constant 41 : i32
    %426 = vector.broadcast %c41_i32_248 : i32 to vector<8x128xi32>
    %427 = arith.cmpi slt, %2, %426 : vector<8x128xi32>
    %428 = arith.select %427, %289, %380 : vector<8x128xi1>, vector<8x128xf32>
    %c592 = arith.constant 592 : index
    %c0_249 = arith.constant 0 : index
    %429 = vector.load %arg6[%c592, %c0_249] : memref<1408x128xf32, #tpu.memory_space<vmem>>, vector<8x128xf32>
    tpu.vector_store %arg6[%c592, %c0_249], %428 {strides = array<i32>} : memref<1408x128xf32, #tpu.memory_space<vmem>>, vector<8x128xf32>,
    %c33_i32_250 = arith.constant 33 : i32
    %430 = vector.broadcast %c33_i32_250 : i32 to vector<8x128xi32>
    %431 = arith.cmpi slt, %2, %430 : vector<8x128xi32>
    %432 = arith.select %431, %290, %381 : vector<8x128xi1>, vector<8x128xf32>
    %c600 = arith.constant 600 : index
    %c0_251 = arith.constant 0 : index
    %433 = vector.load %arg6[%c600, %c0_251] : memref<1408x128xf32, #tpu.memory_space<vmem>>, vector<8x128xf32>
    tpu.vector_store %arg6[%c600, %c0_251], %432 {strides = array<i32>} : memref<1408x128xf32, #tpu.memory_space<vmem>>, vector<8x128xf32>,
    %c25_i32_252 = arith.constant 25 : i32
    %434 = vector.broadcast %c25_i32_252 : i32 to vector<8x128xi32>
    %435 = arith.cmpi slt, %2, %434 : vector<8x128xi32>
    %436 = arith.select %435, %291, %382 : vector<8x128xi1>, vector<8x128xf32>
    %c608 = arith.constant 608 : index
    %c0_253 = arith.constant 0 : index
    %437 = vector.load %arg6[%c608, %c0_253] : memref<1408x128xf32, #tpu.memory_space<vmem>>, vector<8x128xf32>
    tpu.vector_store %arg6[%c608, %c0_253], %436 {strides = array<i32>} : memref<1408x128xf32, #tpu.memory_space<vmem>>, vector<8x128xf32>,
    %c17_i32_254 = arith.constant 17 : i32
    %438 = vector.broadcast %c17_i32_254 : i32 to vector<8x128xi32>
    %439 = arith.cmpi slt, %2, %438 : vector<8x128xi32>
    %440 = arith.select %439, %292, %383 : vector<8x128xi1>, vector<8x128xf32>
    %c616 = arith.constant 616 : index
    %c0_255 = arith.constant 0 : index
    %441 = vector.load %arg6[%c616, %c0_255] : memref<1408x128xf32, #tpu.memory_space<vmem>>, vector<8x128xf32>
    tpu.vector_store %arg6[%c616, %c0_255], %440 {strides = array<i32>} : memref<1408x128xf32, #tpu.memory_space<vmem>>, vector<8x128xf32>,
    %c9_i32_256 = arith.constant 9 : i32
    %442 = vector.broadcast %c9_i32_256 : i32 to vector<8x128xi32>
    %443 = arith.cmpi slt, %2, %442 : vector<8x128xi32>
    %444 = arith.select %443, %293, %384 : vector<8x128xi1>, vector<8x128xf32>
    %c624 = arith.constant 624 : index
    %c0_257 = arith.constant 0 : index
    %445 = vector.load %arg6[%c624, %c0_257] : memref<1408x128xf32, #tpu.memory_space<vmem>>, vector<8x128xf32>
    tpu.vector_store %arg6[%c624, %c0_257], %444 {strides = array<i32>} : memref<1408x128xf32, #tpu.memory_space<vmem>>, vector<8x128xf32>,
    %c1_i32_258 = arith.constant 1 : i32
    %446 = vector.broadcast %c1_i32_258 : i32 to vector<8x128xi32>
    %447 = arith.cmpi slt, %2, %446 : vector<8x128xi32>
    %448 = arith.select %447, %294, %385 : vector<8x128xi1>, vector<8x128xf32>
    %c632 = arith.constant 632 : index
    %c0_259 = arith.constant 0 : index
    %449 = vector.load %arg6[%c632, %c0_259] : memref<1408x128xf32, #tpu.memory_space<vmem>>, vector<8x128xf32>
    tpu.vector_store %arg6[%c632, %c0_259], %448 {strides = array<i32>} : memref<1408x128xf32, #tpu.memory_space<vmem>>, vector<8x128xf32>,
    %c0_260 = arith.constant 0 : index
    %c0_261 = arith.constant 0 : index
    %450 = vector.load %arg2[%c0_260, %c0_261] : memref<56x512xf32, #tpu.memory_space<vmem>>, vector<56x512xf32>
    %c128_262 = arith.constant 128 : index
    %c0_263 = arith.constant 0 : index
    %451 = vector.load %arg6[%c128_262, %c0_263] : memref<1408x128xf32, #tpu.memory_space<vmem>>, vector<512x128xf32>
    %cst_264 = arith.constant dense<0.000000e+00> : vector<56x128xf32>
    %452 = tpu.matmul %450, %451, %cst_264 {dimension_numbers = #tpu.dot_dimension_numbers<[1], [0], [0], [1], [0, 0, 1, 1], [], []>} : vector<56x512xf32>, vector<512x128xf32>, vector<56x128xf32> -> vector<56x128xf32>
    %453 = vector.extract_strided_slice %452 {offsets = [0, 0], sizes = [50, 128], strides = [1, 1]} : vector<56x128xf32> to vector<50x128xf32>
    %c0_265 = arith.constant 0 : index
    %c0_266 = arith.constant 0 : index
    %c128_267 = arith.constant 128 : index
    %454 = vector.load %arg5[%c0_265, %c0_266, %c128_267] : memref<1x50x1024xf32, #tpu.memory_space<vmem>>, vector<1x50x128xf32>
    %455 = vector.shape_cast %454 : vector<1x50x128xf32> to vector<50x128xf32>
    %456 = vector.shape_cast %453 : vector<50x128xf32> to vector<1x50x128xf32>
    tpu.vector_store %arg5[%c0_265, %c0_266, %c128_267], %456 {strides = array<i32>} : memref<1x50x1024xf32, #tpu.memory_space<vmem>>, vector<1x50x128xf32>,
    %c0_268 = arith.constant 0 : index
    %c6 = arith.constant 6 : index
    %c0_269 = arith.constant 0 : index
    %457 = vector.load %arg3[%c0_268, %c6, %c0_269] : memref<1x8x128xf32, #tpu.memory_space<vmem>>, vector<1x1x128xf32>
    %458 = vector.shape_cast %457 : vector<1x1x128xf32> to vector<1x128xf32>
    %459 = vector.shape_cast %458 : vector<1x128xf32> to vector<1x128xf32>
    %460 = vector.broadcast %459 : vector<1x128xf32> to vector<8x128xf32>
    %c121_i32_270 = arith.constant 121 : i32
    %461 = tpu.dynamic_rotate %460 by %c121_i32_270 dim 1 {stride = 1 : si32, stride_dimension = 0 : si32} : vector<8x128xf32>, i32 -> vector<8x128xf32>
    %c113_i32_271 = arith.constant 113 : i32
    %462 = tpu.dynamic_rotate %460 by %c113_i32_271 dim 1 {stride = 1 : si32, stride_dimension = 0 : si32} : vector<8x128xf32>, i32 -> vector<8x128xf32>
    %c105_i32_272 = arith.constant 105 : i32
    %463 = tpu.dynamic_rotate %460 by %c105_i32_272 dim 1 {stride = 1 : si32, stride_dimension = 0 : si32} : vector<8x128xf32>, i32 -> vector<8x128xf32>
    %c97_i32_273 = arith.constant 97 : i32
    %464 = tpu.dynamic_rotate %460 by %c97_i32_273 dim 1 {stride = 1 : si32, stride_dimension = 0 : si32} : vector<8x128xf32>, i32 -> vector<8x128xf32>
    %c89_i32_274 = arith.constant 89 : i32
    %465 = tpu.dynamic_rotate %460 by %c89_i32_274 dim 1 {stride = 1 : si32, stride_dimension = 0 : si32} : vector<8x128xf32>, i32 -> vector<8x128xf32>
    %c81_i32_275 = arith.constant 81 : i32
    %466 = tpu.dynamic_rotate %460 by %c81_i32_275 dim 1 {stride = 1 : si32, stride_dimension = 0 : si32} : vector<8x128xf32>, i32 -> vector<8x128xf32>
    %c73_i32_276 = arith.constant 73 : i32
    %467 = tpu.dynamic_rotate %460 by %c73_i32_276 dim 1 {stride = 1 : si32, stride_dimension = 0 : si32} : vector<8x128xf32>, i32 -> vector<8x128xf32>
    %c65_i32_277 = arith.constant 65 : i32
    %468 = tpu.dynamic_rotate %460 by %c65_i32_277 dim 1 {stride = 1 : si32, stride_dimension = 0 : si32} : vector<8x128xf32>, i32 -> vector<8x128xf32>
    %c57_i32_278 = arith.constant 57 : i32
    %469 = tpu.dynamic_rotate %460 by %c57_i32_278 dim 1 {stride = 1 : si32, stride_dimension = 0 : si32} : vector<8x128xf32>, i32 -> vector<8x128xf32>
    %c49_i32_279 = arith.constant 49 : i32
    %470 = tpu.dynamic_rotate %460 by %c49_i32_279 dim 1 {stride = 1 : si32, stride_dimension = 0 : si32} : vector<8x128xf32>, i32 -> vector<8x128xf32>
    %c41_i32_280 = arith.constant 41 : i32
    %471 = tpu.dynamic_rotate %460 by %c41_i32_280 dim 1 {stride = 1 : si32, stride_dimension = 0 : si32} : vector<8x128xf32>, i32 -> vector<8x128xf32>
    %c33_i32_281 = arith.constant 33 : i32
    %472 = tpu.dynamic_rotate %460 by %c33_i32_281 dim 1 {stride = 1 : si32, stride_dimension = 0 : si32} : vector<8x128xf32>, i32 -> vector<8x128xf32>
    %c25_i32_282 = arith.constant 25 : i32
    %473 = tpu.dynamic_rotate %460 by %c25_i32_282 dim 1 {stride = 1 : si32, stride_dimension = 0 : si32} : vector<8x128xf32>, i32 -> vector<8x128xf32>
    %c17_i32_283 = arith.constant 17 : i32
    %474 = tpu.dynamic_rotate %460 by %c17_i32_283 dim 1 {stride = 1 : si32, stride_dimension = 0 : si32} : vector<8x128xf32>, i32 -> vector<8x128xf32>
    %c9_i32_284 = arith.constant 9 : i32
    %475 = tpu.dynamic_rotate %460 by %c9_i32_284 dim 1 {stride = 1 : si32, stride_dimension = 0 : si32} : vector<8x128xf32>, i32 -> vector<8x128xf32>
    %c1_i32_285 = arith.constant 1 : i32
    %476 = tpu.dynamic_rotate %460 by %c1_i32_285 dim 1 {stride = 1 : si32, stride_dimension = 0 : si32} : vector<8x128xf32>, i32 -> vector<8x128xf32>
    %c121_i32_286 = arith.constant 121 : i32
    %477 = vector.broadcast %c121_i32_286 : i32 to vector<8x128xi32>
    %478 = arith.cmpi slt, %2, %477 : vector<8x128xi32>
    %479 = arith.select %478, %370, %461 : vector<8x128xi1>, vector<8x128xf32>
    %c640 = arith.constant 640 : index
    %c0_287 = arith.constant 0 : index
    %480 = vector.load %arg6[%c640, %c0_287] : memref<1408x128xf32, #tpu.memory_space<vmem>>, vector<8x128xf32>
    tpu.vector_store %arg6[%c640, %c0_287], %479 {strides = array<i32>} : memref<1408x128xf32, #tpu.memory_space<vmem>>, vector<8x128xf32>,
    %c113_i32_288 = arith.constant 113 : i32
    %481 = vector.broadcast %c113_i32_288 : i32 to vector<8x128xi32>
    %482 = arith.cmpi slt, %2, %481 : vector<8x128xi32>
    %483 = arith.select %482, %371, %462 : vector<8x128xi1>, vector<8x128xf32>
    %c648 = arith.constant 648 : index
    %c0_289 = arith.constant 0 : index
    %484 = vector.load %arg6[%c648, %c0_289] : memref<1408x128xf32, #tpu.memory_space<vmem>>, vector<8x128xf32>
    tpu.vector_store %arg6[%c648, %c0_289], %483 {strides = array<i32>} : memref<1408x128xf32, #tpu.memory_space<vmem>>, vector<8x128xf32>,
    %c105_i32_290 = arith.constant 105 : i32
    %485 = vector.broadcast %c105_i32_290 : i32 to vector<8x128xi32>
    %486 = arith.cmpi slt, %2, %485 : vector<8x128xi32>
    %487 = arith.select %486, %372, %463 : vector<8x128xi1>, vector<8x128xf32>
    %c656 = arith.constant 656 : index
    %c0_291 = arith.constant 0 : index
    %488 = vector.load %arg6[%c656, %c0_291] : memref<1408x128xf32, #tpu.memory_space<vmem>>, vector<8x128xf32>
    tpu.vector_store %arg6[%c656, %c0_291], %487 {strides = array<i32>} : memref<1408x128xf32, #tpu.memory_space<vmem>>, vector<8x128xf32>,
    %c97_i32_292 = arith.constant 97 : i32
    %489 = vector.broadcast %c97_i32_292 : i32 to vector<8x128xi32>
    %490 = arith.cmpi slt, %2, %489 : vector<8x128xi32>
    %491 = arith.select %490, %373, %464 : vector<8x128xi1>, vector<8x128xf32>
    %c664 = arith.constant 664 : index
    %c0_293 = arith.constant 0 : index
    %492 = vector.load %arg6[%c664, %c0_293] : memref<1408x128xf32, #tpu.memory_space<vmem>>, vector<8x128xf32>
    tpu.vector_store %arg6[%c664, %c0_293], %491 {strides = array<i32>} : memref<1408x128xf32, #tpu.memory_space<vmem>>, vector<8x128xf32>,
    %c89_i32_294 = arith.constant 89 : i32
    %493 = vector.broadcast %c89_i32_294 : i32 to vector<8x128xi32>
    %494 = arith.cmpi slt, %2, %493 : vector<8x128xi32>
    %495 = arith.select %494, %374, %465 : vector<8x128xi1>, vector<8x128xf32>
    %c672 = arith.constant 672 : index
    %c0_295 = arith.constant 0 : index
    %496 = vector.load %arg6[%c672, %c0_295] : memref<1408x128xf32, #tpu.memory_space<vmem>>, vector<8x128xf32>
    tpu.vector_store %arg6[%c672, %c0_295], %495 {strides = array<i32>} : memref<1408x128xf32, #tpu.memory_space<vmem>>, vector<8x128xf32>,
    %c81_i32_296 = arith.constant 81 : i32
    %497 = vector.broadcast %c81_i32_296 : i32 to vector<8x128xi32>
    %498 = arith.cmpi slt, %2, %497 : vector<8x128xi32>
    %499 = arith.select %498, %375, %466 : vector<8x128xi1>, vector<8x128xf32>
    %c680 = arith.constant 680 : index
    %c0_297 = arith.constant 0 : index
    %500 = vector.load %arg6[%c680, %c0_297] : memref<1408x128xf32, #tpu.memory_space<vmem>>, vector<8x128xf32>
    tpu.vector_store %arg6[%c680, %c0_297], %499 {strides = array<i32>} : memref<1408x128xf32, #tpu.memory_space<vmem>>, vector<8x128xf32>,
    %c73_i32_298 = arith.constant 73 : i32
    %501 = vector.broadcast %c73_i32_298 : i32 to vector<8x128xi32>
    %502 = arith.cmpi slt, %2, %501 : vector<8x128xi32>
    %503 = arith.select %502, %376, %467 : vector<8x128xi1>, vector<8x128xf32>
    %c688 = arith.constant 688 : index
    %c0_299 = arith.constant 0 : index
    %504 = vector.load %arg6[%c688, %c0_299] : memref<1408x128xf32, #tpu.memory_space<vmem>>, vector<8x128xf32>
    tpu.vector_store %arg6[%c688, %c0_299], %503 {strides = array<i32>} : memref<1408x128xf32, #tpu.memory_space<vmem>>, vector<8x128xf32>,
    %c65_i32_300 = arith.constant 65 : i32
    %505 = vector.broadcast %c65_i32_300 : i32 to vector<8x128xi32>
    %506 = arith.cmpi slt, %2, %505 : vector<8x128xi32>
    %507 = arith.select %506, %377, %468 : vector<8x128xi1>, vector<8x128xf32>
    %c696 = arith.constant 696 : index
    %c0_301 = arith.constant 0 : index
    %508 = vector.load %arg6[%c696, %c0_301] : memref<1408x128xf32, #tpu.memory_space<vmem>>, vector<8x128xf32>
    tpu.vector_store %arg6[%c696, %c0_301], %507 {strides = array<i32>} : memref<1408x128xf32, #tpu.memory_space<vmem>>, vector<8x128xf32>,
    %c57_i32_302 = arith.constant 57 : i32
    %509 = vector.broadcast %c57_i32_302 : i32 to vector<8x128xi32>
    %510 = arith.cmpi slt, %2, %509 : vector<8x128xi32>
    %511 = arith.select %510, %378, %469 : vector<8x128xi1>, vector<8x128xf32>
    %c704 = arith.constant 704 : index
    %c0_303 = arith.constant 0 : index
    %512 = vector.load %arg6[%c704, %c0_303] : memref<1408x128xf32, #tpu.memory_space<vmem>>, vector<8x128xf32>
    tpu.vector_store %arg6[%c704, %c0_303], %511 {strides = array<i32>} : memref<1408x128xf32, #tpu.memory_space<vmem>>, vector<8x128xf32>,
    %c49_i32_304 = arith.constant 49 : i32
    %513 = vector.broadcast %c49_i32_304 : i32 to vector<8x128xi32>
    %514 = arith.cmpi slt, %2, %513 : vector<8x128xi32>
    %515 = arith.select %514, %379, %470 : vector<8x128xi1>, vector<8x128xf32>
    %c712 = arith.constant 712 : index
    %c0_305 = arith.constant 0 : index
    %516 = vector.load %arg6[%c712, %c0_305] : memref<1408x128xf32, #tpu.memory_space<vmem>>, vector<8x128xf32>
    tpu.vector_store %arg6[%c712, %c0_305], %515 {strides = array<i32>} : memref<1408x128xf32, #tpu.memory_space<vmem>>, vector<8x128xf32>,
    %c41_i32_306 = arith.constant 41 : i32
    %517 = vector.broadcast %c41_i32_306 : i32 to vector<8x128xi32>
    %518 = arith.cmpi slt, %2, %517 : vector<8x128xi32>
    %519 = arith.select %518, %380, %471 : vector<8x128xi1>, vector<8x128xf32>
    %c720 = arith.constant 720 : index
    %c0_307 = arith.constant 0 : index
    %520 = vector.load %arg6[%c720, %c0_307] : memref<1408x128xf32, #tpu.memory_space<vmem>>, vector<8x128xf32>
    tpu.vector_store %arg6[%c720, %c0_307], %519 {strides = array<i32>} : memref<1408x128xf32, #tpu.memory_space<vmem>>, vector<8x128xf32>,
    %c33_i32_308 = arith.constant 33 : i32
    %521 = vector.broadcast %c33_i32_308 : i32 to vector<8x128xi32>
    %522 = arith.cmpi slt, %2, %521 : vector<8x128xi32>
    %523 = arith.select %522, %381, %472 : vector<8x128xi1>, vector<8x128xf32>
    %c728 = arith.constant 728 : index
    %c0_309 = arith.constant 0 : index
    %524 = vector.load %arg6[%c728, %c0_309] : memref<1408x128xf32, #tpu.memory_space<vmem>>, vector<8x128xf32>
    tpu.vector_store %arg6[%c728, %c0_309], %523 {strides = array<i32>} : memref<1408x128xf32, #tpu.memory_space<vmem>>, vector<8x128xf32>,
    %c25_i32_310 = arith.constant 25 : i32
    %525 = vector.broadcast %c25_i32_310 : i32 to vector<8x128xi32>
    %526 = arith.cmpi slt, %2, %525 : vector<8x128xi32>
    %527 = arith.select %526, %382, %473 : vector<8x128xi1>, vector<8x128xf32>
    %c736 = arith.constant 736 : index
    %c0_311 = arith.constant 0 : index
    %528 = vector.load %arg6[%c736, %c0_311] : memref<1408x128xf32, #tpu.memory_space<vmem>>, vector<8x128xf32>
    tpu.vector_store %arg6[%c736, %c0_311], %527 {strides = array<i32>} : memref<1408x128xf32, #tpu.memory_space<vmem>>, vector<8x128xf32>,
    %c17_i32_312 = arith.constant 17 : i32
    %529 = vector.broadcast %c17_i32_312 : i32 to vector<8x128xi32>
    %530 = arith.cmpi slt, %2, %529 : vector<8x128xi32>
    %531 = arith.select %530, %383, %474 : vector<8x128xi1>, vector<8x128xf32>
    %c744 = arith.constant 744 : index
    %c0_313 = arith.constant 0 : index
    %532 = vector.load %arg6[%c744, %c0_313] : memref<1408x128xf32, #tpu.memory_space<vmem>>, vector<8x128xf32>
    tpu.vector_store %arg6[%c744, %c0_313], %531 {strides = array<i32>} : memref<1408x128xf32, #tpu.memory_space<vmem>>, vector<8x128xf32>,
    %c9_i32_314 = arith.constant 9 : i32
    %533 = vector.broadcast %c9_i32_314 : i32 to vector<8x128xi32>
    %534 = arith.cmpi slt, %2, %533 : vector<8x128xi32>
    %535 = arith.select %534, %384, %475 : vector<8x128xi1>, vector<8x128xf32>
    %c752 = arith.constant 752 : index
    %c0_315 = arith.constant 0 : index
    %536 = vector.load %arg6[%c752, %c0_315] : memref<1408x128xf32, #tpu.memory_space<vmem>>, vector<8x128xf32>
    tpu.vector_store %arg6[%c752, %c0_315], %535 {strides = array<i32>} : memref<1408x128xf32, #tpu.memory_space<vmem>>, vector<8x128xf32>,
    %c1_i32_316 = arith.constant 1 : i32
    %537 = vector.broadcast %c1_i32_316 : i32 to vector<8x128xi32>
    %538 = arith.cmpi slt, %2, %537 : vector<8x128xi32>
    %539 = arith.select %538, %385, %476 : vector<8x128xi1>, vector<8x128xf32>
    %c760 = arith.constant 760 : index
    %c0_317 = arith.constant 0 : index
    %540 = vector.load %arg6[%c760, %c0_317] : memref<1408x128xf32, #tpu.memory_space<vmem>>, vector<8x128xf32>
    tpu.vector_store %arg6[%c760, %c0_317], %539 {strides = array<i32>} : memref<1408x128xf32, #tpu.memory_space<vmem>>, vector<8x128xf32>,
    %c0_318 = arith.constant 0 : index
    %c0_319 = arith.constant 0 : index
    %541 = vector.load %arg2[%c0_318, %c0_319] : memref<56x512xf32, #tpu.memory_space<vmem>>, vector<56x512xf32>
    %c256_320 = arith.constant 256 : index
    %c0_321 = arith.constant 0 : index
    %542 = vector.load %arg6[%c256_320, %c0_321] : memref<1408x128xf32, #tpu.memory_space<vmem>>, vector<512x128xf32>
    %cst_322 = arith.constant dense<0.000000e+00> : vector<56x128xf32>
    %543 = tpu.matmul %541, %542, %cst_322 {dimension_numbers = #tpu.dot_dimension_numbers<[1], [0], [0], [1], [0, 0, 1, 1], [], []>} : vector<56x512xf32>, vector<512x128xf32>, vector<56x128xf32> -> vector<56x128xf32>
    %544 = vector.extract_strided_slice %543 {offsets = [0, 0], sizes = [50, 128], strides = [1, 1]} : vector<56x128xf32> to vector<50x128xf32>
    %c0_323 = arith.constant 0 : index
    %c0_324 = arith.constant 0 : index
    %c256_325 = arith.constant 256 : index
    %545 = vector.load %arg5[%c0_323, %c0_324, %c256_325] : memref<1x50x1024xf32, #tpu.memory_space<vmem>>, vector<1x50x128xf32>
    %546 = vector.shape_cast %545 : vector<1x50x128xf32> to vector<50x128xf32>
    %547 = vector.shape_cast %544 : vector<50x128xf32> to vector<1x50x128xf32>
    tpu.vector_store %arg5[%c0_323, %c0_324, %c256_325], %547 {strides = array<i32>} : memref<1x50x1024xf32, #tpu.memory_space<vmem>>, vector<1x50x128xf32>,
    %c0_326 = arith.constant 0 : index
    %c7 = arith.constant 7 : index
    %c0_327 = arith.constant 0 : index
    %548 = vector.load %arg3[%c0_326, %c7, %c0_327] : memref<1x8x128xf32, #tpu.memory_space<vmem>>, vector<1x1x128xf32>
    %549 = vector.shape_cast %548 : vector<1x1x128xf32> to vector<1x128xf32>
    %550 = vector.shape_cast %549 : vector<1x128xf32> to vector<1x128xf32>
    %551 = vector.broadcast %550 : vector<1x128xf32> to vector<8x128xf32>
    %c121_i32_328 = arith.constant 121 : i32
    %552 = tpu.dynamic_rotate %551 by %c121_i32_328 dim 1 {stride = 1 : si32, stride_dimension = 0 : si32} : vector<8x128xf32>, i32 -> vector<8x128xf32>
    %c113_i32_329 = arith.constant 113 : i32
    %553 = tpu.dynamic_rotate %551 by %c113_i32_329 dim 1 {stride = 1 : si32, stride_dimension = 0 : si32} : vector<8x128xf32>, i32 -> vector<8x128xf32>
    %c105_i32_330 = arith.constant 105 : i32
    %554 = tpu.dynamic_rotate %551 by %c105_i32_330 dim 1 {stride = 1 : si32, stride_dimension = 0 : si32} : vector<8x128xf32>, i32 -> vector<8x128xf32>
    %c97_i32_331 = arith.constant 97 : i32
    %555 = tpu.dynamic_rotate %551 by %c97_i32_331 dim 1 {stride = 1 : si32, stride_dimension = 0 : si32} : vector<8x128xf32>, i32 -> vector<8x128xf32>
    %c89_i32_332 = arith.constant 89 : i32
    %556 = tpu.dynamic_rotate %551 by %c89_i32_332 dim 1 {stride = 1 : si32, stride_dimension = 0 : si32} : vector<8x128xf32>, i32 -> vector<8x128xf32>
    %c81_i32_333 = arith.constant 81 : i32
    %557 = tpu.dynamic_rotate %551 by %c81_i32_333 dim 1 {stride = 1 : si32, stride_dimension = 0 : si32} : vector<8x128xf32>, i32 -> vector<8x128xf32>
    %c73_i32_334 = arith.constant 73 : i32
    %558 = tpu.dynamic_rotate %551 by %c73_i32_334 dim 1 {stride = 1 : si32, stride_dimension = 0 : si32} : vector<8x128xf32>, i32 -> vector<8x128xf32>
    %c65_i32_335 = arith.constant 65 : i32
    %559 = tpu.dynamic_rotate %551 by %c65_i32_335 dim 1 {stride = 1 : si32, stride_dimension = 0 : si32} : vector<8x128xf32>, i32 -> vector<8x128xf32>
    %c57_i32_336 = arith.constant 57 : i32
    %560 = tpu.dynamic_rotate %551 by %c57_i32_336 dim 1 {stride = 1 : si32, stride_dimension = 0 : si32} : vector<8x128xf32>, i32 -> vector<8x128xf32>
    %c49_i32_337 = arith.constant 49 : i32
    %561 = tpu.dynamic_rotate %551 by %c49_i32_337 dim 1 {stride = 1 : si32, stride_dimension = 0 : si32} : vector<8x128xf32>, i32 -> vector<8x128xf32>
    %c41_i32_338 = arith.constant 41 : i32
    %562 = tpu.dynamic_rotate %551 by %c41_i32_338 dim 1 {stride = 1 : si32, stride_dimension = 0 : si32} : vector<8x128xf32>, i32 -> vector<8x128xf32>
    %c33_i32_339 = arith.constant 33 : i32
    %563 = tpu.dynamic_rotate %551 by %c33_i32_339 dim 1 {stride = 1 : si32, stride_dimension = 0 : si32} : vector<8x128xf32>, i32 -> vector<8x128xf32>
    %c25_i32_340 = arith.constant 25 : i32
    %564 = tpu.dynamic_rotate %551 by %c25_i32_340 dim 1 {stride = 1 : si32, stride_dimension = 0 : si32} : vector<8x128xf32>, i32 -> vector<8x128xf32>
    %c17_i32_341 = arith.constant 17 : i32
    %565 = tpu.dynamic_rotate %551 by %c17_i32_341 dim 1 {stride = 1 : si32, stride_dimension = 0 : si32} : vector<8x128xf32>, i32 -> vector<8x128xf32>
    %c9_i32_342 = arith.constant 9 : i32
    %566 = tpu.dynamic_rotate %551 by %c9_i32_342 dim 1 {stride = 1 : si32, stride_dimension = 0 : si32} : vector<8x128xf32>, i32 -> vector<8x128xf32>
    %c1_i32_343 = arith.constant 1 : i32
    %567 = tpu.dynamic_rotate %551 by %c1_i32_343 dim 1 {stride = 1 : si32, stride_dimension = 0 : si32} : vector<8x128xf32>, i32 -> vector<8x128xf32>
    %c121_i32_344 = arith.constant 121 : i32
    %568 = vector.broadcast %c121_i32_344 : i32 to vector<8x128xi32>
    %569 = arith.cmpi slt, %2, %568 : vector<8x128xi32>
    %570 = arith.select %569, %461, %552 : vector<8x128xi1>, vector<8x128xf32>
    %c768 = arith.constant 768 : index
    %c0_345 = arith.constant 0 : index
    %571 = vector.load %arg6[%c768, %c0_345] : memref<1408x128xf32, #tpu.memory_space<vmem>>, vector<8x128xf32>
    tpu.vector_store %arg6[%c768, %c0_345], %570 {strides = array<i32>} : memref<1408x128xf32, #tpu.memory_space<vmem>>, vector<8x128xf32>,
    %c113_i32_346 = arith.constant 113 : i32
    %572 = vector.broadcast %c113_i32_346 : i32 to vector<8x128xi32>
    %573 = arith.cmpi slt, %2, %572 : vector<8x128xi32>
    %574 = arith.select %573, %462, %553 : vector<8x128xi1>, vector<8x128xf32>
    %c776 = arith.constant 776 : index
    %c0_347 = arith.constant 0 : index
    %575 = vector.load %arg6[%c776, %c0_347] : memref<1408x128xf32, #tpu.memory_space<vmem>>, vector<8x128xf32>
    tpu.vector_store %arg6[%c776, %c0_347], %574 {strides = array<i32>} : memref<1408x128xf32, #tpu.memory_space<vmem>>, vector<8x128xf32>,
    %c105_i32_348 = arith.constant 105 : i32
    %576 = vector.broadcast %c105_i32_348 : i32 to vector<8x128xi32>
    %577 = arith.cmpi slt, %2, %576 : vector<8x128xi32>
    %578 = arith.select %577, %463, %554 : vector<8x128xi1>, vector<8x128xf32>
    %c784 = arith.constant 784 : index
    %c0_349 = arith.constant 0 : index
    %579 = vector.load %arg6[%c784, %c0_349] : memref<1408x128xf32, #tpu.memory_space<vmem>>, vector<8x128xf32>
    tpu.vector_store %arg6[%c784, %c0_349], %578 {strides = array<i32>} : memref<1408x128xf32, #tpu.memory_space<vmem>>, vector<8x128xf32>,
    %c97_i32_350 = arith.constant 97 : i32
    %580 = vector.broadcast %c97_i32_350 : i32 to vector<8x128xi32>
    %581 = arith.cmpi slt, %2, %580 : vector<8x128xi32>
    %582 = arith.select %581, %464, %555 : vector<8x128xi1>, vector<8x128xf32>
    %c792 = arith.constant 792 : index
    %c0_351 = arith.constant 0 : index
    %583 = vector.load %arg6[%c792, %c0_351] : memref<1408x128xf32, #tpu.memory_space<vmem>>, vector<8x128xf32>
    tpu.vector_store %arg6[%c792, %c0_351], %582 {strides = array<i32>} : memref<1408x128xf32, #tpu.memory_space<vmem>>, vector<8x128xf32>,
    %c89_i32_352 = arith.constant 89 : i32
    %584 = vector.broadcast %c89_i32_352 : i32 to vector<8x128xi32>
    %585 = arith.cmpi slt, %2, %584 : vector<8x128xi32>
    %586 = arith.select %585, %465, %556 : vector<8x128xi1>, vector<8x128xf32>
    %c800 = arith.constant 800 : index
    %c0_353 = arith.constant 0 : index
    %587 = vector.load %arg6[%c800, %c0_353] : memref<1408x128xf32, #tpu.memory_space<vmem>>, vector<8x128xf32>
    tpu.vector_store %arg6[%c800, %c0_353], %586 {strides = array<i32>} : memref<1408x128xf32, #tpu.memory_space<vmem>>, vector<8x128xf32>,
    %c81_i32_354 = arith.constant 81 : i32
    %588 = vector.broadcast %c81_i32_354 : i32 to vector<8x128xi32>
    %589 = arith.cmpi slt, %2, %588 : vector<8x128xi32>
    %590 = arith.select %589, %466, %557 : vector<8x128xi1>, vector<8x128xf32>
    %c808 = arith.constant 808 : index
    %c0_355 = arith.constant 0 : index
    %591 = vector.load %arg6[%c808, %c0_355] : memref<1408x128xf32, #tpu.memory_space<vmem>>, vector<8x128xf32>
    tpu.vector_store %arg6[%c808, %c0_355], %590 {strides = array<i32>} : memref<1408x128xf32, #tpu.memory_space<vmem>>, vector<8x128xf32>,
    %c73_i32_356 = arith.constant 73 : i32
    %592 = vector.broadcast %c73_i32_356 : i32 to vector<8x128xi32>
    %593 = arith.cmpi slt, %2, %592 : vector<8x128xi32>
    %594 = arith.select %593, %467, %558 : vector<8x128xi1>, vector<8x128xf32>
    %c816 = arith.constant 816 : index
    %c0_357 = arith.constant 0 : index
    %595 = vector.load %arg6[%c816, %c0_357] : memref<1408x128xf32, #tpu.memory_space<vmem>>, vector<8x128xf32>
    tpu.vector_store %arg6[%c816, %c0_357], %594 {strides = array<i32>} : memref<1408x128xf32, #tpu.memory_space<vmem>>, vector<8x128xf32>,
    %c65_i32_358 = arith.constant 65 : i32
    %596 = vector.broadcast %c65_i32_358 : i32 to vector<8x128xi32>
    %597 = arith.cmpi slt, %2, %596 : vector<8x128xi32>
    %598 = arith.select %597, %468, %559 : vector<8x128xi1>, vector<8x128xf32>
    %c824 = arith.constant 824 : index
    %c0_359 = arith.constant 0 : index
    %599 = vector.load %arg6[%c824, %c0_359] : memref<1408x128xf32, #tpu.memory_space<vmem>>, vector<8x128xf32>
    tpu.vector_store %arg6[%c824, %c0_359], %598 {strides = array<i32>} : memref<1408x128xf32, #tpu.memory_space<vmem>>, vector<8x128xf32>,
    %c57_i32_360 = arith.constant 57 : i32
    %600 = vector.broadcast %c57_i32_360 : i32 to vector<8x128xi32>
    %601 = arith.cmpi slt, %2, %600 : vector<8x128xi32>
    %602 = arith.select %601, %469, %560 : vector<8x128xi1>, vector<8x128xf32>
    %c832 = arith.constant 832 : index
    %c0_361 = arith.constant 0 : index
    %603 = vector.load %arg6[%c832, %c0_361] : memref<1408x128xf32, #tpu.memory_space<vmem>>, vector<8x128xf32>
    tpu.vector_store %arg6[%c832, %c0_361], %602 {strides = array<i32>} : memref<1408x128xf32, #tpu.memory_space<vmem>>, vector<8x128xf32>,
    %c49_i32_362 = arith.constant 49 : i32
    %604 = vector.broadcast %c49_i32_362 : i32 to vector<8x128xi32>
    %605 = arith.cmpi slt, %2, %604 : vector<8x128xi32>
    %606 = arith.select %605, %470, %561 : vector<8x128xi1>, vector<8x128xf32>
    %c840 = arith.constant 840 : index
    %c0_363 = arith.constant 0 : index
    %607 = vector.load %arg6[%c840, %c0_363] : memref<1408x128xf32, #tpu.memory_space<vmem>>, vector<8x128xf32>
    tpu.vector_store %arg6[%c840, %c0_363], %606 {strides = array<i32>} : memref<1408x128xf32, #tpu.memory_space<vmem>>, vector<8x128xf32>,
    %c41_i32_364 = arith.constant 41 : i32
    %608 = vector.broadcast %c41_i32_364 : i32 to vector<8x128xi32>
    %609 = arith.cmpi slt, %2, %608 : vector<8x128xi32>
    %610 = arith.select %609, %471, %562 : vector<8x128xi1>, vector<8x128xf32>
    %c848 = arith.constant 848 : index
    %c0_365 = arith.constant 0 : index
    %611 = vector.load %arg6[%c848, %c0_365] : memref<1408x128xf32, #tpu.memory_space<vmem>>, vector<8x128xf32>
    tpu.vector_store %arg6[%c848, %c0_365], %610 {strides = array<i32>} : memref<1408x128xf32, #tpu.memory_space<vmem>>, vector<8x128xf32>,
    %c33_i32_366 = arith.constant 33 : i32
    %612 = vector.broadcast %c33_i32_366 : i32 to vector<8x128xi32>
    %613 = arith.cmpi slt, %2, %612 : vector<8x128xi32>
    %614 = arith.select %613, %472, %563 : vector<8x128xi1>, vector<8x128xf32>
    %c856 = arith.constant 856 : index
    %c0_367 = arith.constant 0 : index
    %615 = vector.load %arg6[%c856, %c0_367] : memref<1408x128xf32, #tpu.memory_space<vmem>>, vector<8x128xf32>
    tpu.vector_store %arg6[%c856, %c0_367], %614 {strides = array<i32>} : memref<1408x128xf32, #tpu.memory_space<vmem>>, vector<8x128xf32>,
    %c25_i32_368 = arith.constant 25 : i32
    %616 = vector.broadcast %c25_i32_368 : i32 to vector<8x128xi32>
    %617 = arith.cmpi slt, %2, %616 : vector<8x128xi32>
    %618 = arith.select %617, %473, %564 : vector<8x128xi1>, vector<8x128xf32>
    %c864 = arith.constant 864 : index
    %c0_369 = arith.constant 0 : index
    %619 = vector.load %arg6[%c864, %c0_369] : memref<1408x128xf32, #tpu.memory_space<vmem>>, vector<8x128xf32>
    tpu.vector_store %arg6[%c864, %c0_369], %618 {strides = array<i32>} : memref<1408x128xf32, #tpu.memory_space<vmem>>, vector<8x128xf32>,
    %c17_i32_370 = arith.constant 17 : i32
    %620 = vector.broadcast %c17_i32_370 : i32 to vector<8x128xi32>
    %621 = arith.cmpi slt, %2, %620 : vector<8x128xi32>
    %622 = arith.select %621, %474, %565 : vector<8x128xi1>, vector<8x128xf32>
    %c872 = arith.constant 872 : index
    %c0_371 = arith.constant 0 : index
    %623 = vector.load %arg6[%c872, %c0_371] : memref<1408x128xf32, #tpu.memory_space<vmem>>, vector<8x128xf32>
    tpu.vector_store %arg6[%c872, %c0_371], %622 {strides = array<i32>} : memref<1408x128xf32, #tpu.memory_space<vmem>>, vector<8x128xf32>,
    %c9_i32_372 = arith.constant 9 : i32
    %624 = vector.broadcast %c9_i32_372 : i32 to vector<8x128xi32>
    %625 = arith.cmpi slt, %2, %624 : vector<8x128xi32>
    %626 = arith.select %625, %475, %566 : vector<8x128xi1>, vector<8x128xf32>
    %c880 = arith.constant 880 : index
    %c0_373 = arith.constant 0 : index
    %627 = vector.load %arg6[%c880, %c0_373] : memref<1408x128xf32, #tpu.memory_space<vmem>>, vector<8x128xf32>
    tpu.vector_store %arg6[%c880, %c0_373], %626 {strides = array<i32>} : memref<1408x128xf32, #tpu.memory_space<vmem>>, vector<8x128xf32>,
    %c1_i32_374 = arith.constant 1 : i32
    %628 = vector.broadcast %c1_i32_374 : i32 to vector<8x128xi32>
    %629 = arith.cmpi slt, %2, %628 : vector<8x128xi32>
    %630 = arith.select %629, %476, %567 : vector<8x128xi1>, vector<8x128xf32>
    %c888 = arith.constant 888 : index
    %c0_375 = arith.constant 0 : index
    %631 = vector.load %arg6[%c888, %c0_375] : memref<1408x128xf32, #tpu.memory_space<vmem>>, vector<8x128xf32>
    tpu.vector_store %arg6[%c888, %c0_375], %630 {strides = array<i32>} : memref<1408x128xf32, #tpu.memory_space<vmem>>, vector<8x128xf32>,
    %c0_376 = arith.constant 0 : index
    %c0_377 = arith.constant 0 : index
    %632 = vector.load %arg2[%c0_376, %c0_377] : memref<56x512xf32, #tpu.memory_space<vmem>>, vector<56x512xf32>
    %c384_378 = arith.constant 384 : index
    %c0_379 = arith.constant 0 : index
    %633 = vector.load %arg6[%c384_378, %c0_379] : memref<1408x128xf32, #tpu.memory_space<vmem>>, vector<512x128xf32>
    %cst_380 = arith.constant dense<0.000000e+00> : vector<56x128xf32>
    %634 = tpu.matmul %632, %633, %cst_380 {dimension_numbers = #tpu.dot_dimension_numbers<[1], [0], [0], [1], [0, 0, 1, 1], [], []>} : vector<56x512xf32>, vector<512x128xf32>, vector<56x128xf32> -> vector<56x128xf32>
    %635 = vector.extract_strided_slice %634 {offsets = [0, 0], sizes = [50, 128], strides = [1, 1]} : vector<56x128xf32> to vector<50x128xf32>
    %c0_381 = arith.constant 0 : index
    %c0_382 = arith.constant 0 : index
    %c384_383 = arith.constant 384 : index
    %636 = vector.load %arg5[%c0_381, %c0_382, %c384_383] : memref<1x50x1024xf32, #tpu.memory_space<vmem>>, vector<1x50x128xf32>
    %637 = vector.shape_cast %636 : vector<1x50x128xf32> to vector<50x128xf32>
    %638 = vector.shape_cast %635 : vector<50x128xf32> to vector<1x50x128xf32>
    tpu.vector_store %arg5[%c0_381, %c0_382, %c384_383], %638 {strides = array<i32>} : memref<1x50x1024xf32, #tpu.memory_space<vmem>>, vector<1x50x128xf32>,
    %c0_384 = arith.constant 0 : index
    %c0_385 = arith.constant 0 : index
    %c0_386 = arith.constant 0 : index
    %639 = vector.load %arg4[%c0_384, %c0_385, %c0_386] : memref<1x8x128xf32, #tpu.memory_space<vmem>>, vector<1x1x128xf32>
    %640 = vector.shape_cast %639 : vector<1x1x128xf32> to vector<1x128xf32>
    %641 = vector.shape_cast %640 : vector<1x128xf32> to vector<1x128xf32>
    %642 = vector.broadcast %641 : vector<1x128xf32> to vector<8x128xf32>
    %c121_i32_387 = arith.constant 121 : i32
    %643 = tpu.dynamic_rotate %642 by %c121_i32_387 dim 1 {stride = 1 : si32, stride_dimension = 0 : si32} : vector<8x128xf32>, i32 -> vector<8x128xf32>
    %c113_i32_388 = arith.constant 113 : i32
    %644 = tpu.dynamic_rotate %642 by %c113_i32_388 dim 1 {stride = 1 : si32, stride_dimension = 0 : si32} : vector<8x128xf32>, i32 -> vector<8x128xf32>
    %c105_i32_389 = arith.constant 105 : i32
    %645 = tpu.dynamic_rotate %642 by %c105_i32_389 dim 1 {stride = 1 : si32, stride_dimension = 0 : si32} : vector<8x128xf32>, i32 -> vector<8x128xf32>
    %c97_i32_390 = arith.constant 97 : i32
    %646 = tpu.dynamic_rotate %642 by %c97_i32_390 dim 1 {stride = 1 : si32, stride_dimension = 0 : si32} : vector<8x128xf32>, i32 -> vector<8x128xf32>
    %c89_i32_391 = arith.constant 89 : i32
    %647 = tpu.dynamic_rotate %642 by %c89_i32_391 dim 1 {stride = 1 : si32, stride_dimension = 0 : si32} : vector<8x128xf32>, i32 -> vector<8x128xf32>
    %c81_i32_392 = arith.constant 81 : i32
    %648 = tpu.dynamic_rotate %642 by %c81_i32_392 dim 1 {stride = 1 : si32, stride_dimension = 0 : si32} : vector<8x128xf32>, i32 -> vector<8x128xf32>
    %c73_i32_393 = arith.constant 73 : i32
    %649 = tpu.dynamic_rotate %642 by %c73_i32_393 dim 1 {stride = 1 : si32, stride_dimension = 0 : si32} : vector<8x128xf32>, i32 -> vector<8x128xf32>
    %c65_i32_394 = arith.constant 65 : i32
    %650 = tpu.dynamic_rotate %642 by %c65_i32_394 dim 1 {stride = 1 : si32, stride_dimension = 0 : si32} : vector<8x128xf32>, i32 -> vector<8x128xf32>
    %c57_i32_395 = arith.constant 57 : i32
    %651 = tpu.dynamic_rotate %642 by %c57_i32_395 dim 1 {stride = 1 : si32, stride_dimension = 0 : si32} : vector<8x128xf32>, i32 -> vector<8x128xf32>
    %c49_i32_396 = arith.constant 49 : i32
    %652 = tpu.dynamic_rotate %642 by %c49_i32_396 dim 1 {stride = 1 : si32, stride_dimension = 0 : si32} : vector<8x128xf32>, i32 -> vector<8x128xf32>
    %c41_i32_397 = arith.constant 41 : i32
    %653 = tpu.dynamic_rotate %642 by %c41_i32_397 dim 1 {stride = 1 : si32, stride_dimension = 0 : si32} : vector<8x128xf32>, i32 -> vector<8x128xf32>
    %c33_i32_398 = arith.constant 33 : i32
    %654 = tpu.dynamic_rotate %642 by %c33_i32_398 dim 1 {stride = 1 : si32, stride_dimension = 0 : si32} : vector<8x128xf32>, i32 -> vector<8x128xf32>
    %c25_i32_399 = arith.constant 25 : i32
    %655 = tpu.dynamic_rotate %642 by %c25_i32_399 dim 1 {stride = 1 : si32, stride_dimension = 0 : si32} : vector<8x128xf32>, i32 -> vector<8x128xf32>
    %c17_i32_400 = arith.constant 17 : i32
    %656 = tpu.dynamic_rotate %642 by %c17_i32_400 dim 1 {stride = 1 : si32, stride_dimension = 0 : si32} : vector<8x128xf32>, i32 -> vector<8x128xf32>
    %c9_i32_401 = arith.constant 9 : i32
    %657 = tpu.dynamic_rotate %642 by %c9_i32_401 dim 1 {stride = 1 : si32, stride_dimension = 0 : si32} : vector<8x128xf32>, i32 -> vector<8x128xf32>
    %c1_i32_402 = arith.constant 1 : i32
    %658 = tpu.dynamic_rotate %642 by %c1_i32_402 dim 1 {stride = 1 : si32, stride_dimension = 0 : si32} : vector<8x128xf32>, i32 -> vector<8x128xf32>
    %c121_i32_403 = arith.constant 121 : i32
    %659 = vector.broadcast %c121_i32_403 : i32 to vector<8x128xi32>
    %660 = arith.cmpi slt, %2, %659 : vector<8x128xi32>
    %661 = arith.select %660, %552, %643 : vector<8x128xi1>, vector<8x128xf32>
    %c896 = arith.constant 896 : index
    %c0_404 = arith.constant 0 : index
    %662 = vector.load %arg6[%c896, %c0_404] : memref<1408x128xf32, #tpu.memory_space<vmem>>, vector<8x128xf32>
    tpu.vector_store %arg6[%c896, %c0_404], %661 {strides = array<i32>} : memref<1408x128xf32, #tpu.memory_space<vmem>>, vector<8x128xf32>,
    %c113_i32_405 = arith.constant 113 : i32
    %663 = vector.broadcast %c113_i32_405 : i32 to vector<8x128xi32>
    %664 = arith.cmpi slt, %2, %663 : vector<8x128xi32>
    %665 = arith.select %664, %553, %644 : vector<8x128xi1>, vector<8x128xf32>
    %c904 = arith.constant 904 : index
    %c0_406 = arith.constant 0 : index
    %666 = vector.load %arg6[%c904, %c0_406] : memref<1408x128xf32, #tpu.memory_space<vmem>>, vector<8x128xf32>
    tpu.vector_store %arg6[%c904, %c0_406], %665 {strides = array<i32>} : memref<1408x128xf32, #tpu.memory_space<vmem>>, vector<8x128xf32>,
    %c105_i32_407 = arith.constant 105 : i32
    %667 = vector.broadcast %c105_i32_407 : i32 to vector<8x128xi32>
    %668 = arith.cmpi slt, %2, %667 : vector<8x128xi32>
    %669 = arith.select %668, %554, %645 : vector<8x128xi1>, vector<8x128xf32>
    %c912 = arith.constant 912 : index
    %c0_408 = arith.constant 0 : index
    %670 = vector.load %arg6[%c912, %c0_408] : memref<1408x128xf32, #tpu.memory_space<vmem>>, vector<8x128xf32>
    tpu.vector_store %arg6[%c912, %c0_408], %669 {strides = array<i32>} : memref<1408x128xf32, #tpu.memory_space<vmem>>, vector<8x128xf32>,
    %c97_i32_409 = arith.constant 97 : i32
    %671 = vector.broadcast %c97_i32_409 : i32 to vector<8x128xi32>
    %672 = arith.cmpi slt, %2, %671 : vector<8x128xi32>
    %673 = arith.select %672, %555, %646 : vector<8x128xi1>, vector<8x128xf32>
    %c920 = arith.constant 920 : index
    %c0_410 = arith.constant 0 : index
    %674 = vector.load %arg6[%c920, %c0_410] : memref<1408x128xf32, #tpu.memory_space<vmem>>, vector<8x128xf32>
    tpu.vector_store %arg6[%c920, %c0_410], %673 {strides = array<i32>} : memref<1408x128xf32, #tpu.memory_space<vmem>>, vector<8x128xf32>,
    %c89_i32_411 = arith.constant 89 : i32
    %675 = vector.broadcast %c89_i32_411 : i32 to vector<8x128xi32>
    %676 = arith.cmpi slt, %2, %675 : vector<8x128xi32>
    %677 = arith.select %676, %556, %647 : vector<8x128xi1>, vector<8x128xf32>
    %c928 = arith.constant 928 : index
    %c0_412 = arith.constant 0 : index
    %678 = vector.load %arg6[%c928, %c0_412] : memref<1408x128xf32, #tpu.memory_space<vmem>>, vector<8x128xf32>
    tpu.vector_store %arg6[%c928, %c0_412], %677 {strides = array<i32>} : memref<1408x128xf32, #tpu.memory_space<vmem>>, vector<8x128xf32>,
    %c81_i32_413 = arith.constant 81 : i32
    %679 = vector.broadcast %c81_i32_413 : i32 to vector<8x128xi32>
    %680 = arith.cmpi slt, %2, %679 : vector<8x128xi32>
    %681 = arith.select %680, %557, %648 : vector<8x128xi1>, vector<8x128xf32>
    %c936 = arith.constant 936 : index
    %c0_414 = arith.constant 0 : index
    %682 = vector.load %arg6[%c936, %c0_414] : memref<1408x128xf32, #tpu.memory_space<vmem>>, vector<8x128xf32>
    tpu.vector_store %arg6[%c936, %c0_414], %681 {strides = array<i32>} : memref<1408x128xf32, #tpu.memory_space<vmem>>, vector<8x128xf32>,
    %c73_i32_415 = arith.constant 73 : i32
    %683 = vector.broadcast %c73_i32_415 : i32 to vector<8x128xi32>
    %684 = arith.cmpi slt, %2, %683 : vector<8x128xi32>
    %685 = arith.select %684, %558, %649 : vector<8x128xi1>, vector<8x128xf32>
    %c944 = arith.constant 944 : index
    %c0_416 = arith.constant 0 : index
    %686 = vector.load %arg6[%c944, %c0_416] : memref<1408x128xf32, #tpu.memory_space<vmem>>, vector<8x128xf32>
    tpu.vector_store %arg6[%c944, %c0_416], %685 {strides = array<i32>} : memref<1408x128xf32, #tpu.memory_space<vmem>>, vector<8x128xf32>,
    %c65_i32_417 = arith.constant 65 : i32
    %687 = vector.broadcast %c65_i32_417 : i32 to vector<8x128xi32>
    %688 = arith.cmpi slt, %2, %687 : vector<8x128xi32>
    %689 = arith.select %688, %559, %650 : vector<8x128xi1>, vector<8x128xf32>
    %c952 = arith.constant 952 : index
    %c0_418 = arith.constant 0 : index
    %690 = vector.load %arg6[%c952, %c0_418] : memref<1408x128xf32, #tpu.memory_space<vmem>>, vector<8x128xf32>
    tpu.vector_store %arg6[%c952, %c0_418], %689 {strides = array<i32>} : memref<1408x128xf32, #tpu.memory_space<vmem>>, vector<8x128xf32>,
    %c57_i32_419 = arith.constant 57 : i32
    %691 = vector.broadcast %c57_i32_419 : i32 to vector<8x128xi32>
    %692 = arith.cmpi slt, %2, %691 : vector<8x128xi32>
    %693 = arith.select %692, %560, %651 : vector<8x128xi1>, vector<8x128xf32>
    %c960 = arith.constant 960 : index
    %c0_420 = arith.constant 0 : index
    %694 = vector.load %arg6[%c960, %c0_420] : memref<1408x128xf32, #tpu.memory_space<vmem>>, vector<8x128xf32>
    tpu.vector_store %arg6[%c960, %c0_420], %693 {strides = array<i32>} : memref<1408x128xf32, #tpu.memory_space<vmem>>, vector<8x128xf32>,
    %c49_i32_421 = arith.constant 49 : i32
    %695 = vector.broadcast %c49_i32_421 : i32 to vector<8x128xi32>
    %696 = arith.cmpi slt, %2, %695 : vector<8x128xi32>
    %697 = arith.select %696, %561, %652 : vector<8x128xi1>, vector<8x128xf32>
    %c968 = arith.constant 968 : index
    %c0_422 = arith.constant 0 : index
    %698 = vector.load %arg6[%c968, %c0_422] : memref<1408x128xf32, #tpu.memory_space<vmem>>, vector<8x128xf32>
    tpu.vector_store %arg6[%c968, %c0_422], %697 {strides = array<i32>} : memref<1408x128xf32, #tpu.memory_space<vmem>>, vector<8x128xf32>,
    %c41_i32_423 = arith.constant 41 : i32
    %699 = vector.broadcast %c41_i32_423 : i32 to vector<8x128xi32>
    %700 = arith.cmpi slt, %2, %699 : vector<8x128xi32>
    %701 = arith.select %700, %562, %653 : vector<8x128xi1>, vector<8x128xf32>
    %c976 = arith.constant 976 : index
    %c0_424 = arith.constant 0 : index
    %702 = vector.load %arg6[%c976, %c0_424] : memref<1408x128xf32, #tpu.memory_space<vmem>>, vector<8x128xf32>
    tpu.vector_store %arg6[%c976, %c0_424], %701 {strides = array<i32>} : memref<1408x128xf32, #tpu.memory_space<vmem>>, vector<8x128xf32>,
    %c33_i32_425 = arith.constant 33 : i32
    %703 = vector.broadcast %c33_i32_425 : i32 to vector<8x128xi32>
    %704 = arith.cmpi slt, %2, %703 : vector<8x128xi32>
    %705 = arith.select %704, %563, %654 : vector<8x128xi1>, vector<8x128xf32>
    %c984 = arith.constant 984 : index
    %c0_426 = arith.constant 0 : index
    %706 = vector.load %arg6[%c984, %c0_426] : memref<1408x128xf32, #tpu.memory_space<vmem>>, vector<8x128xf32>
    tpu.vector_store %arg6[%c984, %c0_426], %705 {strides = array<i32>} : memref<1408x128xf32, #tpu.memory_space<vmem>>, vector<8x128xf32>,
    %c25_i32_427 = arith.constant 25 : i32
    %707 = vector.broadcast %c25_i32_427 : i32 to vector<8x128xi32>
    %708 = arith.cmpi slt, %2, %707 : vector<8x128xi32>
    %709 = arith.select %708, %564, %655 : vector<8x128xi1>, vector<8x128xf32>
    %c992 = arith.constant 992 : index
    %c0_428 = arith.constant 0 : index
    %710 = vector.load %arg6[%c992, %c0_428] : memref<1408x128xf32, #tpu.memory_space<vmem>>, vector<8x128xf32>
    tpu.vector_store %arg6[%c992, %c0_428], %709 {strides = array<i32>} : memref<1408x128xf32, #tpu.memory_space<vmem>>, vector<8x128xf32>,
    %c17_i32_429 = arith.constant 17 : i32
    %711 = vector.broadcast %c17_i32_429 : i32 to vector<8x128xi32>
    %712 = arith.cmpi slt, %2, %711 : vector<8x128xi32>
    %713 = arith.select %712, %565, %656 : vector<8x128xi1>, vector<8x128xf32>
    %c1000 = arith.constant 1000 : index
    %c0_430 = arith.constant 0 : index
    %714 = vector.load %arg6[%c1000, %c0_430] : memref<1408x128xf32, #tpu.memory_space<vmem>>, vector<8x128xf32>
    tpu.vector_store %arg6[%c1000, %c0_430], %713 {strides = array<i32>} : memref<1408x128xf32, #tpu.memory_space<vmem>>, vector<8x128xf32>,
    %c9_i32_431 = arith.constant 9 : i32
    %715 = vector.broadcast %c9_i32_431 : i32 to vector<8x128xi32>
    %716 = arith.cmpi slt, %2, %715 : vector<8x128xi32>
    %717 = arith.select %716, %566, %657 : vector<8x128xi1>, vector<8x128xf32>
    %c1008 = arith.constant 1008 : index
    %c0_432 = arith.constant 0 : index
    %718 = vector.load %arg6[%c1008, %c0_432] : memref<1408x128xf32, #tpu.memory_space<vmem>>, vector<8x128xf32>
    tpu.vector_store %arg6[%c1008, %c0_432], %717 {strides = array<i32>} : memref<1408x128xf32, #tpu.memory_space<vmem>>, vector<8x128xf32>,
    %c1_i32_433 = arith.constant 1 : i32
    %719 = vector.broadcast %c1_i32_433 : i32 to vector<8x128xi32>
    %720 = arith.cmpi slt, %2, %719 : vector<8x128xi32>
    %721 = arith.select %720, %567, %658 : vector<8x128xi1>, vector<8x128xf32>
    %c1016 = arith.constant 1016 : index
    %c0_434 = arith.constant 0 : index
    %722 = vector.load %arg6[%c1016, %c0_434] : memref<1408x128xf32, #tpu.memory_space<vmem>>, vector<8x128xf32>
    tpu.vector_store %arg6[%c1016, %c0_434], %721 {strides = array<i32>} : memref<1408x128xf32, #tpu.memory_space<vmem>>, vector<8x128xf32>,
    %c0_435 = arith.constant 0 : index
    %c0_436 = arith.constant 0 : index
    %723 = vector.load %arg2[%c0_435, %c0_436] : memref<56x512xf32, #tpu.memory_space<vmem>>, vector<56x512xf32>
    %c512_437 = arith.constant 512 : index
    %c0_438 = arith.constant 0 : index
    %724 = vector.load %arg6[%c512_437, %c0_438] : memref<1408x128xf32, #tpu.memory_space<vmem>>, vector<512x128xf32>
    %cst_439 = arith.constant dense<0.000000e+00> : vector<56x128xf32>
    %725 = tpu.matmul %723, %724, %cst_439 {dimension_numbers = #tpu.dot_dimension_numbers<[1], [0], [0], [1], [0, 0, 1, 1], [], []>} : vector<56x512xf32>, vector<512x128xf32>, vector<56x128xf32> -> vector<56x128xf32>
    %726 = vector.extract_strided_slice %725 {offsets = [0, 0], sizes = [50, 128], strides = [1, 1]} : vector<56x128xf32> to vector<50x128xf32>
    %c0_440 = arith.constant 0 : index
    %c0_441 = arith.constant 0 : index
    %c512_442 = arith.constant 512 : index
    %727 = vector.load %arg5[%c0_440, %c0_441, %c512_442] : memref<1x50x1024xf32, #tpu.memory_space<vmem>>, vector<1x50x128xf32>
    %728 = vector.shape_cast %727 : vector<1x50x128xf32> to vector<50x128xf32>
    %729 = vector.shape_cast %726 : vector<50x128xf32> to vector<1x50x128xf32>
    tpu.vector_store %arg5[%c0_440, %c0_441, %c512_442], %729 {strides = array<i32>} : memref<1x50x1024xf32, #tpu.memory_space<vmem>>, vector<1x50x128xf32>,
    %c0_443 = arith.constant 0 : index
    %c1_444 = arith.constant 1 : index
    %c0_445 = arith.constant 0 : index
    %730 = vector.load %arg4[%c0_443, %c1_444, %c0_445] : memref<1x8x128xf32, #tpu.memory_space<vmem>>, vector<1x1x128xf32>
    %731 = vector.shape_cast %730 : vector<1x1x128xf32> to vector<1x128xf32>
    %732 = vector.shape_cast %731 : vector<1x128xf32> to vector<1x128xf32>
    %733 = vector.broadcast %732 : vector<1x128xf32> to vector<8x128xf32>
    %c121_i32_446 = arith.constant 121 : i32
    %734 = tpu.dynamic_rotate %733 by %c121_i32_446 dim 1 {stride = 1 : si32, stride_dimension = 0 : si32} : vector<8x128xf32>, i32 -> vector<8x128xf32>
    %c113_i32_447 = arith.constant 113 : i32
    %735 = tpu.dynamic_rotate %733 by %c113_i32_447 dim 1 {stride = 1 : si32, stride_dimension = 0 : si32} : vector<8x128xf32>, i32 -> vector<8x128xf32>
    %c105_i32_448 = arith.constant 105 : i32
    %736 = tpu.dynamic_rotate %733 by %c105_i32_448 dim 1 {stride = 1 : si32, stride_dimension = 0 : si32} : vector<8x128xf32>, i32 -> vector<8x128xf32>
    %c97_i32_449 = arith.constant 97 : i32
    %737 = tpu.dynamic_rotate %733 by %c97_i32_449 dim 1 {stride = 1 : si32, stride_dimension = 0 : si32} : vector<8x128xf32>, i32 -> vector<8x128xf32>
    %c89_i32_450 = arith.constant 89 : i32
    %738 = tpu.dynamic_rotate %733 by %c89_i32_450 dim 1 {stride = 1 : si32, stride_dimension = 0 : si32} : vector<8x128xf32>, i32 -> vector<8x128xf32>
    %c81_i32_451 = arith.constant 81 : i32
    %739 = tpu.dynamic_rotate %733 by %c81_i32_451 dim 1 {stride = 1 : si32, stride_dimension = 0 : si32} : vector<8x128xf32>, i32 -> vector<8x128xf32>
    %c73_i32_452 = arith.constant 73 : i32
    %740 = tpu.dynamic_rotate %733 by %c73_i32_452 dim 1 {stride = 1 : si32, stride_dimension = 0 : si32} : vector<8x128xf32>, i32 -> vector<8x128xf32>
    %c65_i32_453 = arith.constant 65 : i32
    %741 = tpu.dynamic_rotate %733 by %c65_i32_453 dim 1 {stride = 1 : si32, stride_dimension = 0 : si32} : vector<8x128xf32>, i32 -> vector<8x128xf32>
    %c57_i32_454 = arith.constant 57 : i32
    %742 = tpu.dynamic_rotate %733 by %c57_i32_454 dim 1 {stride = 1 : si32, stride_dimension = 0 : si32} : vector<8x128xf32>, i32 -> vector<8x128xf32>
    %c49_i32_455 = arith.constant 49 : i32
    %743 = tpu.dynamic_rotate %733 by %c49_i32_455 dim 1 {stride = 1 : si32, stride_dimension = 0 : si32} : vector<8x128xf32>, i32 -> vector<8x128xf32>
    %c41_i32_456 = arith.constant 41 : i32
    %744 = tpu.dynamic_rotate %733 by %c41_i32_456 dim 1 {stride = 1 : si32, stride_dimension = 0 : si32} : vector<8x128xf32>, i32 -> vector<8x128xf32>
    %c33_i32_457 = arith.constant 33 : i32
    %745 = tpu.dynamic_rotate %733 by %c33_i32_457 dim 1 {stride = 1 : si32, stride_dimension = 0 : si32} : vector<8x128xf32>, i32 -> vector<8x128xf32>
    %c25_i32_458 = arith.constant 25 : i32
    %746 = tpu.dynamic_rotate %733 by %c25_i32_458 dim 1 {stride = 1 : si32, stride_dimension = 0 : si32} : vector<8x128xf32>, i32 -> vector<8x128xf32>
    %c17_i32_459 = arith.constant 17 : i32
    %747 = tpu.dynamic_rotate %733 by %c17_i32_459 dim 1 {stride = 1 : si32, stride_dimension = 0 : si32} : vector<8x128xf32>, i32 -> vector<8x128xf32>
    %c9_i32_460 = arith.constant 9 : i32
    %748 = tpu.dynamic_rotate %733 by %c9_i32_460 dim 1 {stride = 1 : si32, stride_dimension = 0 : si32} : vector<8x128xf32>, i32 -> vector<8x128xf32>
    %c1_i32_461 = arith.constant 1 : i32
    %749 = tpu.dynamic_rotate %733 by %c1_i32_461 dim 1 {stride = 1 : si32, stride_dimension = 0 : si32} : vector<8x128xf32>, i32 -> vector<8x128xf32>
    %c121_i32_462 = arith.constant 121 : i32
    %750 = vector.broadcast %c121_i32_462 : i32 to vector<8x128xi32>
    %751 = arith.cmpi slt, %2, %750 : vector<8x128xi32>
    %752 = arith.select %751, %643, %734 : vector<8x128xi1>, vector<8x128xf32>
    %c1024 = arith.constant 1024 : index
    %c0_463 = arith.constant 0 : index
    %753 = vector.load %arg6[%c1024, %c0_463] : memref<1408x128xf32, #tpu.memory_space<vmem>>, vector<8x128xf32>
    tpu.vector_store %arg6[%c1024, %c0_463], %752 {strides = array<i32>} : memref<1408x128xf32, #tpu.memory_space<vmem>>, vector<8x128xf32>,
    %c113_i32_464 = arith.constant 113 : i32
    %754 = vector.broadcast %c113_i32_464 : i32 to vector<8x128xi32>
    %755 = arith.cmpi slt, %2, %754 : vector<8x128xi32>
    %756 = arith.select %755, %644, %735 : vector<8x128xi1>, vector<8x128xf32>
    %c1032 = arith.constant 1032 : index
    %c0_465 = arith.constant 0 : index
    %757 = vector.load %arg6[%c1032, %c0_465] : memref<1408x128xf32, #tpu.memory_space<vmem>>, vector<8x128xf32>
    tpu.vector_store %arg6[%c1032, %c0_465], %756 {strides = array<i32>} : memref<1408x128xf32, #tpu.memory_space<vmem>>, vector<8x128xf32>,
    %c105_i32_466 = arith.constant 105 : i32
    %758 = vector.broadcast %c105_i32_466 : i32 to vector<8x128xi32>
    %759 = arith.cmpi slt, %2, %758 : vector<8x128xi32>
    %760 = arith.select %759, %645, %736 : vector<8x128xi1>, vector<8x128xf32>
    %c1040 = arith.constant 1040 : index
    %c0_467 = arith.constant 0 : index
    %761 = vector.load %arg6[%c1040, %c0_467] : memref<1408x128xf32, #tpu.memory_space<vmem>>, vector<8x128xf32>
    tpu.vector_store %arg6[%c1040, %c0_467], %760 {strides = array<i32>} : memref<1408x128xf32, #tpu.memory_space<vmem>>, vector<8x128xf32>,
    %c97_i32_468 = arith.constant 97 : i32
    %762 = vector.broadcast %c97_i32_468 : i32 to vector<8x128xi32>
    %763 = arith.cmpi slt, %2, %762 : vector<8x128xi32>
    %764 = arith.select %763, %646, %737 : vector<8x128xi1>, vector<8x128xf32>
    %c1048 = arith.constant 1048 : index
    %c0_469 = arith.constant 0 : index
    %765 = vector.load %arg6[%c1048, %c0_469] : memref<1408x128xf32, #tpu.memory_space<vmem>>, vector<8x128xf32>
    tpu.vector_store %arg6[%c1048, %c0_469], %764 {strides = array<i32>} : memref<1408x128xf32, #tpu.memory_space<vmem>>, vector<8x128xf32>,
    %c89_i32_470 = arith.constant 89 : i32
    %766 = vector.broadcast %c89_i32_470 : i32 to vector<8x128xi32>
    %767 = arith.cmpi slt, %2, %766 : vector<8x128xi32>
    %768 = arith.select %767, %647, %738 : vector<8x128xi1>, vector<8x128xf32>
    %c1056 = arith.constant 1056 : index
    %c0_471 = arith.constant 0 : index
    %769 = vector.load %arg6[%c1056, %c0_471] : memref<1408x128xf32, #tpu.memory_space<vmem>>, vector<8x128xf32>
    tpu.vector_store %arg6[%c1056, %c0_471], %768 {strides = array<i32>} : memref<1408x128xf32, #tpu.memory_space<vmem>>, vector<8x128xf32>,
    %c81_i32_472 = arith.constant 81 : i32
    %770 = vector.broadcast %c81_i32_472 : i32 to vector<8x128xi32>
    %771 = arith.cmpi slt, %2, %770 : vector<8x128xi32>
    %772 = arith.select %771, %648, %739 : vector<8x128xi1>, vector<8x128xf32>
    %c1064 = arith.constant 1064 : index
    %c0_473 = arith.constant 0 : index
    %773 = vector.load %arg6[%c1064, %c0_473] : memref<1408x128xf32, #tpu.memory_space<vmem>>, vector<8x128xf32>
    tpu.vector_store %arg6[%c1064, %c0_473], %772 {strides = array<i32>} : memref<1408x128xf32, #tpu.memory_space<vmem>>, vector<8x128xf32>,
    %c73_i32_474 = arith.constant 73 : i32
    %774 = vector.broadcast %c73_i32_474 : i32 to vector<8x128xi32>
    %775 = arith.cmpi slt, %2, %774 : vector<8x128xi32>
    %776 = arith.select %775, %649, %740 : vector<8x128xi1>, vector<8x128xf32>
    %c1072 = arith.constant 1072 : index
    %c0_475 = arith.constant 0 : index
    %777 = vector.load %arg6[%c1072, %c0_475] : memref<1408x128xf32, #tpu.memory_space<vmem>>, vector<8x128xf32>
    tpu.vector_store %arg6[%c1072, %c0_475], %776 {strides = array<i32>} : memref<1408x128xf32, #tpu.memory_space<vmem>>, vector<8x128xf32>,
    %c65_i32_476 = arith.constant 65 : i32
    %778 = vector.broadcast %c65_i32_476 : i32 to vector<8x128xi32>
    %779 = arith.cmpi slt, %2, %778 : vector<8x128xi32>
    %780 = arith.select %779, %650, %741 : vector<8x128xi1>, vector<8x128xf32>
    %c1080 = arith.constant 1080 : index
    %c0_477 = arith.constant 0 : index
    %781 = vector.load %arg6[%c1080, %c0_477] : memref<1408x128xf32, #tpu.memory_space<vmem>>, vector<8x128xf32>
    tpu.vector_store %arg6[%c1080, %c0_477], %780 {strides = array<i32>} : memref<1408x128xf32, #tpu.memory_space<vmem>>, vector<8x128xf32>,
    %c57_i32_478 = arith.constant 57 : i32
    %782 = vector.broadcast %c57_i32_478 : i32 to vector<8x128xi32>
    %783 = arith.cmpi slt, %2, %782 : vector<8x128xi32>
    %784 = arith.select %783, %651, %742 : vector<8x128xi1>, vector<8x128xf32>
    %c1088 = arith.constant 1088 : index
    %c0_479 = arith.constant 0 : index
    %785 = vector.load %arg6[%c1088, %c0_479] : memref<1408x128xf32, #tpu.memory_space<vmem>>, vector<8x128xf32>
    tpu.vector_store %arg6[%c1088, %c0_479], %784 {strides = array<i32>} : memref<1408x128xf32, #tpu.memory_space<vmem>>, vector<8x128xf32>,
    %c49_i32_480 = arith.constant 49 : i32
    %786 = vector.broadcast %c49_i32_480 : i32 to vector<8x128xi32>
    %787 = arith.cmpi slt, %2, %786 : vector<8x128xi32>
    %788 = arith.select %787, %652, %743 : vector<8x128xi1>, vector<8x128xf32>
    %c1096 = arith.constant 1096 : index
    %c0_481 = arith.constant 0 : index
    %789 = vector.load %arg6[%c1096, %c0_481] : memref<1408x128xf32, #tpu.memory_space<vmem>>, vector<8x128xf32>
    tpu.vector_store %arg6[%c1096, %c0_481], %788 {strides = array<i32>} : memref<1408x128xf32, #tpu.memory_space<vmem>>, vector<8x128xf32>,
    %c41_i32_482 = arith.constant 41 : i32
    %790 = vector.broadcast %c41_i32_482 : i32 to vector<8x128xi32>
    %791 = arith.cmpi slt, %2, %790 : vector<8x128xi32>
    %792 = arith.select %791, %653, %744 : vector<8x128xi1>, vector<8x128xf32>
    %c1104 = arith.constant 1104 : index
    %c0_483 = arith.constant 0 : index
    %793 = vector.load %arg6[%c1104, %c0_483] : memref<1408x128xf32, #tpu.memory_space<vmem>>, vector<8x128xf32>
    tpu.vector_store %arg6[%c1104, %c0_483], %792 {strides = array<i32>} : memref<1408x128xf32, #tpu.memory_space<vmem>>, vector<8x128xf32>,
    %c33_i32_484 = arith.constant 33 : i32
    %794 = vector.broadcast %c33_i32_484 : i32 to vector<8x128xi32>
    %795 = arith.cmpi slt, %2, %794 : vector<8x128xi32>
    %796 = arith.select %795, %654, %745 : vector<8x128xi1>, vector<8x128xf32>
    %c1112 = arith.constant 1112 : index
    %c0_485 = arith.constant 0 : index
    %797 = vector.load %arg6[%c1112, %c0_485] : memref<1408x128xf32, #tpu.memory_space<vmem>>, vector<8x128xf32>
    tpu.vector_store %arg6[%c1112, %c0_485], %796 {strides = array<i32>} : memref<1408x128xf32, #tpu.memory_space<vmem>>, vector<8x128xf32>,
    %c25_i32_486 = arith.constant 25 : i32
    %798 = vector.broadcast %c25_i32_486 : i32 to vector<8x128xi32>
    %799 = arith.cmpi slt, %2, %798 : vector<8x128xi32>
    %800 = arith.select %799, %655, %746 : vector<8x128xi1>, vector<8x128xf32>
    %c1120 = arith.constant 1120 : index
    %c0_487 = arith.constant 0 : index
    %801 = vector.load %arg6[%c1120, %c0_487] : memref<1408x128xf32, #tpu.memory_space<vmem>>, vector<8x128xf32>
    tpu.vector_store %arg6[%c1120, %c0_487], %800 {strides = array<i32>} : memref<1408x128xf32, #tpu.memory_space<vmem>>, vector<8x128xf32>,
    %c17_i32_488 = arith.constant 17 : i32
    %802 = vector.broadcast %c17_i32_488 : i32 to vector<8x128xi32>
    %803 = arith.cmpi slt, %2, %802 : vector<8x128xi32>
    %804 = arith.select %803, %656, %747 : vector<8x128xi1>, vector<8x128xf32>
    %c1128 = arith.constant 1128 : index
    %c0_489 = arith.constant 0 : index
    %805 = vector.load %arg6[%c1128, %c0_489] : memref<1408x128xf32, #tpu.memory_space<vmem>>, vector<8x128xf32>
    tpu.vector_store %arg6[%c1128, %c0_489], %804 {strides = array<i32>} : memref<1408x128xf32, #tpu.memory_space<vmem>>, vector<8x128xf32>,
    %c9_i32_490 = arith.constant 9 : i32
    %806 = vector.broadcast %c9_i32_490 : i32 to vector<8x128xi32>
    %807 = arith.cmpi slt, %2, %806 : vector<8x128xi32>
    %808 = arith.select %807, %657, %748 : vector<8x128xi1>, vector<8x128xf32>
    %c1136 = arith.constant 1136 : index
    %c0_491 = arith.constant 0 : index
    %809 = vector.load %arg6[%c1136, %c0_491] : memref<1408x128xf32, #tpu.memory_space<vmem>>, vector<8x128xf32>
    tpu.vector_store %arg6[%c1136, %c0_491], %808 {strides = array<i32>} : memref<1408x128xf32, #tpu.memory_space<vmem>>, vector<8x128xf32>,
    %c1_i32_492 = arith.constant 1 : i32
    %810 = vector.broadcast %c1_i32_492 : i32 to vector<8x128xi32>
    %811 = arith.cmpi slt, %2, %810 : vector<8x128xi32>
    %812 = arith.select %811, %658, %749 : vector<8x128xi1>, vector<8x128xf32>
    %c1144 = arith.constant 1144 : index
    %c0_493 = arith.constant 0 : index
    %813 = vector.load %arg6[%c1144, %c0_493] : memref<1408x128xf32, #tpu.memory_space<vmem>>, vector<8x128xf32>
    tpu.vector_store %arg6[%c1144, %c0_493], %812 {strides = array<i32>} : memref<1408x128xf32, #tpu.memory_space<vmem>>, vector<8x128xf32>,
    %c0_494 = arith.constant 0 : index
    %c0_495 = arith.constant 0 : index
    %814 = vector.load %arg2[%c0_494, %c0_495] : memref<56x512xf32, #tpu.memory_space<vmem>>, vector<56x512xf32>
    %c640_496 = arith.constant 640 : index
    %c0_497 = arith.constant 0 : index
    %815 = vector.load %arg6[%c640_496, %c0_497] : memref<1408x128xf32, #tpu.memory_space<vmem>>, vector<512x128xf32>
    %cst_498 = arith.constant dense<0.000000e+00> : vector<56x128xf32>
    %816 = tpu.matmul %814, %815, %cst_498 {dimension_numbers = #tpu.dot_dimension_numbers<[1], [0], [0], [1], [0, 0, 1, 1], [], []>} : vector<56x512xf32>, vector<512x128xf32>, vector<56x128xf32> -> vector<56x128xf32>
    %817 = vector.extract_strided_slice %816 {offsets = [0, 0], sizes = [50, 128], strides = [1, 1]} : vector<56x128xf32> to vector<50x128xf32>
    %c0_499 = arith.constant 0 : index
    %c0_500 = arith.constant 0 : index
    %c640_501 = arith.constant 640 : index
    %818 = vector.load %arg5[%c0_499, %c0_500, %c640_501] : memref<1x50x1024xf32, #tpu.memory_space<vmem>>, vector<1x50x128xf32>
    %819 = vector.shape_cast %818 : vector<1x50x128xf32> to vector<50x128xf32>
    %820 = vector.shape_cast %817 : vector<50x128xf32> to vector<1x50x128xf32>
    tpu.vector_store %arg5[%c0_499, %c0_500, %c640_501], %820 {strides = array<i32>} : memref<1x50x1024xf32, #tpu.memory_space<vmem>>, vector<1x50x128xf32>,
    %c0_502 = arith.constant 0 : index
    %c2_503 = arith.constant 2 : index
    %c0_504 = arith.constant 0 : index
    %821 = vector.load %arg4[%c0_502, %c2_503, %c0_504] : memref<1x8x128xf32, #tpu.memory_space<vmem>>, vector<1x1x128xf32>
    %822 = vector.shape_cast %821 : vector<1x1x128xf32> to vector<1x128xf32>
    %823 = vector.shape_cast %822 : vector<1x128xf32> to vector<1x128xf32>
    %824 = vector.broadcast %823 : vector<1x128xf32> to vector<8x128xf32>
    %c121_i32_505 = arith.constant 121 : i32
    %825 = tpu.dynamic_rotate %824 by %c121_i32_505 dim 1 {stride = 1 : si32, stride_dimension = 0 : si32} : vector<8x128xf32>, i32 -> vector<8x128xf32>
    %c113_i32_506 = arith.constant 113 : i32
    %826 = tpu.dynamic_rotate %824 by %c113_i32_506 dim 1 {stride = 1 : si32, stride_dimension = 0 : si32} : vector<8x128xf32>, i32 -> vector<8x128xf32>
    %c105_i32_507 = arith.constant 105 : i32
    %827 = tpu.dynamic_rotate %824 by %c105_i32_507 dim 1 {stride = 1 : si32, stride_dimension = 0 : si32} : vector<8x128xf32>, i32 -> vector<8x128xf32>
    %c97_i32_508 = arith.constant 97 : i32
    %828 = tpu.dynamic_rotate %824 by %c97_i32_508 dim 1 {stride = 1 : si32, stride_dimension = 0 : si32} : vector<8x128xf32>, i32 -> vector<8x128xf32>
    %c89_i32_509 = arith.constant 89 : i32
    %829 = tpu.dynamic_rotate %824 by %c89_i32_509 dim 1 {stride = 1 : si32, stride_dimension = 0 : si32} : vector<8x128xf32>, i32 -> vector<8x128xf32>
    %c81_i32_510 = arith.constant 81 : i32
    %830 = tpu.dynamic_rotate %824 by %c81_i32_510 dim 1 {stride = 1 : si32, stride_dimension = 0 : si32} : vector<8x128xf32>, i32 -> vector<8x128xf32>
    %c73_i32_511 = arith.constant 73 : i32
    %831 = tpu.dynamic_rotate %824 by %c73_i32_511 dim 1 {stride = 1 : si32, stride_dimension = 0 : si32} : vector<8x128xf32>, i32 -> vector<8x128xf32>
    %c65_i32_512 = arith.constant 65 : i32
    %832 = tpu.dynamic_rotate %824 by %c65_i32_512 dim 1 {stride = 1 : si32, stride_dimension = 0 : si32} : vector<8x128xf32>, i32 -> vector<8x128xf32>
    %c57_i32_513 = arith.constant 57 : i32
    %833 = tpu.dynamic_rotate %824 by %c57_i32_513 dim 1 {stride = 1 : si32, stride_dimension = 0 : si32} : vector<8x128xf32>, i32 -> vector<8x128xf32>
    %c49_i32_514 = arith.constant 49 : i32
    %834 = tpu.dynamic_rotate %824 by %c49_i32_514 dim 1 {stride = 1 : si32, stride_dimension = 0 : si32} : vector<8x128xf32>, i32 -> vector<8x128xf32>
    %c41_i32_515 = arith.constant 41 : i32
    %835 = tpu.dynamic_rotate %824 by %c41_i32_515 dim 1 {stride = 1 : si32, stride_dimension = 0 : si32} : vector<8x128xf32>, i32 -> vector<8x128xf32>
    %c33_i32_516 = arith.constant 33 : i32
    %836 = tpu.dynamic_rotate %824 by %c33_i32_516 dim 1 {stride = 1 : si32, stride_dimension = 0 : si32} : vector<8x128xf32>, i32 -> vector<8x128xf32>
    %c25_i32_517 = arith.constant 25 : i32
    %837 = tpu.dynamic_rotate %824 by %c25_i32_517 dim 1 {stride = 1 : si32, stride_dimension = 0 : si32} : vector<8x128xf32>, i32 -> vector<8x128xf32>
    %c17_i32_518 = arith.constant 17 : i32
    %838 = tpu.dynamic_rotate %824 by %c17_i32_518 dim 1 {stride = 1 : si32, stride_dimension = 0 : si32} : vector<8x128xf32>, i32 -> vector<8x128xf32>
    %c9_i32_519 = arith.constant 9 : i32
    %839 = tpu.dynamic_rotate %824 by %c9_i32_519 dim 1 {stride = 1 : si32, stride_dimension = 0 : si32} : vector<8x128xf32>, i32 -> vector<8x128xf32>
    %c1_i32_520 = arith.constant 1 : i32
    %840 = tpu.dynamic_rotate %824 by %c1_i32_520 dim 1 {stride = 1 : si32, stride_dimension = 0 : si32} : vector<8x128xf32>, i32 -> vector<8x128xf32>
    %c121_i32_521 = arith.constant 121 : i32
    %841 = vector.broadcast %c121_i32_521 : i32 to vector<8x128xi32>
    %842 = arith.cmpi slt, %2, %841 : vector<8x128xi32>
    %843 = arith.select %842, %734, %825 : vector<8x128xi1>, vector<8x128xf32>
    %c1152 = arith.constant 1152 : index
    %c0_522 = arith.constant 0 : index
    %844 = vector.load %arg6[%c1152, %c0_522] : memref<1408x128xf32, #tpu.memory_space<vmem>>, vector<8x128xf32>
    tpu.vector_store %arg6[%c1152, %c0_522], %843 {strides = array<i32>} : memref<1408x128xf32, #tpu.memory_space<vmem>>, vector<8x128xf32>,
    %c113_i32_523 = arith.constant 113 : i32
    %845 = vector.broadcast %c113_i32_523 : i32 to vector<8x128xi32>
    %846 = arith.cmpi slt, %2, %845 : vector<8x128xi32>
    %847 = arith.select %846, %735, %826 : vector<8x128xi1>, vector<8x128xf32>
    %c1160 = arith.constant 1160 : index
    %c0_524 = arith.constant 0 : index
    %848 = vector.load %arg6[%c1160, %c0_524] : memref<1408x128xf32, #tpu.memory_space<vmem>>, vector<8x128xf32>
    tpu.vector_store %arg6[%c1160, %c0_524], %847 {strides = array<i32>} : memref<1408x128xf32, #tpu.memory_space<vmem>>, vector<8x128xf32>,
    %c105_i32_525 = arith.constant 105 : i32
    %849 = vector.broadcast %c105_i32_525 : i32 to vector<8x128xi32>
    %850 = arith.cmpi slt, %2, %849 : vector<8x128xi32>
    %851 = arith.select %850, %736, %827 : vector<8x128xi1>, vector<8x128xf32>
    %c1168 = arith.constant 1168 : index
    %c0_526 = arith.constant 0 : index
    %852 = vector.load %arg6[%c1168, %c0_526] : memref<1408x128xf32, #tpu.memory_space<vmem>>, vector<8x128xf32>
    tpu.vector_store %arg6[%c1168, %c0_526], %851 {strides = array<i32>} : memref<1408x128xf32, #tpu.memory_space<vmem>>, vector<8x128xf32>,
    %c97_i32_527 = arith.constant 97 : i32
    %853 = vector.broadcast %c97_i32_527 : i32 to vector<8x128xi32>
    %854 = arith.cmpi slt, %2, %853 : vector<8x128xi32>
    %855 = arith.select %854, %737, %828 : vector<8x128xi1>, vector<8x128xf32>
    %c1176 = arith.constant 1176 : index
    %c0_528 = arith.constant 0 : index
    %856 = vector.load %arg6[%c1176, %c0_528] : memref<1408x128xf32, #tpu.memory_space<vmem>>, vector<8x128xf32>
    tpu.vector_store %arg6[%c1176, %c0_528], %855 {strides = array<i32>} : memref<1408x128xf32, #tpu.memory_space<vmem>>, vector<8x128xf32>,
    %c89_i32_529 = arith.constant 89 : i32
    %857 = vector.broadcast %c89_i32_529 : i32 to vector<8x128xi32>
    %858 = arith.cmpi slt, %2, %857 : vector<8x128xi32>
    %859 = arith.select %858, %738, %829 : vector<8x128xi1>, vector<8x128xf32>
    %c1184 = arith.constant 1184 : index
    %c0_530 = arith.constant 0 : index
    %860 = vector.load %arg6[%c1184, %c0_530] : memref<1408x128xf32, #tpu.memory_space<vmem>>, vector<8x128xf32>
    tpu.vector_store %arg6[%c1184, %c0_530], %859 {strides = array<i32>} : memref<1408x128xf32, #tpu.memory_space<vmem>>, vector<8x128xf32>,
    %c81_i32_531 = arith.constant 81 : i32
    %861 = vector.broadcast %c81_i32_531 : i32 to vector<8x128xi32>
    %862 = arith.cmpi slt, %2, %861 : vector<8x128xi32>
    %863 = arith.select %862, %739, %830 : vector<8x128xi1>, vector<8x128xf32>
    %c1192 = arith.constant 1192 : index
    %c0_532 = arith.constant 0 : index
    %864 = vector.load %arg6[%c1192, %c0_532] : memref<1408x128xf32, #tpu.memory_space<vmem>>, vector<8x128xf32>
    tpu.vector_store %arg6[%c1192, %c0_532], %863 {strides = array<i32>} : memref<1408x128xf32, #tpu.memory_space<vmem>>, vector<8x128xf32>,
    %c73_i32_533 = arith.constant 73 : i32
    %865 = vector.broadcast %c73_i32_533 : i32 to vector<8x128xi32>
    %866 = arith.cmpi slt, %2, %865 : vector<8x128xi32>
    %867 = arith.select %866, %740, %831 : vector<8x128xi1>, vector<8x128xf32>
    %c1200 = arith.constant 1200 : index
    %c0_534 = arith.constant 0 : index
    %868 = vector.load %arg6[%c1200, %c0_534] : memref<1408x128xf32, #tpu.memory_space<vmem>>, vector<8x128xf32>
    tpu.vector_store %arg6[%c1200, %c0_534], %867 {strides = array<i32>} : memref<1408x128xf32, #tpu.memory_space<vmem>>, vector<8x128xf32>,
    %c65_i32_535 = arith.constant 65 : i32
    %869 = vector.broadcast %c65_i32_535 : i32 to vector<8x128xi32>
    %870 = arith.cmpi slt, %2, %869 : vector<8x128xi32>
    %871 = arith.select %870, %741, %832 : vector<8x128xi1>, vector<8x128xf32>
    %c1208 = arith.constant 1208 : index
    %c0_536 = arith.constant 0 : index
    %872 = vector.load %arg6[%c1208, %c0_536] : memref<1408x128xf32, #tpu.memory_space<vmem>>, vector<8x128xf32>
    tpu.vector_store %arg6[%c1208, %c0_536], %871 {strides = array<i32>} : memref<1408x128xf32, #tpu.memory_space<vmem>>, vector<8x128xf32>,
    %c57_i32_537 = arith.constant 57 : i32
    %873 = vector.broadcast %c57_i32_537 : i32 to vector<8x128xi32>
    %874 = arith.cmpi slt, %2, %873 : vector<8x128xi32>
    %875 = arith.select %874, %742, %833 : vector<8x128xi1>, vector<8x128xf32>
    %c1216 = arith.constant 1216 : index
    %c0_538 = arith.constant 0 : index
    %876 = vector.load %arg6[%c1216, %c0_538] : memref<1408x128xf32, #tpu.memory_space<vmem>>, vector<8x128xf32>
    tpu.vector_store %arg6[%c1216, %c0_538], %875 {strides = array<i32>} : memref<1408x128xf32, #tpu.memory_space<vmem>>, vector<8x128xf32>,
    %c49_i32_539 = arith.constant 49 : i32
    %877 = vector.broadcast %c49_i32_539 : i32 to vector<8x128xi32>
    %878 = arith.cmpi slt, %2, %877 : vector<8x128xi32>
    %879 = arith.select %878, %743, %834 : vector<8x128xi1>, vector<8x128xf32>
    %c1224 = arith.constant 1224 : index
    %c0_540 = arith.constant 0 : index
    %880 = vector.load %arg6[%c1224, %c0_540] : memref<1408x128xf32, #tpu.memory_space<vmem>>, vector<8x128xf32>
    tpu.vector_store %arg6[%c1224, %c0_540], %879 {strides = array<i32>} : memref<1408x128xf32, #tpu.memory_space<vmem>>, vector<8x128xf32>,
    %c41_i32_541 = arith.constant 41 : i32
    %881 = vector.broadcast %c41_i32_541 : i32 to vector<8x128xi32>
    %882 = arith.cmpi slt, %2, %881 : vector<8x128xi32>
    %883 = arith.select %882, %744, %835 : vector<8x128xi1>, vector<8x128xf32>
    %c1232 = arith.constant 1232 : index
    %c0_542 = arith.constant 0 : index
    %884 = vector.load %arg6[%c1232, %c0_542] : memref<1408x128xf32, #tpu.memory_space<vmem>>, vector<8x128xf32>
    tpu.vector_store %arg6[%c1232, %c0_542], %883 {strides = array<i32>} : memref<1408x128xf32, #tpu.memory_space<vmem>>, vector<8x128xf32>,
    %c33_i32_543 = arith.constant 33 : i32
    %885 = vector.broadcast %c33_i32_543 : i32 to vector<8x128xi32>
    %886 = arith.cmpi slt, %2, %885 : vector<8x128xi32>
    %887 = arith.select %886, %745, %836 : vector<8x128xi1>, vector<8x128xf32>
    %c1240 = arith.constant 1240 : index
    %c0_544 = arith.constant 0 : index
    %888 = vector.load %arg6[%c1240, %c0_544] : memref<1408x128xf32, #tpu.memory_space<vmem>>, vector<8x128xf32>
    tpu.vector_store %arg6[%c1240, %c0_544], %887 {strides = array<i32>} : memref<1408x128xf32, #tpu.memory_space<vmem>>, vector<8x128xf32>,
    %c25_i32_545 = arith.constant 25 : i32
    %889 = vector.broadcast %c25_i32_545 : i32 to vector<8x128xi32>
    %890 = arith.cmpi slt, %2, %889 : vector<8x128xi32>
    %891 = arith.select %890, %746, %837 : vector<8x128xi1>, vector<8x128xf32>
    %c1248 = arith.constant 1248 : index
    %c0_546 = arith.constant 0 : index
    %892 = vector.load %arg6[%c1248, %c0_546] : memref<1408x128xf32, #tpu.memory_space<vmem>>, vector<8x128xf32>
    tpu.vector_store %arg6[%c1248, %c0_546], %891 {strides = array<i32>} : memref<1408x128xf32, #tpu.memory_space<vmem>>, vector<8x128xf32>,
    %c17_i32_547 = arith.constant 17 : i32
    %893 = vector.broadcast %c17_i32_547 : i32 to vector<8x128xi32>
    %894 = arith.cmpi slt, %2, %893 : vector<8x128xi32>
    %895 = arith.select %894, %747, %838 : vector<8x128xi1>, vector<8x128xf32>
    %c1256 = arith.constant 1256 : index
    %c0_548 = arith.constant 0 : index
    %896 = vector.load %arg6[%c1256, %c0_548] : memref<1408x128xf32, #tpu.memory_space<vmem>>, vector<8x128xf32>
    tpu.vector_store %arg6[%c1256, %c0_548], %895 {strides = array<i32>} : memref<1408x128xf32, #tpu.memory_space<vmem>>, vector<8x128xf32>,
    %c9_i32_549 = arith.constant 9 : i32
    %897 = vector.broadcast %c9_i32_549 : i32 to vector<8x128xi32>
    %898 = arith.cmpi slt, %2, %897 : vector<8x128xi32>
    %899 = arith.select %898, %748, %839 : vector<8x128xi1>, vector<8x128xf32>
    %c1264 = arith.constant 1264 : index
    %c0_550 = arith.constant 0 : index
    %900 = vector.load %arg6[%c1264, %c0_550] : memref<1408x128xf32, #tpu.memory_space<vmem>>, vector<8x128xf32>
    tpu.vector_store %arg6[%c1264, %c0_550], %899 {strides = array<i32>} : memref<1408x128xf32, #tpu.memory_space<vmem>>, vector<8x128xf32>,
    %c1_i32_551 = arith.constant 1 : i32
    %901 = vector.broadcast %c1_i32_551 : i32 to vector<8x128xi32>
    %902 = arith.cmpi slt, %2, %901 : vector<8x128xi32>
    %903 = arith.select %902, %749, %840 : vector<8x128xi1>, vector<8x128xf32>
    %c1272 = arith.constant 1272 : index
    %c0_552 = arith.constant 0 : index
    %904 = vector.load %arg6[%c1272, %c0_552] : memref<1408x128xf32, #tpu.memory_space<vmem>>, vector<8x128xf32>
    tpu.vector_store %arg6[%c1272, %c0_552], %903 {strides = array<i32>} : memref<1408x128xf32, #tpu.memory_space<vmem>>, vector<8x128xf32>,
    %c0_553 = arith.constant 0 : index
    %c0_554 = arith.constant 0 : index
    %905 = vector.load %arg2[%c0_553, %c0_554] : memref<56x512xf32, #tpu.memory_space<vmem>>, vector<56x512xf32>
    %c768_555 = arith.constant 768 : index
    %c0_556 = arith.constant 0 : index
    %906 = vector.load %arg6[%c768_555, %c0_556] : memref<1408x128xf32, #tpu.memory_space<vmem>>, vector<512x128xf32>
    %cst_557 = arith.constant dense<0.000000e+00> : vector<56x128xf32>
    %907 = tpu.matmul %905, %906, %cst_557 {dimension_numbers = #tpu.dot_dimension_numbers<[1], [0], [0], [1], [0, 0, 1, 1], [], []>} : vector<56x512xf32>, vector<512x128xf32>, vector<56x128xf32> -> vector<56x128xf32>
    %908 = vector.extract_strided_slice %907 {offsets = [0, 0], sizes = [50, 128], strides = [1, 1]} : vector<56x128xf32> to vector<50x128xf32>
    %c0_558 = arith.constant 0 : index
    %c0_559 = arith.constant 0 : index
    %c768_560 = arith.constant 768 : index
    %909 = vector.load %arg5[%c0_558, %c0_559, %c768_560] : memref<1x50x1024xf32, #tpu.memory_space<vmem>>, vector<1x50x128xf32>
    %910 = vector.shape_cast %909 : vector<1x50x128xf32> to vector<50x128xf32>
    %911 = vector.shape_cast %908 : vector<50x128xf32> to vector<1x50x128xf32>
    tpu.vector_store %arg5[%c0_558, %c0_559, %c768_560], %911 {strides = array<i32>} : memref<1x50x1024xf32, #tpu.memory_space<vmem>>, vector<1x50x128xf32>,
    %c0_561 = arith.constant 0 : index
    %c3_562 = arith.constant 3 : index
    %c0_563 = arith.constant 0 : index
    %912 = vector.load %arg4[%c0_561, %c3_562, %c0_563] : memref<1x8x128xf32, #tpu.memory_space<vmem>>, vector<1x1x128xf32>
    %913 = vector.shape_cast %912 : vector<1x1x128xf32> to vector<1x128xf32>
    %914 = vector.shape_cast %913 : vector<1x128xf32> to vector<1x128xf32>
    %915 = vector.broadcast %914 : vector<1x128xf32> to vector<8x128xf32>
    %c121_i32_564 = arith.constant 121 : i32
    %916 = tpu.dynamic_rotate %915 by %c121_i32_564 dim 1 {stride = 1 : si32, stride_dimension = 0 : si32} : vector<8x128xf32>, i32 -> vector<8x128xf32>
    %c113_i32_565 = arith.constant 113 : i32
    %917 = tpu.dynamic_rotate %915 by %c113_i32_565 dim 1 {stride = 1 : si32, stride_dimension = 0 : si32} : vector<8x128xf32>, i32 -> vector<8x128xf32>
    %c105_i32_566 = arith.constant 105 : i32
    %918 = tpu.dynamic_rotate %915 by %c105_i32_566 dim 1 {stride = 1 : si32, stride_dimension = 0 : si32} : vector<8x128xf32>, i32 -> vector<8x128xf32>
    %c97_i32_567 = arith.constant 97 : i32
    %919 = tpu.dynamic_rotate %915 by %c97_i32_567 dim 1 {stride = 1 : si32, stride_dimension = 0 : si32} : vector<8x128xf32>, i32 -> vector<8x128xf32>
    %c89_i32_568 = arith.constant 89 : i32
    %920 = tpu.dynamic_rotate %915 by %c89_i32_568 dim 1 {stride = 1 : si32, stride_dimension = 0 : si32} : vector<8x128xf32>, i32 -> vector<8x128xf32>
    %c81_i32_569 = arith.constant 81 : i32
    %921 = tpu.dynamic_rotate %915 by %c81_i32_569 dim 1 {stride = 1 : si32, stride_dimension = 0 : si32} : vector<8x128xf32>, i32 -> vector<8x128xf32>
    %c73_i32_570 = arith.constant 73 : i32
    %922 = tpu.dynamic_rotate %915 by %c73_i32_570 dim 1 {stride = 1 : si32, stride_dimension = 0 : si32} : vector<8x128xf32>, i32 -> vector<8x128xf32>
    %c65_i32_571 = arith.constant 65 : i32
    %923 = tpu.dynamic_rotate %915 by %c65_i32_571 dim 1 {stride = 1 : si32, stride_dimension = 0 : si32} : vector<8x128xf32>, i32 -> vector<8x128xf32>
    %c57_i32_572 = arith.constant 57 : i32
    %924 = tpu.dynamic_rotate %915 by %c57_i32_572 dim 1 {stride = 1 : si32, stride_dimension = 0 : si32} : vector<8x128xf32>, i32 -> vector<8x128xf32>
    %c49_i32_573 = arith.constant 49 : i32
    %925 = tpu.dynamic_rotate %915 by %c49_i32_573 dim 1 {stride = 1 : si32, stride_dimension = 0 : si32} : vector<8x128xf32>, i32 -> vector<8x128xf32>
    %c41_i32_574 = arith.constant 41 : i32
    %926 = tpu.dynamic_rotate %915 by %c41_i32_574 dim 1 {stride = 1 : si32, stride_dimension = 0 : si32} : vector<8x128xf32>, i32 -> vector<8x128xf32>
    %c33_i32_575 = arith.constant 33 : i32
    %927 = tpu.dynamic_rotate %915 by %c33_i32_575 dim 1 {stride = 1 : si32, stride_dimension = 0 : si32} : vector<8x128xf32>, i32 -> vector<8x128xf32>
    %c25_i32_576 = arith.constant 25 : i32
    %928 = tpu.dynamic_rotate %915 by %c25_i32_576 dim 1 {stride = 1 : si32, stride_dimension = 0 : si32} : vector<8x128xf32>, i32 -> vector<8x128xf32>
    %c17_i32_577 = arith.constant 17 : i32
    %929 = tpu.dynamic_rotate %915 by %c17_i32_577 dim 1 {stride = 1 : si32, stride_dimension = 0 : si32} : vector<8x128xf32>, i32 -> vector<8x128xf32>
    %c9_i32_578 = arith.constant 9 : i32
    %930 = tpu.dynamic_rotate %915 by %c9_i32_578 dim 1 {stride = 1 : si32, stride_dimension = 0 : si32} : vector<8x128xf32>, i32 -> vector<8x128xf32>
    %c1_i32_579 = arith.constant 1 : i32
    %931 = tpu.dynamic_rotate %915 by %c1_i32_579 dim 1 {stride = 1 : si32, stride_dimension = 0 : si32} : vector<8x128xf32>, i32 -> vector<8x128xf32>
    %c121_i32_580 = arith.constant 121 : i32
    %932 = vector.broadcast %c121_i32_580 : i32 to vector<8x128xi32>
    %933 = arith.cmpi slt, %2, %932 : vector<8x128xi32>
    %934 = arith.select %933, %825, %916 : vector<8x128xi1>, vector<8x128xf32>
    %c1280 = arith.constant 1280 : index
    %c0_581 = arith.constant 0 : index
    %935 = vector.load %arg6[%c1280, %c0_581] : memref<1408x128xf32, #tpu.memory_space<vmem>>, vector<8x128xf32>
    tpu.vector_store %arg6[%c1280, %c0_581], %934 {strides = array<i32>} : memref<1408x128xf32, #tpu.memory_space<vmem>>, vector<8x128xf32>,
    %c113_i32_582 = arith.constant 113 : i32
    %936 = vector.broadcast %c113_i32_582 : i32 to vector<8x128xi32>
    %937 = arith.cmpi slt, %2, %936 : vector<8x128xi32>
    %938 = arith.select %937, %826, %917 : vector<8x128xi1>, vector<8x128xf32>
    %c1288 = arith.constant 1288 : index
    %c0_583 = arith.constant 0 : index
    %939 = vector.load %arg6[%c1288, %c0_583] : memref<1408x128xf32, #tpu.memory_space<vmem>>, vector<8x128xf32>
    tpu.vector_store %arg6[%c1288, %c0_583], %938 {strides = array<i32>} : memref<1408x128xf32, #tpu.memory_space<vmem>>, vector<8x128xf32>,
    %c105_i32_584 = arith.constant 105 : i32
    %940 = vector.broadcast %c105_i32_584 : i32 to vector<8x128xi32>
    %941 = arith.cmpi slt, %2, %940 : vector<8x128xi32>
    %942 = arith.select %941, %827, %918 : vector<8x128xi1>, vector<8x128xf32>
    %c1296 = arith.constant 1296 : index
    %c0_585 = arith.constant 0 : index
    %943 = vector.load %arg6[%c1296, %c0_585] : memref<1408x128xf32, #tpu.memory_space<vmem>>, vector<8x128xf32>
    tpu.vector_store %arg6[%c1296, %c0_585], %942 {strides = array<i32>} : memref<1408x128xf32, #tpu.memory_space<vmem>>, vector<8x128xf32>,
    %c97_i32_586 = arith.constant 97 : i32
    %944 = vector.broadcast %c97_i32_586 : i32 to vector<8x128xi32>
    %945 = arith.cmpi slt, %2, %944 : vector<8x128xi32>
    %946 = arith.select %945, %828, %919 : vector<8x128xi1>, vector<8x128xf32>
    %c1304 = arith.constant 1304 : index
    %c0_587 = arith.constant 0 : index
    %947 = vector.load %arg6[%c1304, %c0_587] : memref<1408x128xf32, #tpu.memory_space<vmem>>, vector<8x128xf32>
    tpu.vector_store %arg6[%c1304, %c0_587], %946 {strides = array<i32>} : memref<1408x128xf32, #tpu.memory_space<vmem>>, vector<8x128xf32>,
    %c89_i32_588 = arith.constant 89 : i32
    %948 = vector.broadcast %c89_i32_588 : i32 to vector<8x128xi32>
    %949 = arith.cmpi slt, %2, %948 : vector<8x128xi32>
    %950 = arith.select %949, %829, %920 : vector<8x128xi1>, vector<8x128xf32>
    %c1312 = arith.constant 1312 : index
    %c0_589 = arith.constant 0 : index
    %951 = vector.load %arg6[%c1312, %c0_589] : memref<1408x128xf32, #tpu.memory_space<vmem>>, vector<8x128xf32>
    tpu.vector_store %arg6[%c1312, %c0_589], %950 {strides = array<i32>} : memref<1408x128xf32, #tpu.memory_space<vmem>>, vector<8x128xf32>,
    %c81_i32_590 = arith.constant 81 : i32
    %952 = vector.broadcast %c81_i32_590 : i32 to vector<8x128xi32>
    %953 = arith.cmpi slt, %2, %952 : vector<8x128xi32>
    %954 = arith.select %953, %830, %921 : vector<8x128xi1>, vector<8x128xf32>
    %c1320 = arith.constant 1320 : index
    %c0_591 = arith.constant 0 : index
    %955 = vector.load %arg6[%c1320, %c0_591] : memref<1408x128xf32, #tpu.memory_space<vmem>>, vector<8x128xf32>
    tpu.vector_store %arg6[%c1320, %c0_591], %954 {strides = array<i32>} : memref<1408x128xf32, #tpu.memory_space<vmem>>, vector<8x128xf32>,
    %c73_i32_592 = arith.constant 73 : i32
    %956 = vector.broadcast %c73_i32_592 : i32 to vector<8x128xi32>
    %957 = arith.cmpi slt, %2, %956 : vector<8x128xi32>
    %958 = arith.select %957, %831, %922 : vector<8x128xi1>, vector<8x128xf32>
    %c1328 = arith.constant 1328 : index
    %c0_593 = arith.constant 0 : index
    %959 = vector.load %arg6[%c1328, %c0_593] : memref<1408x128xf32, #tpu.memory_space<vmem>>, vector<8x128xf32>
    tpu.vector_store %arg6[%c1328, %c0_593], %958 {strides = array<i32>} : memref<1408x128xf32, #tpu.memory_space<vmem>>, vector<8x128xf32>,
    %c65_i32_594 = arith.constant 65 : i32
    %960 = vector.broadcast %c65_i32_594 : i32 to vector<8x128xi32>
    %961 = arith.cmpi slt, %2, %960 : vector<8x128xi32>
    %962 = arith.select %961, %832, %923 : vector<8x128xi1>, vector<8x128xf32>
    %c1336 = arith.constant 1336 : index
    %c0_595 = arith.constant 0 : index
    %963 = vector.load %arg6[%c1336, %c0_595] : memref<1408x128xf32, #tpu.memory_space<vmem>>, vector<8x128xf32>
    tpu.vector_store %arg6[%c1336, %c0_595], %962 {strides = array<i32>} : memref<1408x128xf32, #tpu.memory_space<vmem>>, vector<8x128xf32>,
    %c57_i32_596 = arith.constant 57 : i32
    %964 = vector.broadcast %c57_i32_596 : i32 to vector<8x128xi32>
    %965 = arith.cmpi slt, %2, %964 : vector<8x128xi32>
    %966 = arith.select %965, %833, %924 : vector<8x128xi1>, vector<8x128xf32>
    %c1344 = arith.constant 1344 : index
    %c0_597 = arith.constant 0 : index
    %967 = vector.load %arg6[%c1344, %c0_597] : memref<1408x128xf32, #tpu.memory_space<vmem>>, vector<8x128xf32>
    tpu.vector_store %arg6[%c1344, %c0_597], %966 {strides = array<i32>} : memref<1408x128xf32, #tpu.memory_space<vmem>>, vector<8x128xf32>,
    %c49_i32_598 = arith.constant 49 : i32
    %968 = vector.broadcast %c49_i32_598 : i32 to vector<8x128xi32>
    %969 = arith.cmpi slt, %2, %968 : vector<8x128xi32>
    %970 = arith.select %969, %834, %925 : vector<8x128xi1>, vector<8x128xf32>
    %c1352 = arith.constant 1352 : index
    %c0_599 = arith.constant 0 : index
    %971 = vector.load %arg6[%c1352, %c0_599] : memref<1408x128xf32, #tpu.memory_space<vmem>>, vector<8x128xf32>
    tpu.vector_store %arg6[%c1352, %c0_599], %970 {strides = array<i32>} : memref<1408x128xf32, #tpu.memory_space<vmem>>, vector<8x128xf32>,
    %c41_i32_600 = arith.constant 41 : i32
    %972 = vector.broadcast %c41_i32_600 : i32 to vector<8x128xi32>
    %973 = arith.cmpi slt, %2, %972 : vector<8x128xi32>
    %974 = arith.select %973, %835, %926 : vector<8x128xi1>, vector<8x128xf32>
    %c1360 = arith.constant 1360 : index
    %c0_601 = arith.constant 0 : index
    %975 = vector.load %arg6[%c1360, %c0_601] : memref<1408x128xf32, #tpu.memory_space<vmem>>, vector<8x128xf32>
    tpu.vector_store %arg6[%c1360, %c0_601], %974 {strides = array<i32>} : memref<1408x128xf32, #tpu.memory_space<vmem>>, vector<8x128xf32>,
    %c33_i32_602 = arith.constant 33 : i32
    %976 = vector.broadcast %c33_i32_602 : i32 to vector<8x128xi32>
    %977 = arith.cmpi slt, %2, %976 : vector<8x128xi32>
    %978 = arith.select %977, %836, %927 : vector<8x128xi1>, vector<8x128xf32>
    %c1368 = arith.constant 1368 : index
    %c0_603 = arith.constant 0 : index
    %979 = vector.load %arg6[%c1368, %c0_603] : memref<1408x128xf32, #tpu.memory_space<vmem>>, vector<8x128xf32>
    tpu.vector_store %arg6[%c1368, %c0_603], %978 {strides = array<i32>} : memref<1408x128xf32, #tpu.memory_space<vmem>>, vector<8x128xf32>,
    %c25_i32_604 = arith.constant 25 : i32
    %980 = vector.broadcast %c25_i32_604 : i32 to vector<8x128xi32>
    %981 = arith.cmpi slt, %2, %980 : vector<8x128xi32>
    %982 = arith.select %981, %837, %928 : vector<8x128xi1>, vector<8x128xf32>
    %c1376 = arith.constant 1376 : index
    %c0_605 = arith.constant 0 : index
    %983 = vector.load %arg6[%c1376, %c0_605] : memref<1408x128xf32, #tpu.memory_space<vmem>>, vector<8x128xf32>
    tpu.vector_store %arg6[%c1376, %c0_605], %982 {strides = array<i32>} : memref<1408x128xf32, #tpu.memory_space<vmem>>, vector<8x128xf32>,
    %c17_i32_606 = arith.constant 17 : i32
    %984 = vector.broadcast %c17_i32_606 : i32 to vector<8x128xi32>
    %985 = arith.cmpi slt, %2, %984 : vector<8x128xi32>
    %986 = arith.select %985, %838, %929 : vector<8x128xi1>, vector<8x128xf32>
    %c1384 = arith.constant 1384 : index
    %c0_607 = arith.constant 0 : index
    %987 = vector.load %arg6[%c1384, %c0_607] : memref<1408x128xf32, #tpu.memory_space<vmem>>, vector<8x128xf32>
    tpu.vector_store %arg6[%c1384, %c0_607], %986 {strides = array<i32>} : memref<1408x128xf32, #tpu.memory_space<vmem>>, vector<8x128xf32>,
    %c9_i32_608 = arith.constant 9 : i32
    %988 = vector.broadcast %c9_i32_608 : i32 to vector<8x128xi32>
    %989 = arith.cmpi slt, %2, %988 : vector<8x128xi32>
    %990 = arith.select %989, %839, %930 : vector<8x128xi1>, vector<8x128xf32>
    %c1392 = arith.constant 1392 : index
    %c0_609 = arith.constant 0 : index
    %991 = vector.load %arg6[%c1392, %c0_609] : memref<1408x128xf32, #tpu.memory_space<vmem>>, vector<8x128xf32>
    tpu.vector_store %arg6[%c1392, %c0_609], %990 {strides = array<i32>} : memref<1408x128xf32, #tpu.memory_space<vmem>>, vector<8x128xf32>,
    %c1_i32_610 = arith.constant 1 : i32
    %992 = vector.broadcast %c1_i32_610 : i32 to vector<8x128xi32>
    %993 = arith.cmpi slt, %2, %992 : vector<8x128xi32>
    %994 = arith.select %993, %840, %931 : vector<8x128xi1>, vector<8x128xf32>
    %c1400 = arith.constant 1400 : index
    %c0_611 = arith.constant 0 : index
    %995 = vector.load %arg6[%c1400, %c0_611] : memref<1408x128xf32, #tpu.memory_space<vmem>>, vector<8x128xf32>
    tpu.vector_store %arg6[%c1400, %c0_611], %994 {strides = array<i32>} : memref<1408x128xf32, #tpu.memory_space<vmem>>, vector<8x128xf32>,
    %c0_612 = arith.constant 0 : index
    %c0_613 = arith.constant 0 : index
    %996 = vector.load %arg2[%c0_612, %c0_613] : memref<56x512xf32, #tpu.memory_space<vmem>>, vector<56x512xf32>
    %c896_614 = arith.constant 896 : index
    %c0_615 = arith.constant 0 : index
    %997 = vector.load %arg6[%c896_614, %c0_615] : memref<1408x128xf32, #tpu.memory_space<vmem>>, vector<512x128xf32>
    %cst_616 = arith.constant dense<0.000000e+00> : vector<56x128xf32>
    %998 = tpu.matmul %996, %997, %cst_616 {dimension_numbers = #tpu.dot_dimension_numbers<[1], [0], [0], [1], [0, 0, 1, 1], [], []>} : vector<56x512xf32>, vector<512x128xf32>, vector<56x128xf32> -> vector<56x128xf32>
    %999 = vector.extract_strided_slice %998 {offsets = [0, 0], sizes = [50, 128], strides = [1, 1]} : vector<56x128xf32> to vector<50x128xf32>
    %c0_617 = arith.constant 0 : index
    %c0_618 = arith.constant 0 : index
    %c896_619 = arith.constant 896 : index
    %1000 = vector.load %arg5[%c0_617, %c0_618, %c896_619] : memref<1x50x1024xf32, #tpu.memory_space<vmem>>, vector<1x50x128xf32>
    %1001 = vector.shape_cast %1000 : vector<1x50x128xf32> to vector<50x128xf32>
    %1002 = vector.shape_cast %999 : vector<50x128xf32> to vector<1x50x128xf32>
    tpu.vector_store %arg5[%c0_617, %c0_618, %c896_619], %1002 {strides = array<i32>} : memref<1x50x1024xf32, #tpu.memory_space<vmem>>, vector<1x50x128xf32>,
    return
  }
  func.func @transform_0(%arg0: i32, %arg1: i32) -> (i32, i32) {
    %c0_i32 = arith.constant 0 : i32
    %c0_i32_0 = arith.constant 0 : i32
    %c0_i32_1 = arith.constant 0 : i32
    return %c0_i32, %c0_i32_0 : i32, i32
  }
  func.func @transform_1(%arg0: i32, %arg1: i32) -> (i32, i32, i32) {
    %c0_i32 = arith.constant 0 : i32
    %c0_i32_0 = arith.constant 0 : i32
    return %arg0, %arg1, %c0_i32 : i32, i32, i32
  }
  func.func @transform_2(%arg0: i32, %arg1: i32) -> (i32, i32, i32) {
    %c1_i32 = arith.constant 1 : i32
    %0 = arith.addi %arg1, %c1_i32 : i32
    %c0_i32 = arith.constant 0 : i32
    %c0_i32_0 = arith.constant 0 : i32
    return %arg0, %0, %c0_i32 : i32, i32, i32
  }
  func.func @transform_3(%arg0: i32, %arg1: i32) -> (i32, i32, i32) {
    %c0_i32 = arith.constant 0 : i32
    %c0_i32_0 = arith.constant 0 : i32
    return %arg0, %c0_i32, %arg1 : i32, i32, i32
  }
}

</mosaic_0001>

<bundles_post_ra>
// kernel: ricker_forward.1
= control target key start
LH: loop header
LB: loop body
LE: loop exit
PB: predicated region body
PF: predicated region fallthrough
CT: control target
= control target key end

     0   :  { %s3810_s12 = smov 0   ;;  %s3812_s13 = smov 0   ;;  %s6566_s0 = inlined_call_operand.vmem [shape: f32[56,512], index: 0, kind: input, shape index: {}]   ;;  %s6567_s1 = inlined_call_operand.vmem [shape: f32[2,16,128], index: 1, kind: input, shape index: {}, may-alias: {1,2}]   ;;  %s6568_s2 = inlined_call_operand.vmem [shape: f32[2,16,128], index: 2, kind: input, shape index: {}, may-alias: {1,2}]   ;;  %s6569_s3 = inlined_call_operand.vmem [shape: f32[2,50,1024], index: 3, kind: output, shape index: {}]  }
   0x1   :  { %s3814_s14 = smov 0  }
   0x2 LB: > { %s25_s15 = sadd.s32 1, %s3768_s13  ;;  %p3525_p0 = scmp.ge.s32.totalorder %s3772_s14, 1  ;;  %s3772_s14 = sphi %s3814_s14, %s13_s14   ;;  %s3768_s13 = sphi %s3812_s13, %s7115_s13   ;;  %s3764_s12 = sphi %s3810_s12, %s7114_s12  }
   0x3   : > { %p27_p1 = scmp.ge.s32.totalorder %s25_s15, 2  ;;  %p175_p2 = scmp.lt.s32.totalorder %s3772_s14, 3 }
   0x5   : > { %s7117_s15 = smov (%p27_p1, %s25_s15), 0  ;;  %p176_p3 = pnand %p3525_p0, %p175_p2 }
   0x7   : > { %179 = sbr.rel (%p176_p3) target bundleno = 893 (0x37d), region = 32 }
   0xc   : > { %p215_p4 = scmp.lt.s32.totalorder %s3764_s12, 1  ;;  %s3774_s20 = smov 273   ;;  %v243_v9 = vlaneseq }
   0xd   : > { %s3775_s21 = smov 257   ;;  %s3776_s22 = smov 265  }
   0xe   : > { %s7119_s12 = smov (!%p215_p4, %s3764_s12), 1  ;;  %s3777_s23 = smov 281   ;;  %v244_v11 = vand.u32 127, %v243_v9  ;;  %v246_v12 = vshrl.u32 %v243_v9, 7 }
   0xf   : > { %s3533_s16 = sshll.u32 %s7119_s12, 4  ;;  %s3778_s24 = smov 289  }
  0x10   : > { %s3836_s19 = scalar_lea.vmem %s6567_s1, %s3533_s16  ;;  %s3779_s25 = smov 297   ;;  %v3939_v13 = vsub.s32 %v244_v11, %v246_v12 }
  0x11   : > { %v3738_v0 = vld [vmem:[%s3836_s19 + $0x2] ss:$0 sm:$0xff]  ;;  %v3739_v1 = vld [vmem:[%s3836_s19 + $0x3] ss:$0 sm:$0xff]  ;;  %v3740_v2 = vld [vmem:[%s3836_s19] ss:$0 sm:$0xff] }
  0x12   : > { %v3741_v3 = vld [vmem:[%s3836_s19 + $0x4] ss:$0 sm:$0xff]  ;;  %v3842_v4 = vpack.i.bf16 %v3739_v1, %v3738_v0  ;;  %v3853_v6 = vld [vmem:[%s3836_s19 + $0x1] ss:$0 sm:$0xff]  ;;  %s3780_s26 = smov 305   ;;  %s3781_s27 = smov 313  }
  0x13   : > { %v3844_v5 = vpack.i.bf16 %v3740_v2, %v3741_v3  ;;  %s3782_s28 = smov 321   ;;  %s3783_s29 = smov 329   ;;  %vm425_vm0 = vcmp.lt.s32.totalorder %v3939_v13, 1  ;;  %vm422_vm1 = vcmp.lt.s32.totalorder %v3939_v13, 9  ;;  %vm419_vm2 = vcmp.lt.s32.totalorder %v3939_v13, 17 }
  0x14   : > { %3594 = vrot.lane.b32.xlu2 %v3842_v4, %s3774_s20  ;;  %3579 = vrot.lane.b32.xlu0 %v3842_v4, %s3775_s21  ;;  %s3784_s30 = smov 337   ;;  %s3785_s4 = smov 345   ;;  %v3986_v33 = vld [vmem:[%s3836_s19 + $0x5] ss:$0 sm:$0xff]  ;;  %vm416_vm3 = vcmp.lt.s32.totalorder %v3939_v13, 25  ;;  %vm413_vm4 = vcmp.lt.s32.totalorder %v3939_v13, 33 }
  0x15   : > { %3589 = vrot.lane.b32.xlu1 %v3844_v5, %s3775_s21  ;;  %s3786_s5 = smov 353   ;;  %s3787_s6 = smov 361   ;;  %vm410_vm5 = vcmp.lt.s32.totalorder %v3939_v13, 41  ;;  %vm407_vm6 = vcmp.lt.s32.totalorder %v3939_v13, 49  ;;  %vm404_vm7 = vcmp.lt.s32.totalorder %v3939_v13, 57  ;;  %vm401_vm8 = vcmp.lt.s32.totalorder %v3939_v13, 65 }
  0x16   : > { %s3788_s7 = smov 369   ;;  %s3789_s8 = smov 377   ;;  %vm398_vm9 = vcmp.lt.s32.totalorder %v3939_v13, 73  ;;  %vm395_vm10 = vcmp.lt.s32.totalorder %v3939_v13, 81  ;;  %vm392_vm11 = vcmp.lt.s32.totalorder %v3939_v13, 89  ;;  %vm389_vm12 = vcmp.lt.s32.totalorder %v3939_v13, 97 }
  0x17   : > { %s3535_s9 = sadd.s32 8, %s3533_s16  ;;  %vm386_vm13 = vcmp.lt.s32.totalorder %v3939_v13, 105  ;;  %vm383_vm14 = vcmp.lt.s32.totalorder %v3939_v13, 113  ;;  %vm380_vm15 = vcmp.lt.s32.totalorder %v3939_v13, 121  ;;  %v6334_v13 = vld [vmem:[%s6566_s0 + $0x10] sm:$0xff] }
  0x18   : > { %s4051_s17 = scalar_lea.vmem %s6568_s2, %s3535_s9 }
  0x1c   : > { %3584 = vrot.lane.b32.xlu0 %v3842_v4, %s3776_s22  ;;  %3599 = vrot.lane.b32.xlu2 %v3844_v5, %s3776_s22 }
  0x1d   : > { %378 = vrot.lane.b32.xlu1 %v3853_v6, %s3775_s21 }
  0x24   : > { %374 = vrot.lane.b32.xlu0 %v3853_v6, %s3776_s22  ;;  %3609 = vrot.lane.b32.xlu2 %v3844_v5, %s3774_s20 }
  0x25   : > { %3604 = vrot.lane.b32.xlu1 %v3842_v4, %s3777_s23 }
  0x2c   : > { %370 = vrot.lane.b32.xlu0 %v3853_v6, %s3774_s20  ;;  %3619 = vrot.lane.b32.xlu2 %v3844_v5, %s3777_s23 }
  0x2d   : > { %3614 = vrot.lane.b32.xlu1 %v3842_v4, %s3778_s24 }
  0x34   : > { %366 = vrot.lane.b32.xlu0 %v3853_v6, %s3777_s23  ;;  %3629 = vrot.lane.b32.xlu2 %v3844_v5, %s3778_s24 }
  0x35   : > { %3624 = vrot.lane.b32.xlu1 %v3842_v4, %s3779_s25 }
  0x3c   : > { %362 = vrot.lane.b32.xlu0 %v3853_v6, %s3778_s24  ;;  %3639 = vrot.lane.b32.xlu2 %v3844_v5, %s3779_s25 }
  0x3d   : > { %3634 = vrot.lane.b32.xlu1 %v3842_v4, %s3780_s26 }
  0x44   : > { %358 = vrot.lane.b32.xlu0 %v3853_v6, %s3779_s25  ;;  %3649 = vrot.lane.b32.xlu2 %v3844_v5, %s3780_s26 }
  0x45   : > { %3644 = vrot.lane.b32.xlu1 %v3842_v4, %s3781_s27 }
  0x4c   : > { %354 = vrot.lane.b32.xlu0 %v3853_v6, %s3780_s26  ;;  %3659 = vrot.lane.b32.xlu2 %v3844_v5, %s3781_s27 }
  0x4d   : > { %3654 = vrot.lane.b32.xlu1 %v3842_v4, %s3782_s28 }
  0x54   : > { %350 = vrot.lane.b32.xlu0 %v3853_v6, %s3781_s27  ;;  %3669 = vrot.lane.b32.xlu2 %v3844_v5, %s3782_s28 }
  0x55   : > { %3664 = vrot.lane.b32.xlu1 %v3842_v4, %s3783_s29 }
  0x5c   : > { %346 = vrot.lane.b32.xlu0 %v3853_v6, %s3782_s28  ;;  %3679 = vrot.lane.b32.xlu2 %v3844_v5, %s3783_s29 }
  0x5d   : > { %3674 = vrot.lane.b32.xlu1 %v3842_v4, %s3784_s30 }
  0x64   : > { %342 = vrot.lane.b32.xlu0 %v3853_v6, %s3783_s29  ;;  %3689 = vrot.lane.b32.xlu2 %v3844_v5, %s3784_s30 }
  0x65   : > { %3684 = vrot.lane.b32.xlu1 %v3842_v4, %s3785_s4 }
  0x6c   : > { %338 = vrot.lane.b32.xlu0 %v3853_v6, %s3784_s30  ;;  %3699 = vrot.lane.b32.xlu2 %v3844_v5, %s3785_s4 }
  0x6d   : > { %3694 = vrot.lane.b32.xlu1 %v3842_v4, %s3786_s5 }
  0x6e   : > { %v3921_v7 = vpop.permute.xlu2 %3594 }
  0x6f   : > { %v3597_v26 = vunpack.i.h.bf16 %v3921_v7  ;;  %v3596_v27 = vunpack.i.l.bf16 %v3921_v7 }
  0x71   : > { %v4004_v37 = vsel %vm419_vm2, %v3596_v27, %v3597_v26 }
  0x74   : > { %334 = vrot.lane.b32.xlu0 %v3853_v6, %s3785_s4  ;;  %3709 = vrot.lane.b32.xlu2 %v3844_v5, %s3786_s5 }
  0x75   : > { %3704 = vrot.lane.b32.xlu1 %v3842_v4, %s3787_s6 }
  0x76   : > { %v3929_v8 = vpop.permute.xlu2 %3599 }
  0x77   : > { %v6581_v22 = vunpack.i.l.bf16 %v3929_v8  ;;  %v3602_v38 = vunpack.i.h.bf16 %v3929_v8 }
  0x7c   : > { %330 = vrot.lane.b32.xlu0 %v3853_v6, %s3786_s5  ;;  %3719 = vrot.lane.b32.xlu2 %v3844_v5, %s3787_s6 }
  0x7d   : > { %3714 = vrot.lane.b32.xlu1 %v3842_v4, %s3788_s7 }
  0x7e   : > { %v3937_v10 = vpop.permute.xlu2 %3609 }
  0x7f   : > { %v6580_v34 = vunpack.i.l.bf16 %v3937_v10  ;;  %v3612_v50 = vunpack.i.h.bf16 %v3937_v10 }
  0x81   : > { %v4018_v39 = vsel %vm419_vm2, %v3597_v26, %v6580_v34 }
  0x84   : > { %326 = vrot.lane.b32.xlu0 %v3853_v6, %s3787_s6  ;;  %3729 = vrot.lane.b32.xlu2 %v3844_v5, %s3788_s7 }
  0x85   : > { %3724 = vrot.lane.b32.xlu1 %v3842_v4, %s3789_s8 }
  0x86   : > { %v3580_v14 = vpop.permute.xlu0 %3579  ;;  %v3947_v15 = vpop.permute.xlu2 %3619 }
  0x87   : > { %v3582_v16 = vunpack.i.h.bf16 %v3580_v14  ;;  %v3581_v17 = vunpack.i.l.bf16 %v3580_v14  ;;  %v3949_v18 = vpop.permute.xlu1 %3589  ;;  %v6578_v40 = vunpack.i.l.bf16 %v3947_v15  ;;  %v3622_v61 = vunpack.i.h.bf16 %v3947_v15 }
  0x88   : > { %v6582_v19 = vunpack.i.l.bf16 %v3949_v18  ;;  %v3592_v23 = vunpack.i.h.bf16 %v3949_v18 }
  0x89   : > { %v3955_v20 = vsel %vm425_vm0, %v3581_v17, %v3582_v16 }
  0x8a   : > { %890 = vmatpush.msra.mxu2 %v3955_v20  ;;  %v3962_v21 = vsel %vm425_vm0, %v3582_v16, %v6582_v19 }
  0x8b   : > { %6799 = vst [vmem:[#allocation3_spill] sm:$0xff] %v3962_v21  ;;  %928 = vmatpush.msra.mxu3 %v3962_v21 }
  0x8c   : > { %322 = vrot.lane.b32.xlu0 %v3853_v6, %s3788_s7  ;;  %318 = vrot.lane.b32.xlu2 %v3853_v6, %s3789_s8 }
  0x8d   : > { %3734 = vrot.lane.b32.xlu1 %v3844_v5, %s3789_s8 }
  0x8e   : > { %v3585_v24 = vpop.permute.xlu0 %3584  ;;  %v3973_v25 = vpop.permute.xlu2 %3629 }
  0x8f   : > { %v3587_v28 = vunpack.i.h.bf16 %v3585_v24  ;;  %v3586_v29 = vunpack.i.l.bf16 %v3585_v24  ;;  %v379_v30 = vpop.permute.xlu1 %378  ;;  %v6577_v51 = vunpack.i.l.bf16 %v3973_v25  ;;  %v3632_v9 = vunpack.i.h.bf16 %v3973_v25 }
  0x90   : > { %v426_v31 = vsel %vm425_vm0, %v3592_v23, %v379_v30  ;;  %v3982_v32 = vsel %vm425_vm0, %v379_v30, %v3581_v17 }
  0x91   : > { %814 = vmatpush.msra.mxu0 %v426_v31  ;;  %852 = vmatpush.msra.mxu1 %v3982_v32  ;;  %v3992_v35 = vsel %vm422_vm1, %v3586_v29, %v3587_v28  ;;  %v3998_v36 = vsel %vm422_vm1, %v3587_v28, %v6581_v22 }
  0x92   : > { %6800 = vst [vmem:[#allocation4_spill] sm:$0xff] %v3998_v36  ;;  %891 = vmatpush.msra.mxu2 %v3992_v35  ;;  %929 = vmatpush.msra.mxu3 %v3998_v36 }
  0x94   : > { %892 = vmatpush.msra.mxu2 %v4004_v37  ;;  %1037 = vrot.lane.b32.xlu0 %v3986_v33, %s3775_s21 }
  0x95   : > { %1029 = vrot.lane.b32.xlu2 %v3986_v33, %s3774_s20  ;;  %1033 = vrot.lane.b32.xlu1 %v3986_v33, %s3776_s22 }
  0x96   : > { %930 = vmatpush.msra.mxu3 %v4018_v39  ;;  %v375_v41 = vpop.permute.xlu0 %374  ;;  %v4022_v42 = vpop.permute.xlu2 %3639 }
  0x97   : > { %v3605_v43 = vpop.permute.xlu1 %3604  ;;  %v423_v44 = vsel %vm422_vm1, %v3602_v38, %v375_v41  ;;  %v4028_v45 = vsel %vm422_vm1, %v375_v41, %v3586_v29  ;;  %v6576_v62 = vunpack.i.l.bf16 %v4022_v42  ;;  %v3642_v29 = vunpack.i.h.bf16 %v4022_v42 }
  0x98   : > { %v3607_v46 = vunpack.i.h.bf16 %v3605_v43  ;;  %v3606_v47 = vunpack.i.l.bf16 %v3605_v43  ;;  %815 = vmatpush.msra.mxu0 %v423_v44  ;;  %853 = vmatpush.msra.mxu1 %v4028_v45 }
  0x9a   : > { %v4034_v48 = vsel %vm416_vm3, %v3606_v47, %v3607_v46  ;;  %v4040_v49 = vsel %vm416_vm3, %v3607_v46, %v6578_v40 }
  0x9b   : > { %893 = vmatpush.msra.mxu2 %v4034_v48  ;;  %931 = vmatpush.msra.mxu3 %v4040_v49 }
  0x9c   : > { %1025 = vrot.lane.b32.xlu0 %v3986_v33, %s3777_s23 }
  0x9d   : > { %1017 = vrot.lane.b32.xlu2 %v3986_v33, %s3779_s25  ;;  %1021 = vrot.lane.b32.xlu1 %v3986_v33, %s3778_s24 }
  0x9e   : > { %v371_v52 = vpop.permute.xlu0 %370  ;;  %v4059_v53 = vpop.permute.xlu2 %3649 }
  0x9f   : > { %v3615_v54 = vpop.permute.xlu1 %3614  ;;  %v420_v55 = vsel %vm419_vm2, %v3612_v50, %v371_v52  ;;  %v4065_v56 = vsel %vm419_vm2, %v371_v52, %v3596_v27  ;;  %v6575_v11 = vunpack.i.l.bf16 %v4059_v53 }
  0xa0   : > { %v3617_v57 = vunpack.i.h.bf16 %v3615_v54  ;;  %v3616_v58 = vunpack.i.l.bf16 %v3615_v54  ;;  %816 = vmatpush.msra.mxu0 %v420_v55  ;;  %854 = vmatpush.msra.mxu1 %v4065_v56  ;;  %v3652_v55 = vunpack.i.h.bf16 %v4059_v53 }
  0xa2   : > { %v4071_v59 = vsel %vm413_vm4, %v3616_v58, %v3617_v57  ;;  %v4077_v60 = vsel %vm413_vm4, %v3617_v57, %v6577_v51 }
  0xa3   : > { %894 = vmatpush.msra.mxu2 %v4071_v59  ;;  %932 = vmatpush.msra.mxu3 %v4077_v60 }
  0xa4   : > { %1013 = vrot.lane.b32.xlu0 %v3986_v33, %s3780_s26 }
  0xa5   : > { %1005 = vrot.lane.b32.xlu2 %v3986_v33, %s3782_s28  ;;  %1009 = vrot.lane.b32.xlu1 %v3986_v33, %s3781_s27 }
  0xa6   : > { %v367_v63 = vpop.permute.xlu0 %366  ;;  %v4089_v0 = vpop.permute.xlu2 %3659 }
  0xa7   : > { %v3625_v1 = vpop.permute.xlu1 %3624  ;;  %v417_v2 = vsel %vm416_vm3, %v3622_v61, %v367_v63  ;;  %v4095_v3 = vsel %vm416_vm3, %v367_v63, %v3606_v47  ;;  %v6573_v30 = vunpack.i.l.bf16 %v4089_v0  ;;  %v4158_v47 = vld [vmem:[%s3836_s19 + $0x6] ss:$0 sm:$0xff] }
  0xa8   : > { %v3627_v4 = vunpack.i.h.bf16 %v3625_v1  ;;  %v3626_v5 = vunpack.i.l.bf16 %v3625_v1  ;;  %817 = vmatpush.msra.mxu0 %v417_v2  ;;  %855 = vmatpush.msra.mxu1 %v4095_v3 }
  0xaa   : > { %v4101_v6 = vsel %vm410_vm5, %v3626_v5, %v3627_v4  ;;  %v4107_v7 = vsel %vm410_vm5, %v3627_v4, %v6576_v62 }
  0xab   : > { %895 = vmatpush.msra.mxu2 %v4101_v6  ;;  %933 = vmatpush.msra.mxu3 %v4107_v7 }
  0xac   : > { %1001 = vrot.lane.b32.xlu0 %v3986_v33, %s3783_s29 }
  0xad   : > { %993 = vrot.lane.b32.xlu2 %v3986_v33, %s3785_s4  ;;  %997 = vrot.lane.b32.xlu1 %v3986_v33, %s3784_s30 }
  0xae   : > { %v363_v12 = vpop.permute.xlu0 %362  ;;  %v4127_v26 = vpop.permute.xlu2 %3669 }
  0xaf   : > { %v3635_v14 = vpop.permute.xlu1 %3634  ;;  %v414_v16 = vsel %vm413_vm4, %v3632_v9, %v363_v12  ;;  %v4123_v17 = vsel %vm413_vm4, %v363_v12, %v3616_v58  ;;  %v6572_v57 = vunpack.i.l.bf16 %v4127_v26  ;;  %v3662_v9 = vunpack.i.h.bf16 %v4089_v0 }
  0xb0   : > { %v3637_v23 = vunpack.i.h.bf16 %v3635_v14  ;;  %v3636_v24 = vunpack.i.l.bf16 %v3635_v14  ;;  %818 = vmatpush.msra.mxu0 %v414_v16  ;;  %856 = vmatpush.msra.mxu1 %v4123_v17 }
  0xb2   : > { %v4131_v27 = vsel %vm407_vm6, %v3636_v24, %v3637_v23  ;;  %v4137_v28 = vsel %vm407_vm6, %v3637_v23, %v6575_v11 }
  0xb3   : > { %896 = vmatpush.msra.mxu2 %v4131_v27  ;;  %934 = vmatpush.msra.mxu3 %v4137_v28 }
  0xb4   : > { %989 = vrot.lane.b32.xlu0 %v3986_v33, %s3786_s5 }
  0xb5   : > { %981 = vrot.lane.b32.xlu2 %v3986_v33, %s3788_s7  ;;  %985 = vrot.lane.b32.xlu1 %v3986_v33, %s3787_s6 }
  0xb6   : > { %v359_v31 = vpop.permute.xlu0 %358  ;;  %v4170_v54 = vpop.permute.xlu2 %3679 }
  0xb7   : > { %v3645_v38 = vpop.permute.xlu1 %3644  ;;  %v411_v41 = vsel %vm410_vm5, %v3642_v29, %v359_v31  ;;  %v4153_v43 = vsel %vm410_vm5, %v359_v31, %v3626_v5  ;;  %6801 = vst [vmem:[#allocation5_spill] sm:$0xff] %v4170_v54  ;;  %v6571_v14 = vunpack.i.l.bf16 %v4170_v54 }
  0xb8   : > { %v3647_v44 = vunpack.i.h.bf16 %v3645_v38  ;;  %v3646_v46 = vunpack.i.l.bf16 %v3645_v38  ;;  %819 = vmatpush.msra.mxu0 %v411_v41  ;;  %857 = vmatpush.msra.mxu1 %v4153_v43 }
  0xba   : > { %v4162_v50 = vsel %vm404_vm7, %v3646_v46, %v3647_v44  ;;  %v4168_v52 = vsel %vm404_vm7, %v3647_v44, %v6573_v30 }
  0xbb   : > { %897 = vmatpush.msra.mxu2 %v4162_v50  ;;  %935 = vmatpush.msra.mxu3 %v4168_v52 }
  0xbc   : > { %977 = vrot.lane.b32.xlu0 %v3986_v33, %s3789_s8 }
  0xbd   : > { %1382 = vrot.lane.b32.xlu2 %v4158_v47, %s3776_s22  ;;  %1386 = vrot.lane.b32.xlu1 %v4158_v47, %s3775_s21 }
  0xbe   : > { %v355_v58 = vpop.permute.xlu0 %354  ;;  %v4205_v12 = vpop.permute.xlu2 %3689 }
  0xbf   : > { %v3655_v61 = vpop.permute.xlu1 %3654  ;;  %v408_v63 = vsel %vm407_vm6, %v3652_v55, %v355_v58  ;;  %v4186_v1 = vsel %vm407_vm6, %v355_v58, %v3636_v24  ;;  %6802 = vst [vmem:[#allocation6_spill] sm:$0xff] %v4205_v12  ;;  %v6570_v55 = vunpack.i.l.bf16 %v4205_v12 }
  0xc0   : > { %v3657_v33 = vunpack.i.h.bf16 %v3655_v61  ;;  %v3656_v2 = vunpack.i.l.bf16 %v3655_v61  ;;  %820 = vmatpush.msra.mxu0 %v408_v63  ;;  %858 = vmatpush.msra.mxu1 %v4186_v1 }
  0xc2   : > { %v4192_v4 = vsel %vm401_vm8, %v3656_v2, %v3657_v33  ;;  %v4198_v5 = vsel %vm401_vm8, %v3657_v33, %v6572_v57 }
  0xc3   : > { %898 = vmatpush.msra.mxu2 %v4192_v4  ;;  %936 = vmatpush.msra.mxu3 %v4198_v5 }
  0xc4   : > { %1378 = vrot.lane.b32.xlu0 %v4158_v47, %s3774_s20 }
  0xc5   : > { %1370 = vrot.lane.b32.xlu2 %v4158_v47, %s3778_s24  ;;  %1374 = vrot.lane.b32.xlu1 %v4158_v47, %s3777_s23 }
  0xc6   : > { %v351_v16 = vpop.permute.xlu0 %350  ;;  %v4240_v61 = vpop.permute.xlu2 %3699 }
  0xc7   : > { %v3665_v23 = vpop.permute.xlu1 %3664  ;;  %v405_v24 = vsel %vm404_vm7, %v3662_v9, %v351_v16  ;;  %v4216_v29 = vsel %vm404_vm7, %v351_v16, %v3646_v46  ;;  %v3672_v46 = vunpack.i.h.bf16 %v4127_v26  ;;  %6803 = vst [vmem:[#allocation7_spill] sm:$0xff] %v4240_v61 }
  0xc8   : > { %v3667_v31 = vunpack.i.h.bf16 %v3665_v23  ;;  %v3666_v38 = vunpack.i.l.bf16 %v3665_v23  ;;  %821 = vmatpush.msra.mxu0 %v405_v24  ;;  %859 = vmatpush.msra.mxu1 %v4216_v29 }
  0xca   : > { %v4222_v41 = vsel %vm398_vm9, %v3666_v38, %v3667_v31  ;;  %v4228_v44 = vsel %vm398_vm9, %v3667_v31, %v6571_v14 }
  0xcb   : > { %899 = vmatpush.msra.mxu2 %v4222_v41  ;;  %937 = vmatpush.msra.mxu3 %v4228_v44 }
  0xcc   : > { %1366 = vrot.lane.b32.xlu0 %v4158_v47, %s3779_s25 }
  0xcd   : > { %1358 = vrot.lane.b32.xlu2 %v4158_v47, %s3781_s27  ;;  %1362 = vrot.lane.b32.xlu1 %v4158_v47, %s3780_s26 }
  0xce   : > { %v347_v58 = vpop.permute.xlu0 %346  ;;  %v4278_v57 = vpop.permute.xlu2 %3709 }
  0xcf   : > { %v3675_v63 = vpop.permute.xlu1 %3674  ;;  %v402_v33 = vsel %vm401_vm8, %v3672_v46, %v347_v58  ;;  %v4246_v9 = vsel %vm401_vm8, %v347_v58, %v3656_v2  ;;  %v3682_v2 = vunpack.i.h.bf16 %v4170_v54  ;;  %v6574_v46 = vunpack.i.l.bf16 %v4240_v61  ;;  %6804 = vst [vmem:[#allocation8_spill] sm:$0xff] %v4278_v57 }
  0xd0   : > { %v3677_v16 = vunpack.i.h.bf16 %v3675_v63  ;;  %v3676_v23 = vunpack.i.l.bf16 %v3675_v63  ;;  %822 = vmatpush.msra.mxu0 %v402_v33  ;;  %860 = vmatpush.msra.mxu1 %v4246_v9 }
  0xd2   : > { %v4252_v24 = vsel %vm395_vm10, %v3676_v23, %v3677_v16  ;;  %v4258_v31 = vsel %vm395_vm10, %v3677_v16, %v6570_v55 }
  0xd3   : > { %900 = vmatpush.msra.mxu2 %v4252_v24  ;;  %938 = vmatpush.msra.mxu3 %v4258_v31 }
  0xd4   : > { %1354 = vrot.lane.b32.xlu0 %v4158_v47, %s3782_s28 }
  0xd5   : > { %1346 = vrot.lane.b32.xlu2 %v4158_v47, %s3784_s30  ;;  %1350 = vrot.lane.b32.xlu1 %v4158_v47, %s3783_s29 }
  0xd6   : > { %v343_v58 = vpop.permute.xlu0 %342  ;;  %v4318_v40 = vpop.permute.xlu2 %3719 }
  0xd7   : > { %v3685_v63 = vpop.permute.xlu1 %3684  ;;  %v399_v33 = vsel %vm398_vm9, %v3682_v2, %v343_v58  ;;  %v4274_v16 = vsel %vm398_vm9, %v343_v58, %v3666_v38  ;;  %v3692_v38 = vunpack.i.h.bf16 %v4205_v12  ;;  %v6579_v58 = vunpack.i.l.bf16 %v4278_v57  ;;  %6805 = vst [vmem:[#allocation9_spill] sm:$0xff] %v4318_v40 }
  0xd8   : > { %v3687_v55 = vunpack.i.h.bf16 %v3685_v63  ;;  %v3686_v14 = vunpack.i.l.bf16 %v3685_v63  ;;  %823 = vmatpush.msra.mxu0 %v399_v33  ;;  %861 = vmatpush.msra.mxu1 %v4274_v16 }
  0xda   : > { %v4282_v30 = vsel %vm392_vm11, %v3686_v14, %v3687_v55  ;;  %v4288_v2 = vsel %vm392_vm11, %v3687_v55, %v6574_v46 }
  0xdb   : > { %901 = vmatpush.msra.mxu2 %v4282_v30  ;;  %939 = vmatpush.msra.mxu3 %v4288_v2 }
  0xdc   : > { %1342 = vrot.lane.b32.xlu0 %v4158_v47, %s3785_s4 }
  0xdd   : > { %1334 = vrot.lane.b32.xlu2 %v4158_v47, %s3787_s6  ;;  %1338 = vrot.lane.b32.xlu1 %v4158_v47, %s3786_s5 }
  0xde   : > { %v339_v55 = vpop.permute.xlu0 %338 }
  0xdf   : > { %v3695_v63 = vpop.permute.xlu1 %3694  ;;  %v396_v33 = vsel %vm395_vm10, %v3692_v38, %v339_v55  ;;  %v4304_v46 = vsel %vm395_vm10, %v339_v55, %v3676_v23  ;;  %v4321_v23 = vld [vmem:[%s3836_s19 + $0x7] ss:$0 sm:$0xff]  ;;  %v3702_v55 = vunpack.i.h.bf16 %v4240_v61  ;;  %s3537_s19 = smul.u32 448, %s7119_s12 }
  0xe0   : > { %v3697_v11 = vunpack.i.h.bf16 %v3695_v63  ;;  %v3696_v62 = vunpack.i.l.bf16 %v3695_v63  ;;  %824 = vmatpush.msra.mxu0 %v396_v33  ;;  %862 = vmatpush.msra.mxu1 %v4304_v46 }
  0xe1   : > { %s5274_s10 = scalar_lea.vmem %s6569_s3, %s3537_s19 }
  0xe2   : > { %v4310_v51 = vsel %vm389_vm12, %v3696_v62, %v3697_v11  ;;  %v4316_v38 = vsel %vm389_vm12, %v3697_v11, %v6579_v58  ;;  %v6583_v11 = vunpack.i.l.bf16 %v4318_v40 }
  0xe3   : > { %902 = vmatpush.msra.mxu2 %v4310_v51  ;;  %940 = vmatpush.msra.mxu3 %v4316_v38 }
  0xe4   : > { %1330 = vrot.lane.b32.xlu0 %v4158_v47, %s3788_s7 }
  0xe5   : > { %1735 = vrot.lane.b32.xlu2 %v4321_v23, %s3775_s21  ;;  %1326 = vrot.lane.b32.xlu1 %v4158_v47, %s3789_s8 }
  0xe6   : > { %v335_v63 = vpop.permute.xlu0 %334 }
  0xe7   : > { %v3705_v33 = vpop.permute.xlu1 %3704  ;;  %v393_v58 = vsel %vm392_vm11, %v3702_v55, %v335_v63  ;;  %v4337_v34 = vsel %vm392_vm11, %v335_v63, %v3686_v14  ;;  %v3712_v14 = vunpack.i.h.bf16 %v4278_v57 }
  0xe8   : > { %v3707_v22 = vunpack.i.h.bf16 %v3705_v33  ;;  %v3706_v19 = vunpack.i.l.bf16 %v3705_v33  ;;  %825 = vmatpush.msra.mxu0 %v393_v58  ;;  %863 = vmatpush.msra.mxu1 %v4337_v34  ;;  %v4356_v58 = vpop.permute.xlu2 %3729 }
  0xe9   : > { %6807 = vst [vmem:[#allocation11_spill] sm:$0xff] %v4356_v58 }
  0xea   : > { %v4343_v47 = vsel %vm386_vm13, %v3706_v19, %v3707_v22  ;;  %v4349_v55 = vsel %vm386_vm13, %v3707_v22, %v6583_v11  ;;  %v6589_v22 = vunpack.i.l.bf16 %v4356_v58 }
  0xeb   : > { %6806 = vst [vmem:[#allocation10_spill] sm:$0xff] %v4343_v47  ;;  %903 = vmatpush.msra.mxu2 %v4343_v47  ;;  %941 = vmatpush.msra.mxu3 %v4349_v55 }
  0xec   : > { %1731 = vrot.lane.b32.xlu0 %v4321_v23, %s3776_s22 }
  0xed   : > { %1727 = vrot.lane.b32.xlu1 %v4321_v23, %s3774_s20  ;;  %1723 = vrot.lane.b32.xlu2 %v4321_v23, %s3777_s23 }
  0xee   : > { %v331_v63 = vpop.permute.xlu0 %330 }
  0xef   : > { %v3715_v33 = vpop.permute.xlu1 %3714  ;;  %v390_v11 = vsel %vm389_vm12, %v3712_v14, %v331_v63  ;;  %v4367_v61 = vsel %vm389_vm12, %v331_v63, %v3696_v62  ;;  %v3722_v62 = vunpack.i.h.bf16 %v4318_v40  ;;  %v4401_v40 = vld [vmem:[%s6566_s0 + $0x10] sm:$0xff] }
  0xf0   : > { %v3717_v57 = vunpack.i.h.bf16 %v3715_v33  ;;  %v3716_v12 = vunpack.i.l.bf16 %v3715_v33  ;;  %826 = vmatpush.msra.mxu0 %v390_v11  ;;  %864 = vmatpush.msra.mxu1 %v4367_v61  ;;  %6809 = vst [vmem:[#allocation13_spill] sm:$0xff] %v4401_v40 }
  0xf2   : > { %v4373_v47 = vsel %vm383_vm14, %v3716_v12, %v3717_v57  ;;  %v4379_v14 = vsel %vm383_vm14, %v3717_v57, %v6589_v22 }
  0xf3   : > { %6808 = vst [vmem:[#allocation12_spill] sm:$0xff] %v4373_v47  ;;  %904 = vmatpush.msra.mxu2 %v4373_v47  ;;  %942 = vmatpush.msra.mxu3 %v4379_v14 }
  0xf4   : > { %1719 = vrot.lane.b32.xlu0 %v4321_v23, %s3778_s24 }
  0xf5   : > { %1715 = vrot.lane.b32.xlu1 %v4321_v23, %s3779_s25  ;;  %1711 = vrot.lane.b32.xlu2 %v4321_v23, %s3780_s26 }
  0xf6   : > { %v327_v11 = vpop.permute.xlu0 %326 }
  0xf7   : > { %v3725_v63 = vpop.permute.xlu1 %3724  ;;  %v387_v57 = vsel %vm386_vm13, %v3722_v62, %v327_v11  ;;  %v4394_v33 = vsel %vm386_vm13, %v327_v11, %v3706_v19  ;;  %v319_v19 = vpop.permute.xlu2 %318  ;;  %v3732_v62 = vunpack.i.h.bf16 %v4356_v58 }
  0xf8   : > { %v3727_v22 = vunpack.i.h.bf16 %v3725_v63  ;;  %v3726_v47 = vunpack.i.l.bf16 %v3725_v63  ;;  %827 = vmatpush.msra.mxu0 %v387_v57  ;;  %865 = vmatpush.msra.mxu1 %v4394_v33 }
  0xfa   : > { %v4405_v54 = vsel %vm380_vm15, %v3726_v47, %v3727_v22 }
  0xfb   : > { %905 = vmatpush.msra.mxu2 %v4405_v54 }
  0xfc   : > { %906 = vmatmul.f32.vlgmr.msra.gmra.mxu2 %v4401_v40  ;;  %1707 = vrot.lane.b32.xlu0 %v4321_v23, %s3781_s27 }
  0xfd   : > { %1239 = vmatpush.msrb.mxu2 %v3962_v21  ;;  %1703 = vrot.lane.b32.xlu1 %v4321_v23, %s3782_s28 }
  0xfe   : > { %v323_v11 = vpop.permute.xlu0 %322  ;;  %1699 = vrot.lane.b32.xlu2 %v4321_v23, %s3783_s29 }
  0xff   : > { %1240 = vmatpush.msrb.mxu2 %v3998_v36  ;;  %v4418_v63 = vpop.permute.xlu1 %3734  ;;  %v384_v57 = vsel %vm383_vm14, %v3732_v62, %v323_v11  ;;  %v4424_v40 = vsel %vm383_vm14, %v323_v11, %v3716_v12  ;;  %v4432_v36 = vsel %vm380_vm15, %v319_v19, %v3726_v47  ;;  %v4437_v62 = vld [vmem:[%s6566_s0] sm:$0xff]  ;;  %v4451_v47 = vld [vmem:[%s6566_s0 + $0x8] sm:$0xff] }
 0x100   : > { %v3737_v58 = vunpack.i.h.bf16 %v4418_v63  ;;  %v6601_v21 = vunpack.i.l.bf16 %v4418_v63  ;;  %828 = vmatpush.msra.mxu0 %v384_v57  ;;  %866 = vmatpush.msra.mxu1 %v4424_v40  ;;  %6810 = vst [vmem:[#allocation14_spill] sm:$0xff] %v4451_v47  ;;  %v4456_v57 = vld [vmem:[%s6566_s0 + $0x30] sm:$0xff] }
 0x101   : > { %1241 = vmatpush.msrb.mxu2 %v4018_v39  ;;  %6811 = vst [vmem:[#allocation15_spill] sm:$0xff] %v4456_v57 }
 0x102   : > { %v381_v12 = vsel %vm380_vm15, %v3737_v58, %v319_v19  ;;  %867 = vmatpush.msra.mxu1 %v4432_v36  ;;  %v4446_v11 = vsel %vm380_vm15, %v3727_v22, %v6601_v21  ;;  %v4463_v58 = vpop.permute.xlu2 %1029 }
 0x103   : > { %1242 = vmatpush.msrb.mxu2 %v4040_v49  ;;  %829 = vmatpush.msra.mxu0 %v381_v12  ;;  %v4477_v12 = vld [vmem:[%s6566_s0 + $0x18] sm:$0xff] }
 0x104   : > { %943 = vmatpush.msra.mxu3 %v4446_v11  ;;  %830 = vmatmul.f32.vlgmr.msra.gmra.mxu0 %v4437_v62  ;;  %6812 = vst [vmem:[#allocation16_spill] sm:$0xff] %v4477_v12 }
 0x105   : > { %868 = vmatmul.f32.vlgmr.msra.gmra.mxu1 %v4451_v47  ;;  %909 = vmatmul.f32.gmra.mxu2 %v4456_v57 }
 0x106   : > { %1163 = vmatpush.msrb.mxu0 %v3982_v32  ;;  %1201 = vmatpush.msrb.mxu1 %v3955_v20  ;;  %v4467_v22 = vpop.permute.xlu0 %1037  ;;  %v6813_v32 = vunpack.i.l.bf16 %v3949_v18  ;;  %v4505_v18 = vld [vmem:[%s6566_s0 + $0x28] sm:$0xff] }
 0x107   : > { %1243 = vmatpush.msrb.mxu2 %v4077_v60  ;;  %1695 = vrot.lane.b32.xlu0 %v4321_v23, %s3784_s30  ;;  %v4472_v19 = vpop.permute.xlu1 %1033  ;;  %6815 = vst [vmem:[#allocation18_spill] sm:$0xff] %v4505_v18 }
 0x108   : > { %1691 = vrot.lane.b32.xlu1 %v4321_v23, %s3785_s4  ;;  %1164 = vmatpush.msrb.mxu0 %v4028_v45  ;;  %v4489_v21 = vsel %vm425_vm0, %v6813_v32, %v4467_v22  ;;  %v4498_v45 = vld [vmem:[%s6566_s0 + $0x20] sm:$0xff]  ;;  %v6817_v32 = vunpack.i.l.bf16 %v3929_v8 }
 0x109   : > { %1202 = vmatpush.msrb.mxu1 %v3992_v35  ;;  %1244 = vmatpush.msrb.mxu2 %v4107_v7  ;;  %6814 = vst [vmem:[#allocation17_spill] sm:$0xff] %v4498_v45 }
 0x10a   : > { %1165 = vmatpush.msrb.mxu0 %v4065_v56  ;;  %944 = vmatmul.f32.vlgmr.msra.gmra.mxu3 %v4477_v12  ;;  %v4510_v56 = vld [vmem:[%s6566_s0 + $0x50] sm:$0xff]  ;;  %v4517_v12 = vsel %vm422_vm1, %v6817_v32, %v4472_v19  ;;  %v4529_v8 = vpop.permute.xlu2 %1017  ;;  %v6818_v32 = vunpack.i.l.bf16 %v3937_v10  ;;  %v4551_v10 = vld [vmem:[%s6566_s0 + $0x38] sm:$0xff] }
 0x10b   : > { %1203 = vmatpush.msrb.mxu1 %v4004_v37  ;;  %1245 = vmatpush.msrb.mxu2 %v4137_v28  ;;  %6816 = vst [vmem:[#allocation19_spill] sm:$0xff] %v4510_v56 }
 0x10c   : > { %1277 = vmatpush.msrb.mxu3 %v4489_v21  ;;  %1166 = vmatpush.msrb.mxu0 %v4095_v3  ;;  %6819 = vst [vmem:[#allocation20_spill] sm:$0xff] %v4551_v10 }
 0x10d   : > { %1204 = vmatpush.msrb.mxu1 %v4034_v48  ;;  %1246 = vmatpush.msrb.mxu2 %v4168_v52 }
 0x10e   : > { %1278 = vmatpush.msrb.mxu3 %v4517_v12  ;;  %833 = vmatmul.f32.gmra.mxu0 %v4498_v45  ;;  %v4523_v3 = vpop.permute.xlu0 %1025  ;;  %v4538_v45 = vsel %vm419_vm2, %v6818_v32, %v4463_v58 }
 0x10f   : > { %871 = vmatmul.f32.gmra.mxu1 %v4505_v18  ;;  %912 = vmatmul.f32.gmra.mxu2 %v4510_v56  ;;  %v4527_v57 = vpop.permute.xlu1 %1021  ;;  %v6825_v56 = vunpack.i.l.bf16 %v3973_v25  ;;  %v6827_v25 = vunpack.i.l.bf16 %v4022_v42  ;;  %v6829_v42 = vunpack.i.l.bf16 %v4059_v53  ;;  %v4651_v53 = vld [vmem:[%s6566_s0 + $0x60] sm:$0xff] }
 0x110   : > { %1167 = vmatpush.msrb.mxu0 %v4123_v17  ;;  %1205 = vmatpush.msrb.mxu1 %v4071_v59  ;;  %v6820_v17 = vunpack.i.l.bf16 %v3947_v15  ;;  %v4570_v15 = vld [vmem:[%s6566_s0 + $0x40] sm:$0xff]  ;;  %6832 = vst [vmem:[#allocation29_spill] sm:$0xff] %v4651_v53 }
 0x111   : > { %1247 = vmatpush.msrb.mxu2 %v4198_v5  ;;  %1683 = vrot.lane.b32.xlu0 %v4321_v23, %s3787_s6  ;;  %6822 = vst [vmem:[#allocation22_spill] sm:$0xff] %v4570_v15  ;;  %v4593_v18 = vsel %vm413_vm4, %v6825_v56, %v4527_v57  ;;  %v4613_v56 = vsel %vm410_vm5, %v6827_v25, %v4529_v8 }
 0x112   : > { %1679 = vrot.lane.b32.xlu1 %v4321_v23, %s3788_s7  ;;  %1279 = vmatpush.msrb.mxu3 %v4538_v45  ;;  %v4559_v32 = vsel %vm416_vm3, %v6820_v17, %v4523_v3  ;;  %v4584_v17 = vld [vmem:[%s6566_s0 + $0x70] sm:$0xff]  ;;  %6826 = vst [vmem:[#allocation25_spill] sm:$0xff] %v4593_v18  ;;  %v4602_v47 = vpop.permute.xlu2 %1005 }
 0x113   : > { %1168 = vmatpush.msrb.mxu0 %v4153_v43  ;;  %1206 = vmatpush.msrb.mxu1 %v4101_v6  ;;  %6821 = vst [vmem:[#allocation21_spill] sm:$0xff] %v4559_v32 }
 0x114   : > { %1248 = vmatpush.msrb.mxu2 %v4228_v44  ;;  %1687 = vrot.lane.b32.xlu2 %v4321_v23, %s3786_s5  ;;  %6824 = vst [vmem:[#allocation24_spill] sm:$0xff] %v4584_v17 }
 0x115   : > { %1169 = vmatpush.msrb.mxu0 %v4186_v1  ;;  %1207 = vmatpush.msrb.mxu1 %v4131_v27  ;;  %v4579_v1 = vld [vmem:[%s6566_s0 + $0x48] sm:$0xff] }
 0x116   : > { %1249 = vmatpush.msrb.mxu2 %v4258_v31  ;;  %947 = vmatmul.f32.gmra.mxu3 %v4551_v10  ;;  %v4572_v43 = vpop.permute.xlu0 %1013  ;;  %6823 = vst [vmem:[#allocation23_spill] sm:$0xff] %v4579_v1 }
 0x117   : > { %1280 = vmatpush.msrb.mxu3 %v4559_v32  ;;  %1170 = vmatpush.msrb.mxu0 %v4216_v29  ;;  %v4586_v10 = vpop.permute.xlu1 %1009  ;;  %v4598_v29 = vld [vmem:[%s4051_s17] ss:$0 sm:$0xff] }
 0x118   : > { %1208 = vmatpush.msrb.mxu1 %v4162_v50  ;;  %1250 = vmatpush.msrb.mxu2 %v4288_v2 }
 0x119   : > { %1281 = vmatpush.msrb.mxu3 %v4593_v18  ;;  %836 = vmatmul.f32.gmra.mxu0 %v4570_v15  ;;  %v6844_v15 = vld [vmem:[#allocation12_spill] sm:$0xff] }
 0x11a   : > { %874 = vmatmul.f32.gmra.mxu1 %v4579_v1  ;;  %915 = vmatmul.f32.gmra.mxu2 %v4584_v17  ;;  %v4621_v17 = vld [vmem:[%s6566_s0 + $0x58] sm:$0xff] }
 0x11b   : > { %1171 = vmatpush.msrb.mxu0 %v4246_v9  ;;  %1209 = vmatpush.msrb.mxu1 %v4192_v4  ;;  %6828 = vst [vmem:[#allocation26_spill] sm:$0xff] %v4621_v17  ;;  %v4633_v9 = vsel %vm407_vm6, %v6829_v42, %v4572_v43  ;;  %v6834_v42 = vunpack.i.l.bf16 %v4089_v0 }
 0x11c   : > { %1251 = vmatpush.msrb.mxu2 %v4316_v38  ;;  %2084 = vrot.lane.b32.xlu0 %v4598_v29, %s3775_s21 }
 0x11d   : > { %2080 = vrot.lane.b32.xlu1 %v4598_v29, %s3776_s22  ;;  %1282 = vmatpush.msrb.mxu3 %v4613_v56 }
 0x11e   : > { %1172 = vmatpush.msrb.mxu0 %v4274_v16  ;;  %1210 = vmatpush.msrb.mxu1 %v4222_v41  ;;  %v4635_v25 = vpop.permute.xlu0 %1001 }
 0x11f   : > { %6830 = vst [vmem:[#allocation27_spill] sm:$0xff] %v4635_v25  ;;  %1252 = vmatpush.msrb.mxu2 %v4349_v55  ;;  %950 = vmatmul.f32.gmra.mxu3 %v4621_v17  ;;  %v4641_v16 = vpop.permute.xlu1 %997  ;;  %v4663_v17 = vsel %vm404_vm7, %v6834_v42, %v4586_v10  ;;  %v6838_v42 = vunpack.i.l.bf16 %v4127_v26  ;;  %v6840_v26 = vld [vmem:[#allocation5_spill] sm:$0xff] }
 0x120   : > { %1173 = vmatpush.msrb.mxu0 %v4304_v46  ;;  %1211 = vmatpush.msrb.mxu1 %v4252_v24  ;;  %6831 = vst [vmem:[#allocation28_spill] sm:$0xff] %v4641_v16  ;;  %v4656_v46 = vld [vmem:[%s6566_s0 + $0x68] sm:$0xff] }
 0x121   : > { %1253 = vmatpush.msrb.mxu2 %v4379_v14  ;;  %1283 = vmatpush.msrb.mxu3 %v4633_v9  ;;  %6833 = vst [vmem:[#allocation30_spill] sm:$0xff] %v4656_v46  ;;  %v4687_v1 = vsel %vm401_vm8, %v6838_v42, %v4602_v47 }
 0x122   : > { %1675 = vrot.lane.b32.xlu2 %v4321_v23, %s3789_s8  ;;  %1174 = vmatpush.msrb.mxu0 %v4337_v34  ;;  %v4670_v34 = vld [vmem:[%s6566_s0 + $0x90] sm:$0xff]  ;;  %v4672_v23 = vpop.permute.xlu2 %993 }
 0x123   : > { %1212 = vmatpush.msrb.mxu1 %v4282_v30  ;;  %1254 = vmatpush.msrb.mxu2 %v4446_v11  ;;  %6835 = vst [vmem:[#allocation31_spill] sm:$0xff] %v4670_v34 }
 0x124   : > { %6836 = vst [vmem:[#allocation32_spill] sm:$0xff] %v4672_v23  ;;  %1284 = vmatpush.msrb.mxu3 %v4663_v17  ;;  %839 = vmatmul.f32.gmra.mxu0 %v4651_v53 }
 0x125   : > { %1588 = vmatpush.msra.mxu2 %v4489_v21  ;;  %877 = vmatmul.f32.gmra.mxu1 %v4656_v46  ;;  %v6842_v46 = vld [vmem:[#allocation10_spill] sm:$0xff] }
 0x126   : > { %918 = vmatmul.f32.gmra.mxu2 %v4670_v34  ;;  %1175 = vmatpush.msrb.mxu0 %v4367_v61  ;;  %v4680_v0 = vpop.permute.xlu0 %989  ;;  %v4695_v34 = vld [vmem:[%s6566_s0 + $0x78] sm:$0xff]  ;;  %v6841_v61 = vunpack.i.l.bf16 %v6840_v26 }
 0x127   : > { %6837 = vst [vmem:[#allocation33_spill] sm:$0xff] %v4680_v0  ;;  %1213 = vmatpush.msrb.mxu1 %v4310_v51  ;;  %2072 = vrot.lane.b32.xlu0 %v4598_v29, %s3777_s23  ;;  %v4711_v53 = vpop.permute.xlu1 %985 }
 0x128   : > { %6839 = vst [vmem:[#allocation34_spill] sm:$0xff] %v4695_v34  ;;  %2068 = vrot.lane.b32.xlu1 %v4598_v29, %s3778_s24  ;;  %1285 = vmatpush.msrb.mxu3 %v4687_v1  ;;  %v4707_v42 = vsel %vm398_vm9, %v6841_v61, %v4635_v25  ;;  %v6851_v25 = vld [vmem:[#allocation7_spill] sm:$0xff] }
 0x129   : > { %1589 = vmatpush.msra.mxu2 %v4517_v12  ;;  %1176 = vmatpush.msrb.mxu0 %v4394_v33  ;;  %6843 = vst [vmem:[#allocation5_spill] sm:$0xff] %v4711_v53  ;;  %v6845_v33 = vld [vmem:[#allocation6_spill] sm:$0xff] }
 0x12a   : > { %1214 = vmatpush.msrb.mxu1 %v6842_v46  ;;  %953 = vmatmul.f32.gmra.mxu3 %v4695_v34  ;;  %v6846_v26 = vunpack.i.l.bf16 %v6845_v33  ;;  %v4726_v34 = vpop.permute.xlu2 %981  ;;  %v4738_v33 = vld [vmem:[%s6566_s0 + $0x88] sm:$0xff] }
 0x12b   : > { %1590 = vmatpush.msra.mxu2 %v4538_v45  ;;  %1177 = vmatpush.msrb.mxu0 %v4424_v40  ;;  %v4733_v40 = vld [vmem:[%s6566_s0 + $0x80] sm:$0xff]  ;;  %6848 = vst [vmem:[#allocation12_spill] sm:$0xff] %v4738_v33 }
 0x12c   : > { %1215 = vmatpush.msrb.mxu1 %v6844_v15  ;;  %1286 = vmatpush.msrb.mxu3 %v4707_v42  ;;  %v4722_v61 = vsel %vm395_vm10, %v6846_v26, %v4641_v16  ;;  %6847 = vst [vmem:[#allocation10_spill] sm:$0xff] %v4733_v40  ;;  %v4747_v16 = vld [vmem:[%s6566_s0 + $0xb0] sm:$0xff] }
 0x12d   : > { %1591 = vmatpush.msra.mxu2 %v4559_v32  ;;  %1178 = vmatpush.msrb.mxu0 %v4432_v36  ;;  %v6849_v36 = vld [vmem:[#allocation3_spill] sm:$0xff]  ;;  %6850 = vst [vmem:[#allocation6_spill] sm:$0xff] %v4747_v16  ;;  %v6852_v32 = vunpack.i.l.bf16 %v6851_v25  ;;  %v6854_v25 = vld [vmem:[#allocation4_spill] sm:$0xff] }
 0x12e   : > { %1216 = vmatpush.msrb.mxu1 %v4405_v54  ;;  %1287 = vmatpush.msrb.mxu3 %v4722_v61  ;;  %v4740_v26 = vpop.permute.xlu0 %977 }
 0x12f   : > { %1512 = vmatpush.msra.mxu0 %v3955_v20  ;;  %1592 = vmatpush.msra.mxu2 %v4593_v18  ;;  %v4759_v20 = vsel %vm392_vm11, %v6852_v32, %v4672_v23  ;;  %v4767_v18 = vld [vmem:[%s6566_s0 + $0x98] sm:$0xff]  ;;  %v6855_v32 = vld [vmem:[#allocation8_spill] sm:$0xff] }
 0x130   : > { %1550 = vmatpush.msra.mxu1 %v6849_v36  ;;  %2076 = vrot.lane.b32.xlu2 %v4598_v29, %s3774_s20  ;;  %6853 = vst [vmem:[#allocation3_spill] sm:$0xff] %v4767_v18 }
 0x131   : > { %842 = vmatmul.f32.gmra.mxu0 %v4733_v40  ;;  %880 = vmatmul.f32.gmra.mxu1 %v4738_v33  ;;  %v4781_v40 = vpop.permute.xlu1 %1386 }
 0x132   : > { %921 = vmatmul.f32.gmra.mxu2 %v4747_v16  ;;  %2060 = vrot.lane.b32.xlu0 %v4598_v29, %s3780_s26  ;;  %v6856_v16 = vunpack.i.l.bf16 %v6855_v32  ;;  %v4791_v32 = vpop.permute.xlu2 %1382 }
 0x133   : > { %2056 = vrot.lane.b32.xlu1 %v4598_v29, %s3781_s27  ;;  %1288 = vmatpush.msrb.mxu3 %v4759_v20 }
 0x134   : > { %1513 = vmatpush.msra.mxu0 %v3992_v35  ;;  %1551 = vmatpush.msra.mxu1 %v6854_v25  ;;  %v4779_v33 = vsel %vm389_vm12, %v6856_v16, %v4680_v0  ;;  %v6857_v16 = vld [vmem:[#allocation9_spill] sm:$0xff] }
 0x135   : > { %1593 = vmatpush.msra.mxu2 %v4613_v56  ;;  %956 = vmatmul.f32.gmra.mxu3 %v4767_v18  ;;  %v6858_v0 = vunpack.i.l.bf16 %v6857_v16  ;;  %v4812_v16 = vld [vmem:[%s6566_s0 + $0xa8] sm:$0xff] }
 0x136   : > { %1514 = vmatpush.msra.mxu0 %v4004_v37  ;;  %1552 = vmatpush.msra.mxu1 %v4018_v39  ;;  %v4787_v35 = vpop.permute.xlu0 %1378  ;;  %v4805_v37 = vld [vmem:[%s6566_s0 + $0xa0] sm:$0xff]  ;;  %6860 = vst [vmem:[#allocation4_spill] sm:$0xff] %v4812_v16 }
 0x137   : > { %1594 = vmatpush.msra.mxu2 %v4633_v9  ;;  %1289 = vmatpush.msrb.mxu3 %v4779_v33  ;;  %v4798_v23 = vsel %vm386_vm13, %v6858_v0, %v4711_v53  ;;  %6859 = vst [vmem:[#allocation7_spill] sm:$0xff] %v4805_v37  ;;  %v6862_v0 = vld [vmem:[#allocation11_spill] sm:$0xff] }
 0x138   : > { %1515 = vmatpush.msra.mxu0 %v4034_v48  ;;  %1553 = vmatpush.msra.mxu1 %v4040_v49  ;;  %v4817_v48 = vld [vmem:[%s6566_s0 + $0xd0] sm:$0xff]  ;;  %v6863_v18 = vunpack.i.l.bf16 %v6862_v0 }
 0x139   : > { %1595 = vmatpush.msra.mxu2 %v4663_v17  ;;  %1290 = vmatpush.msrb.mxu3 %v4798_v23  ;;  %6861 = vst [vmem:[#allocation8_spill] sm:$0xff] %v4817_v48 }
 0x13a   : > { %1516 = vmatpush.msra.mxu0 %v4071_v59  ;;  %1554 = vmatpush.msra.mxu1 %v4077_v60  ;;  %v4830_v53 = vsel %vm383_vm14, %v6863_v18, %v4726_v34  ;;  %v4838_v59 = vpop.permute.xlu1 %1374  ;;  %v4845_v18 = vld [vmem:[%s6566_s0 + $0xb8] sm:$0xff] }
 0x13b   : > { %1596 = vmatpush.msra.mxu2 %v4687_v1  ;;  %845 = vmatmul.f32.gmra.mxu0 %v4805_v37  ;;  %6864 = vst [vmem:[#allocation9_spill] sm:$0xff] %v4845_v18 }
 0x13c   : > { %883 = vmatmul.f32.gmra.mxu1 %v4812_v16  ;;  %924 = vmatmul.f32.gmra.mxu2 %v4817_v48  ;;  %v6865_v48 = vunpack.i.l.bf16 %v4418_v63  ;;  %v4867_v63 = vpop.permute.xlu2 %1370 }
 0x13d   : > { %2048 = vrot.lane.b32.xlu0 %v4598_v29, %s3783_s29  ;;  %2044 = vrot.lane.b32.xlu1 %v4598_v29, %s3784_s30 }
 0x13e   : > { %1291 = vmatpush.msrb.mxu3 %v4830_v53  ;;  %1517 = vmatpush.msra.mxu0 %v4101_v6  ;;  %v4847_v0 = vpop.permute.xlu0 %1366  ;;  %v4854_v16 = vsel %vm380_vm15, %v6865_v48, %v4740_v26  ;;  %v4863_v6 = vsel %vm425_vm0, %v4467_v22, %v4781_v40  ;;  %v4883_v22 = vld [vmem:[%s6566_s0 + $0xc8] sm:$0xff]  ;;  %v6870_v48 = vld [vmem:[#allocation13_spill] sm:$0xff] }
 0x13f   : > { %1555 = vmatpush.msra.mxu1 %v4107_v7  ;;  %1597 = vmatpush.msra.mxu2 %v4707_v42  ;;  %6866 = vst [vmem:[#allocation11_spill] sm:$0xff] %v4863_v6 }
 0x140   : > { %2064 = vrot.lane.b32.xlu2 %v4598_v29, %s3779_s25  ;;  %1518 = vmatpush.msra.mxu0 %v4131_v27  ;;  %v4876_v27 = vld [vmem:[%s6566_s0 + $0xc0] sm:$0xff]  ;;  %6868 = vst [vmem:[#allocation36_spill] sm:$0xff] %v4883_v22 }
 0x141   : > { %1556 = vmatpush.msra.mxu1 %v4137_v28  ;;  %1598 = vmatpush.msra.mxu2 %v4722_v61  ;;  %6867 = vst [vmem:[#allocation35_spill] sm:$0xff] %v4876_v27 }
 0x142   : > { %959 = vmatmul.f32.gmra.mxu3 %v4845_v18  ;;  %1519 = vmatpush.msra.mxu0 %v4162_v50  ;;  %v4893_v50 = vsel %vm422_vm1, %v4472_v19, %v4791_v32  ;;  %v4912_v19 = vld [vmem:[%s6566_s0 + $0xd8] sm:$0xff] }
 0x143   : > { %1292 = vmatpush.msrb.mxu3 %v4854_v16  ;;  %1557 = vmatpush.msra.mxu1 %v4168_v52  ;;  %6869 = vst [vmem:[#allocation37_spill] sm:$0xff] %v4893_v50 }
 0x144   : > { %1599 = vmatpush.msra.mxu2 %v4759_v20  ;;  %1520 = vmatpush.msra.mxu0 %v4192_v4  ;;  %v4900_v4 = vpop.permute.xlu1 %1362  ;;  %6871 = vst [vmem:[#allocation38_spill] sm:$0xff] %v4912_v19 }
 0x145   : > { %1626 = vmatpush.msra.mxu3 %v4863_v6  ;;  %1558 = vmatpush.msra.mxu1 %v4198_v5 }
 0x146   : > { %1600 = vmatpush.msra.mxu2 %v4779_v33  ;;  %848 = vmatmul.f32.gmra.mxu0 %v4876_v27  ;;  %v4905_v27 = vpop.permute.xlu0 %1354 }
 0x147   : > { %886 = vmatmul.f32.gmra.mxu1 %v4883_v22  ;;  %1255 = vmatmul.f32.vlgmr.msrb.gmra.mxu2 %v6870_v48  ;;  %v4917_v48 = vpop.permute.xlu2 %1358 }
 0x148   : > { %1627 = vmatpush.msra.mxu3 %v4893_v50  ;;  %2036 = vrot.lane.b32.xlu0 %v4598_v29, %s3786_s5 }
 0x149   : > { %2032 = vrot.lane.b32.xlu1 %v4598_v29, %s3787_s6  ;;  %1521 = vmatpush.msra.mxu0 %v4222_v41  ;;  %v4923_v41 = vsel %vm419_vm2, %v4463_v58, %v4787_v35  ;;  %v4942_v58 = vld [vmem:[%s4051_s17 + $0x1] ss:$0 sm:$0xff] }
 0x14a   : > { %1559 = vmatpush.msra.mxu1 %v4228_v44  ;;  %1601 = vmatpush.msra.mxu2 %v4798_v23 }
 0x14b   : > { %1522 = vmatpush.msra.mxu0 %v4252_v24  ;;  %2052 = vrot.lane.b32.xlu2 %v4598_v29, %s3782_s28  ;;  %v4937_v24 = vsel %vm416_vm3, %v4523_v3, %v4838_v59  ;;  %v4959_v3 = vsel %vm413_vm4, %v4527_v57, %v4867_v63  ;;  %v6877_v57 = vld [vmem:[#allocation16_spill] sm:$0xff] }
 0x14c   : > { %1560 = vmatpush.msra.mxu1 %v4258_v31  ;;  %1602 = vmatpush.msra.mxu2 %v4830_v53  ;;  %6872 = vst [vmem:[#allocation39_spill] sm:$0xff] %v4937_v24 }
 0x14d   : > { %962 = vmatmul.f32.gmra.mxu3 %v4912_v19  ;;  %1523 = vmatpush.msra.mxu0 %v4282_v30  ;;  %v6873_v30 = vld [vmem:[#allocation14_spill] sm:$0xff]  ;;  %v6874_v19 = vld [vmem:[#allocation15_spill] sm:$0xff] }
 0x14e   : > { %1561 = vmatpush.msra.mxu1 %v4288_v2  ;;  %1603 = vmatpush.msra.mxu2 %v4854_v16  ;;  %6875 = vst [vmem:[#allocation14_spill] sm:$0xff] %v4959_v3 }
 0x14f   : > { %1628 = vmatpush.msra.mxu3 %v4923_v41  ;;  %1524 = vmatpush.msra.mxu0 %v4310_v51  ;;  %v4953_v51 = vpop.permute.xlu0 %1342 }
 0x150   : > { %1937 = vmatpush.msrb.mxu2 %v4863_v6  ;;  %1562 = vmatpush.msra.mxu1 %v4316_v38  ;;  %v4948_v6 = vpop.permute.xlu1 %1350 }
 0x151   : > { %1629 = vmatpush.msra.mxu3 %v4937_v24  ;;  %1179 = vmatmul.f32.vlgmr.msrb.gmra.mxu0 %v4437_v62 }
 0x152   : > { %1217 = vmatmul.f32.vlgmr.msrb.gmra.mxu1 %v6873_v30  ;;  %1258 = vmatmul.f32.gmra.mxu2 %v6874_v19  ;;  %v4973_v19 = vsel %vm410_vm5, %v4529_v8, %v4847_v0  ;;  %v4986_v8 = vsel %vm407_vm6, %v4572_v43, %v4900_v4 }
 0x153   : > { %1938 = vmatpush.msrb.mxu2 %v4893_v50  ;;  %2024 = vrot.lane.b32.xlu0 %v4598_v29, %s3789_s8  ;;  %v4966_v50 = vpop.permute.xlu2 %1346  ;;  %6876 = vst [vmem:[#allocation40_spill] sm:$0xff] %v4973_v19 }
 0x154   : > { %2433 = vrot.lane.b32.xlu1 %v4942_v58, %s3775_s21  ;;  %1525 = vmatpush.msra.mxu0 %v6842_v46  ;;  %6878 = vst [vmem:[#allocation16_spill] sm:$0xff] %v4986_v8  ;;  %v6880_v46 = vld [vmem:[#allocation18_spill] sm:$0xff] }
 0x155   : > { %1563 = vmatpush.msra.mxu1 %v4349_v55  ;;  %1630 = vmatpush.msra.mxu3 %v4959_v3 }
 0x156   : > { %1939 = vmatpush.msrb.mxu2 %v4923_v41  ;;  %1526 = vmatpush.msra.mxu0 %v6844_v15 }
 0x157   : > { %1564 = vmatpush.msra.mxu1 %v4379_v14  ;;  %1293 = vmatmul.f32.vlgmr.msrb.gmra.mxu3 %v6877_v57  ;;  %v4999_v43 = vpop.permute.xlu0 %1330 }
 0x158   : > { %1940 = vmatpush.msrb.mxu2 %v4937_v24  ;;  %1527 = vmatpush.msra.mxu0 %v4405_v54  ;;  %v6879_v54 = vld [vmem:[#allocation17_spill] sm:$0xff]  ;;  %v4995_v15 = vpop.permute.xlu1 %1338  ;;  %v6881_v24 = vld [vmem:[#allocation19_spill] sm:$0xff] }
 0x159   : > { %1565 = vmatpush.msra.mxu1 %v4446_v11  ;;  %1631 = vmatpush.msra.mxu3 %v4973_v19 }
 0x15a   : > { %1861 = vmatpush.msrb.mxu0 %v6849_v36  ;;  %1941 = vmatpush.msrb.mxu2 %v4959_v3  ;;  %v5007_v36 = vsel %vm404_vm7, %v4586_v10, %v4917_v48  ;;  %v5022_v10 = vsel %vm401_vm8, %v4602_v47, %v4905_v27  ;;  %v6887_v47 = vld [vmem:[#allocation27_spill] sm:$0xff] }
 0x15b   : > { %1899 = vmatpush.msrb.mxu1 %v4489_v21  ;;  %1632 = vmatpush.msra.mxu3 %v4986_v8  ;;  %6882 = vst [vmem:[#allocation17_spill] sm:$0xff] %v5007_v36  ;;  %v5012_v3 = vpop.permute.xlu2 %1334 }
 0x15c   : > { %2040 = vrot.lane.b32.xlu2 %v4598_v29, %s3785_s4  ;;  %1182 = vmatmul.f32.gmra.mxu0 %v6879_v54  ;;  %6883 = vst [vmem:[#allocation18_spill] sm:$0xff] %v5022_v10 }
 0x15d   : > { %1220 = vmatmul.f32.gmra.mxu1 %v6880_v46  ;;  %1261 = vmatmul.f32.gmra.mxu2 %v6881_v24 }
 0x15e   : > { %1862 = vmatpush.msrb.mxu0 %v6854_v25  ;;  %1900 = vmatpush.msrb.mxu1 %v4517_v12  ;;  %v6884_v25 = vld [vmem:[#allocation21_spill] sm:$0xff] }
 0x15f   : > { %1942 = vmatpush.msrb.mxu2 %v4973_v19  ;;  %2425 = vrot.lane.b32.xlu0 %v4942_v58, %s3774_s20  ;;  %v5037_v19 = vsel %vm398_vm9, %v6887_v47, %v4948_v6  ;;  %v6892_v47 = vld [vmem:[#allocation28_spill] sm:$0xff] }
 0x160   : > { %1633 = vmatpush.msra.mxu3 %v5007_v36  ;;  %1863 = vmatpush.msrb.mxu0 %v4018_v39  ;;  %v6885_v39 = vld [vmem:[#allocation20_spill] sm:$0xff]  ;;  %6888 = vst [vmem:[#allocation21_spill] sm:$0xff] %v5037_v19  ;;  %v5041_v24 = vpop.permute.xlu1 %1326 }
 0x161   : > { %1901 = vmatpush.msrb.mxu1 %v4538_v45  ;;  %1943 = vmatpush.msrb.mxu2 %v4986_v8  ;;  %v6886_v8 = vld [vmem:[#allocation25_spill] sm:$0xff] }
 0x162   : > { %2421 = vrot.lane.b32.xlu1 %v4942_v58, %s3777_s23  ;;  %1864 = vmatpush.msrb.mxu0 %v4040_v49  ;;  %v6889_v49 = vld [vmem:[#allocation22_spill] sm:$0xff] }
 0x163   : > { %1902 = vmatpush.msrb.mxu1 %v6884_v25  ;;  %1944 = vmatpush.msrb.mxu2 %v5007_v36  ;;  %v6890_v36 = vld [vmem:[#allocation23_spill] sm:$0xff] }
 0x164   : > { %1296 = vmatmul.f32.gmra.mxu3 %v6885_v39  ;;  %1865 = vmatpush.msrb.mxu0 %v4077_v60  ;;  %v5045_v60 = vpop.permute.xlu0 %1731  ;;  %v5047_v39 = vpop.permute.xlu2 %1735 }
 0x165   : > { %1634 = vmatpush.msra.mxu3 %v5022_v10  ;;  %1903 = vmatpush.msrb.mxu1 %v6886_v8  ;;  %v6891_v8 = vld [vmem:[#allocation24_spill] sm:$0xff] }
 0x166   : > { %1945 = vmatpush.msrb.mxu2 %v5022_v10  ;;  %1185 = vmatmul.f32.gmra.mxu0 %v6889_v49  ;;  %v5055_v10 = vsel %vm395_vm10, %v6892_v47, %v4966_v50 }
 0x167   : > { %1635 = vmatpush.msra.mxu3 %v5037_v19  ;;  %1223 = vmatmul.f32.gmra.mxu1 %v6890_v36  ;;  %6893 = vst [vmem:[#allocation27_spill] sm:$0xff] %v5055_v10 }
 0x168   : > { %1264 = vmatmul.f32.gmra.mxu2 %v6891_v8  ;;  %1866 = vmatpush.msrb.mxu0 %v4107_v7  ;;  %v6894_v7 = vld [vmem:[#allocation32_spill] sm:$0xff] }
 0x169   : > { %1904 = vmatpush.msrb.mxu1 %v4613_v56  ;;  %1946 = vmatpush.msrb.mxu2 %v5037_v19  ;;  %v5068_v8 = vsel %vm392_vm11, %v6894_v7, %v4953_v51  ;;  %v6902_v19 = vld [vmem:[#allocation31_spill] sm:$0xff] }
 0x16a   : > { %1636 = vmatpush.msra.mxu3 %v5055_v10  ;;  %2028 = vrot.lane.b32.xlu2 %v4598_v29, %s3788_s7  ;;  %6895 = vst [vmem:[#allocation22_spill] sm:$0xff] %v5068_v8  ;;  %v6896_v29 = vld [vmem:[#allocation26_spill] sm:$0xff] }
 0x16b   : > { %1867 = vmatpush.msrb.mxu0 %v4137_v28  ;;  %1905 = vmatpush.msrb.mxu1 %v4633_v9  ;;  %v6897_v28 = vld [vmem:[#allocation33_spill] sm:$0xff] }
 0x16c   : > { %1947 = vmatpush.msrb.mxu2 %v5055_v10  ;;  %2413 = vrot.lane.b32.xlu0 %v4942_v58, %s3779_s25  ;;  %v5084_v47 = vsel %vm389_vm12, %v6897_v28, %v4995_v15  ;;  %v5092_v7 = vpop.permute.xlu0 %1719  ;;  %v6899_v10 = vld [vmem:[#allocation30_spill] sm:$0xff]  ;;  %v6900_v28 = vld [vmem:[#allocation5_spill] sm:$0xff] }
 0x16d   : > { %1868 = vmatpush.msrb.mxu0 %v4168_v52  ;;  %1906 = vmatpush.msrb.mxu1 %v4663_v17  ;;  %v5088_v52 = vpop.permute.xlu1 %1727 }
 0x16e   : > { %1299 = vmatmul.f32.gmra.mxu3 %v6896_v29  ;;  %1948 = vmatpush.msrb.mxu2 %v5068_v8  ;;  %v6898_v29 = vld [vmem:[#allocation29_spill] sm:$0xff] }
 0x16f   : > { %1637 = vmatpush.msra.mxu3 %v5068_v8  ;;  %2409 = vrot.lane.b32.xlu1 %v4942_v58, %s3780_s26  ;;  %v5094_v8 = vpop.permute.xlu2 %1723 }
 0x170   : > { %1869 = vmatpush.msrb.mxu0 %v4198_v5  ;;  %1907 = vmatpush.msrb.mxu1 %v4687_v1  ;;  %v5102_v5 = vsel %vm386_vm13, %v6900_v28, %v5012_v3  ;;  %v5115_v28 = vsel %vm383_vm14, %v4726_v34, %v4999_v43 }
 0x171   : > { %1638 = vmatpush.msra.mxu3 %v5084_v47  ;;  %1949 = vmatpush.msrb.mxu2 %v5084_v47  ;;  %6901 = vst [vmem:[#allocation23_spill] sm:$0xff] %v5102_v5 }
 0x172   : > { %1188 = vmatmul.f32.gmra.mxu0 %v6898_v29  ;;  %1226 = vmatmul.f32.gmra.mxu1 %v6899_v10  ;;  %6903 = vst [vmem:[#allocation28_spill] sm:$0xff] %v5115_v28 }
 0x173   : > { %1267 = vmatmul.f32.gmra.mxu2 %v6902_v19  ;;  %1870 = vmatpush.msrb.mxu0 %v4228_v44  ;;  %v6904_v44 = vld [vmem:[#allocation34_spill] sm:$0xff] }
 0x174   : > { %1908 = vmatpush.msrb.mxu1 %v4707_v42  ;;  %1639 = vmatpush.msra.mxu3 %v5102_v5  ;;  %v5138_v34 = vpop.permute.xlu0 %1707 }
 0x175   : > { %1950 = vmatpush.msrb.mxu2 %v5102_v5  ;;  %1871 = vmatpush.msrb.mxu0 %v4258_v31  ;;  %v5130_v31 = vsel %vm380_vm15, %v4740_v26, %v5041_v24  ;;  %6906 = vst [vmem:[#allocation33_spill] sm:$0xff] %v5138_v34  ;;  %v6909_v5 = vld [vmem:[#allocation12_spill] sm:$0xff]  ;;  %v6911_v26 = vld [vmem:[#allocation6_spill] sm:$0xff] }
 0x176   : > { %1909 = vmatpush.msrb.mxu1 %v4722_v61  ;;  %2401 = vrot.lane.b32.xlu0 %v4942_v58, %s3782_s28  ;;  %6905 = vst [vmem:[#allocation32_spill] sm:$0xff] %v5130_v31 }
 0x177   : > { %1872 = vmatpush.msrb.mxu0 %v4288_v2  ;;  %2429 = vrot.lane.b32.xlu2 %v4942_v58, %s3776_s22  ;;  %v5134_v2 = vpop.permute.xlu1 %1715 }
 0x178   : > { %1910 = vmatpush.msrb.mxu1 %v4759_v20  ;;  %1302 = vmatmul.f32.gmra.mxu3 %v6904_v44  ;;  %v5140_v44 = vpop.permute.xlu2 %1711 }
 0x179   : > { %1640 = vmatpush.msra.mxu3 %v5115_v28  ;;  %1951 = vmatpush.msrb.mxu2 %v5115_v28  ;;  %6907 = vst [vmem:[#allocation29_spill] sm:$0xff] %v5140_v44  ;;  %v6908_v28 = vld [vmem:[#allocation10_spill] sm:$0xff] }
 0x17a   : > { %1873 = vmatpush.msrb.mxu0 %v4316_v38  ;;  %1911 = vmatpush.msrb.mxu1 %v4779_v33  ;;  %v5148_v38 = vsel %vm425_vm0, %v4781_v40, %v5047_v39  ;;  %v6912_v40 = vld [vmem:[#allocation3_spill] sm:$0xff] }
 0x17b   : > { %1641 = vmatpush.msra.mxu3 %v5130_v31  ;;  %1952 = vmatpush.msrb.mxu2 %v5130_v31  ;;  %6910 = vst [vmem:[#allocation30_spill] sm:$0xff] %v5148_v38  ;;  %v5158_v31 = vsel %vm422_vm1, %v4791_v32, %v5045_v60 }
 0x17c   : > { %1191 = vmatmul.f32.gmra.mxu0 %v6908_v28  ;;  %1229 = vmatmul.f32.gmra.mxu1 %v6909_v5 }
 0x17d   : > { %1270 = vmatmul.f32.gmra.mxu2 %v6911_v26  ;;  %1874 = vmatpush.msrb.mxu0 %v4349_v55  ;;  %v5171_v55 = vsel %vm419_vm2, %v4787_v35, %v5088_v52  ;;  %v5191_v35 = vsel %vm413_vm4, %v4867_v63, %v5092_v7  ;;  %v5197_v26 = vpop.permute.xlu0 %1695  ;;  %v5208_v63 = vsel %vm410_vm5, %v4847_v0, %v5134_v2 }
 0x17e   : > { %1912 = vmatpush.msrb.mxu1 %v4798_v23  ;;  %1975 = vmatpush.msrb.mxu3 %v5148_v38  ;;  %6913 = vst [vmem:[#allocation5_spill] sm:$0xff] %v5171_v55  ;;  %v5224_v0 = vsel %vm404_vm7, %v4917_v48, %v5138_v34 }
 0x17f   : > { %2397 = vrot.lane.b32.xlu1 %v4942_v58, %s3783_s29  ;;  %1875 = vmatpush.msrb.mxu0 %v4379_v14  ;;  %v5183_v14 = vsel %vm416_vm3, %v4838_v59, %v5094_v8  ;;  %v5193_v32 = vpop.permute.xlu1 %1703 }
 0x180   : > { %1913 = vmatpush.msrb.mxu1 %v4830_v53  ;;  %1305 = vmatmul.f32.gmra.mxu3 %v6912_v40  ;;  %6914 = vst [vmem:[#allocation31_spill] sm:$0xff] %v5183_v14  ;;  %v6917_v40 = vld [vmem:[#allocation8_spill] sm:$0xff]  ;;  %v5199_v59 = vpop.permute.xlu2 %1699  ;;  %v5238_v48 = vsel %vm401_vm8, %v4905_v27, %v5193_v32 }
 0x181   : > { %1876 = vmatpush.msrb.mxu0 %v4446_v11  ;;  %1976 = vmatpush.msrb.mxu3 %v5158_v31  ;;  %v6915_v11 = vld [vmem:[#allocation4_spill] sm:$0xff]  ;;  %6916 = vst [vmem:[#allocation10_spill] sm:$0xff] %v5193_v32 }
 0x182   : > { %1914 = vmatpush.msrb.mxu1 %v4854_v16  ;;  %2417 = vrot.lane.b32.xlu2 %v4942_v58, %s3778_s24  ;;  %6920 = vst [vmem:[#allocation12_spill] sm:$0xff] %v5238_v48 }
 0x183   : > { %1977 = vmatpush.msrb.mxu3 %v5171_v55  ;;  %2389 = vrot.lane.b32.xlu0 %v4942_v58, %s3785_s4 }
 0x184   : > { %1194 = vmatmul.f32.gmra.mxu0 %v4805_v37  ;;  %1232 = vmatmul.f32.gmra.mxu1 %v6915_v11  ;;  %v869_v11 = vpop.f32.mrf.mxu1  ;;  %v6918_v37 = vld [vmem:[#allocation35_spill] sm:$0xff] }
 0x185   : > { %1273 = vmatmul.f32.gmra.mxu2 %v6917_v40  ;;  %1978 = vmatpush.msrb.mxu3 %v5183_v14  ;;  %v5216_v40 = vsel %vm407_vm6, %v4900_v4, %v5140_v44  ;;  %v6919_v4 = vld [vmem:[#allocation13_spill] sm:$0xff] }
 0x187   : > { %2385 = vrot.lane.b32.xlu1 %v4942_v58, %s3786_s5  ;;  %1979 = vmatpush.msrb.mxu3 %v5191_v35  ;;  %v5240_v34 = vpop.permute.xlu1 %1691 }
 0x188   : > { %1308 = vmatmul.f32.gmra.mxu3 %v4845_v18  ;;  %v831_v18 = vpop.f32.mrf.mxu0  ;;  %v5257_v27 = vpop.permute.xlu2 %1687 }
 0x189   : > { %1980 = vmatpush.msrb.mxu3 %v5208_v63  ;;  %v870_v44 = vadd.f32 %v869_v11, %v831_v18  ;;  %v5255_v18 = vsel %vm398_vm9, %v4948_v6, %v5199_v59  ;;  %v6921_v11 = vld [vmem:[#allocation38_spill] sm:$0xff] }
 0x18a   : > { %2405 = vrot.lane.b32.xlu2 %v4942_v58, %s3781_s27 }
 0x18b   : > { %1981 = vmatpush.msrb.mxu3 %v5216_v40  ;;  %2377 = vrot.lane.b32.xlu0 %v4942_v58, %s3788_s7 }
 0x18c   : > { %1197 = vmatmul.f32.gmra.mxu0 %v6918_v37  ;;  %1235 = vmatmul.f32.gmra.mxu1 %v4883_v22  ;;  %v5249_v22 = vpop.permute.xlu0 %1683  ;;  %v907_v37 = vpop.f32.mrf.mxu2 }
 0x18d   : > { %1604 = vmatmul.f32.vlgmr.msra.gmra.mxu2 %v6919_v4  ;;  %1982 = vmatpush.msrb.mxu3 %v5224_v0  ;;  %v5247_v4 = vld [vmem:[%s4051_s17 + $0x2] ss:$0 sm:$0xff]  ;;  %v908_v32 = vadd.f32 %v907_v37, %v870_v44  ;;  %v945_v6 = vpop.f32.mrf.mxu3 }
 0x18e   : > { %2286 = vmatpush.msra.mxu2 %v5148_v38  ;;  %v5265_v38 = vsel %vm395_vm10, %v4966_v50, %v5197_v26  ;;  %v6922_v37 = vld [vmem:[#allocation15_spill] sm:$0xff] }
 0x18f   : > { %2373 = vrot.lane.b32.xlu1 %v4942_v58, %s3789_s8  ;;  %1983 = vmatpush.msrb.mxu3 %v5238_v48  ;;  %v946_v50 = vadd.f32 %v945_v6, %v908_v32  ;;  %v6923_v44 = vld [vmem:[#allocation11_spill] sm:$0xff]  ;;  %v872_v6 = vpop.f32.mrf.mxu1 }
 0x190   : > { %2287 = vmatpush.msra.mxu2 %v5158_v31  ;;  %1311 = vmatmul.f32.gmra.mxu3 %v6921_v11  ;;  %v834_v32 = vpop.f32.mrf.mxu0 }
 0x191   : > { %1984 = vmatpush.msrb.mxu3 %v5255_v18  ;;  %966 = vst [vmem:[%s5274_s10] sm:$0xff] %v946_v50 }
 0x192   : > { %2288 = vmatpush.msra.mxu2 %v5171_v55  ;;  %2393 = vrot.lane.b32.xlu2 %v4942_v58, %s3784_s30  ;;  %v5290_v55 = vsel %vm392_vm11, %v4953_v51, %v5240_v34 }
 0x193   : > { %2778 = vrot.lane.b32.xlu0 %v5247_v4, %s3776_s22  ;;  %1985 = vmatpush.msrb.mxu3 %v5265_v38 }
 0x194   : > { %2289 = vmatpush.msra.mxu2 %v5183_v14  ;;  %1528 = vmatmul.f32.vlgmr.msra.gmra.mxu0 %v4437_v62  ;;  %v873_v62 = vadd.f32 %v872_v6, %v834_v32  ;;  %v910_v50 = vpop.f32.mrf.mxu2  ;;  %v5300_v51 = vpop.permute.xlu0 %2084  ;;  %v6925_v32 = vld [vmem:[#allocation39_spill] sm:$0xff] }
 0x195   : > { %1566 = vmatmul.f32.vlgmr.msra.gmra.mxu1 %v6873_v30  ;;  %1607 = vmatmul.f32.gmra.mxu2 %v6922_v37  ;;  %v6924_v30 = vld [vmem:[#allocation37_spill] sm:$0xff]  ;;  %v5302_v14 = vpop.permute.xlu2 %1675 }
 0x196   : > { %2210 = vmatpush.msra.mxu0 %v4489_v21  ;;  %2248 = vmatpush.msra.mxu1 %v6923_v44  ;;  %v5296_v21 = vpop.permute.xlu1 %1679  ;;  %v911_v37 = vadd.f32 %v910_v50, %v873_v62  ;;  %v5320_v50 = vsel %vm389_vm12, %v4995_v15, %v5257_v27  ;;  %v5332_v15 = vsel %vm386_vm13, %v5012_v3, %v5249_v22 }
 0x197   : > { %2290 = vmatpush.msra.mxu2 %v5191_v35  ;;  %1986 = vmatpush.msrb.mxu3 %v5290_v55  ;;  %v875_v62 = vpop.f32.mrf.mxu1  ;;  %6927 = vst [vmem:[#allocation13_spill] sm:$0xff] %v5320_v50 }
 0x198   : > { %2211 = vmatpush.msra.mxu0 %v4517_v12  ;;  %2249 = vmatpush.msra.mxu1 %v6924_v30  ;;  %v837_v6 = vpop.f32.mrf.mxu0  ;;  %6931 = vst [vmem:[#allocation38_spill] sm:$0xff] %v5332_v15 }
 0x199   : > { %2291 = vmatpush.msra.mxu2 %v5208_v63  ;;  %1642 = vmatmul.f32.vlgmr.msra.gmra.mxu3 %v6877_v57  ;;  %v948_v12 = vpop.f32.mrf.mxu3 }
 0x19a   : > { %2212 = vmatpush.msra.mxu0 %v4538_v45  ;;  %2250 = vmatpush.msra.mxu1 %v4923_v41  ;;  %v949_v57 = vadd.f32 %v948_v12, %v911_v37  ;;  %v6926_v45 = vld [vmem:[#allocation19_spill] sm:$0xff]  ;;  %v6929_v37 = vld [vmem:[#allocation14_spill] sm:$0xff]  ;;  %v876_v12 = vadd.f32 %v875_v62, %v837_v6  ;;  %v6932_v6 = vld [vmem:[#allocation20_spill] sm:$0xff] }
 0x19b   : > { %2292 = vmatpush.msra.mxu2 %v5216_v40  ;;  %2774 = vrot.lane.b32.xlu1 %v5247_v4, %s3774_s20 }
 0x19c   : > { %2213 = vmatpush.msra.mxu0 %v6884_v25  ;;  %2251 = vmatpush.msra.mxu1 %v6925_v32  ;;  %967 = vst [vmem:[%s5274_s10 + $0x40] sm:$0xff] %v949_v57  ;;  %v6928_v25 = vld [vmem:[#allocation25_spill] sm:$0xff] }
 0x19d   : > { %2293 = vmatpush.msra.mxu2 %v5224_v0  ;;  %1531 = vmatmul.f32.gmra.mxu0 %v6879_v54  ;;  %v913_v54 = vpop.f32.mrf.mxu2 }
 0x19e   : > { %1569 = vmatmul.f32.gmra.mxu1 %v6880_v46  ;;  %1610 = vmatmul.f32.gmra.mxu2 %v6926_v45  ;;  %v6930_v46 = vld [vmem:[#allocation40_spill] sm:$0xff]  ;;  %v914_v57 = vadd.f32 %v913_v54, %v876_v12  ;;  %v5334_v45 = vpop.permute.xlu2 %2076  ;;  %v5338_v62 = vpop.permute.xlu1 %2080  ;;  %v6934_v12 = vld [vmem:[#allocation17_spill] sm:$0xff]  ;;  %v5352_v54 = vsel %vm383_vm14, %v4999_v43, %v5296_v21 }
 0x19f   : > { %2214 = vmatpush.msra.mxu0 %v6928_v25  ;;  %2252 = vmatpush.msra.mxu1 %v6929_v37  ;;  %v5342_v25 = vpop.permute.xlu0 %2072  ;;  %6935 = vst [vmem:[#allocation15_spill] sm:$0xff] %v5352_v54 }
 0x1a0   : > { %2294 = vmatpush.msra.mxu2 %v5238_v48  ;;  %1987 = vmatpush.msrb.mxu3 %v5320_v50 }
 0x1a1   : > { %2215 = vmatpush.msra.mxu0 %v4613_v56  ;;  %2253 = vmatpush.msra.mxu1 %v6930_v46  ;;  %v6933_v56 = vld [vmem:[#allocation16_spill] sm:$0xff] }
 0x1a2   : > { %2295 = vmatpush.msra.mxu2 %v5255_v18  ;;  %1645 = vmatmul.f32.gmra.mxu3 %v6932_v6  ;;  %v951_v48 = vpop.f32.mrf.mxu3  ;;  %v878_v6 = vpop.f32.mrf.mxu1 }
 0x1a3   : > { %2216 = vmatpush.msra.mxu0 %v4633_v9  ;;  %2254 = vmatpush.msra.mxu1 %v6933_v56  ;;  %v952_v3 = vadd.f32 %v951_v48, %v914_v57  ;;  %v840_v9 = vpop.f32.mrf.mxu0  ;;  %v6936_v48 = vld [vmem:[#allocation24_spill] sm:$0xff]  ;;  %v5369_v57 = vsel %vm380_vm15, %v5041_v24, %v5302_v14  ;;  %v5385_v24 = vsel %vm425_vm0, %v5047_v39, %v5300_v51  ;;  %v6943_v39 = vld [vmem:[#allocation22_spill] sm:$0xff] }
 0x1a4   : > { %2296 = vmatpush.msra.mxu2 %v5265_v38  ;;  %1988 = vmatpush.msrb.mxu3 %v5332_v15  ;;  %6937 = vst [vmem:[#allocation11_spill] sm:$0xff] %v5369_v57 }
 0x1a5   : > { %2217 = vmatpush.msra.mxu0 %v4663_v17  ;;  %2255 = vmatpush.msra.mxu1 %v6934_v12  ;;  %968 = vst [vmem:[%s5274_s10 + $0x80] sm:$0xff] %v952_v3  ;;  %v879_v17 = vadd.f32 %v878_v6, %v840_v9  ;;  %v916_v43 = vpop.f32.mrf.mxu2  ;;  %v6938_v3 = vld [vmem:[#allocation18_spill] sm:$0xff]  ;;  %v6941_v6 = vld [vmem:[#allocation27_spill] sm:$0xff] }
 0x1a6   : > { %2297 = vmatpush.msra.mxu2 %v5290_v55  ;;  %2766 = vrot.lane.b32.xlu0 %v5247_v4, %s3778_s24  ;;  %6940 = vst [vmem:[#allocation37_spill] sm:$0xff] %v5385_v24 }
 0x1a7   : > { %2381 = vrot.lane.b32.xlu2 %v4942_v58, %s3787_s6  ;;  %1989 = vmatpush.msrb.mxu3 %v5352_v54  ;;  %v917_v58 = vadd.f32 %v916_v43, %v879_v17 }
 0x1a8   : > { %1534 = vmatmul.f32.gmra.mxu0 %v6889_v49  ;;  %1572 = vmatmul.f32.gmra.mxu1 %v6890_v36  ;;  %v6939_v36 = vld [vmem:[#allocation21_spill] sm:$0xff]  ;;  %v5379_v49 = vpop.permute.xlu1 %2068 }
 0x1a9   : > { %1613 = vmatmul.f32.gmra.mxu2 %v6936_v48  ;;  %2218 = vmatpush.msra.mxu0 %v4687_v1  ;;  %v5377_v1 = vpop.permute.xlu2 %2064 }
 0x1aa   : > { %2256 = vmatpush.msra.mxu1 %v6938_v3  ;;  %2298 = vmatpush.msra.mxu2 %v5320_v50  ;;  %v5403_v50 = vsel %vm422_vm1, %v5045_v60, %v5338_v62 }
 0x1ab   : > { %1990 = vmatpush.msrb.mxu3 %v5369_v57  ;;  %2219 = vmatpush.msra.mxu0 %v4707_v42  ;;  %v5390_v42 = vpop.permute.xlu0 %2060  ;;  %6944 = vst [vmem:[#allocation39_spill] sm:$0xff] %v5403_v50 }
 0x1ac   : > { %2257 = vmatpush.msra.mxu1 %v6939_v36  ;;  %2299 = vmatpush.msra.mxu2 %v5332_v15  ;;  %v6942_v15 = vld [vmem:[#allocation26_spill] sm:$0xff] }
 0x1ad   : > { %2762 = vrot.lane.b32.xlu1 %v5247_v4, %s3779_s25  ;;  %2220 = vmatpush.msra.mxu0 %v4722_v61  ;;  %v954_v9 = vpop.f32.mrf.mxu3  ;;  %v919_v61 = vpop.f32.mrf.mxu2 }
 0x1ae   : > { %2258 = vmatpush.msra.mxu1 %v6941_v6  ;;  %2300 = vmatpush.msra.mxu2 %v5352_v54  ;;  %v955_v17 = vadd.f32 %v954_v9, %v917_v58  ;;  %v843_v43 = vpop.f32.mrf.mxu0  ;;  %v881_v48 = vpop.f32.mrf.mxu1 }
 0x1af   : > { %1648 = vmatmul.f32.gmra.mxu3 %v6942_v15  ;;  %2221 = vmatpush.msra.mxu0 %v4759_v20  ;;  %v882_v58 = vadd.f32 %v881_v48, %v843_v43  ;;  %v5415_v20 = vsel %vm419_vm2, %v5088_v52, %v5334_v45  ;;  %v6953_v43 = vld [vmem:[#allocation32_spill] sm:$0xff] }
 0x1b0   : > { %2324 = vmatpush.msra.mxu3 %v5385_v24  ;;  %2259 = vmatpush.msra.mxu1 %v6943_v39  ;;  %969 = vst [vmem:[%s5274_s10 + $0xc0] sm:$0xff] %v955_v17  ;;  %v5431_v60 = vpop.permute.xlu1 %2056  ;;  %v5448_v17 = vsel %vm413_vm4, %v5092_v7, %v5379_v49  ;;  %v6955_v7 = vld [vmem:[#allocation6_spill] sm:$0xff] }
 0x1b1   : > { %2301 = vmatpush.msra.mxu2 %v5369_v57  ;;  %1537 = vmatmul.f32.gmra.mxu0 %v6898_v29  ;;  %6945 = vst [vmem:[#allocation19_spill] sm:$0xff] %v5415_v20  ;;  %v6948_v29 = vld [vmem:[#allocation34_spill] sm:$0xff]  ;;  %v5436_v52 = vpop.permute.xlu2 %2052  ;;  %v6965_v57 = vld [vmem:[#allocation4_spill] sm:$0xff] }
 0x1b2   : > { %2325 = vmatpush.msra.mxu3 %v5403_v50  ;;  %1575 = vmatmul.f32.gmra.mxu1 %v6899_v10  ;;  %v920_v10 = vadd.f32 %v919_v61, %v882_v58  ;;  %6949 = vst [vmem:[#allocation14_spill] sm:$0xff] %v5436_v52 }
 0x1b3   : > { %1616 = vmatmul.f32.gmra.mxu2 %v6902_v19  ;;  %2222 = vmatpush.msra.mxu0 %v4779_v33  ;;  %v6946_v33 = vld [vmem:[#allocation23_spill] sm:$0xff]  ;;  %v5429_v19 = vsel %vm416_vm3, %v5094_v8, %v5342_v25  ;;  %v5440_v15 = vpop.permute.xlu0 %2048  ;;  %6952 = vst [vmem:[#allocation20_spill] sm:$0xff] %v5448_v17 }
 0x1b4   : > { %2260 = vmatpush.msra.mxu1 %v5084_v47  ;;  %2782 = vrot.lane.b32.xlu2 %v5247_v4, %s3775_s21  ;;  %6947 = vst [vmem:[#allocation25_spill] sm:$0xff] %v5429_v19 }
 0x1b5   : > { %2326 = vmatpush.msra.mxu3 %v5415_v20  ;;  %2754 = vrot.lane.b32.xlu0 %v5247_v4, %s3781_s27  ;;  %6951 = vst [vmem:[#allocation40_spill] sm:$0xff] %v5440_v15 }
 0x1b6   : > { %2223 = vmatpush.msra.mxu0 %v4798_v23  ;;  %2261 = vmatpush.msra.mxu1 %v6946_v33  ;;  %v6950_v23 = vld [vmem:[#allocation28_spill] sm:$0xff] }
 0x1b7   : > { %2750 = vrot.lane.b32.xlu1 %v5247_v4, %s3782_s28  ;;  %1651 = vmatmul.f32.gmra.mxu3 %v6948_v29  ;;  %v6960_v29 = vld [vmem:[#allocation33_spill] sm:$0xff] }
 0x1b8   : > { %2224 = vmatpush.msra.mxu0 %v4830_v53  ;;  %2262 = vmatpush.msra.mxu1 %v6950_v23  ;;  %v957_v9 = vpop.f32.mrf.mxu3  ;;  %v922_v53 = vpop.f32.mrf.mxu2 }
 0x1b9   : > { %2327 = vmatpush.msra.mxu3 %v5429_v19  ;;  %1540 = vmatmul.f32.gmra.mxu0 %v6908_v28  ;;  %v958_v8 = vadd.f32 %v957_v9, %v920_v10  ;;  %v846_v48 = vpop.f32.mrf.mxu0  ;;  %v884_v61 = vpop.f32.mrf.mxu1  ;;  %v5459_v28 = vsel %vm410_vm5, %v5134_v2, %v5377_v1  ;;  %v6958_v10 = vld [vmem:[#allocation3_spill] sm:$0xff]  ;;  %v5483_v9 = vsel %vm404_vm7, %v6960_v29, %v5431_v60 }
 0x1ba   : > { %2225 = vmatpush.msra.mxu0 %v4854_v16  ;;  %2263 = vmatpush.msra.mxu1 %v6953_v43  ;;  %6954 = vst [vmem:[#allocation16_spill] sm:$0xff] %v5459_v28  ;;  %v6956_v16 = vld [vmem:[#allocation29_spill] sm:$0xff]  ;;  %v885_v58 = vadd.f32 %v884_v61, %v846_v48  ;;  %v5477_v2 = vpop.permute.xlu1 %2044  ;;  %v5487_v48 = vpop.permute.xlu2 %2040  ;;  %v5502_v29 = vsel %vm398_vm9, %v5199_v59, %v5440_v15 }
 0x1bb   : > { %2328 = vmatpush.msra.mxu3 %v5448_v17  ;;  %1578 = vmatmul.f32.gmra.mxu1 %v6909_v5  ;;  %970 = vst [vmem:[%s5274_s10 + $0x100] sm:$0xff] %v958_v8  ;;  %v5469_v5 = vsel %vm407_vm6, %v6956_v16, %v5390_v42  ;;  %v6961_v8 = vld [vmem:[#allocation7_spill] sm:$0xff]  ;;  %v5489_v61 = vpop.permute.xlu0 %2036  ;;  %v6963_v16 = vld [vmem:[#allocation10_spill] sm:$0xff]  ;;  %v5515_v59 = vsel %vm395_vm10, %v5197_v26, %v5477_v2  ;;  %v5532_v26 = vld [vmem:[%s6566_s0 + $0x10] sm:$0xff] }
 0x1bc   : > { %1619 = vmatmul.f32.gmra.mxu2 %v6955_v7  ;;  %2770 = vrot.lane.b32.xlu2 %v5247_v4, %s3777_s23  ;;  %6957 = vst [vmem:[#allocation17_spill] sm:$0xff] %v5469_v5  ;;  %v923_v7 = vadd.f32 %v922_v53, %v885_v58 }
 0x1bd   : > { %2329 = vmatpush.msra.mxu3 %v5459_v28  ;;  %2742 = vrot.lane.b32.xlu0 %v5247_v4, %s3784_s30  ;;  %6959 = vst [vmem:[#allocation24_spill] sm:$0xff] %v5477_v2 }
 0x1be   : > { %6962 = vst [vmem:[#allocation18_spill] sm:$0xff] %v5487_v48 }
 0x1bf   : > { %1654 = vmatmul.f32.gmra.mxu3 %v6958_v10  ;;  %2738 = vrot.lane.b32.xlu1 %v5247_v4, %s3785_s4  ;;  %v5495_v10 = vsel %vm401_vm8, %v6963_v16, %v5436_v52  ;;  %6966 = vst [vmem:[#allocation27_spill] sm:$0xff] %v5502_v29 }
 0x1c0   : > { %2330 = vmatpush.msra.mxu3 %v5469_v5  ;;  %6964 = vst [vmem:[#allocation21_spill] sm:$0xff] %v5495_v10  ;;  %v925_v53 = vpop.f32.mrf.mxu2 }
 0x1c1   : > { %1543 = vmatmul.f32.gmra.mxu0 %v6961_v8  ;;  %v6967_v8 = vld [vmem:[#allocation8_spill] sm:$0xff]  ;;  %6968 = vst [vmem:[#allocation26_spill] sm:$0xff] %v5515_v59 }
 0x1c2   : > { %2331 = vmatpush.msra.mxu3 %v5483_v9  ;;  %6972 = vst [vmem:[#allocation23_spill] sm:$0xff] %v5532_v26 }
 0x1c3   : > { %1581 = vmatmul.f32.gmra.mxu1 %v6965_v57  ;;  %v849_v58 = vpop.f32.mrf.mxu0 }
 0x1c4   : > { %1622 = vmatmul.f32.gmra.mxu2 %v6967_v8  ;;  %2332 = vmatpush.msra.mxu3 %v5495_v10  ;;  %v887_v52 = vpop.f32.mrf.mxu1  ;;  %v6969_v8 = vld [vmem:[#allocation9_spill] sm:$0xff] }
 0x1c5   : > { %2758 = vrot.lane.b32.xlu2 %v5247_v4, %s3780_s26  ;;  %2730 = vrot.lane.b32.xlu0 %v5247_v4, %s3787_s6  ;;  %v960_v57 = vpop.f32.mrf.mxu3  ;;  %v888_v2 = vadd.f32 %v887_v52, %v849_v58  ;;  %v5551_v15 = vpop.permute.xlu0 %2024 }
 0x1c6   : > { %2333 = vmatpush.msra.mxu3 %v5502_v29  ;;  %v961_v16 = vadd.f32 %v960_v57, %v923_v7  ;;  %v5526_v7 = vsel %vm392_vm11, %v5240_v34, %v5487_v48  ;;  %v6971_v57 = vld [vmem:[#allocation35_spill] sm:$0xff]  ;;  %v5544_v34 = vpop.permute.xlu1 %2032  ;;  %v6974_v48 = vld [vmem:[#allocation36_spill] sm:$0xff]  ;;  %6975 = vst [vmem:[#allocation28_spill] sm:$0xff] %v5551_v15 }
 0x1c7   : > { %1657 = vmatmul.f32.gmra.mxu3 %v6969_v8  ;;  %2726 = vrot.lane.b32.xlu1 %v5247_v4, %s3788_s7  ;;  %6970 = vst [vmem:[#allocation22_spill] sm:$0xff] %v5526_v7  ;;  %v5538_v8 = vsel %vm389_vm12, %v5257_v27, %v5489_v61  ;;  %v5558_v27 = vsel %vm386_vm13, %v5249_v22, %v5544_v34 }
 0x1c8   : > { %2334 = vmatpush.msra.mxu3 %v5515_v59  ;;  %971 = vst [vmem:[%s5274_s10 + $0x140] sm:$0xff] %v961_v16  ;;  %v5541_v16 = vld [vmem:[%s4051_s17 + $0x3] ss:$0 sm:$0xff]  ;;  %v926_v52 = vadd.f32 %v925_v53, %v888_v2  ;;  %v5582_v2 = vsel %vm380_vm15, %v5302_v14, %v5551_v15  ;;  %v5597_v14 = vld [vmem:[%s6566_s0 + $0x30] sm:$0xff] }
 0x1c9   : > { %1546 = vmatmul.f32.gmra.mxu0 %v6971_v57  ;;  %6973 = vst [vmem:[#allocation34_spill] sm:$0xff] %v5538_v8  ;;  %v5548_v57 = vpop.permute.xlu2 %2028 }
 0x1ca   : > { %2335 = vmatpush.msra.mxu3 %v5526_v7  ;;  %6976 = vst [vmem:[#allocation32_spill] sm:$0xff] %v5558_v27  ;;  %v1256_v58 = vpop.f32.mrf.mxu2  ;;  %v5575_v22 = vsel %vm383_vm14, %v5296_v21, %v5548_v57 }
 0x1cb   : > { %1584 = vmatmul.f32.gmra.mxu1 %v6974_v48  ;;  %v5566_v48 = vld [vmem:[%s6566_s0] sm:$0xff]  ;;  %6978 = vst [vmem:[#allocation29_spill] sm:$0xff] %v5575_v22 }
 0x1cc   : > { %1953 = vmatmul.f32.vlgmr.msrb.gmra.mxu2 %v5532_v26  ;;  %2336 = vmatpush.msra.mxu3 %v5538_v8  ;;  %6977 = vst [vmem:[#allocation6_spill] sm:$0xff] %v5566_v48 }
 0x1cd   : > { %2635 = vmatpush.msrb.mxu2 %v5385_v24  ;;  %3131 = vrot.lane.b32.xlu0 %v5541_v16, %s3775_s21  ;;  %6979 = vst [vmem:[#allocation3_spill] sm:$0xff] %v5582_v2 }
 0x1ce   : > { %2337 = vmatpush.msra.mxu3 %v5558_v27  ;;  %2746 = vrot.lane.b32.xlu2 %v5247_v4, %s3783_s29  ;;  %v1180_v53 = vpop.f32.mrf.mxu0 }
 0x1cf   : > { %2636 = vmatpush.msrb.mxu2 %v5403_v50  ;;  %1660 = vmatmul.f32.gmra.mxu3 %v6921_v11  ;;  %v5587_v50 = vld [vmem:[%s6566_s0 + $0x8] sm:$0xff]  ;;  %v1218_v11 = vpop.f32.mrf.mxu1 }
 0x1d0   : > { %2338 = vmatpush.msra.mxu3 %v5575_v22  ;;  %3127 = vrot.lane.b32.xlu1 %v5541_v16, %s3776_s22  ;;  %v963_v21 = vpop.f32.mrf.mxu3  ;;  %v1219_v15 = vadd.f32 %v1218_v11, %v1180_v53 }
 0x1d1   : > { %2637 = vmatpush.msrb.mxu2 %v5415_v20  ;;  %1877 = vmatmul.f32.vlgmr.msrb.gmra.mxu0 %v5566_v48  ;;  %v964_v24 = vadd.f32 %v963_v21, %v926_v52  ;;  %v6980_v20 = vld [vmem:[#allocation30_spill] sm:$0xff]  ;;  %v5606_v48 = vpop.permute.xlu1 %2433  ;;  %v6982_v52 = vld [vmem:[#allocation5_spill] sm:$0xff]  ;;  %v5628_v53 = vpop.permute.xlu2 %2429  ;;  %v5633_v21 = vld [vmem:[%s6566_s0 + $0x20] sm:$0xff] }
 0x1d2   : > { %2559 = vmatpush.msrb.mxu0 %v6923_v44  ;;  %2339 = vmatpush.msra.mxu3 %v5582_v2  ;;  %v5613_v44 = vld [vmem:[%s6566_s0 + $0x18] sm:$0xff] }
 0x1d3   : > { %2638 = vmatpush.msrb.mxu2 %v5429_v19  ;;  %1915 = vmatmul.f32.vlgmr.msrb.gmra.mxu1 %v5587_v50  ;;  %972 = vst [vmem:[%s5274_s10 + $0x180] sm:$0x3] %v964_v24  ;;  %v5623_v24 = vsel %vm425_vm0, %v5300_v51, %v5606_v48  ;;  %v5645_v51 = vld [vmem:[%s6566_s0 + $0x50] sm:$0xff] }
 0x1d4   : > { %1956 = vmatmul.f32.gmra.mxu2 %v5597_v14  ;;  %2597 = vmatpush.msrb.mxu1 %v6980_v20  ;;  %6981 = vst [vmem:[#allocation33_spill] sm:$0xff] %v5623_v24 }
 0x1d5   : > { %2639 = vmatpush.msrb.mxu2 %v5448_v17  ;;  %2560 = vmatpush.msrb.mxu0 %v6924_v30  ;;  %v1257_v30 = vadd.f32 %v1256_v58, %v1219_v15  ;;  %v1259_v11 = vpop.f32.mrf.mxu2  ;;  %6983 = vst [vmem:[#allocation7_spill] sm:$0xff] %v5645_v51  ;;  %v6984_v15 = vld [vmem:[#allocation31_spill] sm:$0xff]  ;;  %v5659_v17 = vpop.permute.xlu0 %2425 }
 0x1d6   : > { %2598 = vmatpush.msrb.mxu1 %v5158_v31  ;;  %2734 = vrot.lane.b32.xlu2 %v5247_v4, %s3786_s5 }
 0x1d7   : > { %2640 = vmatpush.msrb.mxu2 %v5459_v28  ;;  %2561 = vmatpush.msrb.mxu0 %v4923_v41  ;;  %v5640_v41 = vld [vmem:[%s6566_s0 + $0x28] sm:$0xff] }
 0x1d8   : > { %2599 = vmatpush.msrb.mxu1 %v6982_v52  ;;  %1991 = vmatmul.f32.vlgmr.msrb.gmra.mxu3 %v5613_v44 }
 0x1d9   : > { %2641 = vmatpush.msrb.mxu2 %v5469_v5  ;;  %2562 = vmatpush.msrb.mxu0 %v6925_v32  ;;  %v5655_v32 = vsel %vm422_vm1, %v5338_v62, %v5628_v53  ;;  %v1183_v28 = vpop.f32.mrf.mxu0  ;;  %v5671_v62 = vld [vmem:[%s6566_s0 + $0x38] sm:$0xff] }
 0x1da   : > { %2600 = vmatpush.msrb.mxu1 %v6984_v15  ;;  %2673 = vmatpush.msrb.mxu3 %v5623_v24  ;;  %v1294_v58 = vpop.f32.mrf.mxu3  ;;  %6985 = vst [vmem:[#allocation10_spill] sm:$0xff] %v5655_v32  ;;  %v1221_v19 = vpop.f32.mrf.mxu1 }
 0x1db   : > { %2642 = vmatpush.msrb.mxu2 %v5483_v9  ;;  %1880 = vmatmul.f32.gmra.mxu0 %v5633_v21  ;;  %v1295_v5 = vadd.f32 %v1294_v58, %v1257_v30  ;;  %v5673_v30 = vpop.permute.xlu1 %2421 }
 0x1dc   : > { %1918 = vmatmul.f32.gmra.mxu1 %v5640_v41  ;;  %1959 = vmatmul.f32.gmra.mxu2 %v5645_v51 }
 0x1dd   : > { %2563 = vmatpush.msrb.mxu0 %v6929_v37  ;;  %2601 = vmatpush.msrb.mxu1 %v5191_v35  ;;  %1315 = vst [vmem:[%s5274_s10 + $0x8] sm:$0xff] %v1295_v5  ;;  %v5682_v37 = vsel %vm419_vm2, %v5334_v45, %v5659_v17  ;;  %v5691_v5 = vld [vmem:[%s6566_s0 + $0x40] sm:$0xff]  ;;  %v5698_v45 = vld [vmem:[%s6566_s0 + $0x48] sm:$0xff] }
 0x1de   : > { %2643 = vmatpush.msrb.mxu2 %v5495_v10  ;;  %2674 = vmatpush.msrb.mxu3 %v5655_v32  ;;  %6986 = vst [vmem:[#allocation4_spill] sm:$0xff] %v5682_v37 }
 0x1df   : > { %2564 = vmatpush.msrb.mxu0 %v6930_v46  ;;  %2602 = vmatpush.msrb.mxu1 %v5208_v63  ;;  %v1222_v46 = vadd.f32 %v1221_v19, %v1183_v28  ;;  %6987 = vst [vmem:[#allocation8_spill] sm:$0xff] %v5691_v5  ;;  %v5705_v19 = vpop.permute.xlu2 %2417 }
 0x1e0   : > { %2644 = vmatpush.msrb.mxu2 %v5502_v29  ;;  %3119 = vrot.lane.b32.xlu0 %v5541_v16, %s3777_s23  ;;  %v1262_v58 = vpop.f32.mrf.mxu2  ;;  %6988 = vst [vmem:[#allocation9_spill] sm:$0xff] %v5698_v45  ;;  %v5720_v29 = vpop.permute.xlu0 %2413 }
 0x1e1   : > { %2565 = vmatpush.msrb.mxu0 %v6933_v56  ;;  %2603 = vmatpush.msrb.mxu1 %v5216_v40  ;;  %v5703_v56 = vld [vmem:[%s6566_s0 + $0x70] sm:$0xff]  ;;  %v1260_v28 = vadd.f32 %v1259_v11, %v1222_v46  ;;  %v6991_v46 = vld [vmem:[#allocation12_spill] sm:$0xff] }
 0x1e2   : > { %2645 = vmatpush.msrb.mxu2 %v5515_v59  ;;  %1994 = vmatmul.f32.gmra.mxu3 %v5671_v62  ;;  %6989 = vst [vmem:[#allocation35_spill] sm:$0xff] %v5703_v56 }
 0x1e3   : > { %2675 = vmatpush.msrb.mxu3 %v5682_v37  ;;  %2566 = vmatpush.msrb.mxu0 %v6934_v12  ;;  %v5716_v12 = vsel %vm416_vm3, %v5342_v25, %v5673_v30  ;;  %v1186_v59 = vpop.f32.mrf.mxu0 }
 0x1e4   : > { %2604 = vmatpush.msrb.mxu1 %v5224_v0  ;;  %2646 = vmatpush.msrb.mxu2 %v5526_v7  ;;  %6990 = vst [vmem:[#allocation36_spill] sm:$0xff] %v5716_v12  ;;  %v1224_v11 = vpop.f32.mrf.mxu1  ;;  %v5728_v7 = vsel %vm413_vm4, %v5379_v49, %v5705_v19 }
 0x1e5   : > { %3115 = vrot.lane.b32.xlu1 %v5541_v16, %s3778_s24  ;;  %1883 = vmatmul.f32.gmra.mxu0 %v5691_v5  ;;  %6992 = vst [vmem:[#allocation30_spill] sm:$0xff] %v5728_v7  ;;  %v1225_v49 = vadd.f32 %v1224_v11, %v1186_v59 }
 0x1e6   : > { %1921 = vmatmul.f32.gmra.mxu1 %v5698_v45  ;;  %1962 = vmatmul.f32.gmra.mxu2 %v5703_v56 }
 0x1e7   : > { %2567 = vmatpush.msrb.mxu0 %v6938_v3  ;;  %2605 = vmatpush.msrb.mxu1 %v6991_v46  ;;  %v1297_v25 = vpop.f32.mrf.mxu3  ;;  %v5737_v3 = vld [vmem:[%s6566_s0 + $0x58] sm:$0xff]  ;;  %v5739_v46 = vpop.permute.xlu1 %2409 }
 0x1e8   : > { %2647 = vmatpush.msrb.mxu2 %v5538_v8  ;;  %2676 = vmatpush.msrb.mxu3 %v5716_v12  ;;  %v1298_v10 = vadd.f32 %v1297_v25, %v1260_v28  ;;  %v5768_v59 = vpop.permute.xlu2 %2405  ;;  %v5787_v25 = vpop.permute.xlu0 %2401  ;;  %v7001_v8 = vld [vmem:[#allocation38_spill] sm:$0xff] }
 0x1e9   : > { %2568 = vmatpush.msrb.mxu0 %v6939_v36  ;;  %2606 = vmatpush.msrb.mxu1 %v5255_v18  ;;  %v5752_v36 = vsel %vm410_vm5, %v5377_v1, %v5720_v29  ;;  %6995 = vst [vmem:[#allocation41_spill] sm:$0xff] %v5768_v59  ;;  %v1263_v1 = vadd.f32 %v1262_v58, %v1225_v49  ;;  %v5794_v58 = vld [vmem:[%s6566_s0 + $0x78] sm:$0xff] }
 0x1ea   : > { %2648 = vmatpush.msrb.mxu2 %v5558_v27  ;;  %2677 = vmatpush.msrb.mxu3 %v5728_v7  ;;  %1316 = vst [vmem:[%s5274_s10 + $0x48] sm:$0xff] %v1298_v10  ;;  %v5766_v10 = vld [vmem:[%s6566_s0 + $0x68] sm:$0xff] }
 0x1eb   : > { %2569 = vmatpush.msrb.mxu0 %v6941_v6  ;;  %2607 = vmatpush.msrb.mxu1 %v5265_v38  ;;  %v1265_v28 = vpop.f32.mrf.mxu2  ;;  %v5761_v6 = vld [vmem:[%s6566_s0 + $0x60] sm:$0xff]  ;;  %6994 = vst [vmem:[#allocation31_spill] sm:$0xff] %v5766_v10 }
 0x1ec   : > { %2649 = vmatpush.msrb.mxu2 %v5575_v22  ;;  %1997 = vmatmul.f32.gmra.mxu3 %v5737_v3  ;;  %6993 = vst [vmem:[#allocation5_spill] sm:$0xff] %v5761_v6 }
 0x1ed   : > { %3107 = vrot.lane.b32.xlu0 %v5541_v16, %s3780_s26  ;;  %2722 = vrot.lane.b32.xlu2 %v5247_v4, %s3789_s8  ;;  %v5775_v4 = vld [vmem:[%s6566_s0 + $0x90] sm:$0xff]  ;;  %6997 = vst [vmem:[#allocation43_spill] sm:$0xff] %v5787_v25 }
 0x1ee   : > { %2570 = vmatpush.msrb.mxu0 %v6943_v39  ;;  %2608 = vmatpush.msrb.mxu1 %v5290_v55  ;;  %6996 = vst [vmem:[#allocation42_spill] sm:$0xff] %v5775_v4  ;;  %v5785_v39 = vsel %vm407_vm6, %v5390_v42, %v5739_v46  ;;  %v5803_v42 = vsel %vm404_vm7, %v5431_v60, %v5768_v59  ;;  %v5817_v60 = vld [vmem:[%s6566_s0 + $0x80] sm:$0xff] }
 0x1ef   : > { %2650 = vmatpush.msrb.mxu2 %v5582_v2  ;;  %2678 = vmatpush.msrb.mxu3 %v5752_v36  ;;  %v1189_v11 = vpop.f32.mrf.mxu0  ;;  %v1227_v22 = vpop.f32.mrf.mxu1  ;;  %6998 = vst [vmem:[#allocation44_spill] sm:$0xff] %v5794_v58  ;;  %v6999_v2 = vld [vmem:[#allocation13_spill] sm:$0xff] }
 0x1f0   : > { %1886 = vmatmul.f32.gmra.mxu0 %v5761_v6  ;;  %1924 = vmatmul.f32.gmra.mxu1 %v5766_v10  ;;  %7002 = vst [vmem:[#allocation46_spill] sm:$0xff] %v5817_v60 }
 0x1f1   : > { %1965 = vmatmul.f32.gmra.mxu2 %v5775_v4  ;;  %2571 = vmatpush.msrb.mxu0 %v5084_v47  ;;  %v1300_v49 = vpop.f32.mrf.mxu3  ;;  %v5807_v47 = vpop.permute.xlu1 %2397 }
 0x1f2   : > { %2609 = vmatpush.msrb.mxu1 %v6999_v2  ;;  %3103 = vrot.lane.b32.xlu1 %v5541_v16, %s3781_s27  ;;  %v1301_v27 = vadd.f32 %v1300_v49, %v1263_v1  ;;  %7000 = vst [vmem:[#allocation45_spill] sm:$0xff] %v5807_v47  ;;  %v1228_v2 = vadd.f32 %v1227_v22, %v1189_v11  ;;  %v7005_v22 = vld [vmem:[#allocation14_spill] sm:$0xff]  ;;  %v5841_v11 = vpop.permute.xlu2 %2393  ;;  %v7008_v49 = vld [vmem:[#allocation11_spill] sm:$0xff] }
 0x1f3   : > { %2572 = vmatpush.msrb.mxu0 %v6946_v33  ;;  %2679 = vmatpush.msrb.mxu3 %v5785_v39  ;;  %v5825_v33 = vld [vmem:[%s6566_s0 + $0x88] sm:$0xff]  ;;  %v5839_v1 = vsel %vm401_vm8, %v7005_v22, %v5787_v25  ;;  %7007 = vst [vmem:[#allocation49_spill] sm:$0xff] %v5841_v11 }
 0x1f4   : > { %2610 = vmatpush.msrb.mxu1 %v7001_v8  ;;  %2000 = vmatmul.f32.gmra.mxu3 %v5794_v58  ;;  %1317 = vst [vmem:[%s5274_s10 + $0x88] sm:$0xff] %v1301_v27  ;;  %v1266_v58 = vadd.f32 %v1265_v28, %v1228_v2  ;;  %v7010_v22 = vld [vmem:[#allocation40_spill] sm:$0xff] }
 0x1f5   : > { %2573 = vmatpush.msrb.mxu0 %v6950_v23  ;;  %2680 = vmatpush.msrb.mxu3 %v5803_v42  ;;  %7003 = vst [vmem:[#allocation47_spill] sm:$0xff] %v5825_v33  ;;  %v5830_v23 = vld [vmem:[%s6566_s0 + $0xb0] sm:$0xff]  ;;  %v5859_v2 = vsel %vm398_vm9, %v7010_v22, %v5807_v47  ;;  %v5861_v28 = vpop.permute.xlu0 %2389  ;;  %v5874_v22 = vld [vmem:[%s6566_s0 + $0xa0] sm:$0xff] }
 0x1f6   : > { %2611 = vmatpush.msrb.mxu1 %v5352_v54  ;;  %3123 = vrot.lane.b32.xlu2 %v5541_v16, %s3774_s20  ;;  %7004 = vst [vmem:[#allocation48_spill] sm:$0xff] %v5830_v23  ;;  %v1268_v27 = vpop.f32.mrf.mxu2 }
 0x1f7   : > { %2574 = vmatpush.msrb.mxu0 %v6953_v43  ;;  %3095 = vrot.lane.b32.xlu0 %v5541_v16, %s3783_s29  ;;  %7006 = vst [vmem:[#allocation14_spill] sm:$0xff] %v5839_v1  ;;  %v5850_v43 = vld [vmem:[%s6566_s0 + $0x98] sm:$0xff] }
 0x1f8   : > { %2612 = vmatpush.msrb.mxu1 %v7008_v49  ;;  %1889 = vmatmul.f32.gmra.mxu0 %v5817_v60  ;;  %7009 = vst [vmem:[#allocation50_spill] sm:$0xff] %v5850_v43  ;;  %v7012_v60 = vld [vmem:[#allocation24_spill] sm:$0xff] }
 0x1f9   : > { %1927 = vmatmul.f32.gmra.mxu1 %v5825_v33  ;;  %1968 = vmatmul.f32.gmra.mxu2 %v5830_v23  ;;  %v1192_v54 = vpop.f32.mrf.mxu0  ;;  %7011 = vst [vmem:[#allocation40_spill] sm:$0xff] %v5861_v28  ;;  %v1230_v23 = vpop.f32.mrf.mxu1  ;;  %v5868_v49 = vsel %vm395_vm10, %v7012_v60, %v5841_v11  ;;  %v5886_v60 = vld [vmem:[%s6566_s0 + $0xd0] sm:$0xff] }
 0x1fa   : > { %2681 = vmatpush.msrb.mxu3 %v5839_v1  ;;  %3091 = vrot.lane.b32.xlu1 %v5541_v16, %s3784_s30  ;;  %v1231_v8 = vadd.f32 %v1230_v23, %v1192_v54  ;;  %7013 = vst [vmem:[#allocation24_spill] sm:$0xff] %v5874_v22  ;;  %v5876_v47 = vpop.permute.xlu1 %2385  ;;  %v7016_v54 = vld [vmem:[#allocation18_spill] sm:$0xff] }
 0x1fb   : > { %v1303_v33 = vpop.f32.mrf.mxu3  ;;  %7015 = vst [vmem:[#allocation52_spill] sm:$0xff] %v5886_v60 }
 0x1fc   : > { %2003 = vmatmul.f32.gmra.mxu3 %v5850_v43  ;;  %v1304_v25 = vadd.f32 %v1303_v33, %v1266_v58  ;;  %v5881_v43 = vld [vmem:[%s6566_s0 + $0xa8] sm:$0xff]  ;;  %v5898_v58 = vsel %vm392_vm11, %v7016_v54, %v5861_v28  ;;  %v1269_v33 = vadd.f32 %v1268_v27, %v1231_v8  ;;  %v5917_v8 = vsel %vm389_vm12, %v5489_v61, %v5876_v47  ;;  %v5932_v61 = vld [vmem:[%s6566_s0 + $0xc0] sm:$0xff] }
 0x1fd   : > { %2682 = vmatpush.msrb.mxu3 %v5859_v2  ;;  %7014 = vst [vmem:[#allocation51_spill] sm:$0xff] %v5881_v43 }
 0x1fe   : > { %3111 = vrot.lane.b32.xlu2 %v5541_v16, %s3779_s25  ;;  %1318 = vst [vmem:[%s5274_s10 + $0xc8] sm:$0xff] %v1304_v25  ;;  %v5906_v25 = vld [vmem:[%s6566_s0 + $0xb8] sm:$0xff] }
 0x1ff   : > { %2683 = vmatpush.msrb.mxu3 %v5868_v49  ;;  %3083 = vrot.lane.b32.xlu0 %v5541_v16, %s3786_s5  ;;  %7017 = vst [vmem:[#allocation18_spill] sm:$0xff] %v5898_v58 }
 0x200   : > { %1892 = vmatmul.f32.gmra.mxu0 %v5874_v22  ;;  %v1271_v23 = vpop.f32.mrf.mxu2  ;;  %7018 = vst [vmem:[#allocation53_spill] sm:$0xff] %v5906_v25  ;;  %v5926_v22 = vpop.permute.xlu0 %2377 }
 0x201   : > { %1930 = vmatmul.f32.gmra.mxu1 %v5881_v43  ;;  %1971 = vmatmul.f32.gmra.mxu2 %v5886_v60  ;;  %v5908_v11 = vpop.permute.xlu2 %2381  ;;  %7019 = vst [vmem:[#allocation54_spill] sm:$0xff] %v5917_v8  ;;  %v1195_v27 = vpop.f32.mrf.mxu0 }
 0x202   : > { %2684 = vmatpush.msrb.mxu3 %v5898_v58  ;;  %3079 = vrot.lane.b32.xlu1 %v5541_v16, %s3787_s6  ;;  %v1233_v54 = vpop.f32.mrf.mxu1  ;;  %v5924_v43 = vsel %vm386_vm13, %v5544_v34, %v5908_v11  ;;  %7021 = vst [vmem:[#allocation56_spill] sm:$0xff] %v5932_v61  ;;  %v5949_v34 = vsel %vm383_vm14, %v5548_v57, %v5926_v22  ;;  %v7025_v57 = vld [vmem:[#allocation28_spill] sm:$0xff] }
 0x203   : > { %v1306_v60 = vpop.f32.mrf.mxu3  ;;  %7020 = vst [vmem:[#allocation55_spill] sm:$0xff] %v5924_v43  ;;  %v1234_v59 = vadd.f32 %v1233_v54, %v1195_v27 }
 0x204   : > { %2006 = vmatmul.f32.gmra.mxu3 %v5906_v25  ;;  %v1307_v28 = vadd.f32 %v1306_v60, %v1269_v33  ;;  %v5937_v25 = vld [vmem:[%s6566_s0 + $0xc8] sm:$0xff]  ;;  %7023 = vst [vmem:[#allocation58_spill] sm:$0xff] %v5949_v34  ;;  %v5951_v60 = vpop.permute.xlu1 %2373 }
 0x205   : > { %2685 = vmatpush.msrb.mxu3 %v5917_v8  ;;  %7022 = vst [vmem:[#allocation57_spill] sm:$0xff] %v5937_v25  ;;  %v1272_v33 = vadd.f32 %v1271_v23, %v1234_v59  ;;  %v5967_v59 = vsel %vm380_vm15, %v7025_v57, %v5951_v60  ;;  %v7027_v57 = vld [vmem:[#allocation6_spill] sm:$0xff] }
 0x206   : > { %3099 = vrot.lane.b32.xlu2 %v5541_v16, %s3782_s28  ;;  %1319 = vst [vmem:[%s5274_s10 + $0x108] sm:$0xff] %v1307_v28  ;;  %v5959_v28 = vld [vmem:[%s6566_s0 + $0xd8] sm:$0xff] }
 0x207   : > { %2686 = vmatpush.msrb.mxu3 %v5924_v43  ;;  %3071 = vrot.lane.b32.xlu0 %v5541_v16, %s3789_s8  ;;  %7024 = vst [vmem:[#allocation59_spill] sm:$0xff] %v5951_v60 }
 0x208   : > { %1895 = vmatmul.f32.gmra.mxu0 %v5932_v61  ;;  %v1274_v27 = vpop.f32.mrf.mxu2  ;;  %7026 = vst [vmem:[#allocation28_spill] sm:$0xff] %v5967_v59 }
 0x209   : > { %1933 = vmatmul.f32.gmra.mxu1 %v5937_v25  ;;  %2302 = vmatmul.f32.vlgmr.msra.gmra.mxu2 %v5532_v26  ;;  %v1198_v23 = vpop.f32.mrf.mxu0 }
 0x20a   : > { %2984 = vmatpush.msra.mxu2 %v5623_v24  ;;  %2687 = vmatpush.msrb.mxu3 %v5949_v34  ;;  %v1236_v54 = vpop.f32.mrf.mxu1 }
 0x20b   : > { %v1309_v25 = vpop.f32.mrf.mxu3  ;;  %v1237_v61 = vadd.f32 %v1236_v54, %v1198_v23 }
 0x20c   : > { %2985 = vmatpush.msra.mxu2 %v5655_v32  ;;  %2009 = vmatmul.f32.gmra.mxu3 %v5959_v28  ;;  %v1310_v26 = vadd.f32 %v1309_v25, %v1272_v33  ;;  %v7028_v25 = vld [vmem:[#allocation37_spill] sm:$0xff] }
 0x20d   : > { %2688 = vmatpush.msrb.mxu3 %v5967_v59  ;;  %v1275_v60 = vadd.f32 %v1274_v27, %v1237_v61  ;;  %v7029_v61 = vld [vmem:[#allocation39_spill] sm:$0xff] }
 0x20e   : > { %2986 = vmatpush.msra.mxu2 %v5682_v37  ;;  %3087 = vrot.lane.b32.xlu2 %v5541_v16, %s3785_s4  ;;  %1320 = vst [vmem:[%s5274_s10 + $0x148] sm:$0xff] %v1310_v26  ;;  %v5978_v24 = vpop.permute.xlu2 %2782  ;;  %v5985_v26 = vpop.permute.xlu0 %2778  ;;  %v7030_v37 = vld [vmem:[#allocation19_spill] sm:$0xff] }
 0x20f   : > { %v5993_v27 = vsel %vm425_vm0, %v5606_v48, %v5978_v24 }
 0x210   : > { %2987 = vmatpush.msra.mxu2 %v5716_v12  ;;  %2226 = vmatmul.f32.vlgmr.msra.gmra.mxu0 %v7027_v57  ;;  %v1605_v32 = vpop.f32.mrf.mxu2  ;;  %v5997_v12 = vpop.permute.xlu1 %2774 }
 0x211   : > { %2264 = vmatmul.f32.vlgmr.msra.gmra.mxu1 %v5587_v50  ;;  %2305 = vmatmul.f32.gmra.mxu2 %v5597_v14  ;;  %v1529_v33 = vpop.f32.mrf.mxu0 }
 0x212   : > { %2908 = vmatpush.msra.mxu0 %v6980_v20  ;;  %2946 = vmatpush.msra.mxu1 %v7028_v25  ;;  %v1567_v23 = vpop.f32.mrf.mxu1 }
 0x213   : > { %2988 = vmatpush.msra.mxu2 %v5728_v7  ;;  %v1312_v54 = vpop.f32.mrf.mxu3  ;;  %v1568_v7 = vadd.f32 %v1567_v23, %v1529_v33  ;;  %v6024_v23 = vsel %vm419_vm2, %v5659_v17, %v5997_v12 }
 0x214   : > { %2909 = vmatpush.msra.mxu0 %v5158_v31  ;;  %2947 = vmatpush.msra.mxu1 %v7029_v61  ;;  %v1313_v20 = vadd.f32 %v1312_v54, %v1275_v60  ;;  %v7031_v31 = vld [vmem:[#allocation25_spill] sm:$0xff] }
 0x215   : > { %2989 = vmatpush.msra.mxu2 %v5752_v36  ;;  %2340 = vmatmul.f32.vlgmr.msra.gmra.mxu3 %v5613_v44  ;;  %v1606_v60 = vadd.f32 %v1605_v32, %v1568_v7  ;;  %v7033_v32 = vld [vmem:[#allocation16_spill] sm:$0xff] }
 0x216   : > { %2910 = vmatpush.msra.mxu0 %v6982_v52  ;;  %2948 = vmatpush.msra.mxu1 %v7030_v37  ;;  %1321 = vst [vmem:[%s5274_s10 + $0x188] sm:$0x3] %v1313_v20  ;;  %v6012_v52 = vsel %vm422_vm1, %v5628_v53, %v5985_v26  ;;  %v6016_v33 = vpop.permute.xlu2 %2770 }
 0x217   : > { %2990 = vmatpush.msra.mxu2 %v5785_v39  ;;  %3022 = vmatpush.msra.mxu3 %v5993_v27 }
 0x218   : > { %2911 = vmatpush.msra.mxu0 %v6984_v15  ;;  %2949 = vmatpush.msra.mxu1 %v7031_v31  ;;  %v1608_v48 = vpop.f32.mrf.mxu2  ;;  %v7032_v15 = vld [vmem:[#allocation20_spill] sm:$0xff] }
 0x219   : > { %2991 = vmatpush.msra.mxu2 %v5803_v42  ;;  %2229 = vmatmul.f32.gmra.mxu0 %v5633_v21 }
 0x21a   : > { %2267 = vmatmul.f32.gmra.mxu1 %v5640_v41  ;;  %2308 = vmatmul.f32.gmra.mxu2 %v5645_v51  ;;  %v1532_v53 = vpop.f32.mrf.mxu0  ;;  %v7034_v51 = vld [vmem:[#allocation17_spill] sm:$0xff] }
 0x21b   : > { %2912 = vmatpush.msra.mxu0 %v5191_v35  ;;  %2950 = vmatpush.msra.mxu1 %v7032_v15  ;;  %v1570_v54 = vpop.f32.mrf.mxu1  ;;  %v6030_v35 = vpop.permute.xlu0 %2766 }
 0x21c   : > { %2992 = vmatpush.msra.mxu2 %v5839_v1  ;;  %3023 = vmatpush.msra.mxu3 %v6012_v52  ;;  %v1643_v7 = vpop.f32.mrf.mxu3  ;;  %v1571_v17 = vadd.f32 %v1570_v54, %v1532_v53  ;;  %v7035_v53 = vld [vmem:[#allocation12_spill] sm:$0xff] }
 0x21d   : > { %2913 = vmatpush.msra.mxu0 %v5208_v63  ;;  %2951 = vmatpush.msra.mxu1 %v7033_v32  ;;  %v1644_v20 = vadd.f32 %v1643_v7, %v1606_v60 }
 0x21e   : > { %2993 = vmatpush.msra.mxu2 %v5859_v2  ;;  %3024 = vmatpush.msra.mxu3 %v6024_v23  ;;  %v1609_v63 = vadd.f32 %v1608_v48, %v1571_v17 }
 0x21f   : > { %2914 = vmatpush.msra.mxu0 %v5216_v40  ;;  %2952 = vmatpush.msra.mxu1 %v7034_v51  ;;  %v6036_v1 = vpop.permute.xlu1 %2762  ;;  %1664 = vst [vmem:[%s5274_s10 + $0x10] sm:$0xff] %v1644_v20  ;;  %v6049_v40 = vsel %vm416_vm3, %v5673_v30, %v6016_v33  ;;  %v6055_v54 = vpop.permute.xlu2 %2758  ;;  %v6063_v30 = vsel %vm413_vm4, %v5705_v19, %v6030_v35  ;;  %v7040_v19 = vld [vmem:[#allocation26_spill] sm:$0xff] }
 0x220   : > { %2994 = vmatpush.msra.mxu2 %v5868_v49  ;;  %2343 = vmatmul.f32.gmra.mxu3 %v5671_v62  ;;  %7037 = vst [vmem:[#allocation6_spill] sm:$0xff] %v6055_v54 }
 0x221   : > { %2915 = vmatpush.msra.mxu0 %v5224_v0  ;;  %2953 = vmatpush.msra.mxu1 %v5483_v9  ;;  %v1611_v60 = vpop.f32.mrf.mxu2  ;;  %v7036_v0 = vld [vmem:[#allocation21_spill] sm:$0xff] }
 0x222   : > { %2995 = vmatpush.msra.mxu2 %v5898_v58  ;;  %2232 = vmatmul.f32.gmra.mxu0 %v5691_v5  ;;  %v7059_v5 = vld [vmem:[#allocation45_spill] sm:$0xff]  ;;  %v7060_v58 = vld [vmem:[#allocation48_spill] sm:$0xff] }
 0x223   : > { %2270 = vmatmul.f32.gmra.mxu1 %v5698_v45  ;;  %2311 = vmatmul.f32.gmra.mxu2 %v5703_v56  ;;  %v7056_v45 = vld [vmem:[#allocation3_spill] sm:$0xff] }
 0x224   : > { %2916 = vmatpush.msra.mxu0 %v7035_v53  ;;  %2954 = vmatpush.msra.mxu1 %v7036_v0  ;;  %v7038_v53 = vld [vmem:[#allocation27_spill] sm:$0xff] }
 0x225   : > { %2996 = vmatpush.msra.mxu2 %v5917_v8  ;;  %3025 = vmatpush.msra.mxu3 %v6049_v40  ;;  %v1646_v48 = vpop.f32.mrf.mxu3  ;;  %v1535_v7 = vpop.f32.mrf.mxu0 }
 0x226   : > { %3075 = vrot.lane.b32.xlu2 %v5541_v16, %s3788_s7  ;;  %2917 = vmatpush.msra.mxu0 %v5255_v18  ;;  %v1647_v20 = vadd.f32 %v1646_v48, %v1609_v63  ;;  %v1573_v17 = vpop.f32.mrf.mxu1  ;;  %v6081_v18 = vsel %vm410_vm5, %v5720_v29, %v6036_v1  ;;  %v7042_v63 = vld [vmem:[#allocation22_spill] sm:$0xff]  ;;  %v6095_v29 = vsel %vm407_vm6, %v5739_v46, %v6055_v54  ;;  %v7055_v54 = vld [vmem:[#allocation11_spill] sm:$0xff] }
 0x227   : > { %2955 = vmatpush.msra.mxu1 %v7038_v53  ;;  %2997 = vmatpush.msra.mxu2 %v5924_v43  ;;  %v6070_v56 = vpop.permute.xlu0 %2754  ;;  %v7050_v43 = vld [vmem:[#allocation15_spill] sm:$0xff] }
 0x228   : > { %7039 = vst [vmem:[#allocation37_spill] sm:$0xff] %v6070_v56  ;;  %3026 = vmatpush.msra.mxu3 %v6063_v30  ;;  %2918 = vmatpush.msra.mxu0 %v5265_v38  ;;  %v1574_v38 = vadd.f32 %v1573_v17, %v1535_v7  ;;  %v7045_v7 = vld [vmem:[#allocation41_spill] sm:$0xff] }
 0x229   : > { %1665 = vst [vmem:[%s5274_s10 + $0x50] sm:$0xff] %v1647_v20  ;;  %2956 = vmatpush.msra.mxu1 %v7040_v19  ;;  %2998 = vmatpush.msra.mxu2 %v5949_v34  ;;  %v6083_v16 = vpop.permute.xlu1 %2750  ;;  %v7044_v20 = vld [vmem:[#allocation34_spill] sm:$0xff]  ;;  %v6105_v17 = vsel %vm404_vm7, %v7045_v7, %v6070_v56  ;;  %v7051_v7 = vld [vmem:[#allocation29_spill] sm:$0xff] }
 0x22a   : > { %7041 = vst [vmem:[#allocation39_spill] sm:$0xff] %v6083_v16  ;;  %2346 = vmatmul.f32.gmra.mxu3 %v5737_v3  ;;  %2919 = vmatpush.msra.mxu0 %v5290_v55  ;;  %v7043_v55 = vld [vmem:[#allocation13_spill] sm:$0xff]  ;;  %v1612_v46 = vadd.f32 %v1611_v60, %v1574_v38  ;;  %v7054_v60 = vld [vmem:[#allocation43_spill] sm:$0xff] }
 0x22b   : > { %2957 = vmatpush.msra.mxu1 %v7042_v63  ;;  %2999 = vmatpush.msra.mxu2 %v5967_v59 }
 0x22c   : > { %3027 = vmatpush.msra.mxu3 %v6081_v18  ;;  %2235 = vmatmul.f32.gmra.mxu0 %v5761_v6  ;;  %v1614_v48 = vpop.f32.mrf.mxu2  ;;  %v6107_v6 = vpop.permute.xlu2 %2746 }
 0x22d   : > { %2273 = vmatmul.f32.gmra.mxu1 %v5766_v10  ;;  %2314 = vmatmul.f32.gmra.mxu2 %v5775_v4  ;;  %7046 = vst [vmem:[#allocation19_spill] sm:$0xff] %v6107_v6  ;;  %v7047_v10 = vld [vmem:[#allocation38_spill] sm:$0xff]  ;;  %v7048_v4 = vld [vmem:[#allocation32_spill] sm:$0xff] }
 0x22e   : > { %2920 = vmatpush.msra.mxu0 %v7043_v55  ;;  %2958 = vmatpush.msra.mxu1 %v7044_v20  ;;  %v1538_v59 = vpop.f32.mrf.mxu0  ;;  %v7053_v20 = vld [vmem:[#allocation44_spill] sm:$0xff] }
 0x22f   : > { %3028 = vmatpush.msra.mxu3 %v6095_v29  ;;  %v1576_v34 = vpop.f32.mrf.mxu1  ;;  %v6112_v55 = vpop.permute.xlu0 %2742 }
 0x230   : > { %2921 = vmatpush.msra.mxu0 %v7047_v10  ;;  %2959 = vmatpush.msra.mxu1 %v7048_v4  ;;  %7049 = vst [vmem:[#allocation25_spill] sm:$0xff] %v6112_v55  ;;  %v6124_v10 = vsel %vm401_vm8, %v7054_v60, %v6083_v16  ;;  %v1577_v4 = vadd.f32 %v1576_v34, %v1538_v59  ;;  %v7061_v59 = vld [vmem:[#allocation49_spill] sm:$0xff]  ;;  %v7074_v16 = vld [vmem:[#allocation59_spill] sm:$0xff] }
 0x231   : > { %3029 = vmatpush.msra.mxu3 %v6105_v17  ;;  %v6117_v8 = vpop.permute.xlu1 %2738 }
 0x232   : > { %2922 = vmatpush.msra.mxu0 %v7050_v43  ;;  %2960 = vmatpush.msra.mxu1 %v7051_v7  ;;  %v1649_v56 = vpop.f32.mrf.mxu3  ;;  %7052 = vst [vmem:[#allocation20_spill] sm:$0xff] %v6117_v8  ;;  %v7057_v43 = vld [vmem:[#allocation46_spill] sm:$0xff]  ;;  %v7058_v7 = vld [vmem:[#allocation47_spill] sm:$0xff] }
 0x233   : > { %2349 = vmatmul.f32.gmra.mxu3 %v7053_v20  ;;  %v1650_v38 = vadd.f32 %v1649_v56, %v1612_v46  ;;  %v6134_v20 = vsel %vm398_vm9, %v7059_v5, %v6107_v6  ;;  %v1615_v46 = vadd.f32 %v1614_v48, %v1577_v4  ;;  %v7069_v6 = vld [vmem:[#allocation52_spill] sm:$0xff] }
 0x234   : > { %2923 = vmatpush.msra.mxu0 %v7055_v54  ;;  %2961 = vmatpush.msra.mxu1 %v7056_v45  ;;  %v6143_v54 = vsel %vm395_vm10, %v7061_v59, %v6112_v55  ;;  %v6146_v60 = vpop.permute.xlu2 %2734  ;;  %v7065_v59 = vld [vmem:[#allocation50_spill] sm:$0xff] }
 0x235   : > { %2238 = vmatmul.f32.gmra.mxu0 %v7057_v43  ;;  %2276 = vmatmul.f32.gmra.mxu1 %v7058_v7  ;;  %1666 = vst [vmem:[%s5274_s10 + $0x90] sm:$0xff] %v1650_v38  ;;  %v7063_v38 = vld [vmem:[#allocation40_spill] sm:$0xff]  ;;  %v6162_v4 = vsel %vm389_vm12, %v5876_v47, %v6146_v60 }
 0x236   : > { %2317 = vmatmul.f32.gmra.mxu2 %v7060_v58  ;;  %3030 = vmatpush.msra.mxu3 %v6124_v10  ;;  %v1541_v56 = vpop.f32.mrf.mxu0  ;;  %v1617_v34 = vpop.f32.mrf.mxu2  ;;  %7062 = vst [vmem:[#allocation16_spill] sm:$0xff] %v6146_v60  ;;  %v6152_v58 = vsel %vm392_vm11, %v7063_v38, %v6117_v8  ;;  %v7067_v38 = vld [vmem:[#allocation24_spill] sm:$0xff]  ;;  %v7068_v8 = vld [vmem:[#allocation51_spill] sm:$0xff] }
 0x237   : > { %v6155_v43 = vpop.permute.xlu0 %2730 }
 0x238   : > { %3031 = vmatpush.msra.mxu3 %v6134_v20  ;;  %v1579_v5 = vpop.f32.mrf.mxu1  ;;  %7064 = vst [vmem:[#allocation17_spill] sm:$0xff] %v6155_v43 }
 0x239   : > { %v1580_v55 = vadd.f32 %v1579_v5, %v1541_v56  ;;  %v6165_v45 = vpop.permute.xlu1 %2726 }
 0x23a   : > { %3032 = vmatpush.msra.mxu3 %v6143_v54  ;;  %v1652_v7 = vpop.f32.mrf.mxu3  ;;  %7066 = vst [vmem:[#allocation12_spill] sm:$0xff] %v6165_v45  ;;  %v6182_v56 = vsel %vm383_vm14, %v5926_v22, %v6165_v45 }
 0x23b   : > { %2352 = vmatmul.f32.gmra.mxu3 %v7065_v59  ;;  %v1653_v48 = vadd.f32 %v1652_v7, %v1615_v46  ;;  %v6174_v59 = vsel %vm386_vm13, %v5908_v11, %v6155_v43  ;;  %v1618_v7 = vadd.f32 %v1617_v34, %v1580_v55  ;;  %v7072_v55 = vld [vmem:[#allocation57_spill] sm:$0xff]  ;;  %v7073_v34 = vld [vmem:[#allocation23_spill] sm:$0xff] }
 0x23c   : > { %3033 = vmatpush.msra.mxu3 %v6152_v58 }
 0x23d   : > { %2241 = vmatmul.f32.gmra.mxu0 %v7067_v38  ;;  %2279 = vmatmul.f32.gmra.mxu1 %v7068_v8  ;;  %1667 = vst [vmem:[%s5274_s10 + $0xd0] sm:$0xff] %v1653_v48  ;;  %v7070_v48 = vld [vmem:[#allocation53_spill] sm:$0xff]  ;;  %v7071_v38 = vld [vmem:[#allocation56_spill] sm:$0xff] }
 0x23e   : > { %2320 = vmatmul.f32.gmra.mxu2 %v7069_v6  ;;  %3034 = vmatpush.msra.mxu3 %v6162_v4  ;;  %v1544_v47 = vpop.f32.mrf.mxu0 }
 0x23f   : > { %v1620_v46 = vpop.f32.mrf.mxu2 }
 0x240   : > { %3035 = vmatpush.msra.mxu3 %v6174_v59  ;;  %v1582_v5 = vpop.f32.mrf.mxu1 }
 0x241   : > { %v1583_v8 = vadd.f32 %v1582_v5, %v1544_v47 }
 0x242   : > { %3036 = vmatpush.msra.mxu3 %v6182_v56  ;;  %v1655_v11 = vpop.f32.mrf.mxu3 }
 0x243   : > { %2355 = vmatmul.f32.gmra.mxu3 %v7070_v48  ;;  %v1656_v6 = vadd.f32 %v1655_v11, %v1618_v7  ;;  %v1621_v43 = vadd.f32 %v1620_v46, %v1583_v8 }
 0x245   : > { %2244 = vmatmul.f32.gmra.mxu0 %v7071_v38  ;;  %2282 = vmatmul.f32.gmra.mxu1 %v7072_v55  ;;  %1668 = vst [vmem:[%s5274_s10 + $0x110] sm:$0xff] %v1656_v6 }
 0x246   : > { %2651 = vmatmul.f32.vlgmr.msrb.gmra.mxu2 %v7073_v34  ;;  %v1547_v22 = vpop.f32.mrf.mxu0 }
 0x247   : > { %3333 = vmatpush.msrb.mxu2 %v5993_v27  ;;  %v6192_v45 = vpop.permute.xlu2 %2722  ;;  %v1623_v60 = vpop.f32.mrf.mxu2 }
 0x248   : > { %v6198_v47 = vsel %vm380_vm15, %v7074_v16, %v6192_v45  ;;  %v1585_v7 = vpop.f32.mrf.mxu1  ;;  %v3132_v27 = vpop.permute.xlu0 %3131  ;;  %v7075_v16 = vld [vmem:[#allocation33_spill] sm:$0xff] }
 0x249   : > { %3334 = vmatpush.msrb.mxu2 %v6012_v52  ;;  %3037 = vmatpush.msra.mxu3 %v6198_v47  ;;  %v1586_v8 = vadd.f32 %v1585_v7, %v1547_v22  ;;  %v3128_v52 = vpop.permute.xlu1 %3127 }
 0x24a   : > { %v1658_v6 = vpop.f32.mrf.mxu3 }
 0x24b   : > { %3335 = vmatpush.msrb.mxu2 %v6024_v23  ;;  %2358 = vmatmul.f32.gmra.mxu3 %v5959_v28  ;;  %v1659_v5 = vadd.f32 %v1658_v6, %v1621_v43  ;;  %v1624_v23 = vadd.f32 %v1623_v60, %v1586_v8  ;;  %v7078_v60 = vld [vmem:[#allocation36_spill] sm:$0xff]  ;;  %v7090_v6 = vld [vmem:[#allocation55_spill] sm:$0xff] }
 0x24d   : > { %3336 = vmatpush.msrb.mxu2 %v6049_v40  ;;  %2575 = vmatmul.f32.vlgmr.msrb.gmra.mxu0 %v7027_v57  ;;  %1669 = vst [vmem:[%s5274_s10 + $0x150] sm:$0xff] %v1659_v5  ;;  %v7076_v57 = vld [vmem:[#allocation10_spill] sm:$0xff]  ;;  %v7092_v5 = vld [vmem:[#allocation39_spill] sm:$0xff] }
 0x24e   : > { %2613 = vmatmul.f32.vlgmr.msrb.gmra.mxu1 %v5587_v50  ;;  %3257 = vmatpush.msrb.mxu0 %v7028_v25  ;;  %v1878_v46 = vpop.f32.mrf.mxu0  ;;  %v3163_v50 = vsel %vm425_vm0, %v5978_v24, %v3132_v27  ;;  %v7091_v27 = vld [vmem:[#allocation35_spill] sm:$0xff] }
 0x24f   : > { %3295 = vmatpush.msrb.mxu1 %v7075_v16  ;;  %3337 = vmatpush.msrb.mxu2 %v6063_v30  ;;  %v1954_v11 = vpop.f32.mrf.mxu2  ;;  %v7077_v30 = vld [vmem:[#allocation4_spill] sm:$0xff] }
 0x250   : > { %3258 = vmatpush.msrb.mxu0 %v7029_v61  ;;  %v3124_v43 = vpop.permute.xlu2 %3123  ;;  %2654 = vmatmul.f32.gmra.mxu2 %v5597_v14  ;;  %v1916_v40 = vpop.f32.mrf.mxu1  ;;  %v3161_v14 = vsel %vm422_vm1, %v5985_v26, %v3128_v52  ;;  %v7093_v52 = vld [vmem:[#allocation29_spill] sm:$0xff] }
 0x251   : > { %3296 = vmatpush.msrb.mxu1 %v7076_v57  ;;  %3338 = vmatpush.msrb.mxu2 %v6081_v18  ;;  %v1917_v18 = vadd.f32 %v1916_v40, %v1878_v46  ;;  %v7094_v46 = vld [vmem:[#allocation58_spill] sm:$0xff] }
 0x252   : > { %3259 = vmatpush.msrb.mxu0 %v7030_v37  ;;  %v1661_v25 = vpop.f32.mrf.mxu3  ;;  %v3120_v24 = vpop.permute.xlu0 %3119  ;;  %v7079_v37 = vld [vmem:[#allocation30_spill] sm:$0xff] }
 0x253   : > { %3297 = vmatpush.msrb.mxu1 %v7077_v30  ;;  %3339 = vmatpush.msrb.mxu2 %v6095_v29  ;;  %v1662_v61 = vadd.f32 %v1661_v25, %v1624_v23  ;;  %v1955_v26 = vadd.f32 %v1954_v11, %v1917_v18  ;;  %v7095_v11 = vld [vmem:[#allocation44_spill] sm:$0xff]  ;;  %v7097_v25 = vld [vmem:[#allocation3_spill] sm:$0xff] }
 0x254   : > { %2689 = vmatmul.f32.vlgmr.msrb.gmra.mxu3 %v5613_v44  ;;  %3260 = vmatpush.msrb.mxu0 %v7031_v31  ;;  %v3159_v44 = vsel %vm419_vm2, %v5997_v12, %v3124_v43  ;;  %v7096_v43 = vld [vmem:[#allocation19_spill] sm:$0xff] }
 0x255   : > { %3371 = vmatpush.msrb.mxu3 %v3163_v50  ;;  %3298 = vmatpush.msrb.mxu1 %v7078_v60  ;;  %1670 = vst [vmem:[%s5274_s10 + $0x190] sm:$0x3] %v1662_v61  ;;  %v7098_v61 = vld [vmem:[#allocation28_spill] sm:$0xff]  ;;  %v7100_v60 = vld [vmem:[#allocation25_spill] sm:$0xff] }
 0x256   : > { %3340 = vmatpush.msrb.mxu2 %v6105_v17  ;;  %3261 = vmatpush.msrb.mxu0 %v7032_v15 }
 0x257   : > { %3299 = vmatpush.msrb.mxu1 %v7079_v37  ;;  %3372 = vmatpush.msrb.mxu3 %v3161_v14  ;;  %v1957_v31 = vpop.f32.mrf.mxu2  ;;  %v3116_v12 = vpop.permute.xlu1 %3115  ;;  %v7099_v14 = vld [vmem:[#allocation5_spill] sm:$0xff] }
 0x258   : > { %3341 = vmatpush.msrb.mxu2 %v6124_v10  ;;  %3262 = vmatpush.msrb.mxu0 %v7033_v32  ;;  %v1881_v29 = vpop.f32.mrf.mxu0  ;;  %v3112_v15 = vpop.permute.xlu2 %3111 }
 0x259   : > { %3300 = vmatpush.msrb.mxu1 %v5752_v36  ;;  %3373 = vmatpush.msrb.mxu3 %v3159_v44  ;;  %v1919_v17 = vpop.f32.mrf.mxu1  ;;  %v7101_v44 = vld [vmem:[#allocation31_spill] sm:$0xff] }
 0x25a   : > { %3342 = vmatpush.msrb.mxu2 %v6134_v20  ;;  %3263 = vmatpush.msrb.mxu0 %v7034_v51  ;;  %v3157_v51 = vsel %vm416_vm3, %v6016_v33, %v3120_v24  ;;  %v7082_v20 = vld [vmem:[#allocation18_spill] sm:$0xff] }
 0x25b   : > { %3301 = vmatpush.msrb.mxu1 %v5785_v39  ;;  %2578 = vmatmul.f32.gmra.mxu0 %v5633_v21  ;;  %v1992_v10 = vpop.f32.mrf.mxu3  ;;  %v1920_v21 = vadd.f32 %v1919_v17, %v1881_v29  ;;  %v7080_v39 = vld [vmem:[#allocation14_spill] sm:$0xff] }
 0x25c   : > { %3343 = vmatpush.msrb.mxu2 %v6143_v54  ;;  %2692 = vmatmul.f32.gmra.mxu3 %v5671_v62  ;;  %v1993_v36 = vadd.f32 %v1992_v10, %v1955_v26  ;;  %v7084_v54 = vld [vmem:[#allocation9_spill] sm:$0xff]  ;;  %v7102_v26 = vld [vmem:[#allocation20_spill] sm:$0xff] }
 0x25d   : > { %3264 = vmatpush.msrb.mxu0 %v5483_v9  ;;  %3302 = vmatpush.msrb.mxu1 %v5803_v42  ;;  %v3155_v9 = vsel %vm413_vm4, %v6030_v35, %v3116_v12  ;;  %v7103_v12 = vld [vmem:[#allocation42_spill] sm:$0xff] }
 0x25e   : > { %3344 = vmatpush.msrb.mxu2 %v6152_v58  ;;  %2616 = vmatmul.f32.gmra.mxu1 %v5640_v41  ;;  %2013 = vst [vmem:[%s5274_s10 + $0x18] sm:$0xff] %v1993_v36  ;;  %v1958_v41 = vadd.f32 %v1957_v31, %v1920_v21  ;;  %v7081_v58 = vld [vmem:[#allocation7_spill] sm:$0xff] }
 0x25f   : > { %3265 = vmatpush.msrb.mxu0 %v7036_v0  ;;  %3303 = vmatpush.msrb.mxu1 %v7080_v39  ;;  %v3108_v62 = vpop.permute.xlu0 %3107  ;;  %v1960_v42 = vpop.f32.mrf.mxu2  ;;  %v7105_v39 = vld [vmem:[#allocation50_spill] sm:$0xff] }
 0x260   : > { %3345 = vmatpush.msrb.mxu2 %v6162_v4  ;;  %3374 = vmatpush.msrb.mxu3 %v3157_v51  ;;  %v3100_v0 = vpop.permute.xlu2 %3099 }
 0x261   : > { %3266 = vmatpush.msrb.mxu0 %v7038_v53  ;;  %3304 = vmatpush.msrb.mxu1 %v5859_v2  ;;  %v3153_v2 = vsel %vm410_vm5, %v6036_v1, %v3112_v15  ;;  %v7087_v1 = vld [vmem:[#allocation54_spill] sm:$0xff]  ;;  %v3147_v8 = vsel %vm401_vm8, %v7092_v5, %v3100_v0  ;;  %v7104_v15 = vld [vmem:[#allocation16_spill] sm:$0xff] }
 0x262   : > { %3346 = vmatpush.msrb.mxu2 %v6174_v59  ;;  %3375 = vmatpush.msrb.mxu3 %v3155_v9  ;;  %v1884_v33 = vpop.f32.mrf.mxu0  ;;  %v7085_v59 = vld [vmem:[#allocation6_spill] sm:$0xff]  ;;  %v7106_v9 = vld [vmem:[#allocation17_spill] sm:$0xff] }
 0x263   : > { %2657 = vmatmul.f32.gmra.mxu2 %v7081_v58  ;;  %3267 = vmatpush.msrb.mxu0 %v7040_v19  ;;  %v1922_v32 = vpop.f32.mrf.mxu1  ;;  %v7107_v58 = vld [vmem:[#allocation46_spill] sm:$0xff] }
 0x264   : > { %3305 = vmatpush.msrb.mxu1 %v5868_v49  ;;  %3347 = vmatpush.msrb.mxu2 %v6182_v56  ;;  %v3104_v35 = vpop.permute.xlu1 %3103  ;;  %v7083_v49 = vld [vmem:[#allocation8_spill] sm:$0xff]  ;;  %v1923_v4 = vadd.f32 %v1922_v32, %v1884_v33  ;;  %v7088_v56 = vld [vmem:[#allocation37_spill] sm:$0xff]  ;;  %v7108_v32 = vld [vmem:[#allocation47_spill] sm:$0xff] }
 0x265   : > { %2695 = vmatmul.f32.gmra.mxu3 %v5737_v3  ;;  %3268 = vmatpush.msrb.mxu0 %v7042_v63  ;;  %v1995_v53 = vpop.f32.mrf.mxu3  ;;  %v3151_v3 = vsel %vm407_vm6, %v7085_v59, %v3108_v62  ;;  %v7086_v63 = vld [vmem:[#allocation34_spill] sm:$0xff]  ;;  %v3149_v34 = vsel %vm404_vm7, %v7088_v56, %v3104_v35  ;;  %v7110_v59 = vld [vmem:[#allocation24_spill] sm:$0xff] }
 0x266   : > { %3306 = vmatpush.msrb.mxu1 %v7082_v20  ;;  %3348 = vmatpush.msrb.mxu2 %v6198_v47  ;;  %v1996_v19 = vadd.f32 %v1995_v53, %v1958_v41  ;;  %v7089_v47 = vld [vmem:[#allocation32_spill] sm:$0xff]  ;;  %v1961_v23 = vadd.f32 %v1960_v42, %v1923_v4 }
 0x267   : > { %2581 = vmatmul.f32.gmra.mxu0 %v7083_v49  ;;  %2619 = vmatmul.f32.gmra.mxu1 %v7084_v54 }
 0x268   : > { %3376 = vmatpush.msrb.mxu3 %v3153_v2  ;;  %3269 = vmatpush.msrb.mxu0 %v7086_v63  ;;  %2014 = vst [vmem:[%s5274_s10 + $0x58] sm:$0xff] %v1996_v19  ;;  %v3088_v30 = vpop.permute.xlu2 %3087  ;;  %v7109_v2 = vld [vmem:[#allocation48_spill] sm:$0xff]  ;;  %v7111_v63 = vld [vmem:[#allocation51_spill] sm:$0xff] }
 0x269   : > { %3307 = vmatpush.msrb.mxu1 %v7087_v1  ;;  %v3096_v22 = vpop.permute.xlu0 %3095  ;;  %v1963_v7 = vpop.f32.mrf.mxu2  ;;  %v3141_v29 = vsel %vm392_vm11, %v7102_v26, %v3088_v30  ;;  %v6371_v30 = vld [vmem:[%s6566_s0 + $0x20] sm:$0xff]  ;;  %v6389_v26 = vld [vmem:[%s6566_s0 + $0x58] sm:$0xff] }
 0x26a   : > { %3270 = vmatpush.msrb.mxu0 %v7089_v47  ;;  %3377 = vmatpush.msrb.mxu3 %v3151_v3  ;;  %v3145_v40 = vsel %vm398_vm9, %v7096_v43, %v3096_v22 }
 0x26b   : > { %3308 = vmatpush.msrb.mxu1 %v7090_v6  ;;  %2660 = vmatmul.f32.gmra.mxu2 %v7091_v27 }
 0x26c   : > { %3271 = vmatpush.msrb.mxu0 %v7093_v52  ;;  %3378 = vmatpush.msrb.mxu3 %v3149_v34  ;;  %v3092_v16 = vpop.permute.xlu1 %3091  ;;  %v7112_v34 = vld [vmem:[#allocation12_spill] sm:$0xff] }
 0x26d   : > { %3309 = vmatpush.msrb.mxu1 %v7094_v46  ;;  %2698 = vmatmul.f32.gmra.mxu3 %v7095_v11  ;;  %v1887_v57 = vpop.f32.mrf.mxu0  ;;  %v1925_v50 = vpop.f32.mrf.mxu1  ;;  %v3143_v24 = vsel %vm395_vm10, %v7100_v60, %v3092_v16  ;;  %v6339_v16 = vld [vmem:[%s6566_s0 + $0x18] sm:$0xff] }
 0x26e   : > { %3272 = vmatpush.msrb.mxu0 %v7097_v25  ;;  %3379 = vmatpush.msrb.mxu3 %v3147_v8  ;;  %v1926_v31 = vadd.f32 %v1925_v50, %v1887_v57  ;;  %v6364_v25 = vld [vmem:[%s6566_s0 + $0x38] sm:$0xff] }
 0x26f   : > { %3310 = vmatpush.msrb.mxu1 %v7098_v61  ;;  %2584 = vmatmul.f32.gmra.mxu0 %v7099_v14  ;;  %v1998_v18 = vpop.f32.mrf.mxu3  ;;  %v6377_v61 = vld [vmem:[%s6566_s0 + $0x28] sm:$0xff] }
 0x270   : > { %2622 = vmatmul.f32.gmra.mxu1 %v7101_v44  ;;  %3380 = vmatpush.msrb.mxu3 %v3145_v40  ;;  %v1999_v37 = vadd.f32 %v1998_v18, %v1961_v23  ;;  %v1964_v36 = vadd.f32 %v1963_v7, %v1926_v31  ;;  %v6352_v23 = vld [vmem:[%s6566_s0 + $0x8] sm:$0xff]  ;;  %v6359_v40 = vld [vmem:[%s6566_s0 + $0x30] sm:$0xff] }
 0x271   : > { %v3084_v17 = vpop.permute.xlu0 %3083  ;;  %v6384_v44 = vld [vmem:[%s6566_s0 + $0x50] sm:$0xff] }
 0x272   : > { %2015 = vst [vmem:[%s5274_s10 + $0x98] sm:$0xff] %v1999_v37  ;;  %3381 = vmatpush.msrb.mxu3 %v3143_v24  ;;  %v3139_v10 = vsel %vm389_vm12, %v7104_v15, %v3084_v17 }
 0x273   : > { %2663 = vmatmul.f32.gmra.mxu2 %v7103_v12  ;;  %v6402_v12 = vld [vmem:[%s6566_s0 + $0x48] sm:$0xff] }
 0x274   : > { %3382 = vmatpush.msrb.mxu3 %v3141_v29  ;;  %v3080_v51 = vpop.permute.xlu1 %3079  ;;  %v1966_v21 = vpop.f32.mrf.mxu2  ;;  %v6396_v29 = vld [vmem:[%s6566_s0 + $0x40] sm:$0xff] }
 0x275   : > { %2701 = vmatmul.f32.gmra.mxu3 %v7105_v39  ;;  %v3137_v62 = vsel %vm386_vm13, %v7106_v9, %v3080_v51  ;;  %v1890_v42 = vpop.f32.mrf.mxu0  ;;  %v6414_v39 = vld [vmem:[%s6566_s0 + $0x78] sm:$0xff] }
 0x276   : > { %3383 = vmatpush.msrb.mxu3 %v3139_v10  ;;  %v1928_v41 = vpop.f32.mrf.mxu1 }
 0x277   : > { %2587 = vmatmul.f32.gmra.mxu0 %v7107_v58  ;;  %v2001_v33 = vpop.f32.mrf.mxu3  ;;  %v1929_v0 = vadd.f32 %v1928_v41, %v1890_v42  ;;  %v6426_v41 = vld [vmem:[%s6566_s0 + $0x68] sm:$0xff] }
 0x278   : > { %2625 = vmatmul.f32.gmra.mxu1 %v7108_v32  ;;  %v2002_v35 = vadd.f32 %v2001_v33, %v1964_v36  ;;  %3384 = vmatpush.msrb.mxu3 %v3137_v62  ;;  %v6409_v36 = vld [vmem:[%s6566_s0 + $0x70] sm:$0xff]  ;;  %v6420_v62 = vld [vmem:[%s6566_s0 + $0x60] sm:$0xff] }
 0x279   : > { %v1967_v53 = vadd.f32 %v1966_v21, %v1929_v0  ;;  %v3072_v49 = vpop.permute.xlu0 %3071  ;;  %v6434_v33 = vld [vmem:[%s6566_s0 + $0x90] sm:$0xff]  ;;  %v6439_v0 = vld [vmem:[%s6566_s0 + $0x98] sm:$0xff] }
 0x27a   : > { %2016 = vst [vmem:[%s5274_s10 + $0xd8] sm:$0xff] %v2002_v35  ;;  %v3133_v47 = vsel %vm380_vm15, %v6192_v45, %v3072_v49 }
 0x27b   : > { %2666 = vmatmul.f32.gmra.mxu2 %v7109_v2 }
 0x27c   : > { %v1969_v20 = vpop.f32.mrf.mxu2 }
 0x27d   : > { %2704 = vmatmul.f32.gmra.mxu3 %v7070_v48  ;;  %v1893_v19 = vpop.f32.mrf.mxu0  ;;  %v7113_v48 = vld [vmem:[#allocation52_spill] sm:$0xff] }
 0x27e   : > { %v1931_v54 = vpop.f32.mrf.mxu1 }
 0x27f   : > { %2590 = vmatmul.f32.gmra.mxu0 %v7110_v59  ;;  %v2004_v3 = vpop.f32.mrf.mxu3  ;;  %v1932_v56 = vadd.f32 %v1931_v54, %v1893_v19  ;;  %v6451_v19 = vld [vmem:[%s6566_s0 + $0x88] sm:$0xff] }
 0x280   : > { %2628 = vmatmul.f32.gmra.mxu1 %v7111_v63  ;;  %v3076_v4 = vpop.permute.xlu2 %3075  ;;  %v2005_v1 = vadd.f32 %v2004_v3, %v1967_v53  ;;  %v6459_v3 = vld [vmem:[%s6566_s0 + $0xb0] sm:$0xff]  ;;  %v6464_v63 = vld [vmem:[%s6566_s0 + $0xb8] sm:$0xff] }
 0x281   : > { %v3135_v22 = vsel %vm383_vm14, %v7112_v34, %v3076_v4  ;;  %v1970_v7 = vadd.f32 %v1969_v20, %v1932_v56  ;;  %v6445_v20 = vld [vmem:[%s6566_s0 + $0x80] sm:$0xff] }
 0x282   : > { %3385 = vmatpush.msrb.mxu3 %v3135_v22  ;;  %2017 = vst [vmem:[%s5274_s10 + $0x118] sm:$0xff] %v2005_v1  ;;  %v6470_v22 = vld [vmem:[%s6566_s0 + $0xa0] sm:$0xff] }
 0x283   : > { %2669 = vmatmul.f32.gmra.mxu2 %v7113_v48 }
 0x284   : > { %3386 = vmatpush.msrb.mxu3 %v3133_v47  ;;  %v1972_v6 = vpop.f32.mrf.mxu2  ;;  %v6476_v47 = vld [vmem:[%s6566_s0 + $0xa8] sm:$0xff] }
 0x285   : > { %2707 = vmatmul.f32.gmra.mxu3 %v5959_v28  ;;  %v1896_v27 = vpop.f32.mrf.mxu0  ;;  %v6346_v28 = vld [vmem:[%s6566_s0] sm:$0xff] }
 0x286   : > { %v1934_v5 = vpop.f32.mrf.mxu1 }
 0x287   : > { %2593 = vmatmul.f32.gmra.mxu0 %v7071_v38  ;;  %v2007_v8 = vpop.f32.mrf.mxu3  ;;  %v1935_v52 = vadd.f32 %v1934_v5, %v1896_v27  ;;  %v6483_v27 = vld [vmem:[%s6566_s0 + $0xd0] sm:$0xff]  ;;  %v6489_v5 = vld [vmem:[%s6566_s0 + $0xd8] sm:$0xff] }
 0x288   : > { %2631 = vmatmul.f32.gmra.mxu1 %v7072_v55  ;;  %v2008_v45 = vadd.f32 %v2007_v8, %v1970_v7 }
 0x289   : > { %v1973_v38 = vadd.f32 %v1972_v6, %v1935_v52 }
 0x28a   : > { %2018 = vst [vmem:[%s5274_s10 + $0x158] sm:$0xff] %v2008_v45 }
 0x28b   : > { %3000 = vmatmul.f32.vlgmr.msra.gmra.mxu2 %v6334_v13 }
 0x28c   : > { %v2303_v55 = vpop.f32.mrf.mxu2 }
 0x28d   : > { %3038 = vmatmul.f32.vlgmr.msra.gmra.mxu3 %v6339_v16  ;;  %v2227_v46 = vpop.f32.mrf.mxu0 }
 0x28e   : > { %v2265_v11 = vpop.f32.mrf.mxu1 }
 0x28f   : > { %2924 = vmatmul.f32.vlgmr.msra.gmra.mxu0 %v6346_v28  ;;  %v2010_v43 = vpop.f32.mrf.mxu3  ;;  %v2266_v50 = vadd.f32 %v2265_v11, %v2227_v46 }
 0x290   : > { %2962 = vmatmul.f32.vlgmr.msra.gmra.mxu1 %v6352_v23  ;;  %v2011_v57 = vadd.f32 %v2010_v43, %v1973_v38  ;;  %v6495_v38 = vld [vmem:[%s6566_s0 + $0xc0] sm:$0xff] }
 0x291   : > { %v2304_v14 = vadd.f32 %v2303_v55, %v2266_v50  ;;  %v6501_v55 = vld [vmem:[%s6566_s0 + $0xc8] sm:$0xff] }
 0x292   : > { %2019 = vst [vmem:[%s5274_s10 + $0x198] sm:$0x3] %v2011_v57 }
 0x293   : > { %3003 = vmatmul.f32.gmra.mxu2 %v6359_v40 }
 0x294   : > { %v2306_v18 = vpop.f32.mrf.mxu2 }
 0x295   : > { %3041 = vmatmul.f32.gmra.mxu3 %v6364_v25 }
 0x296   : > { %v2230_v60 = vpop.f32.mrf.mxu0 }
 0x297   : > { %2927 = vmatmul.f32.gmra.mxu0 %v6371_v30  ;;  %v2268_v24 = vpop.f32.mrf.mxu1 }
 0x298   : > { %2965 = vmatmul.f32.gmra.mxu1 %v6377_v61  ;;  %v2341_v37 = vpop.f32.mrf.mxu3  ;;  %v2269_v17 = vadd.f32 %v2268_v24, %v2230_v60 }
 0x299   : > { %v2342_v31 = vadd.f32 %v2341_v37, %v2304_v14 }
 0x29a   : > { %v2307_v51 = vadd.f32 %v2306_v18, %v2269_v17 }
 0x29b   : > { %3006 = vmatmul.f32.gmra.mxu2 %v6384_v44  ;;  %2362 = vst [vmem:[%s5274_s10 + $0x20] sm:$0xff] %v2342_v31 }
 0x29d   : > { %3044 = vmatmul.f32.gmra.mxu3 %v6389_v26  ;;  %v2309_v10 = vpop.f32.mrf.mxu2 }
 0x29f   : > { %2930 = vmatmul.f32.gmra.mxu0 %v6396_v29  ;;  %v2233_v15 = vpop.f32.mrf.mxu0 }
 0x2a0   : > { %2968 = vmatmul.f32.gmra.mxu1 %v6402_v12  ;;  %v2271_v21 = vpop.f32.mrf.mxu1 }
 0x2a1   : > { %v2272_v58 = vadd.f32 %v2271_v21, %v2233_v15 }
 0x2a3   : > { %3009 = vmatmul.f32.gmra.mxu2 %v6409_v36  ;;  %v2344_v9 = vpop.f32.mrf.mxu3  ;;  %v2310_v2 = vadd.f32 %v2309_v10, %v2272_v58 }
 0x2a4   : > { %v2345_v42 = vadd.f32 %v2344_v9, %v2307_v51 }
 0x2a5   : > { %3047 = vmatmul.f32.gmra.mxu3 %v6414_v39 }
 0x2a6   : > { %2363 = vst [vmem:[%s5274_s10 + $0x60] sm:$0xff] %v2345_v42  ;;  %v2312_v35 = vpop.f32.mrf.mxu2 }
 0x2a7   : > { %2933 = vmatmul.f32.gmra.mxu0 %v6420_v62 }
 0x2a8   : > { %2971 = vmatmul.f32.gmra.mxu1 %v6426_v41 }
 0x2a9   : > { %v2236_v32 = vpop.f32.mrf.mxu0 }
 0x2aa   : > { %v2274_v53 = vpop.f32.mrf.mxu1 }
 0x2ab   : > { %3012 = vmatmul.f32.gmra.mxu2 %v6434_v33  ;;  %v2275_v59 = vadd.f32 %v2274_v53, %v2236_v32 }
 0x2ad   : > { %3050 = vmatmul.f32.gmra.mxu3 %v6439_v0  ;;  %v2347_v49 = vpop.f32.mrf.mxu3  ;;  %v2313_v56 = vadd.f32 %v2312_v35, %v2275_v59 }
 0x2ae   : > { %v2348_v54 = vadd.f32 %v2347_v49, %v2310_v2 }
 0x2af   : > { %2936 = vmatmul.f32.gmra.mxu0 %v6445_v20 }
 0x2b0   : > { %2974 = vmatmul.f32.gmra.mxu1 %v6451_v19  ;;  %2364 = vst [vmem:[%s5274_s10 + $0xa0] sm:$0xff] %v2348_v54  ;;  %v2315_v34 = vpop.f32.mrf.mxu2 }
 0x2b2   : > { %v2239_v4 = vpop.f32.mrf.mxu0  ;;  %v2277_v1 = vpop.f32.mrf.mxu1 }
 0x2b3   : > { %3015 = vmatmul.f32.gmra.mxu2 %v6459_v3  ;;  %v2278_v6 = vadd.f32 %v2277_v1, %v2239_v4 }
 0x2b5   : > { %3053 = vmatmul.f32.gmra.mxu3 %v6464_v63  ;;  %v2316_v52 = vadd.f32 %v2315_v34, %v2278_v6 }
 0x2b6   : > { %v2350_v48 = vpop.f32.mrf.mxu3 }
 0x2b7   : > { %2939 = vmatmul.f32.gmra.mxu0 %v6470_v22  ;;  %v2351_v7 = vadd.f32 %v2350_v48, %v2313_v56 }
 0x2b8   : > { %2977 = vmatmul.f32.gmra.mxu1 %v6476_v47 }
 0x2b9   : > { %2365 = vst [vmem:[%s5274_s10 + $0xe0] sm:$0xff] %v2351_v7  ;;  %v2318_v46 = vpop.f32.mrf.mxu2 }
 0x2ba   : > { %v2242_v8 = vpop.f32.mrf.mxu0  ;;  %v2280_v45 = vpop.f32.mrf.mxu1 }
 0x2bb   : > { %3018 = vmatmul.f32.gmra.mxu2 %v6483_v27  ;;  %v2281_v57 = vadd.f32 %v2280_v45, %v2242_v8 }
 0x2bd   : > { %3056 = vmatmul.f32.gmra.mxu3 %v6489_v5  ;;  %v2319_v50 = vadd.f32 %v2318_v46, %v2281_v57 }
 0x2be   : > { %v2353_v11 = vpop.f32.mrf.mxu3 }
 0x2bf   : > { %2942 = vmatmul.f32.gmra.mxu0 %v6495_v38  ;;  %v2354_v43 = vadd.f32 %v2353_v11, %v2316_v52 }
 0x2c0   : > { %2980 = vmatmul.f32.gmra.mxu1 %v6501_v55 }
 0x2c1   : > { %2366 = vst [vmem:[%s5274_s10 + $0x120] sm:$0xff] %v2354_v43  ;;  %v2321_v31 = vpop.f32.mrf.mxu2 }
 0x2c2   : > { %v2245_v14 = vpop.f32.mrf.mxu0  ;;  %v2283_v18 = vpop.f32.mrf.mxu1 }
 0x2c3   : > { %3349 = vmatmul.f32.vlgmr.msrb.gmra.mxu2 %v6334_v13  ;;  %v2284_v37 = vadd.f32 %v2283_v18, %v2245_v14 }
 0x2c5   : > { %3387 = vmatmul.f32.vlgmr.msrb.gmra.mxu3 %v6339_v16  ;;  %v2322_v17 = vadd.f32 %v2321_v31, %v2284_v37 }
 0x2c6   : > { %v2356_v60 = vpop.f32.mrf.mxu3 }
 0x2c7   : > { %3273 = vmatmul.f32.vlgmr.msrb.gmra.mxu0 %v6346_v28  ;;  %v2357_v24 = vadd.f32 %v2356_v60, %v2319_v50 }
 0x2c8   : > { %3311 = vmatmul.f32.vlgmr.msrb.gmra.mxu1 %v6352_v23 }
 0x2c9   : > { %2367 = vst [vmem:[%s5274_s10 + $0x160] sm:$0xff] %v2357_v24  ;;  %v2652_v51 = vpop.f32.mrf.mxu2 }
 0x2ca   : > { %v2576_v13 = vpop.f32.mrf.mxu0 }
 0x2cb   : > { %3352 = vmatmul.f32.gmra.mxu2 %v6359_v40  ;;  %v2614_v15 = vpop.f32.mrf.mxu1 }
 0x2cc   : > { %v2615_v28 = vadd.f32 %v2614_v15, %v2576_v13 }
 0x2cd   : > { %3390 = vmatmul.f32.gmra.mxu3 %v6364_v25 }
 0x2ce   : > { %v2359_v10 = vpop.f32.mrf.mxu3  ;;  %v2653_v23 = vadd.f32 %v2652_v51, %v2615_v28 }
 0x2cf   : > { %3276 = vmatmul.f32.gmra.mxu0 %v6371_v30  ;;  %v2360_v16 = vadd.f32 %v2359_v10, %v2322_v17 }
 0x2d0   : > { %3314 = vmatmul.f32.gmra.mxu1 %v6377_v61 }
 0x2d1   : > { %2368 = vst [vmem:[%s5274_s10 + $0x1a0] sm:$0x3] %v2360_v16 }
 0x2d3   : > { %3355 = vmatmul.f32.gmra.mxu2 %v6384_v44  ;;  %v2655_v61 = vpop.f32.mrf.mxu2 }
 0x2d5   : > { %3393 = vmatmul.f32.gmra.mxu3 %v6389_v26 }
 0x2d7   : > { %3279 = vmatmul.f32.gmra.mxu0 %v6396_v29  ;;  %v2690_v40 = vpop.f32.mrf.mxu3 }
 0x2d8   : > { %3317 = vmatmul.f32.gmra.mxu1 %v6402_v12  ;;  %v2691_v25 = vadd.f32 %v2690_v40, %v2653_v23  ;;  %v2579_v21 = vpop.f32.mrf.mxu0 }
 0x2da   : > { %2711 = vst [vmem:[%s5274_s10 + $0x28] sm:$0xff] %v2691_v25 }
 0x2db   : > { %3358 = vmatmul.f32.gmra.mxu2 %v6409_v36  ;;  %v2617_v30 = vpop.f32.mrf.mxu1 }
 0x2dc   : > { %v2618_v9 = vadd.f32 %v2617_v30, %v2579_v21 }
 0x2dd   : > { %3396 = vmatmul.f32.gmra.mxu3 %v6414_v39 }
 0x2de   : > { %v2656_v44 = vadd.f32 %v2655_v61, %v2618_v9 }
 0x2df   : > { %3282 = vmatmul.f32.gmra.mxu0 %v6420_v62  ;;  %v2693_v26 = vpop.f32.mrf.mxu3 }
 0x2e0   : > { %3320 = vmatmul.f32.gmra.mxu1 %v6426_v41  ;;  %v2694_v29 = vadd.f32 %v2693_v26, %v2656_v44 }
 0x2e2   : > { %2712 = vst [vmem:[%s5274_s10 + $0x68] sm:$0xff] %v2694_v29 }
 0x2e3   : > { %3361 = vmatmul.f32.gmra.mxu2 %v6434_v33 }
 0x2e4   : > { %v2582_v12 = vpop.f32.mrf.mxu0  ;;  %v2620_v42 = vpop.f32.mrf.mxu1 }
 0x2e5   : > { %v2621_v58 = vadd.f32 %v2620_v42, %v2582_v12  ;;  %3399 = vmatmul.f32.gmra.mxu3 %v6439_v0 }
 0x2e6   : > { %v2658_v36 = vpop.f32.mrf.mxu2 }
 0x2e7   : > { %v2659_v32 = vadd.f32 %v2658_v36, %v2621_v58  ;;  %3285 = vmatmul.f32.gmra.mxu0 %v6445_v20 }
 0x2e8   : > { %3323 = vmatmul.f32.gmra.mxu1 %v6451_v19  ;;  %v2696_v39 = vpop.f32.mrf.mxu3 }
 0x2e9   : > { %v2697_v62 = vadd.f32 %v2696_v39, %v2659_v32 }
 0x2eb   : > { %2713 = vst [vmem:[%s5274_s10 + $0xa8] sm:$0xff] %v2697_v62  ;;  %3364 = vmatmul.f32.gmra.mxu2 %v6459_v3 }
 0x2ec   : > { %v2585_v41 = vpop.f32.mrf.mxu0 }
 0x2ed   : > { %v2623_v35 = vpop.f32.mrf.mxu1  ;;  %3402 = vmatmul.f32.gmra.mxu3 %v6464_v63 }
 0x2ee   : > { %v2624_v33 = vadd.f32 %v2623_v35, %v2585_v41  ;;  %v2661_v2 = vpop.f32.mrf.mxu2 }
 0x2ef   : > { %3288 = vmatmul.f32.gmra.mxu0 %v6470_v22 }
 0x2f0   : > { %v2662_v0 = vadd.f32 %v2661_v2, %v2624_v33  ;;  %3326 = vmatmul.f32.gmra.mxu1 %v6476_v47  ;;  %v2699_v53 = vpop.f32.mrf.mxu3 }
 0x2f2   : > { %v2700_v20 = vadd.f32 %v2699_v53, %v2662_v0 }
 0x2f3   : > { %3367 = vmatmul.f32.gmra.mxu2 %v6483_v27 }
 0x2f4   : > { %2714 = vst [vmem:[%s5274_s10 + $0xe8] sm:$0xff] %v2700_v20  ;;  %v2588_v19 = vpop.f32.mrf.mxu0 }
 0x2f5   : > { %v2626_v49 = vpop.f32.mrf.mxu1  ;;  %3405 = vmatmul.f32.gmra.mxu3 %v6489_v5 }
 0x2f6   : > { %v2627_v54 = vadd.f32 %v2626_v49, %v2588_v19  ;;  %v2664_v59 = vpop.f32.mrf.mxu2 }
 0x2f7   : > { %3291 = vmatmul.f32.gmra.mxu0 %v6495_v38 }
 0x2f8   : > { %v2665_v3 = vadd.f32 %v2664_v59, %v2627_v54  ;;  %3329 = vmatmul.f32.gmra.mxu1 %v6501_v55  ;;  %v2702_v63 = vpop.f32.mrf.mxu3 }
 0x2fa   : > { %v2703_v4 = vadd.f32 %v2702_v63, %v2665_v3 }
 0x2fc   : > { %2715 = vst [vmem:[%s5274_s10 + $0x128] sm:$0xff] %v2703_v4  ;;  %v2591_v1 = vpop.f32.mrf.mxu0 }
 0x2fd   : > { %v2629_v56 = vpop.f32.mrf.mxu1 }
 0x2fe   : > { %v2630_v34 = vadd.f32 %v2629_v56, %v2591_v1  ;;  %v2667_v22 = vpop.f32.mrf.mxu2 }
 0x300   : > { %v2668_v47 = vadd.f32 %v2667_v22, %v2630_v34  ;;  %v2705_v48 = vpop.f32.mrf.mxu3 }
 0x302   : > { %v2706_v7 = vadd.f32 %v2705_v48, %v2668_v47 }
 0x304   : > { %2716 = vst [vmem:[%s5274_s10 + $0x168] sm:$0xff] %v2706_v7  ;;  %v2594_v6 = vpop.f32.mrf.mxu0 }
 0x305   : > { %v2632_v27 = vpop.f32.mrf.mxu1 }
 0x306   : > { %v2633_v5 = vadd.f32 %v2632_v27, %v2594_v6  ;;  %v2670_v8 = vpop.f32.mrf.mxu2 }
 0x308   : > { %v2671_v45 = vadd.f32 %v2670_v8, %v2633_v5  ;;  %v2708_v52 = vpop.f32.mrf.mxu3 }
 0x30a   : > { %v2709_v38 = vadd.f32 %v2708_v52, %v2671_v45 }
 0x30c   : > { %2717 = vst [vmem:[%s5274_s10 + $0x1a8] sm:$0x3] %v2709_v38  ;;  %v2925_v55 = vpop.f32.mrf.mxu0 }
 0x30d   : > { %v2963_v46 = vpop.f32.mrf.mxu1 }
 0x30e   : > { %v2964_v11 = vadd.f32 %v2963_v46, %v2925_v55  ;;  %v3001_v43 = vpop.f32.mrf.mxu2 }
 0x310   : > { %v3002_v57 = vadd.f32 %v3001_v43, %v2964_v11  ;;  %v3039_v50 = vpop.f32.mrf.mxu3 }
 0x312   : > { %v3040_v14 = vadd.f32 %v3039_v50, %v3002_v57 }
 0x314   : > { %3060 = vst [vmem:[%s5274_s10 + $0x30] sm:$0xff] %v3040_v14  ;;  %v2928_v18 = vpop.f32.mrf.mxu0 }
 0x315   : > { %v2966_v60 = vpop.f32.mrf.mxu1 }
 0x316   : > { %v2967_v24 = vadd.f32 %v2966_v60, %v2928_v18  ;;  %v3004_v37 = vpop.f32.mrf.mxu2 }
 0x318   : > { %v3005_v31 = vadd.f32 %v3004_v37, %v2967_v24  ;;  %v3042_v17 = vpop.f32.mrf.mxu3 }
 0x31a   : > { %v3043_v13 = vadd.f32 %v3042_v17, %v3005_v31 }
 0x31c   : > { %3061 = vst [vmem:[%s5274_s10 + $0x70] sm:$0xff] %v3043_v13  ;;  %v2931_v15 = vpop.f32.mrf.mxu0 }
 0x31d   : > { %v2969_v10 = vpop.f32.mrf.mxu1 }
 0x31e   : > { %v2970_v16 = vadd.f32 %v2969_v10, %v2931_v15  ;;  %v3007_v28 = vpop.f32.mrf.mxu2 }
 0x320   : > { %v3008_v51 = vadd.f32 %v3007_v28, %v2970_v16  ;;  %v3045_v23 = vpop.f32.mrf.mxu3 }
 0x322   : > { %v3046_v40 = vadd.f32 %v3045_v23, %v3008_v51 }
 0x324   : > { %3062 = vst [vmem:[%s5274_s10 + $0xb0] sm:$0xff] %v3046_v40  ;;  %v2934_v25 = vpop.f32.mrf.mxu0 }
 0x325   : > { %v2972_v21 = vpop.f32.mrf.mxu1 }
 0x326   : > { %v2973_v30 = vadd.f32 %v2972_v21, %v2934_v25  ;;  %v3010_v61 = vpop.f32.mrf.mxu2 }
 0x328   : > { %v3011_v9 = vadd.f32 %v3010_v61, %v2973_v30  ;;  %v3048_v44 = vpop.f32.mrf.mxu3 }
 0x32a   : > { %v3049_v26 = vadd.f32 %v3048_v44, %v3011_v9 }
 0x32c   : > { %3063 = vst [vmem:[%s5274_s10 + $0xf0] sm:$0xff] %v3049_v26  ;;  %v2937_v29 = vpop.f32.mrf.mxu0 }
 0x32d   : > { %v2975_v12 = vpop.f32.mrf.mxu1 }
 0x32e   : > { %v2976_v42 = vadd.f32 %v2975_v12, %v2937_v29  ;;  %v3013_v58 = vpop.f32.mrf.mxu2 }
 0x330   : > { %v3014_v36 = vadd.f32 %v3013_v58, %v2976_v42  ;;  %v3051_v32 = vpop.f32.mrf.mxu3 }
 0x332   : > { %v3052_v39 = vadd.f32 %v3051_v32, %v3014_v36 }
 0x334   : > { %3064 = vst [vmem:[%s5274_s10 + $0x130] sm:$0xff] %v3052_v39  ;;  %v2940_v62 = vpop.f32.mrf.mxu0 }
 0x335   : > { %v2978_v41 = vpop.f32.mrf.mxu1 }
 0x336   : > { %v2979_v35 = vadd.f32 %v2978_v41, %v2940_v62  ;;  %v3016_v33 = vpop.f32.mrf.mxu2 }
 0x338   : > { %v3017_v2 = vadd.f32 %v3016_v33, %v2979_v35  ;;  %v3054_v0 = vpop.f32.mrf.mxu3 }
 0x33a   : > { %v3055_v53 = vadd.f32 %v3054_v0, %v3017_v2 }
 0x33c   : > { %3065 = vst [vmem:[%s5274_s10 + $0x170] sm:$0xff] %v3055_v53  ;;  %v2943_v20 = vpop.f32.mrf.mxu0 }
 0x33d   : > { %v2981_v19 = vpop.f32.mrf.mxu1 }
 0x33e   : > { %v2982_v49 = vadd.f32 %v2981_v19, %v2943_v20  ;;  %v3019_v54 = vpop.f32.mrf.mxu2 }
 0x340   : > { %v3020_v59 = vadd.f32 %v3019_v54, %v2982_v49  ;;  %v3057_v3 = vpop.f32.mrf.mxu3 }
 0x342   : > { %v3058_v63 = vadd.f32 %v3057_v3, %v3020_v59 }
 0x344   : > { %3066 = vst [vmem:[%s5274_s10 + $0x1b0] sm:$0x3] %v3058_v63  ;;  %v3274_v4 = vpop.f32.mrf.mxu0 }
 0x345   : > { %v3312_v1 = vpop.f32.mrf.mxu1 }
 0x346   : > { %v3313_v56 = vadd.f32 %v3312_v1, %v3274_v4  ;;  %v3350_v34 = vpop.f32.mrf.mxu2 }
 0x348   : > { %v3351_v22 = vadd.f32 %v3350_v34, %v3313_v56  ;;  %v3388_v47 = vpop.f32.mrf.mxu3 }
 0x34a   : > { %v3389_v48 = vadd.f32 %v3388_v47, %v3351_v22 }
 0x34c   : > { %3409 = vst [vmem:[%s5274_s10 + $0x38] sm:$0xff] %v3389_v48  ;;  %v3277_v7 = vpop.f32.mrf.mxu0 }
 0x34d   : > { %v3315_v6 = vpop.f32.mrf.mxu1 }
 0x34e   : > { %v3316_v27 = vadd.f32 %v3315_v6, %v3277_v7  ;;  %v3353_v5 = vpop.f32.mrf.mxu2 }
 0x350   : > { %v3354_v8 = vadd.f32 %v3353_v5, %v3316_v27  ;;  %v3391_v45 = vpop.f32.mrf.mxu3 }
 0x352   : > { %v3392_v52 = vadd.f32 %v3391_v45, %v3354_v8 }
 0x354   : > { %3410 = vst [vmem:[%s5274_s10 + $0x78] sm:$0xff] %v3392_v52  ;;  %v3280_v38 = vpop.f32.mrf.mxu0 }
 0x355   : > { %v3318_v55 = vpop.f32.mrf.mxu1 }
 0x356   : > { %v3319_v46 = vadd.f32 %v3318_v55, %v3280_v38  ;;  %v3356_v11 = vpop.f32.mrf.mxu2 }
 0x358   : > { %v3357_v43 = vadd.f32 %v3356_v11, %v3319_v46  ;;  %v3394_v57 = vpop.f32.mrf.mxu3 }
 0x35a   : > { %v3395_v50 = vadd.f32 %v3394_v57, %v3357_v43 }
 0x35c   : > { %3411 = vst [vmem:[%s5274_s10 + $0xb8] sm:$0xff] %v3395_v50  ;;  %v3283_v14 = vpop.f32.mrf.mxu0 }
 0x35d   : > { %v3321_v18 = vpop.f32.mrf.mxu1 }
 0x35e   : > { %v3322_v60 = vadd.f32 %v3321_v18, %v3283_v14  ;;  %v3359_v24 = vpop.f32.mrf.mxu2 }
 0x360   : > { %v3360_v37 = vadd.f32 %v3359_v24, %v3322_v60  ;;  %v3397_v31 = vpop.f32.mrf.mxu3 }
 0x362   : > { %v3398_v17 = vadd.f32 %v3397_v31, %v3360_v37 }
 0x364   : > { %3412 = vst [vmem:[%s5274_s10 + $0xf8] sm:$0xff] %v3398_v17  ;;  %v3286_v13 = vpop.f32.mrf.mxu0 }
 0x365   : > { %v3324_v15 = vpop.f32.mrf.mxu1 }
 0x366   : > { %v3325_v10 = vadd.f32 %v3324_v15, %v3286_v13  ;;  %v3362_v16 = vpop.f32.mrf.mxu2 }
 0x368   : > { %v3363_v28 = vadd.f32 %v3362_v16, %v3325_v10  ;;  %v3400_v51 = vpop.f32.mrf.mxu3 }
 0x36a   : > { %v3401_v23 = vadd.f32 %v3400_v51, %v3363_v28 }
 0x36c   : > { %3413 = vst [vmem:[%s5274_s10 + $0x138] sm:$0xff] %v3401_v23  ;;  %v3289_v40 = vpop.f32.mrf.mxu0 }
 0x36d   : > { %v3327_v25 = vpop.f32.mrf.mxu1 }
 0x36e   : > { %v3328_v21 = vadd.f32 %v3327_v25, %v3289_v40  ;;  %v3365_v30 = vpop.f32.mrf.mxu2 }
 0x370   : > { %v3366_v61 = vadd.f32 %v3365_v30, %v3328_v21  ;;  %v3403_v9 = vpop.f32.mrf.mxu3 }
 0x372   : > { %v3404_v44 = vadd.f32 %v3403_v9, %v3366_v61 }
 0x374   : > { %3414 = vst [vmem:[%s5274_s10 + $0x178] sm:$0xff] %v3404_v44  ;;  %v3292_v26 = vpop.f32.mrf.mxu0 }
 0x375   : > { %v3330_v29 = vpop.f32.mrf.mxu1 }
 0x376   : > { %v3331_v12 = vadd.f32 %v3330_v29, %v3292_v26  ;;  %v3368_v42 = vpop.f32.mrf.mxu2 }
 0x378   : > { %v3369_v58 = vadd.f32 %v3368_v42, %v3331_v12  ;;  %v3406_v36 = vpop.f32.mrf.mxu3 }
 0x37a   : > { %v3407_v32 = vadd.f32 %v3406_v36, %v3369_v58 }
 0x37c   : > { %3415 = vst [vmem:[%s5274_s10 + $0x1b8] sm:$0x3] %v3407_v32 }
 0x37d PF: > { %s13_s14 = sadd.s32 1, %s3772_s14   ;;  %s7114_s12 = smov %s3768_s13 }
 0x37e   : > { %p10_p5 = scmp.ge.s32.totalorder %s13_s14, 4   ;;  %s7115_s13 = smov %s7117_s15 }
 0x380   :  { %12 = sbr.rel (!%p10_p5) target bundleno = 2 (0x2), region = 65 }

</bundles_post_ra>
